<compile_context>
chip_gen: v6e
topology: v6e:2x2x1
jax: 0.10.0
libtpu: 0.0.40
codegen_flags: <defaults>
</compile_context>

<pallas_src>
import functools

import jax
import jax.numpy as jnp
from jax.experimental import pallas as pl
from jax.experimental.pallas import tpu as pltpu


def _round_up(x, m):
    return (x + m - 1) // m * m


def _pick_tile(padded_dim, unit, max_tile):
    """Largest tile = unit*d that divides padded_dim and is <= max_tile."""
    n = padded_dim // unit
    best = 1
    for d in range(1, n + 1):
        if n % d == 0 and unit * d <= max_tile:
            best = d
    return unit * best


def _lane_pack(x2d):
    """(M, C) -> (M//r, C*r) with r = 128//C when it folds cleanly (lane-dense)."""
    M, C = x2d.shape
    if C < 128 and 128 % C == 0 and M % (128 // C) == 0:
        r = 128 // C
        return x2d.reshape(M // r, C * r), r
    return x2d, 1


# ----------------------------- Pallas kernels ------------------------------

def _matmul_kernel(a_ref, b_ref, o_ref, acc_ref):
    @pl.when(pl.program_id(2) == 0)
    def _():
        acc_ref[...] = jnp.zeros_like(acc_ref)
    acc_ref[...] += jnp.dot(a_ref[...], b_ref[...],
                            preferred_element_type=jnp.float32)

    @pl.when(pl.program_id(2) == pl.num_programs(2) - 1)
    def _():
        o_ref[...] = acc_ref[...]


def _matmul_bias_kernel(a_ref, b_ref, c_ref, o_ref, acc_ref):
    @pl.when(pl.program_id(2) == 0)
    def _():
        acc_ref[...] = jnp.zeros_like(acc_ref)
    acc_ref[...] += jnp.dot(a_ref[...], b_ref[...],
                            preferred_element_type=jnp.float32)

    @pl.when(pl.program_id(2) == pl.num_programs(2) - 1)
    def _():
        o_ref[...] = acc_ref[...] + c_ref[...]


def _bn_act_kernel(x_ref, s_ref, b_ref, o_ref, *, relu):
    y = x_ref[...] * s_ref[...] + b_ref[...]
    if relu:
        y = jnp.maximum(y, 0.0)
    o_ref[...] = y


def _bn_add_act_kernel(x_ref, s_ref, b_ref, r_ref, o_ref, *, relu):
    y = x_ref[...] * s_ref[...] + b_ref[...] + r_ref[...]
    if relu:
        y = jnp.maximum(y, 0.0)
    o_ref[...] = y


def _colstats_kernel(x_ref, s_ref, q_ref):
    @pl.when(pl.program_id(0) == 0)
    def _():
        s_ref[...] = jnp.zeros_like(s_ref)
        q_ref[...] = jnp.zeros_like(q_ref)
    x = x_ref[...]
    s_ref[...] += jnp.sum(x, axis=0, keepdims=True)
    q_ref[...] += jnp.sum(x * x, axis=0, keepdims=True)


def _max9_kernel(*refs):
    o_ref = refs[-1]
    m = refs[0][...]
    for r in refs[1:-1]:
        m = jnp.maximum(m, r[...])
    o_ref[...] = m


# ----------------------------- Pallas wrappers ------------------------------

def pallas_matmul(a, b, bias=None, *, tm_max=256, tn_max=256, tk_max=512):
    """a:(M,K) @ b:(K,N) [+ bias:(N,)] -> f32. bf16 MXU inputs, f32 accumulate.

    Tiled grid=(M/tm, N/tn, K/tk) with a VMEM accumulator; K is the reduction
    ("arbitrary") axis, M/N are "parallel" (megacore shardable on v7x).
    """
    M, K = a.shape
    K2, N = b.shape
    assert K == K2
    Mp = _round_up(M, 16)        # bf16 sublane packing
    Kp = _round_up(K, 128)
    Np = _round_up(N, 128)
    tm = _pick_tile(Mp, 16, tm_max)
    tn = _pick_tile(Np, 128, tn_max)
    tk = _pick_tile(Kp, 128, tk_max)

    a_p = jnp.pad(a.astype(jnp.bfloat16), ((0, Mp - M), (0, Kp - K)))
    b_p = jnp.pad(b.astype(jnp.bfloat16), ((0, Kp - K), (0, Np - N)))

    in_specs = [pl.BlockSpec((tm, tk), lambda i, j, k: (i, k)),
                pl.BlockSpec((tk, tn), lambda i, j, k: (k, j))]
    args = [a_p, b_p]
    if bias is None:
        kernel = _matmul_kernel
    else:
        bias_p = jnp.pad(bias.astype(jnp.float32).reshape(1, N),
                         ((0, 0), (0, Np - N)))
        in_specs.append(pl.BlockSpec((1, tn), lambda i, j, k: (0, j)))
        args.append(bias_p)
        kernel = _matmul_bias_kernel

    out = pl.pallas_call(
        kernel,
        out_shape=jax.ShapeDtypeStruct((Mp, Np), jnp.float32),
        grid=(Mp // tm, Np // tn, Kp // tk),
        in_specs=in_specs,
        out_specs=pl.BlockSpec((tm, tn), lambda i, j, k: (i, j)),
        scratch_shapes=[pltpu.VMEM((tm, tn), jnp.float32)],
        compiler_params=pltpu.CompilerParams(
            dimension_semantics=("parallel", "parallel", "arbitrary")),
    )(*args)
    return out[:M, :N]


def pallas_col_stats(x2d, *, tm_max=1024):
    """One-pass column sum and sum-of-squares of x2d (rows may be zero-padded)."""
    xp, r = _lane_pack(x2d.astype(jnp.float32))
    Mr, Cr = xp.shape
    C = x2d.shape[1]
    Mp = _round_up(Mr, 8)
    tm = _pick_tile(Mp, 8, tm_max)
    xp = jnp.pad(xp, ((0, Mp - Mr), (0, 0)))
    out_s, out_q = pl.pallas_call(
        _colstats_kernel,
        out_shape=(jax.ShapeDtypeStruct((1, Cr), jnp.float32),
                   jax.ShapeDtypeStruct((1, Cr), jnp.float32)),
        grid=(Mp // tm,),
        in_specs=[pl.BlockSpec((tm, Cr), lambda i: (i, 0))],
        out_specs=(pl.BlockSpec((1, Cr), lambda i: (0, 0)),
                   pl.BlockSpec((1, Cr), lambda i: (0, 0))),
        compiler_params=pltpu.CompilerParams(dimension_semantics=("arbitrary",)),
    )(xp)
    s, q = out_s[0], out_q[0]
    if r > 1:
        s = s.reshape(r, C).sum(axis=0)
        q = q.reshape(r, C).sum(axis=0)
    return s, q


def pallas_bn_act(x2d, scale, bias, residual=None, relu=True, *, tm_max=512):
    """Fused y = x*scale + bias (+residual) (+ReLU), tiled over rows."""
    M, C = x2d.shape
    xp, r = _lane_pack(x2d.astype(jnp.float32))
    Mr, Cr = xp.shape
    s = jnp.tile(scale.astype(jnp.float32), r).reshape(1, Cr)
    b = jnp.tile(bias.astype(jnp.float32), r).reshape(1, Cr)
    Mp = _round_up(Mr, 8)
    tm = _pick_tile(Mp, 8, tm_max)
    xp = jnp.pad(xp, ((0, Mp - Mr), (0, 0)))

    args = [xp, s, b]
    in_specs = [pl.BlockSpec((tm, Cr), lambda i: (i, 0)),
                pl.BlockSpec((1, Cr), lambda i: (0, 0)),
                pl.BlockSpec((1, Cr), lambda i: (0, 0))]
    if residual is None:
        kernel = functools.partial(_bn_act_kernel, relu=relu)
    else:
        rp, _ = _lane_pack(residual.astype(jnp.float32))
        rp = jnp.pad(rp, ((0, Mp - Mr), (0, 0)))
        args.append(rp)
        in_specs.append(pl.BlockSpec((tm, Cr), lambda i: (i, 0)))
        kernel = functools.partial(_bn_add_act_kernel, relu=relu)

    out = pl.pallas_call(
        kernel,
        out_shape=jax.ShapeDtypeStruct((Mp, Cr), jnp.float32),
        grid=(Mp // tm,),
        in_specs=in_specs,
        out_specs=pl.BlockSpec((tm, Cr), lambda i: (i, 0)),
        compiler_params=pltpu.CompilerParams(dimension_semantics=("parallel",)),
    )(*args)
    out = out[:Mr]
    if r > 1:
        out = out.reshape(M, C)
    return out


# ----------------------------- ResNet18 pieces ------------------------------

def _extract_patches(x, kh, kw, stride, pad):
    """x: (N,H,W,C) -> patches (N,Ho,Wo, kh*kw*C) ordered (kh, kw, cin)."""
    # TODO(synk): replace materialized im2col with in-kernel tap accumulation;
    # the strided spatial views are not expressible as a BlockSpec index_map.
    N, H, W, C = x.shape
    Ho = (H + 2 * pad - kh) // stride + 1
    Wo = (W + 2 * pad - kw) // stride + 1
    xp = jnp.pad(x, ((0, 0), (pad, pad), (pad, pad), (0, 0)))
    cols = []
    for dy in range(kh):
        for dx in range(kw):
            sl = xp[:, dy:dy + stride * (Ho - 1) + 1:stride,
                       dx:dx + stride * (Wo - 1) + 1:stride, :]
            cols.append(sl)
    return jnp.concatenate(cols, axis=-1), Ho, Wo


def conv_bn_act(x, w, gamma, beta, stride, pad, relu=True, residual=None, eps=1e-5):
    """conv2d(bias=False) -> BatchNorm2d (batch stats) [-> +res] [-> ReLU]."""
    cout, cin, kh, kw = w.shape
    N = x.shape[0]
    patches, Ho, Wo = _extract_patches(x, kh, kw, stride, pad)
    M = N * Ho * Wo
    a = patches.reshape(M, kh * kw * cin)
    bmat = jnp.transpose(w, (2, 3, 1, 0)).reshape(kh * kw * cin, cout)
    y = pallas_matmul(a, bmat)                                   # conv as GEMM
    # BatchNorm with batch statistics (default nn.Module training state),
    # computed in one Pallas pass over y (sum + sum of squares).
    col_sum, col_sumsq = pallas_col_stats(y)
    mean = col_sum / M
    var = jnp.maximum(col_sumsq / M - mean * mean, 0.0)          # biased variance
    scale = gamma.astype(jnp.float32) / jnp.sqrt(var + eps)
    bias = beta.astype(jnp.float32) - mean * scale
    res2d = None if residual is None else residual.reshape(M, cout)
    y = pallas_bn_act(y, scale, bias, residual=res2d, relu=relu)
    return y.reshape(N, Ho, Wo, cout)


def maxpool_3x3_s2_p1(x):
    N, H, W, C = x.shape
    Ho = (H + 2 - 3) // 2 + 1
    Wo = (W + 2 - 3) // 2 + 1
    xp = jnp.pad(x, ((0, 0), (1, 1), (1, 1), (0, 0)), constant_values=-jnp.inf)
    M = N * Ho * Wo
    slabs = []
    for dy in range(3):
        for dx in range(3):
            sl = xp[:, dy:dy + 2 * (Ho - 1) + 1:2, dx:dx + 2 * (Wo - 1) + 1:2, :]
            slabs.append(sl.reshape(M, C))
    packed = [_lane_pack(s.astype(jnp.float32))[0] for s in slabs]
    Mr, Cr = packed[0].shape
    Mp = _round_up(Mr, 8)
    tm = _pick_tile(Mp, 8, 512)
    packed = [jnp.pad(p, ((0, Mp - Mr), (0, 0))) for p in packed]
    out = pl.pallas_call(
        _max9_kernel,
        out_shape=jax.ShapeDtypeStruct((Mp, Cr), jnp.float32),
        grid=(Mp // tm,),
        in_specs=[pl.BlockSpec((tm, Cr), lambda i: (i, 0))] * 9,
        out_specs=pl.BlockSpec((tm, Cr), lambda i: (i, 0)),
        compiler_params=pltpu.CompilerParams(dimension_semantics=("parallel",)),
    )(*packed)
    out = out[:Mr].reshape(M, C)
    return out.reshape(N, Ho, Wo, C)


def basic_block(x, p, stride):
    # `stride` and the presence of a downsample branch are STATIC Python values.
    if 'down_w' in p:
        identity = conv_bn_act(x, p['down_w'], p['down_g'], p['down_b'],
                               stride=stride, pad=0, relu=False)
    else:
        identity = x
    out = conv_bn_act(x, p['conv1_w'], p['bn1_g'], p['bn1_b'],
                      stride=stride, pad=1, relu=True)
    # conv2 -> bn2 -> (+identity) -> relu, fused in the Pallas epilogue kernel
    out = conv_bn_act(out, p['conv2_w'], p['bn2_g'], p['bn2_b'],
                      stride=1, pad=1, relu=True, residual=identity)
    return out


_LAYER_STRIDES = (('layer1', 1), ('layer2', 2), ('layer3', 2), ('layer4', 2))


def quantized_resnet18_forward(x_nchw, params):
    # QuantStub: identity (module not prepared/converted).
    x = jnp.transpose(x_nchw, (0, 2, 3, 1)).astype(jnp.float32)   # NCHW -> NHWC
    x = conv_bn_act(x, params['conv1_w'], params['bn1_g'], params['bn1_b'],
                    stride=2, pad=3, relu=True)
    x = maxpool_3x3_s2_p1(x)
    for name, layer_stride in _LAYER_STRIDES:
        for bi, blk in enumerate(params[name]):
            x = basic_block(x, blk, stride=layer_stride if bi == 0 else 1)
    feat = jnp.mean(x, axis=(1, 2))                               # adaptive avgpool (1,1)
    logits = pallas_matmul(feat, params['fc_w'].T, bias=params['fc_b'],
                           tn_max=512)
    # DeQuantStub: identity (module not prepared/converted).
    return logits


# ----------------------------- parameter init -------------------------------

def init_resnet18_params(key, num_classes=1000):
    keys = iter(jax.random.split(key, 64))

    def conv(cout, cin, kh, kw):
        fan_in = cin * kh * kw
        return (jax.random.normal(next(keys), (cout, cin, kh, kw), jnp.float32)
                * jnp.sqrt(2.0 / fan_in))

    def bn(c):
        return jnp.ones((c,), jnp.float32), jnp.zeros((c,), jnp.float32)

    params = {'conv1_w': conv(64, 3, 7, 7)}
    params['bn1_g'], params['bn1_b'] = bn(64)
    layer_cfg = [('layer1', 64, 64, 1), ('layer2', 64, 128, 2),
                 ('layer3', 128, 256, 2), ('layer4', 256, 512, 2)]
    for name, cin, cout, stride in layer_cfg:
        blocks = []
        for bi in range(2):
            s = stride if bi == 0 else 1
            ci = cin if bi == 0 else cout
            blk = {'conv1_w': conv(cout, ci, 3, 3),
                   'conv2_w': conv(cout, cout, 3, 3)}
            blk['bn1_g'], blk['bn1_b'] = bn(cout)
            blk['bn2_g'], blk['bn2_b'] = bn(cout)
            if s != 1 or ci != cout:
                blk['down_w'] = conv(cout, ci, 1, 1)
                blk['down_g'], blk['down_b'] = bn(cout)
            blocks.append(blk)
        params[name] = blocks
    params['fc_w'] = jax.random.normal(next(keys), (num_classes, 512), jnp.float32) * 0.01
    params['fc_b'] = jnp.zeros((num_classes,), jnp.float32)
    return params


if __name__ == "__main__":
    key = jax.random.PRNGKey(0)
    pkey, xkey = jax.random.split(key)
    params = init_resnet18_params(pkey, num_classes=1000)
    x = jax.random.normal(xkey, (2, 3, 32, 32), jnp.float32)      # small NCHW input

    fwd = jax.jit(quantized_resnet18_forward)
    out = fwd(x, params)
    jax.block_until_ready(out)
    assert out.shape == (2, 1000) and out.dtype == jnp.float32
    print("KERNEL_OK")
</pallas_src>

<mosaic_0001>
module attributes {stable_mosaic.version = 11 : i64} {
  func.func @_matmul_kernel(%arg0: i32, %arg1: i32, %arg2: i32, %arg3: memref<256x256xbf16, #tpu.memory_space<vmem>>, %arg4: memref<256x128xbf16, #tpu.memory_space<vmem>>, %arg5: memref<256x128xf32, #tpu.memory_space<vmem>>, %arg6: memref<256x128xf32, #tpu.memory_space<vmem>>) attributes {dimension_semantics = [#tpu.dimension_semantics<parallel>, #tpu.dimension_semantics<parallel>, #tpu.dimension_semantics<arbitrary>], iteration_bounds = array<i64: 2, 1, 1>, scalar_prefetch = 0 : i64, scratch_operands = 1 : i64, tpu.core_type = #tpu.core_type<tc>, window_params = [{transform_indices = @transform_0, window_bounds = array<i64: 256, 256>}, {transform_indices = @transform_1, window_bounds = array<i64: 256, 128>}, {transform_indices = @transform_2, window_bounds = array<i64: 256, 128>}]} {
    %c0_i32 = arith.constant 0 : i32
    %0 = arith.cmpi eq, %arg2, %c0_i32 : i32
    %1 = arith.extui %0 : i1 to i32
    %c0_i32_0 = arith.constant 0 : i32
    %2 = arith.cmpi ne, %1, %c0_i32_0 : i32
    scf.if %2 {
      %cst_10 = arith.constant 0.000000e+00 : f32
      %12 = vector.broadcast %cst_10 : f32 to vector<256x128xf32>
      %c0_11 = arith.constant 0 : index
      %c0_12 = arith.constant 0 : index
      %13 = vector.load %arg6[%c0_11, %c0_12] : memref<256x128xf32, #tpu.memory_space<vmem>>, vector<256x128xf32>
      tpu.vector_store %arg6[%c0_11, %c0_12], %12 {strides = array<i32>} : memref<256x128xf32, #tpu.memory_space<vmem>>, vector<256x128xf32>,
    } else {
    }
    %c0 = arith.constant 0 : index
    %c0_1 = arith.constant 0 : index
    %3 = vector.load %arg6[%c0, %c0_1] : memref<256x128xf32, #tpu.memory_space<vmem>>, vector<256x128xf32>
    %c0_2 = arith.constant 0 : index
    %c0_3 = arith.constant 0 : index
    %4 = vector.load %arg3[%c0_2, %c0_3] : memref<256x256xbf16, #tpu.memory_space<vmem>>, vector<256x256xbf16>
    %c0_4 = arith.constant 0 : index
    %c0_5 = arith.constant 0 : index
    %5 = vector.load %arg4[%c0_4, %c0_5] : memref<256x128xbf16, #tpu.memory_space<vmem>>, vector<256x128xbf16>
    %cst = arith.constant dense<0.000000e+00> : vector<256x128xf32>
    %6 = tpu.matmul %4, %5, %cst {dimension_numbers = #tpu.dot_dimension_numbers<[1], [0], [0], [1], [0, 0, 1, 1], [], []>} : vector<256x256xbf16>, vector<256x128xbf16>, vector<256x128xf32> -> vector<256x128xf32>
    %7 = arith.addf %3, %6 : vector<256x128xf32>
    %c0_6 = arith.constant 0 : index
    %c0_7 = arith.constant 0 : index
    %8 = vector.load %arg6[%c0_6, %c0_7] : memref<256x128xf32, #tpu.memory_space<vmem>>, vector<256x128xf32>
    tpu.vector_store %arg6[%c0_6, %c0_7], %7 {strides = array<i32>} : memref<256x128xf32, #tpu.memory_space<vmem>>, vector<256x128xf32>,
    %c0_i32_8 = arith.constant 0 : i32
    %9 = arith.cmpi eq, %arg2, %c0_i32_8 : i32
    %10 = arith.extui %9 : i1 to i32
    %c0_i32_9 = arith.constant 0 : i32
    %11 = arith.cmpi ne, %10, %c0_i32_9 : i32
    scf.if %11 {
      %c0_10 = arith.constant 0 : index
      %c0_11 = arith.constant 0 : index
      %12 = vector.load %arg6[%c0_10, %c0_11] : memref<256x128xf32, #tpu.memory_space<vmem>>, vector<256x128xf32>
      %c0_12 = arith.constant 0 : index
      %c0_13 = arith.constant 0 : index
      %13 = vector.load %arg5[%c0_12, %c0_13] : memref<256x128xf32, #tpu.memory_space<vmem>>, vector<256x128xf32>
      tpu.vector_store %arg5[%c0_12, %c0_13], %12 {strides = array<i32>} : memref<256x128xf32, #tpu.memory_space<vmem>>, vector<256x128xf32>,
    } else {
    }
    return
  }
  func.func @transform_0(%arg0: i32, %arg1: i32, %arg2: i32) -> (i32, i32) {
    %c0_i32 = arith.constant 0 : i32
    return %arg0, %arg2 : i32, i32
  }
  func.func @transform_1(%arg0: i32, %arg1: i32, %arg2: i32) -> (i32, i32) {
    %c0_i32 = arith.constant 0 : i32
    return %arg2, %arg1 : i32, i32
  }
  func.func @transform_2(%arg0: i32, %arg1: i32, %arg2: i32) -> (i32, i32) {
    %c0_i32 = arith.constant 0 : i32
    return %arg0, %arg1 : i32, i32
  }
}

module attributes {stable_mosaic.version = 11 : i64} {
  func.func @_colstats_kernel(%arg0: i32, %arg1: memref<256x128xf32, #tpu.memory_space<vmem>>, %arg2: memref<1x128xf32, #tpu.memory_space<vmem>>, %arg3: memref<1x128xf32, #tpu.memory_space<vmem>>) attributes {dimension_semantics = [#tpu.dimension_semantics<arbitrary>], iteration_bounds = array<i64: 1>, scalar_prefetch = 0 : i64, scratch_operands = 0 : i64, tpu.core_type = #tpu.core_type<tc>, window_params = [{transform_indices = @transform_0, window_bounds = array<i64: 256, 128>}, {pipeline_mode = #tpu.pipeline_mode<synchronous>, transform_indices = @transform_1, window_bounds = array<i64: 1, 128>}, {pipeline_mode = #tpu.pipeline_mode<synchronous>, transform_indices = @transform_2, window_bounds = array<i64: 1, 128>}]} {
    %c0_i32 = arith.constant 0 : i32
    %0 = arith.cmpi eq, %arg0, %c0_i32 : i32
    %1 = arith.extui %0 : i1 to i32
    %c0_i32_0 = arith.constant 0 : i32
    %2 = arith.cmpi ne, %1, %c0_i32_0 : i32
    scf.if %2 {
      %cst_11 = arith.constant 0.000000e+00 : f32
      %15 = vector.broadcast %cst_11 : f32 to vector<1x128xf32>
      %c0_12 = arith.constant 0 : index
      %c0_13 = arith.constant 0 : index
      %16 = vector.load %arg2[%c0_12, %c0_13] : memref<1x128xf32, #tpu.memory_space<vmem>>, vector<1x128xf32>
      tpu.vector_store %arg2[%c0_12, %c0_13], %15 {strides = array<i32>} : memref<1x128xf32, #tpu.memory_space<vmem>>, vector<1x128xf32>,
      %cst_14 = arith.constant 0.000000e+00 : f32
      %17 = vector.broadcast %cst_14 : f32 to vector<1x128xf32>
      %c0_15 = arith.constant 0 : index
      %c0_16 = arith.constant 0 : index
      %18 = vector.load %arg3[%c0_15, %c0_16] : memref<1x128xf32, #tpu.memory_space<vmem>>, vector<1x128xf32>
      tpu.vector_store %arg3[%c0_15, %c0_16], %17 {strides = array<i32>} : memref<1x128xf32, #tpu.memory_space<vmem>>, vector<1x128xf32>,
    } else {
    }
    %c0 = arith.constant 0 : index
    %c0_1 = arith.constant 0 : index
    %3 = vector.load %arg1[%c0, %c0_1] : memref<256x128xf32, #tpu.memory_space<vmem>>, vector<256x128xf32>
    %c0_2 = arith.constant 0 : index
    %c0_3 = arith.constant 0 : index
    %4 = vector.load %arg2[%c0_2, %c0_3] : memref<1x128xf32, #tpu.memory_space<vmem>>, vector<1x128xf32>
    %cst = arith.constant dense<0.000000e+00> : vector<128xf32>
    %5 = vector.multi_reduction <add>, %3, %cst [0] : vector<256x128xf32> to vector<128xf32>
    %6 = vector.shape_cast %5 : vector<128xf32> to vector<1x128xf32>
    %7 = arith.addf %4, %6 : vector<1x128xf32>
    %c0_4 = arith.constant 0 : index
    %c0_5 = arith.constant 0 : index
    %8 = vector.load %arg2[%c0_4, %c0_5] : memref<1x128xf32, #tpu.memory_space<vmem>>, vector<1x128xf32>
    tpu.vector_store %arg2[%c0_4, %c0_5], %7 {strides = array<i32>} : memref<1x128xf32, #tpu.memory_space<vmem>>, vector<1x128xf32>,
    %c0_6 = arith.constant 0 : index
    %c0_7 = arith.constant 0 : index
    %9 = vector.load %arg3[%c0_6, %c0_7] : memref<1x128xf32, #tpu.memory_space<vmem>>, vector<1x128xf32>
    %10 = arith.mulf %3, %3 : vector<256x128xf32>
    %cst_8 = arith.constant dense<0.000000e+00> : vector<128xf32>
    %11 = vector.multi_reduction <add>, %10, %cst_8 [0] : vector<256x128xf32> to vector<128xf32>
    %12 = vector.shape_cast %11 : vector<128xf32> to vector<1x128xf32>
    %13 = arith.addf %9, %12 : vector<1x128xf32>
    %c0_9 = arith.constant 0 : index
    %c0_10 = arith.constant 0 : index
    %14 = vector.load %arg3[%c0_9, %c0_10] : memref<1x128xf32, #tpu.memory_space<vmem>>, vector<1x128xf32>
    tpu.vector_store %arg3[%c0_9, %c0_10], %13 {strides = array<i32>} : memref<1x128xf32, #tpu.memory_space<vmem>>, vector<1x128xf32>,
    return
  }
  func.func @transform_0(%arg0: i32) -> (i32, i32) {
    %c0_i32 = arith.constant 0 : i32
    %c0_i32_0 = arith.constant 0 : i32
    return %arg0, %c0_i32 : i32, i32
  }
  func.func @transform_1(%arg0: i32) -> (i32, i32) {
    %c0_i32 = arith.constant 0 : i32
    %c0_i32_0 = arith.constant 0 : i32
    %c0_i32_1 = arith.constant 0 : i32
    return %c0_i32, %c0_i32_0 : i32, i32
  }
  func.func @transform_2(%arg0: i32) -> (i32, i32) {
    %c0_i32 = arith.constant 0 : i32
    %c0_i32_0 = arith.constant 0 : i32
    %c0_i32_1 = arith.constant 0 : i32
    return %c0_i32, %c0_i32_0 : i32, i32
  }
}

module attributes {stable_mosaic.version = 11 : i64} {
  func.func @_bn_act_kernel(%arg0: i32, %arg1: memref<256x128xf32, #tpu.memory_space<vmem>>, %arg2: memref<1x128xf32, #tpu.memory_space<vmem>>, %arg3: memref<1x128xf32, #tpu.memory_space<vmem>>, %arg4: memref<256x128xf32, #tpu.memory_space<vmem>>) attributes {dimension_semantics = [#tpu.dimension_semantics<parallel>], iteration_bounds = array<i64: 1>, scalar_prefetch = 0 : i64, scratch_operands = 0 : i64, tpu.core_type = #tpu.core_type<tc>, window_params = [{transform_indices = @transform_0, window_bounds = array<i64: 256, 128>}, {pipeline_mode = #tpu.pipeline_mode<synchronous>, transform_indices = @transform_1, window_bounds = array<i64: 1, 128>}, {pipeline_mode = #tpu.pipeline_mode<synchronous>, transform_indices = @transform_2, window_bounds = array<i64: 1, 128>}, {transform_indices = @transform_3, window_bounds = array<i64: 256, 128>}]} {
    %c0 = arith.constant 0 : index
    %c0_0 = arith.constant 0 : index
    %0 = vector.load %arg1[%c0, %c0_0] : memref<256x128xf32, #tpu.memory_space<vmem>>, vector<256x128xf32>
    %c0_1 = arith.constant 0 : index
    %c0_2 = arith.constant 0 : index
    %1 = vector.load %arg2[%c0_1, %c0_2] : memref<1x128xf32, #tpu.memory_space<vmem>>, vector<1x128xf32>
    %2 = vector.broadcast %1 : vector<1x128xf32> to vector<256x128xf32>
    %3 = arith.mulf %0, %2 : vector<256x128xf32>
    %c0_3 = arith.constant 0 : index
    %c0_4 = arith.constant 0 : index
    %4 = vector.load %arg3[%c0_3, %c0_4] : memref<1x128xf32, #tpu.memory_space<vmem>>, vector<1x128xf32>
    %5 = vector.broadcast %4 : vector<1x128xf32> to vector<256x128xf32>
    %6 = arith.addf %3, %5 : vector<256x128xf32>
    %cst = arith.constant 0.000000e+00 : f32
    %7 = vector.broadcast %cst : f32 to vector<256x128xf32>
    %8 = arith.maximumf %6, %7 : vector<256x128xf32>
    %c0_5 = arith.constant 0 : index
    %c0_6 = arith.constant 0 : index
    %9 = vector.load %arg4[%c0_5, %c0_6] : memref<256x128xf32, #tpu.memory_space<vmem>>, vector<256x128xf32>
    tpu.vector_store %arg4[%c0_5, %c0_6], %8 {strides = array<i32>} : memref<256x128xf32, #tpu.memory_space<vmem>>, vector<256x128xf32>,
    return
  }
  func.func @transform_0(%arg0: i32) -> (i32, i32) {
    %c0_i32 = arith.constant 0 : i32
    %c0_i32_0 = arith.constant 0 : i32
    return %arg0, %c0_i32 : i32, i32
  }
  func.func @transform_1(%arg0: i32) -> (i32, i32) {
    %c0_i32 = arith.constant 0 : i32
    %c0_i32_0 = arith.constant 0 : i32
    %c0_i32_1 = arith.constant 0 : i32
    return %c0_i32, %c0_i32_0 : i32, i32
  }
  func.func @transform_2(%arg0: i32) -> (i32, i32) {
    %c0_i32 = arith.constant 0 : i32
    %c0_i32_0 = arith.constant 0 : i32
    %c0_i32_1 = arith.constant 0 : i32
    return %c0_i32, %c0_i32_0 : i32, i32
  }
  func.func @transform_3(%arg0: i32) -> (i32, i32) {
    %c0_i32 = arith.constant 0 : i32
    %c0_i32_0 = arith.constant 0 : i32
    return %arg0, %c0_i32 : i32, i32
  }
}

module attributes {stable_mosaic.version = 11 : i64} {
  func.func @_max9_kernel(%arg0: i32, %arg1: memref<64x128xf32, #tpu.memory_space<vmem>>, %arg2: memref<64x128xf32, #tpu.memory_space<vmem>>, %arg3: memref<64x128xf32, #tpu.memory_space<vmem>>, %arg4: memref<64x128xf32, #tpu.memory_space<vmem>>, %arg5: memref<64x128xf32, #tpu.memory_space<vmem>>, %arg6: memref<64x128xf32, #tpu.memory_space<vmem>>, %arg7: memref<64x128xf32, #tpu.memory_space<vmem>>, %arg8: memref<64x128xf32, #tpu.memory_space<vmem>>, %arg9: memref<64x128xf32, #tpu.memory_space<vmem>>, %arg10: memref<64x128xf32, #tpu.memory_space<vmem>>) attributes {dimension_semantics = [#tpu.dimension_semantics<parallel>], iteration_bounds = array<i64: 1>, scalar_prefetch = 0 : i64, scratch_operands = 0 : i64, tpu.core_type = #tpu.core_type<tc>, window_params = [{transform_indices = @transform_0, window_bounds = array<i64: 64, 128>}, {transform_indices = @transform_1, window_bounds = array<i64: 64, 128>}, {transform_indices = @transform_2, window_bounds = array<i64: 64, 128>}, {transform_indices = @transform_3, window_bounds = array<i64: 64, 128>}, {transform_indices = @transform_4, window_bounds = array<i64: 64, 128>}, {transform_indices = @transform_5, window_bounds = array<i64: 64, 128>}, {transform_indices = @transform_6, window_bounds = array<i64: 64, 128>}, {transform_indices = @transform_7, window_bounds = array<i64: 64, 128>}, {transform_indices = @transform_8, window_bounds = array<i64: 64, 128>}, {transform_indices = @transform_9, window_bounds = array<i64: 64, 128>}]} {
    %c0 = arith.constant 0 : index
    %c0_0 = arith.constant 0 : index
    %0 = vector.load %arg1[%c0, %c0_0] : memref<64x128xf32, #tpu.memory_space<vmem>>, vector<64x128xf32>
    %c0_1 = arith.constant 0 : index
    %c0_2 = arith.constant 0 : index
    %1 = vector.load %arg2[%c0_1, %c0_2] : memref<64x128xf32, #tpu.memory_space<vmem>>, vector<64x128xf32>
    %2 = arith.maximumf %0, %1 : vector<64x128xf32>
    %c0_3 = arith.constant 0 : index
    %c0_4 = arith.constant 0 : index
    %3 = vector.load %arg3[%c0_3, %c0_4] : memref<64x128xf32, #tpu.memory_space<vmem>>, vector<64x128xf32>
    %4 = arith.maximumf %2, %3 : vector<64x128xf32>
    %c0_5 = arith.constant 0 : index
    %c0_6 = arith.constant 0 : index
    %5 = vector.load %arg4[%c0_5, %c0_6] : memref<64x128xf32, #tpu.memory_space<vmem>>, vector<64x128xf32>
    %6 = arith.maximumf %4, %5 : vector<64x128xf32>
    %c0_7 = arith.constant 0 : index
    %c0_8 = arith.constant 0 : index
    %7 = vector.load %arg5[%c0_7, %c0_8] : memref<64x128xf32, #tpu.memory_space<vmem>>, vector<64x128xf32>
    %8 = arith.maximumf %6, %7 : vector<64x128xf32>
    %c0_9 = arith.constant 0 : index
    %c0_10 = arith.constant 0 : index
    %9 = vector.load %arg6[%c0_9, %c0_10] : memref<64x128xf32, #tpu.memory_space<vmem>>, vector<64x128xf32>
    %10 = arith.maximumf %8, %9 : vector<64x128xf32>
    %c0_11 = arith.constant 0 : index
    %c0_12 = arith.constant 0 : index
    %11 = vector.load %arg7[%c0_11, %c0_12] : memref<64x128xf32, #tpu.memory_space<vmem>>, vector<64x128xf32>
    %12 = arith.maximumf %10, %11 : vector<64x128xf32>
    %c0_13 = arith.constant 0 : index
    %c0_14 = arith.constant 0 : index
    %13 = vector.load %arg8[%c0_13, %c0_14] : memref<64x128xf32, #tpu.memory_space<vmem>>, vector<64x128xf32>
    %14 = arith.maximumf %12, %13 : vector<64x128xf32>
    %c0_15 = arith.constant 0 : index
    %c0_16 = arith.constant 0 : index
    %15 = vector.load %arg9[%c0_15, %c0_16] : memref<64x128xf32, #tpu.memory_space<vmem>>, vector<64x128xf32>
    %16 = arith.maximumf %14, %15 : vector<64x128xf32>
    %c0_17 = arith.constant 0 : index
    %c0_18 = arith.constant 0 : index
    %17 = vector.load %arg10[%c0_17, %c0_18] : memref<64x128xf32, #tpu.memory_space<vmem>>, vector<64x128xf32>
    tpu.vector_store %arg10[%c0_17, %c0_18], %16 {strides = array<i32>} : memref<64x128xf32, #tpu.memory_space<vmem>>, vector<64x128xf32>,
    return
  }
  func.func @transform_0(%arg0: i32) -> (i32, i32) {
    %c0_i32 = arith.constant 0 : i32
    %c0_i32_0 = arith.constant 0 : i32
    return %arg0, %c0_i32 : i32, i32
  }
  func.func @transform_1(%arg0: i32) -> (i32, i32) {
    %c0_i32 = arith.constant 0 : i32
    %c0_i32_0 = arith.constant 0 : i32
    return %arg0, %c0_i32 : i32, i32
  }
  func.func @transform_2(%arg0: i32) -> (i32, i32) {
    %c0_i32 = arith.constant 0 : i32
    %c0_i32_0 = arith.constant 0 : i32
    return %arg0, %c0_i32 : i32, i32
  }
  func.func @transform_3(%arg0: i32) -> (i32, i32) {
    %c0_i32 = arith.constant 0 : i32
    %c0_i32_0 = arith.constant 0 : i32
    return %arg0, %c0_i32 : i32, i32
  }
  func.func @transform_4(%arg0: i32) -> (i32, i32) {
    %c0_i32 = arith.constant 0 : i32
    %c0_i32_0 = arith.constant 0 : i32
    return %arg0, %c0_i32 : i32, i32
  }
  func.func @transform_5(%arg0: i32) -> (i32, i32) {
    %c0_i32 = arith.constant 0 : i32
    %c0_i32_0 = arith.constant 0 : i32
    return %arg0, %c0_i32 : i32, i32
  }
  func.func @transform_6(%arg0: i32) -> (i32, i32) {
    %c0_i32 = arith.constant 0 : i32
    %c0_i32_0 = arith.constant 0 : i32
    return %arg0, %c0_i32 : i32, i32
  }
  func.func @transform_7(%arg0: i32) -> (i32, i32) {
    %c0_i32 = arith.constant 0 : i32
    %c0_i32_0 = arith.constant 0 : i32
    return %arg0, %c0_i32 : i32, i32
  }
  func.func @transform_8(%arg0: i32) -> (i32, i32) {
    %c0_i32 = arith.constant 0 : i32
    %c0_i32_0 = arith.constant 0 : i32
    return %arg0, %c0_i32 : i32, i32
  }
  func.func @transform_9(%arg0: i32) -> (i32, i32) {
    %c0_i32 = arith.constant 0 : i32
    %c0_i32_0 = arith.constant 0 : i32
    return %arg0, %c0_i32 : i32, i32
  }
}

module attributes {stable_mosaic.version = 11 : i64} {
  func.func @_matmul_kernel(%arg0: i32, %arg1: i32, %arg2: i32, %arg3: memref<128x128xbf16, #tpu.memory_space<vmem>>, %arg4: memref<128x128xbf16, #tpu.memory_space<vmem>>, %arg5: memref<128x128xf32, #tpu.memory_space<vmem>>, %arg6: memref<128x128xf32, #tpu.memory_space<vmem>>) attributes {dimension_semantics = [#tpu.dimension_semantics<parallel>, #tpu.dimension_semantics<parallel>, #tpu.dimension_semantics<arbitrary>], iteration_bounds = array<i64: 1, 1, 5>, scalar_prefetch = 0 : i64, scratch_operands = 1 : i64, tpu.core_type = #tpu.core_type<tc>, window_params = [{transform_indices = @transform_0, window_bounds = array<i64: 128, 128>}, {transform_indices = @transform_1, window_bounds = array<i64: 128, 128>}, {transform_indices = @transform_2, window_bounds = array<i64: 128, 128>}]} {
    %c0_i32 = arith.constant 0 : i32
    %0 = arith.cmpi eq, %arg2, %c0_i32 : i32
    %1 = arith.extui %0 : i1 to i32
    %c0_i32_0 = arith.constant 0 : i32
    %2 = arith.cmpi ne, %1, %c0_i32_0 : i32
    scf.if %2 {
      %cst_9 = arith.constant 0.000000e+00 : f32
      %12 = vector.broadcast %cst_9 : f32 to vector<128x128xf32>
      %c0_10 = arith.constant 0 : index
      %c0_11 = arith.constant 0 : index
      %13 = vector.load %arg6[%c0_10, %c0_11] : memref<128x128xf32, #tpu.memory_space<vmem>>, vector<128x128xf32>
      tpu.vector_store %arg6[%c0_10, %c0_11], %12 {strides = array<i32>} : memref<128x128xf32, #tpu.memory_space<vmem>>, vector<128x128xf32>,
    } else {
    }
    %c0 = arith.constant 0 : index
    %c0_1 = arith.constant 0 : index
    %3 = vector.load %arg6[%c0, %c0_1] : memref<128x128xf32, #tpu.memory_space<vmem>>, vector<128x128xf32>
    %c0_2 = arith.constant 0 : index
    %c0_3 = arith.constant 0 : index
    %4 = vector.load %arg3[%c0_2, %c0_3] : memref<128x128xbf16, #tpu.memory_space<vmem>>, vector<128x128xbf16>
    %c0_4 = arith.constant 0 : index
    %c0_5 = arith.constant 0 : index
    %5 = vector.load %arg4[%c0_4, %c0_5] : memref<128x128xbf16, #tpu.memory_space<vmem>>, vector<128x128xbf16>
    %cst = arith.constant dense<0.000000e+00> : vector<128x128xf32>
    %6 = tpu.matmul %4, %5, %cst {dimension_numbers = #tpu.dot_dimension_numbers<[1], [0], [0], [1], [0, 0, 1, 1], [], []>} : vector<128x128xbf16>, vector<128x128xbf16>, vector<128x128xf32> -> vector<128x128xf32>
    %7 = arith.addf %3, %6 : vector<128x128xf32>
    %c0_6 = arith.constant 0 : index
    %c0_7 = arith.constant 0 : index
    %8 = vector.load %arg6[%c0_6, %c0_7] : memref<128x128xf32, #tpu.memory_space<vmem>>, vector<128x128xf32>
    tpu.vector_store %arg6[%c0_6, %c0_7], %7 {strides = array<i32>} : memref<128x128xf32, #tpu.memory_space<vmem>>, vector<128x128xf32>,
    %c4_i32 = arith.constant 4 : i32
    %9 = arith.cmpi eq, %arg2, %c4_i32 : i32
    %10 = arith.extui %9 : i1 to i32
    %c0_i32_8 = arith.constant 0 : i32
    %11 = arith.cmpi ne, %10, %c0_i32_8 : i32
    scf.if %11 {
      %c0_9 = arith.constant 0 : index
      %c0_10 = arith.constant 0 : index
      %12 = vector.load %arg6[%c0_9, %c0_10] : memref<128x128xf32, #tpu.memory_space<vmem>>, vector<128x128xf32>
      %c0_11 = arith.constant 0 : index
      %c0_12 = arith.constant 0 : index
      %13 = vector.load %arg5[%c0_11, %c0_12] : memref<128x128xf32, #tpu.memory_space<vmem>>, vector<128x128xf32>
      tpu.vector_store %arg5[%c0_11, %c0_12], %12 {strides = array<i32>} : memref<128x128xf32, #tpu.memory_space<vmem>>, vector<128x128xf32>,
    } else {
    }
    return
  }
  func.func @transform_0(%arg0: i32, %arg1: i32, %arg2: i32) -> (i32, i32) {
    %c0_i32 = arith.constant 0 : i32
    return %arg0, %arg2 : i32, i32
  }
  func.func @transform_1(%arg0: i32, %arg1: i32, %arg2: i32) -> (i32, i32) {
    %c0_i32 = arith.constant 0 : i32
    return %arg2, %arg1 : i32, i32
  }
  func.func @transform_2(%arg0: i32, %arg1: i32, %arg2: i32) -> (i32, i32) {
    %c0_i32 = arith.constant 0 : i32
    return %arg0, %arg1 : i32, i32
  }
}

module attributes {stable_mosaic.version = 11 : i64} {
  func.func @_bn_add_act_kernel(%arg0: i32, %arg1: memref<64x128xf32, #tpu.memory_space<vmem>>, %arg2: memref<1x128xf32, #tpu.memory_space<vmem>>, %arg3: memref<1x128xf32, #tpu.memory_space<vmem>>, %arg4: memref<64x128xf32, #tpu.memory_space<vmem>>, %arg5: memref<64x128xf32, #tpu.memory_space<vmem>>) attributes {dimension_semantics = [#tpu.dimension_semantics<parallel>], iteration_bounds = array<i64: 1>, scalar_prefetch = 0 : i64, scratch_operands = 0 : i64, tpu.core_type = #tpu.core_type<tc>, window_params = [{transform_indices = @transform_0, window_bounds = array<i64: 64, 128>}, {pipeline_mode = #tpu.pipeline_mode<synchronous>, transform_indices = @transform_1, window_bounds = array<i64: 1, 128>}, {pipeline_mode = #tpu.pipeline_mode<synchronous>, transform_indices = @transform_2, window_bounds = array<i64: 1, 128>}, {transform_indices = @transform_3, window_bounds = array<i64: 64, 128>}, {transform_indices = @transform_4, window_bounds = array<i64: 64, 128>}]} {
    %c0 = arith.constant 0 : index
    %c0_0 = arith.constant 0 : index
    %0 = vector.load %arg1[%c0, %c0_0] : memref<64x128xf32, #tpu.memory_space<vmem>>, vector<64x128xf32>
    %c0_1 = arith.constant 0 : index
    %c0_2 = arith.constant 0 : index
    %1 = vector.load %arg2[%c0_1, %c0_2] : memref<1x128xf32, #tpu.memory_space<vmem>>, vector<1x128xf32>
    %2 = vector.broadcast %1 : vector<1x128xf32> to vector<64x128xf32>
    %3 = arith.mulf %0, %2 : vector<64x128xf32>
    %c0_3 = arith.constant 0 : index
    %c0_4 = arith.constant 0 : index
    %4 = vector.load %arg3[%c0_3, %c0_4] : memref<1x128xf32, #tpu.memory_space<vmem>>, vector<1x128xf32>
    %5 = vector.broadcast %4 : vector<1x128xf32> to vector<64x128xf32>
    %6 = arith.addf %3, %5 : vector<64x128xf32>
    %c0_5 = arith.constant 0 : index
    %c0_6 = arith.constant 0 : index
    %7 = vector.load %arg4[%c0_5, %c0_6] : memref<64x128xf32, #tpu.memory_space<vmem>>, vector<64x128xf32>
    %8 = arith.addf %6, %7 : vector<64x128xf32>
    %cst = arith.constant 0.000000e+00 : f32
    %9 = vector.broadcast %cst : f32 to vector<64x128xf32>
    %10 = arith.maximumf %8, %9 : vector<64x128xf32>
    %c0_7 = arith.constant 0 : index
    %c0_8 = arith.constant 0 : index
    %11 = vector.load %arg5[%c0_7, %c0_8] : memref<64x128xf32, #tpu.memory_space<vmem>>, vector<64x128xf32>
    tpu.vector_store %arg5[%c0_7, %c0_8], %10 {strides = array<i32>} : memref<64x128xf32, #tpu.memory_space<vmem>>, vector<64x128xf32>,
    return
  }
  func.func @transform_0(%arg0: i32) -> (i32, i32) {
    %c0_i32 = arith.constant 0 : i32
    %c0_i32_0 = arith.constant 0 : i32
    return %arg0, %c0_i32 : i32, i32
  }
  func.func @transform_1(%arg0: i32) -> (i32, i32) {
    %c0_i32 = arith.constant 0 : i32
    %c0_i32_0 = arith.constant 0 : i32
    %c0_i32_1 = arith.constant 0 : i32
    return %c0_i32, %c0_i32_0 : i32, i32
  }
  func.func @transform_2(%arg0: i32) -> (i32, i32) {
    %c0_i32 = arith.constant 0 : i32
    %c0_i32_0 = arith.constant 0 : i32
    %c0_i32_1 = arith.constant 0 : i32
    return %c0_i32, %c0_i32_0 : i32, i32
  }
  func.func @transform_3(%arg0: i32) -> (i32, i32) {
    %c0_i32 = arith.constant 0 : i32
    %c0_i32_0 = arith.constant 0 : i32
    return %arg0, %c0_i32 : i32, i32
  }
  func.func @transform_4(%arg0: i32) -> (i32, i32) {
    %c0_i32 = arith.constant 0 : i32
    %c0_i32_0 = arith.constant 0 : i32
    return %arg0, %c0_i32 : i32, i32
  }
}

module attributes {stable_mosaic.version = 11 : i64} {
  func.func @_colstats_kernel(%arg0: i32, %arg1: memref<64x128xf32, #tpu.memory_space<vmem>>, %arg2: memref<1x128xf32, #tpu.memory_space<vmem>>, %arg3: memref<1x128xf32, #tpu.memory_space<vmem>>) attributes {dimension_semantics = [#tpu.dimension_semantics<arbitrary>], iteration_bounds = array<i64: 1>, scalar_prefetch = 0 : i64, scratch_operands = 0 : i64, tpu.core_type = #tpu.core_type<tc>, window_params = [{transform_indices = @transform_0, window_bounds = array<i64: 64, 128>}, {pipeline_mode = #tpu.pipeline_mode<synchronous>, transform_indices = @transform_1, window_bounds = array<i64: 1, 128>}, {pipeline_mode = #tpu.pipeline_mode<synchronous>, transform_indices = @transform_2, window_bounds = array<i64: 1, 128>}]} {
    %c0_i32 = arith.constant 0 : i32
    %0 = arith.cmpi eq, %arg0, %c0_i32 : i32
    %1 = arith.extui %0 : i1 to i32
    %c0_i32_0 = arith.constant 0 : i32
    %2 = arith.cmpi ne, %1, %c0_i32_0 : i32
    scf.if %2 {
      %cst_11 = arith.constant 0.000000e+00 : f32
      %15 = vector.broadcast %cst_11 : f32 to vector<1x128xf32>
      %c0_12 = arith.constant 0 : index
      %c0_13 = arith.constant 0 : index
      %16 = vector.load %arg2[%c0_12, %c0_13] : memref<1x128xf32, #tpu.memory_space<vmem>>, vector<1x128xf32>
      tpu.vector_store %arg2[%c0_12, %c0_13], %15 {strides = array<i32>} : memref<1x128xf32, #tpu.memory_space<vmem>>, vector<1x128xf32>,
      %cst_14 = arith.constant 0.000000e+00 : f32
      %17 = vector.broadcast %cst_14 : f32 to vector<1x128xf32>
      %c0_15 = arith.constant 0 : index
      %c0_16 = arith.constant 0 : index
      %18 = vector.load %arg3[%c0_15, %c0_16] : memref<1x128xf32, #tpu.memory_space<vmem>>, vector<1x128xf32>
      tpu.vector_store %arg3[%c0_15, %c0_16], %17 {strides = array<i32>} : memref<1x128xf32, #tpu.memory_space<vmem>>, vector<1x128xf32>,
    } else {
    }
    %c0 = arith.constant 0 : index
    %c0_1 = arith.constant 0 : index
    %3 = vector.load %arg1[%c0, %c0_1] : memref<64x128xf32, #tpu.memory_space<vmem>>, vector<64x128xf32>
    %c0_2 = arith.constant 0 : index
    %c0_3 = arith.constant 0 : index
    %4 = vector.load %arg2[%c0_2, %c0_3] : memref<1x128xf32, #tpu.memory_space<vmem>>, vector<1x128xf32>
    %cst = arith.constant dense<0.000000e+00> : vector<128xf32>
    %5 = vector.multi_reduction <add>, %3, %cst [0] : vector<64x128xf32> to vector<128xf32>
    %6 = vector.shape_cast %5 : vector<128xf32> to vector<1x128xf32>
    %7 = arith.addf %4, %6 : vector<1x128xf32>
    %c0_4 = arith.constant 0 : index
    %c0_5 = arith.constant 0 : index
    %8 = vector.load %arg2[%c0_4, %c0_5] : memref<1x128xf32, #tpu.memory_space<vmem>>, vector<1x128xf32>
    tpu.vector_store %arg2[%c0_4, %c0_5], %7 {strides = array<i32>} : memref<1x128xf32, #tpu.memory_space<vmem>>, vector<1x128xf32>,
    %c0_6 = arith.constant 0 : index
    %c0_7 = arith.constant 0 : index
    %9 = vector.load %arg3[%c0_6, %c0_7] : memref<1x128xf32, #tpu.memory_space<vmem>>, vector<1x128xf32>
    %10 = arith.mulf %3, %3 : vector<64x128xf32>
    %cst_8 = arith.constant dense<0.000000e+00> : vector<128xf32>
    %11 = vector.multi_reduction <add>, %10, %cst_8 [0] : vector<64x128xf32> to vector<128xf32>
    %12 = vector.shape_cast %11 : vector<128xf32> to vector<1x128xf32>
    %13 = arith.addf %9, %12 : vector<1x128xf32>
    %c0_9 = arith.constant 0 : index
    %c0_10 = arith.constant 0 : index
    %14 = vector.load %arg3[%c0_9, %c0_10] : memref<1x128xf32, #tpu.memory_space<vmem>>, vector<1x128xf32>
    tpu.vector_store %arg3[%c0_9, %c0_10], %13 {strides = array<i32>} : memref<1x128xf32, #tpu.memory_space<vmem>>, vector<1x128xf32>,
    return
  }
  func.func @transform_0(%arg0: i32) -> (i32, i32) {
    %c0_i32 = arith.constant 0 : i32
    %c0_i32_0 = arith.constant 0 : i32
    return %arg0, %c0_i32 : i32, i32
  }
  func.func @transform_1(%arg0: i32) -> (i32, i32) {
    %c0_i32 = arith.constant 0 : i32
    %c0_i32_0 = arith.constant 0 : i32
    %c0_i32_1 = arith.constant 0 : i32
    return %c0_i32, %c0_i32_0 : i32, i32
  }
  func.func @transform_2(%arg0: i32) -> (i32, i32) {
    %c0_i32 = arith.constant 0 : i32
    %c0_i32_0 = arith.constant 0 : i32
    %c0_i32_1 = arith.constant 0 : i32
    return %c0_i32, %c0_i32_0 : i32, i32
  }
}

module attributes {stable_mosaic.version = 11 : i64} {
  func.func @_bn_act_kernel(%arg0: i32, %arg1: memref<64x128xf32, #tpu.memory_space<vmem>>, %arg2: memref<1x128xf32, #tpu.memory_space<vmem>>, %arg3: memref<1x128xf32, #tpu.memory_space<vmem>>, %arg4: memref<64x128xf32, #tpu.memory_space<vmem>>) attributes {dimension_semantics = [#tpu.dimension_semantics<parallel>], iteration_bounds = array<i64: 1>, scalar_prefetch = 0 : i64, scratch_operands = 0 : i64, tpu.core_type = #tpu.core_type<tc>, window_params = [{transform_indices = @transform_0, window_bounds = array<i64: 64, 128>}, {pipeline_mode = #tpu.pipeline_mode<synchronous>, transform_indices = @transform_1, window_bounds = array<i64: 1, 128>}, {pipeline_mode = #tpu.pipeline_mode<synchronous>, transform_indices = @transform_2, window_bounds = array<i64: 1, 128>}, {transform_indices = @transform_3, window_bounds = array<i64: 64, 128>}]} {
    %c0 = arith.constant 0 : index
    %c0_0 = arith.constant 0 : index
    %0 = vector.load %arg1[%c0, %c0_0] : memref<64x128xf32, #tpu.memory_space<vmem>>, vector<64x128xf32>
    %c0_1 = arith.constant 0 : index
    %c0_2 = arith.constant 0 : index
    %1 = vector.load %arg2[%c0_1, %c0_2] : memref<1x128xf32, #tpu.memory_space<vmem>>, vector<1x128xf32>
    %2 = vector.broadcast %1 : vector<1x128xf32> to vector<64x128xf32>
    %3 = arith.mulf %0, %2 : vector<64x128xf32>
    %c0_3 = arith.constant 0 : index
    %c0_4 = arith.constant 0 : index
    %4 = vector.load %arg3[%c0_3, %c0_4] : memref<1x128xf32, #tpu.memory_space<vmem>>, vector<1x128xf32>
    %5 = vector.broadcast %4 : vector<1x128xf32> to vector<64x128xf32>
    %6 = arith.addf %3, %5 : vector<64x128xf32>
    %cst = arith.constant 0.000000e+00 : f32
    %7 = vector.broadcast %cst : f32 to vector<64x128xf32>
    %8 = arith.maximumf %6, %7 : vector<64x128xf32>
    %c0_5 = arith.constant 0 : index
    %c0_6 = arith.constant 0 : index
    %9 = vector.load %arg4[%c0_5, %c0_6] : memref<64x128xf32, #tpu.memory_space<vmem>>, vector<64x128xf32>
    tpu.vector_store %arg4[%c0_5, %c0_6], %8 {strides = array<i32>} : memref<64x128xf32, #tpu.memory_space<vmem>>, vector<64x128xf32>,
    return
  }
  func.func @transform_0(%arg0: i32) -> (i32, i32) {
    %c0_i32 = arith.constant 0 : i32
    %c0_i32_0 = arith.constant 0 : i32
    return %arg0, %c0_i32 : i32, i32
  }
  func.func @transform_1(%arg0: i32) -> (i32, i32) {
    %c0_i32 = arith.constant 0 : i32
    %c0_i32_0 = arith.constant 0 : i32
    %c0_i32_1 = arith.constant 0 : i32
    return %c0_i32, %c0_i32_0 : i32, i32
  }
  func.func @transform_2(%arg0: i32) -> (i32, i32) {
    %c0_i32 = arith.constant 0 : i32
    %c0_i32_0 = arith.constant 0 : i32
    %c0_i32_1 = arith.constant 0 : i32
    return %c0_i32, %c0_i32_0 : i32, i32
  }
  func.func @transform_3(%arg0: i32) -> (i32, i32) {
    %c0_i32 = arith.constant 0 : i32
    %c0_i32_0 = arith.constant 0 : i32
    return %arg0, %c0_i32 : i32, i32
  }
}

module attributes {stable_mosaic.version = 11 : i64} {
  func.func @_matmul_kernel(%arg0: i32, %arg1: i32, %arg2: i32, %arg3: memref<32x128xbf16, #tpu.memory_space<vmem>>, %arg4: memref<128x128xbf16, #tpu.memory_space<vmem>>, %arg5: memref<32x128xf32, #tpu.memory_space<vmem>>, %arg6: memref<32x128xf32, #tpu.memory_space<vmem>>) attributes {dimension_semantics = [#tpu.dimension_semantics<parallel>, #tpu.dimension_semantics<parallel>, #tpu.dimension_semantics<arbitrary>], iteration_bounds = array<i64: 1, 1, 1>, scalar_prefetch = 0 : i64, scratch_operands = 1 : i64, tpu.core_type = #tpu.core_type<tc>, window_params = [{transform_indices = @transform_0, window_bounds = array<i64: 32, 128>}, {transform_indices = @transform_1, window_bounds = array<i64: 128, 128>}, {transform_indices = @transform_2, window_bounds = array<i64: 32, 128>}]} {
    %c0_i32 = arith.constant 0 : i32
    %0 = arith.cmpi eq, %arg2, %c0_i32 : i32
    %1 = arith.extui %0 : i1 to i32
    %c0_i32_0 = arith.constant 0 : i32
    %2 = arith.cmpi ne, %1, %c0_i32_0 : i32
    scf.if %2 {
      %cst_10 = arith.constant 0.000000e+00 : f32
      %12 = vector.broadcast %cst_10 : f32 to vector<32x128xf32>
      %c0_11 = arith.constant 0 : index
      %c0_12 = arith.constant 0 : index
      %13 = vector.load %arg6[%c0_11, %c0_12] : memref<32x128xf32, #tpu.memory_space<vmem>>, vector<32x128xf32>
      tpu.vector_store %arg6[%c0_11, %c0_12], %12 {strides = array<i32>} : memref<32x128xf32, #tpu.memory_space<vmem>>, vector<32x128xf32>,
    } else {
    }
    %c0 = arith.constant 0 : index
    %c0_1 = arith.constant 0 : index
    %3 = vector.load %arg6[%c0, %c0_1] : memref<32x128xf32, #tpu.memory_space<vmem>>, vector<32x128xf32>
    %c0_2 = arith.constant 0 : index
    %c0_3 = arith.constant 0 : index
    %4 = vector.load %arg3[%c0_2, %c0_3] : memref<32x128xbf16, #tpu.memory_space<vmem>>, vector<32x128xbf16>
    %c0_4 = arith.constant 0 : index
    %c0_5 = arith.constant 0 : index
    %5 = vector.load %arg4[%c0_4, %c0_5] : memref<128x128xbf16, #tpu.memory_space<vmem>>, vector<128x128xbf16>
    %cst = arith.constant dense<0.000000e+00> : vector<32x128xf32>
    %6 = tpu.matmul %4, %5, %cst {dimension_numbers = #tpu.dot_dimension_numbers<[1], [0], [0], [1], [0, 0, 1, 1], [], []>} : vector<32x128xbf16>, vector<128x128xbf16>, vector<32x128xf32> -> vector<32x128xf32>
    %7 = arith.addf %3, %6 : vector<32x128xf32>
    %c0_6 = arith.constant 0 : index
    %c0_7 = arith.constant 0 : index
    %8 = vector.load %arg6[%c0_6, %c0_7] : memref<32x128xf32, #tpu.memory_space<vmem>>, vector<32x128xf32>
    tpu.vector_store %arg6[%c0_6, %c0_7], %7 {strides = array<i32>} : memref<32x128xf32, #tpu.memory_space<vmem>>, vector<32x128xf32>,
    %c0_i32_8 = arith.constant 0 : i32
    %9 = arith.cmpi eq, %arg2, %c0_i32_8 : i32
    %10 = arith.extui %9 : i1 to i32
    %c0_i32_9 = arith.constant 0 : i32
    %11 = arith.cmpi ne, %10, %c0_i32_9 : i32
    scf.if %11 {
      %c0_10 = arith.constant 0 : index
      %c0_11 = arith.constant 0 : index
      %12 = vector.load %arg6[%c0_10, %c0_11] : memref<32x128xf32, #tpu.memory_space<vmem>>, vector<32x128xf32>
      %c0_12 = arith.constant 0 : index
      %c0_13 = arith.constant 0 : index
      %13 = vector.load %arg5[%c0_12, %c0_13] : memref<32x128xf32, #tpu.memory_space<vmem>>, vector<32x128xf32>
      tpu.vector_store %arg5[%c0_12, %c0_13], %12 {strides = array<i32>} : memref<32x128xf32, #tpu.memory_space<vmem>>, vector<32x128xf32>,
    } else {
    }
    return
  }
  func.func @transform_0(%arg0: i32, %arg1: i32, %arg2: i32) -> (i32, i32) {
    %c0_i32 = arith.constant 0 : i32
    return %arg0, %arg2 : i32, i32
  }
  func.func @transform_1(%arg0: i32, %arg1: i32, %arg2: i32) -> (i32, i32) {
    %c0_i32 = arith.constant 0 : i32
    return %arg2, %arg1 : i32, i32
  }
  func.func @transform_2(%arg0: i32, %arg1: i32, %arg2: i32) -> (i32, i32) {
    %c0_i32 = arith.constant 0 : i32
    return %arg0, %arg1 : i32, i32
  }
}

module attributes {stable_mosaic.version = 11 : i64} {
  func.func @_colstats_kernel(%arg0: i32, %arg1: memref<32x128xf32, #tpu.memory_space<vmem>>, %arg2: memref<1x128xf32, #tpu.memory_space<vmem>>, %arg3: memref<1x128xf32, #tpu.memory_space<vmem>>) attributes {dimension_semantics = [#tpu.dimension_semantics<arbitrary>], iteration_bounds = array<i64: 1>, scalar_prefetch = 0 : i64, scratch_operands = 0 : i64, tpu.core_type = #tpu.core_type<tc>, window_params = [{transform_indices = @transform_0, window_bounds = array<i64: 32, 128>}, {pipeline_mode = #tpu.pipeline_mode<synchronous>, transform_indices = @transform_1, window_bounds = array<i64: 1, 128>}, {pipeline_mode = #tpu.pipeline_mode<synchronous>, transform_indices = @transform_2, window_bounds = array<i64: 1, 128>}]} {
    %c0_i32 = arith.constant 0 : i32
    %0 = arith.cmpi eq, %arg0, %c0_i32 : i32
    %1 = arith.extui %0 : i1 to i32
    %c0_i32_0 = arith.constant 0 : i32
    %2 = arith.cmpi ne, %1, %c0_i32_0 : i32
    scf.if %2 {
      %cst_11 = arith.constant 0.000000e+00 : f32
      %15 = vector.broadcast %cst_11 : f32 to vector<1x128xf32>
      %c0_12 = arith.constant 0 : index
      %c0_13 = arith.constant 0 : index
      %16 = vector.load %arg2[%c0_12, %c0_13] : memref<1x128xf32, #tpu.memory_space<vmem>>, vector<1x128xf32>
      tpu.vector_store %arg2[%c0_12, %c0_13], %15 {strides = array<i32>} : memref<1x128xf32, #tpu.memory_space<vmem>>, vector<1x128xf32>,
      %cst_14 = arith.constant 0.000000e+00 : f32
      %17 = vector.broadcast %cst_14 : f32 to vector<1x128xf32>
      %c0_15 = arith.constant 0 : index
      %c0_16 = arith.constant 0 : index
      %18 = vector.load %arg3[%c0_15, %c0_16] : memref<1x128xf32, #tpu.memory_space<vmem>>, vector<1x128xf32>
      tpu.vector_store %arg3[%c0_15, %c0_16], %17 {strides = array<i32>} : memref<1x128xf32, #tpu.memory_space<vmem>>, vector<1x128xf32>,
    } else {
    }
    %c0 = arith.constant 0 : index
    %c0_1 = arith.constant 0 : index
    %3 = vector.load %arg1[%c0, %c0_1] : memref<32x128xf32, #tpu.memory_space<vmem>>, vector<32x128xf32>
    %c0_2 = arith.constant 0 : index
    %c0_3 = arith.constant 0 : index
    %4 = vector.load %arg2[%c0_2, %c0_3] : memref<1x128xf32, #tpu.memory_space<vmem>>, vector<1x128xf32>
    %cst = arith.constant dense<0.000000e+00> : vector<128xf32>
    %5 = vector.multi_reduction <add>, %3, %cst [0] : vector<32x128xf32> to vector<128xf32>
    %6 = vector.shape_cast %5 : vector<128xf32> to vector<1x128xf32>
    %7 = arith.addf %4, %6 : vector<1x128xf32>
    %c0_4 = arith.constant 0 : index
    %c0_5 = arith.constant 0 : index
    %8 = vector.load %arg2[%c0_4, %c0_5] : memref<1x128xf32, #tpu.memory_space<vmem>>, vector<1x128xf32>
    tpu.vector_store %arg2[%c0_4, %c0_5], %7 {strides = array<i32>} : memref<1x128xf32, #tpu.memory_space<vmem>>, vector<1x128xf32>,
    %c0_6 = arith.constant 0 : index
    %c0_7 = arith.constant 0 : index
    %9 = vector.load %arg3[%c0_6, %c0_7] : memref<1x128xf32, #tpu.memory_space<vmem>>, vector<1x128xf32>
    %10 = arith.mulf %3, %3 : vector<32x128xf32>
    %cst_8 = arith.constant dense<0.000000e+00> : vector<128xf32>
    %11 = vector.multi_reduction <add>, %10, %cst_8 [0] : vector<32x128xf32> to vector<128xf32>
    %12 = vector.shape_cast %11 : vector<128xf32> to vector<1x128xf32>
    %13 = arith.addf %9, %12 : vector<1x128xf32>
    %c0_9 = arith.constant 0 : index
    %c0_10 = arith.constant 0 : index
    %14 = vector.load %arg3[%c0_9, %c0_10] : memref<1x128xf32, #tpu.memory_space<vmem>>, vector<1x128xf32>
    tpu.vector_store %arg3[%c0_9, %c0_10], %13 {strides = array<i32>} : memref<1x128xf32, #tpu.memory_space<vmem>>, vector<1x128xf32>,
    return
  }
  func.func @transform_0(%arg0: i32) -> (i32, i32) {
    %c0_i32 = arith.constant 0 : i32
    %c0_i32_0 = arith.constant 0 : i32
    return %arg0, %c0_i32 : i32, i32
  }
  func.func @transform_1(%arg0: i32) -> (i32, i32) {
    %c0_i32 = arith.constant 0 : i32
    %c0_i32_0 = arith.constant 0 : i32
    %c0_i32_1 = arith.constant 0 : i32
    return %c0_i32, %c0_i32_0 : i32, i32
  }
  func.func @transform_2(%arg0: i32) -> (i32, i32) {
    %c0_i32 = arith.constant 0 : i32
    %c0_i32_0 = arith.constant 0 : i32
    %c0_i32_1 = arith.constant 0 : i32
    return %c0_i32, %c0_i32_0 : i32, i32
  }
}

module attributes {stable_mosaic.version = 11 : i64} {
  func.func @_bn_act_kernel(%arg0: i32, %arg1: memref<32x128xf32, #tpu.memory_space<vmem>>, %arg2: memref<1x128xf32, #tpu.memory_space<vmem>>, %arg3: memref<1x128xf32, #tpu.memory_space<vmem>>, %arg4: memref<32x128xf32, #tpu.memory_space<vmem>>) attributes {dimension_semantics = [#tpu.dimension_semantics<parallel>], iteration_bounds = array<i64: 1>, scalar_prefetch = 0 : i64, scratch_operands = 0 : i64, tpu.core_type = #tpu.core_type<tc>, window_params = [{transform_indices = @transform_0, window_bounds = array<i64: 32, 128>}, {pipeline_mode = #tpu.pipeline_mode<synchronous>, transform_indices = @transform_1, window_bounds = array<i64: 1, 128>}, {pipeline_mode = #tpu.pipeline_mode<synchronous>, transform_indices = @transform_2, window_bounds = array<i64: 1, 128>}, {transform_indices = @transform_3, window_bounds = array<i64: 32, 128>}]} {
    %c0 = arith.constant 0 : index
    %c0_0 = arith.constant 0 : index
    %0 = vector.load %arg1[%c0, %c0_0] : memref<32x128xf32, #tpu.memory_space<vmem>>, vector<32x128xf32>
    %c0_1 = arith.constant 0 : index
    %c0_2 = arith.constant 0 : index
    %1 = vector.load %arg2[%c0_1, %c0_2] : memref<1x128xf32, #tpu.memory_space<vmem>>, vector<1x128xf32>
    %2 = vector.broadcast %1 : vector<1x128xf32> to vector<32x128xf32>
    %3 = arith.mulf %0, %2 : vector<32x128xf32>
    %c0_3 = arith.constant 0 : index
    %c0_4 = arith.constant 0 : index
    %4 = vector.load %arg3[%c0_3, %c0_4] : memref<1x128xf32, #tpu.memory_space<vmem>>, vector<1x128xf32>
    %5 = vector.broadcast %4 : vector<1x128xf32> to vector<32x128xf32>
    %6 = arith.addf %3, %5 : vector<32x128xf32>
    %c0_5 = arith.constant 0 : index
    %c0_6 = arith.constant 0 : index
    %7 = vector.load %arg4[%c0_5, %c0_6] : memref<32x128xf32, #tpu.memory_space<vmem>>, vector<32x128xf32>
    tpu.vector_store %arg4[%c0_5, %c0_6], %6 {strides = array<i32>} : memref<32x128xf32, #tpu.memory_space<vmem>>, vector<32x128xf32>,
    return
  }
  func.func @transform_0(%arg0: i32) -> (i32, i32) {
    %c0_i32 = arith.constant 0 : i32
    %c0_i32_0 = arith.constant 0 : i32
    return %arg0, %c0_i32 : i32, i32
  }
  func.func @transform_1(%arg0: i32) -> (i32, i32) {
    %c0_i32 = arith.constant 0 : i32
    %c0_i32_0 = arith.constant 0 : i32
    %c0_i32_1 = arith.constant 0 : i32
    return %c0_i32, %c0_i32_0 : i32, i32
  }
  func.func @transform_2(%arg0: i32) -> (i32, i32) {
    %c0_i32 = arith.constant 0 : i32
    %c0_i32_0 = arith.constant 0 : i32
    %c0_i32_1 = arith.constant 0 : i32
    return %c0_i32, %c0_i32_0 : i32, i32
  }
  func.func @transform_3(%arg0: i32) -> (i32, i32) {
    %c0_i32 = arith.constant 0 : i32
    %c0_i32_0 = arith.constant 0 : i32
    return %arg0, %c0_i32 : i32, i32
  }
}

module attributes {stable_mosaic.version = 11 : i64} {
  func.func @_matmul_kernel(%arg0: i32, %arg1: i32, %arg2: i32, %arg3: memref<32x128xbf16, #tpu.memory_space<vmem>>, %arg4: memref<128x128xbf16, #tpu.memory_space<vmem>>, %arg5: memref<32x128xf32, #tpu.memory_space<vmem>>, %arg6: memref<32x128xf32, #tpu.memory_space<vmem>>) attributes {dimension_semantics = [#tpu.dimension_semantics<parallel>, #tpu.dimension_semantics<parallel>, #tpu.dimension_semantics<arbitrary>], iteration_bounds = array<i64: 1, 1, 5>, scalar_prefetch = 0 : i64, scratch_operands = 1 : i64, tpu.core_type = #tpu.core_type<tc>, window_params = [{transform_indices = @transform_0, window_bounds = array<i64: 32, 128>}, {transform_indices = @transform_1, window_bounds = array<i64: 128, 128>}, {transform_indices = @transform_2, window_bounds = array<i64: 32, 128>}]} {
    %c0_i32 = arith.constant 0 : i32
    %0 = arith.cmpi eq, %arg2, %c0_i32 : i32
    %1 = arith.extui %0 : i1 to i32
    %c0_i32_0 = arith.constant 0 : i32
    %2 = arith.cmpi ne, %1, %c0_i32_0 : i32
    scf.if %2 {
      %cst_9 = arith.constant 0.000000e+00 : f32
      %12 = vector.broadcast %cst_9 : f32 to vector<32x128xf32>
      %c0_10 = arith.constant 0 : index
      %c0_11 = arith.constant 0 : index
      %13 = vector.load %arg6[%c0_10, %c0_11] : memref<32x128xf32, #tpu.memory_space<vmem>>, vector<32x128xf32>
      tpu.vector_store %arg6[%c0_10, %c0_11], %12 {strides = array<i32>} : memref<32x128xf32, #tpu.memory_space<vmem>>, vector<32x128xf32>,
    } else {
    }
    %c0 = arith.constant 0 : index
    %c0_1 = arith.constant 0 : index
    %3 = vector.load %arg6[%c0, %c0_1] : memref<32x128xf32, #tpu.memory_space<vmem>>, vector<32x128xf32>
    %c0_2 = arith.constant 0 : index
    %c0_3 = arith.constant 0 : index
    %4 = vector.load %arg3[%c0_2, %c0_3] : memref<32x128xbf16, #tpu.memory_space<vmem>>, vector<32x128xbf16>
    %c0_4 = arith.constant 0 : index
    %c0_5 = arith.constant 0 : index
    %5 = vector.load %arg4[%c0_4, %c0_5] : memref<128x128xbf16, #tpu.memory_space<vmem>>, vector<128x128xbf16>
    %cst = arith.constant dense<0.000000e+00> : vector<32x128xf32>
    %6 = tpu.matmul %4, %5, %cst {dimension_numbers = #tpu.dot_dimension_numbers<[1], [0], [0], [1], [0, 0, 1, 1], [], []>} : vector<32x128xbf16>, vector<128x128xbf16>, vector<32x128xf32> -> vector<32x128xf32>
    %7 = arith.addf %3, %6 : vector<32x128xf32>
    %c0_6 = arith.constant 0 : index
    %c0_7 = arith.constant 0 : index
    %8 = vector.load %arg6[%c0_6, %c0_7] : memref<32x128xf32, #tpu.memory_space<vmem>>, vector<32x128xf32>
    tpu.vector_store %arg6[%c0_6, %c0_7], %7 {strides = array<i32>} : memref<32x128xf32, #tpu.memory_space<vmem>>, vector<32x128xf32>,
    %c4_i32 = arith.constant 4 : i32
    %9 = arith.cmpi eq, %arg2, %c4_i32 : i32
    %10 = arith.extui %9 : i1 to i32
    %c0_i32_8 = arith.constant 0 : i32
    %11 = arith.cmpi ne, %10, %c0_i32_8 : i32
    scf.if %11 {
      %c0_9 = arith.constant 0 : index
      %c0_10 = arith.constant 0 : index
      %12 = vector.load %arg6[%c0_9, %c0_10] : memref<32x128xf32, #tpu.memory_space<vmem>>, vector<32x128xf32>
      %c0_11 = arith.constant 0 : index
      %c0_12 = arith.constant 0 : index
      %13 = vector.load %arg5[%c0_11, %c0_12] : memref<32x128xf32, #tpu.memory_space<vmem>>, vector<32x128xf32>
      tpu.vector_store %arg5[%c0_11, %c0_12], %12 {strides = array<i32>} : memref<32x128xf32, #tpu.memory_space<vmem>>, vector<32x128xf32>,
    } else {
    }
    return
  }
  func.func @transform_0(%arg0: i32, %arg1: i32, %arg2: i32) -> (i32, i32) {
    %c0_i32 = arith.constant 0 : i32
    return %arg0, %arg2 : i32, i32
  }
  func.func @transform_1(%arg0: i32, %arg1: i32, %arg2: i32) -> (i32, i32) {
    %c0_i32 = arith.constant 0 : i32
    return %arg2, %arg1 : i32, i32
  }
  func.func @transform_2(%arg0: i32, %arg1: i32, %arg2: i32) -> (i32, i32) {
    %c0_i32 = arith.constant 0 : i32
    return %arg0, %arg1 : i32, i32
  }
}

module attributes {stable_mosaic.version = 11 : i64} {
  func.func @_bn_act_kernel(%arg0: i32, %arg1: memref<32x128xf32, #tpu.memory_space<vmem>>, %arg2: memref<1x128xf32, #tpu.memory_space<vmem>>, %arg3: memref<1x128xf32, #tpu.memory_space<vmem>>, %arg4: memref<32x128xf32, #tpu.memory_space<vmem>>) attributes {dimension_semantics = [#tpu.dimension_semantics<parallel>], iteration_bounds = array<i64: 1>, scalar_prefetch = 0 : i64, scratch_operands = 0 : i64, tpu.core_type = #tpu.core_type<tc>, window_params = [{transform_indices = @transform_0, window_bounds = array<i64: 32, 128>}, {pipeline_mode = #tpu.pipeline_mode<synchronous>, transform_indices = @transform_1, window_bounds = array<i64: 1, 128>}, {pipeline_mode = #tpu.pipeline_mode<synchronous>, transform_indices = @transform_2, window_bounds = array<i64: 1, 128>}, {transform_indices = @transform_3, window_bounds = array<i64: 32, 128>}]} {
    %c0 = arith.constant 0 : index
    %c0_0 = arith.constant 0 : index
    %0 = vector.load %arg1[%c0, %c0_0] : memref<32x128xf32, #tpu.memory_space<vmem>>, vector<32x128xf32>
    %c0_1 = arith.constant 0 : index
    %c0_2 = arith.constant 0 : index
    %1 = vector.load %arg2[%c0_1, %c0_2] : memref<1x128xf32, #tpu.memory_space<vmem>>, vector<1x128xf32>
    %2 = vector.broadcast %1 : vector<1x128xf32> to vector<32x128xf32>
    %3 = arith.mulf %0, %2 : vector<32x128xf32>
    %c0_3 = arith.constant 0 : index
    %c0_4 = arith.constant 0 : index
    %4 = vector.load %arg3[%c0_3, %c0_4] : memref<1x128xf32, #tpu.memory_space<vmem>>, vector<1x128xf32>
    %5 = vector.broadcast %4 : vector<1x128xf32> to vector<32x128xf32>
    %6 = arith.addf %3, %5 : vector<32x128xf32>
    %cst = arith.constant 0.000000e+00 : f32
    %7 = vector.broadcast %cst : f32 to vector<32x128xf32>
    %8 = arith.maximumf %6, %7 : vector<32x128xf32>
    %c0_5 = arith.constant 0 : index
    %c0_6 = arith.constant 0 : index
    %9 = vector.load %arg4[%c0_5, %c0_6] : memref<32x128xf32, #tpu.memory_space<vmem>>, vector<32x128xf32>
    tpu.vector_store %arg4[%c0_5, %c0_6], %8 {strides = array<i32>} : memref<32x128xf32, #tpu.memory_space<vmem>>, vector<32x128xf32>,
    return
  }
  func.func @transform_0(%arg0: i32) -> (i32, i32) {
    %c0_i32 = arith.constant 0 : i32
    %c0_i32_0 = arith.constant 0 : i32
    return %arg0, %c0_i32 : i32, i32
  }
  func.func @transform_1(%arg0: i32) -> (i32, i32) {
    %c0_i32 = arith.constant 0 : i32
    %c0_i32_0 = arith.constant 0 : i32
    %c0_i32_1 = arith.constant 0 : i32
    return %c0_i32, %c0_i32_0 : i32, i32
  }
  func.func @transform_2(%arg0: i32) -> (i32, i32) {
    %c0_i32 = arith.constant 0 : i32
    %c0_i32_0 = arith.constant 0 : i32
    %c0_i32_1 = arith.constant 0 : i32
    return %c0_i32, %c0_i32_0 : i32, i32
  }
  func.func @transform_3(%arg0: i32) -> (i32, i32) {
    %c0_i32 = arith.constant 0 : i32
    %c0_i32_0 = arith.constant 0 : i32
    return %arg0, %c0_i32 : i32, i32
  }
}

module attributes {stable_mosaic.version = 11 : i64} {
  func.func @_matmul_kernel(%arg0: i32, %arg1: i32, %arg2: i32, %arg3: memref<32x384xbf16, #tpu.memory_space<vmem>>, %arg4: memref<384x128xbf16, #tpu.memory_space<vmem>>, %arg5: memref<32x128xf32, #tpu.memory_space<vmem>>, %arg6: memref<32x128xf32, #tpu.memory_space<vmem>>) attributes {dimension_semantics = [#tpu.dimension_semantics<parallel>, #tpu.dimension_semantics<parallel>, #tpu.dimension_semantics<arbitrary>], iteration_bounds = array<i64: 1, 1, 3>, scalar_prefetch = 0 : i64, scratch_operands = 1 : i64, tpu.core_type = #tpu.core_type<tc>, window_params = [{transform_indices = @transform_0, window_bounds = array<i64: 32, 384>}, {transform_indices = @transform_1, window_bounds = array<i64: 384, 128>}, {transform_indices = @transform_2, window_bounds = array<i64: 32, 128>}]} {
    %c0_i32 = arith.constant 0 : i32
    %0 = arith.cmpi eq, %arg2, %c0_i32 : i32
    %1 = arith.extui %0 : i1 to i32
    %c0_i32_0 = arith.constant 0 : i32
    %2 = arith.cmpi ne, %1, %c0_i32_0 : i32
    scf.if %2 {
      %cst_9 = arith.constant 0.000000e+00 : f32
      %12 = vector.broadcast %cst_9 : f32 to vector<32x128xf32>
      %c0_10 = arith.constant 0 : index
      %c0_11 = arith.constant 0 : index
      %13 = vector.load %arg6[%c0_10, %c0_11] : memref<32x128xf32, #tpu.memory_space<vmem>>, vector<32x128xf32>
      tpu.vector_store %arg6[%c0_10, %c0_11], %12 {strides = array<i32>} : memref<32x128xf32, #tpu.memory_space<vmem>>, vector<32x128xf32>,
    } else {
    }
    %c0 = arith.constant 0 : index
    %c0_1 = arith.constant 0 : index
    %3 = vector.load %arg6[%c0, %c0_1] : memref<32x128xf32, #tpu.memory_space<vmem>>, vector<32x128xf32>
    %c0_2 = arith.constant 0 : index
    %c0_3 = arith.constant 0 : index
    %4 = vector.load %arg3[%c0_2, %c0_3] : memref<32x384xbf16, #tpu.memory_space<vmem>>, vector<32x384xbf16>
    %c0_4 = arith.constant 0 : index
    %c0_5 = arith.constant 0 : index
    %5 = vector.load %arg4[%c0_4, %c0_5] : memref<384x128xbf16, #tpu.memory_space<vmem>>, vector<384x128xbf16>
    %cst = arith.constant dense<0.000000e+00> : vector<32x128xf32>
    %6 = tpu.matmul %4, %5, %cst {dimension_numbers = #tpu.dot_dimension_numbers<[1], [0], [0], [1], [0, 0, 1, 1], [], []>} : vector<32x384xbf16>, vector<384x128xbf16>, vector<32x128xf32> -> vector<32x128xf32>
    %7 = arith.addf %3, %6 : vector<32x128xf32>
    %c0_6 = arith.constant 0 : index
    %c0_7 = arith.constant 0 : index
    %8 = vector.load %arg6[%c0_6, %c0_7] : memref<32x128xf32, #tpu.memory_space<vmem>>, vector<32x128xf32>
    tpu.vector_store %arg6[%c0_6, %c0_7], %7 {strides = array<i32>} : memref<32x128xf32, #tpu.memory_space<vmem>>, vector<32x128xf32>,
    %c2_i32 = arith.constant 2 : i32
    %9 = arith.cmpi eq, %arg2, %c2_i32 : i32
    %10 = arith.extui %9 : i1 to i32
    %c0_i32_8 = arith.constant 0 : i32
    %11 = arith.cmpi ne, %10, %c0_i32_8 : i32
    scf.if %11 {
      %c0_9 = arith.constant 0 : index
      %c0_10 = arith.constant 0 : index
      %12 = vector.load %arg6[%c0_9, %c0_10] : memref<32x128xf32, #tpu.memory_space<vmem>>, vector<32x128xf32>
      %c0_11 = arith.constant 0 : index
      %c0_12 = arith.constant 0 : index
      %13 = vector.load %arg5[%c0_11, %c0_12] : memref<32x128xf32, #tpu.memory_space<vmem>>, vector<32x128xf32>
      tpu.vector_store %arg5[%c0_11, %c0_12], %12 {strides = array<i32>} : memref<32x128xf32, #tpu.memory_space<vmem>>, vector<32x128xf32>,
    } else {
    }
    return
  }
  func.func @transform_0(%arg0: i32, %arg1: i32, %arg2: i32) -> (i32, i32) {
    %c0_i32 = arith.constant 0 : i32
    return %arg0, %arg2 : i32, i32
  }
  func.func @transform_1(%arg0: i32, %arg1: i32, %arg2: i32) -> (i32, i32) {
    %c0_i32 = arith.constant 0 : i32
    return %arg2, %arg1 : i32, i32
  }
  func.func @transform_2(%arg0: i32, %arg1: i32, %arg2: i32) -> (i32, i32) {
    %c0_i32 = arith.constant 0 : i32
    return %arg0, %arg1 : i32, i32
  }
}

module attributes {stable_mosaic.version = 11 : i64} {
  func.func @_bn_add_act_kernel(%arg0: i32, %arg1: memref<32x128xf32, #tpu.memory_space<vmem>>, %arg2: memref<1x128xf32, #tpu.memory_space<vmem>>, %arg3: memref<1x128xf32, #tpu.memory_space<vmem>>, %arg4: memref<32x128xf32, #tpu.memory_space<vmem>>, %arg5: memref<32x128xf32, #tpu.memory_space<vmem>>) attributes {dimension_semantics = [#tpu.dimension_semantics<parallel>], iteration_bounds = array<i64: 1>, scalar_prefetch = 0 : i64, scratch_operands = 0 : i64, tpu.core_type = #tpu.core_type<tc>, window_params = [{transform_indices = @transform_0, window_bounds = array<i64: 32, 128>}, {pipeline_mode = #tpu.pipeline_mode<synchronous>, transform_indices = @transform_1, window_bounds = array<i64: 1, 128>}, {pipeline_mode = #tpu.pipeline_mode<synchronous>, transform_indices = @transform_2, window_bounds = array<i64: 1, 128>}, {transform_indices = @transform_3, window_bounds = array<i64: 32, 128>}, {transform_indices = @transform_4, window_bounds = array<i64: 32, 128>}]} {
    %c0 = arith.constant 0 : index
    %c0_0 = arith.constant 0 : index
    %0 = vector.load %arg1[%c0, %c0_0] : memref<32x128xf32, #tpu.memory_space<vmem>>, vector<32x128xf32>
    %c0_1 = arith.constant 0 : index
    %c0_2 = arith.constant 0 : index
    %1 = vector.load %arg2[%c0_1, %c0_2] : memref<1x128xf32, #tpu.memory_space<vmem>>, vector<1x128xf32>
    %2 = vector.broadcast %1 : vector<1x128xf32> to vector<32x128xf32>
    %3 = arith.mulf %0, %2 : vector<32x128xf32>
    %c0_3 = arith.constant 0 : index
    %c0_4 = arith.constant 0 : index
    %4 = vector.load %arg3[%c0_3, %c0_4] : memref<1x128xf32, #tpu.memory_space<vmem>>, vector<1x128xf32>
    %5 = vector.broadcast %4 : vector<1x128xf32> to vector<32x128xf32>
    %6 = arith.addf %3, %5 : vector<32x128xf32>
    %c0_5 = arith.constant 0 : index
    %c0_6 = arith.constant 0 : index
    %7 = vector.load %arg4[%c0_5, %c0_6] : memref<32x128xf32, #tpu.memory_space<vmem>>, vector<32x128xf32>
    %8 = arith.addf %6, %7 : vector<32x128xf32>
    %cst = arith.constant 0.000000e+00 : f32
    %9 = vector.broadcast %cst : f32 to vector<32x128xf32>
    %10 = arith.maximumf %8, %9 : vector<32x128xf32>
    %c0_7 = arith.constant 0 : index
    %c0_8 = arith.constant 0 : index
    %11 = vector.load %arg5[%c0_7, %c0_8] : memref<32x128xf32, #tpu.memory_space<vmem>>, vector<32x128xf32>
    tpu.vector_store %arg5[%c0_7, %c0_8], %10 {strides = array<i32>} : memref<32x128xf32, #tpu.memory_space<vmem>>, vector<32x128xf32>,
    return
  }
  func.func @transform_0(%arg0: i32) -> (i32, i32) {
    %c0_i32 = arith.constant 0 : i32
    %c0_i32_0 = arith.constant 0 : i32
    return %arg0, %c0_i32 : i32, i32
  }
  func.func @transform_1(%arg0: i32) -> (i32, i32) {
    %c0_i32 = arith.constant 0 : i32
    %c0_i32_0 = arith.constant 0 : i32
    %c0_i32_1 = arith.constant 0 : i32
    return %c0_i32, %c0_i32_0 : i32, i32
  }
  func.func @transform_2(%arg0: i32) -> (i32, i32) {
    %c0_i32 = arith.constant 0 : i32
    %c0_i32_0 = arith.constant 0 : i32
    %c0_i32_1 = arith.constant 0 : i32
    return %c0_i32, %c0_i32_0 : i32, i32
  }
  func.func @transform_3(%arg0: i32) -> (i32, i32) {
    %c0_i32 = arith.constant 0 : i32
    %c0_i32_0 = arith.constant 0 : i32
    return %arg0, %c0_i32 : i32, i32
  }
  func.func @transform_4(%arg0: i32) -> (i32, i32) {
    %c0_i32 = arith.constant 0 : i32
    %c0_i32_0 = arith.constant 0 : i32
    return %arg0, %c0_i32 : i32, i32
  }
}

module attributes {stable_mosaic.version = 11 : i64} {
  func.func @_colstats_kernel(%arg0: i32, %arg1: memref<8x256xf32, #tpu.memory_space<vmem>>, %arg2: memref<1x256xf32, #tpu.memory_space<vmem>>, %arg3: memref<1x256xf32, #tpu.memory_space<vmem>>) attributes {dimension_semantics = [#tpu.dimension_semantics<arbitrary>], iteration_bounds = array<i64: 1>, scalar_prefetch = 0 : i64, scratch_operands = 0 : i64, tpu.core_type = #tpu.core_type<tc>, window_params = [{transform_indices = @transform_0, window_bounds = array<i64: 8, 256>}, {pipeline_mode = #tpu.pipeline_mode<synchronous>, transform_indices = @transform_1, window_bounds = array<i64: 1, 256>}, {pipeline_mode = #tpu.pipeline_mode<synchronous>, transform_indices = @transform_2, window_bounds = array<i64: 1, 256>}]} {
    %c0_i32 = arith.constant 0 : i32
    %0 = arith.cmpi eq, %arg0, %c0_i32 : i32
    %1 = arith.extui %0 : i1 to i32
    %c0_i32_0 = arith.constant 0 : i32
    %2 = arith.cmpi ne, %1, %c0_i32_0 : i32
    scf.if %2 {
      %cst_11 = arith.constant 0.000000e+00 : f32
      %15 = vector.broadcast %cst_11 : f32 to vector<1x256xf32>
      %c0_12 = arith.constant 0 : index
      %c0_13 = arith.constant 0 : index
      %16 = vector.load %arg2[%c0_12, %c0_13] : memref<1x256xf32, #tpu.memory_space<vmem>>, vector<1x256xf32>
      tpu.vector_store %arg2[%c0_12, %c0_13], %15 {strides = array<i32>} : memref<1x256xf32, #tpu.memory_space<vmem>>, vector<1x256xf32>,
      %cst_14 = arith.constant 0.000000e+00 : f32
      %17 = vector.broadcast %cst_14 : f32 to vector<1x256xf32>
      %c0_15 = arith.constant 0 : index
      %c0_16 = arith.constant 0 : index
      %18 = vector.load %arg3[%c0_15, %c0_16] : memref<1x256xf32, #tpu.memory_space<vmem>>, vector<1x256xf32>
      tpu.vector_store %arg3[%c0_15, %c0_16], %17 {strides = array<i32>} : memref<1x256xf32, #tpu.memory_space<vmem>>, vector<1x256xf32>,
    } else {
    }
    %c0 = arith.constant 0 : index
    %c0_1 = arith.constant 0 : index
    %3 = vector.load %arg1[%c0, %c0_1] : memref<8x256xf32, #tpu.memory_space<vmem>>, vector<8x256xf32>
    %c0_2 = arith.constant 0 : index
    %c0_3 = arith.constant 0 : index
    %4 = vector.load %arg2[%c0_2, %c0_3] : memref<1x256xf32, #tpu.memory_space<vmem>>, vector<1x256xf32>
    %cst = arith.constant dense<0.000000e+00> : vector<256xf32>
    %5 = vector.multi_reduction <add>, %3, %cst [0] : vector<8x256xf32> to vector<256xf32>
    %6 = vector.shape_cast %5 : vector<256xf32> to vector<1x256xf32>
    %7 = arith.addf %4, %6 : vector<1x256xf32>
    %c0_4 = arith.constant 0 : index
    %c0_5 = arith.constant 0 : index
    %8 = vector.load %arg2[%c0_4, %c0_5] : memref<1x256xf32, #tpu.memory_space<vmem>>, vector<1x256xf32>
    tpu.vector_store %arg2[%c0_4, %c0_5], %7 {strides = array<i32>} : memref<1x256xf32, #tpu.memory_space<vmem>>, vector<1x256xf32>,
    %c0_6 = arith.constant 0 : index
    %c0_7 = arith.constant 0 : index
    %9 = vector.load %arg3[%c0_6, %c0_7] : memref<1x256xf32, #tpu.memory_space<vmem>>, vector<1x256xf32>
    %10 = arith.mulf %3, %3 : vector<8x256xf32>
    %cst_8 = arith.constant dense<0.000000e+00> : vector<256xf32>
    %11 = vector.multi_reduction <add>, %10, %cst_8 [0] : vector<8x256xf32> to vector<256xf32>
    %12 = vector.shape_cast %11 : vector<256xf32> to vector<1x256xf32>
    %13 = arith.addf %9, %12 : vector<1x256xf32>
    %c0_9 = arith.constant 0 : index
    %c0_10 = arith.constant 0 : index
    %14 = vector.load %arg3[%c0_9, %c0_10] : memref<1x256xf32, #tpu.memory_space<vmem>>, vector<1x256xf32>
    tpu.vector_store %arg3[%c0_9, %c0_10], %13 {strides = array<i32>} : memref<1x256xf32, #tpu.memory_space<vmem>>, vector<1x256xf32>,
    return
  }
  func.func @transform_0(%arg0: i32) -> (i32, i32) {
    %c0_i32 = arith.constant 0 : i32
    %c0_i32_0 = arith.constant 0 : i32
    return %arg0, %c0_i32 : i32, i32
  }
  func.func @transform_1(%arg0: i32) -> (i32, i32) {
    %c0_i32 = arith.constant 0 : i32
    %c0_i32_0 = arith.constant 0 : i32
    %c0_i32_1 = arith.constant 0 : i32
    return %c0_i32, %c0_i32_0 : i32, i32
  }
  func.func @transform_2(%arg0: i32) -> (i32, i32) {
    %c0_i32 = arith.constant 0 : i32
    %c0_i32_0 = arith.constant 0 : i32
    %c0_i32_1 = arith.constant 0 : i32
    return %c0_i32, %c0_i32_0 : i32, i32
  }
}

module attributes {stable_mosaic.version = 11 : i64} {
  func.func @_matmul_kernel(%arg0: i32, %arg1: i32, %arg2: i32, %arg3: memref<16x128xbf16, #tpu.memory_space<vmem>>, %arg4: memref<128x256xbf16, #tpu.memory_space<vmem>>, %arg5: memref<16x256xf32, #tpu.memory_space<vmem>>, %arg6: memref<16x256xf32, #tpu.memory_space<vmem>>) attributes {dimension_semantics = [#tpu.dimension_semantics<parallel>, #tpu.dimension_semantics<parallel>, #tpu.dimension_semantics<arbitrary>], iteration_bounds = array<i64: 1, 1, 1>, scalar_prefetch = 0 : i64, scratch_operands = 1 : i64, tpu.core_type = #tpu.core_type<tc>, window_params = [{transform_indices = @transform_0, window_bounds = array<i64: 16, 128>}, {transform_indices = @transform_1, window_bounds = array<i64: 128, 256>}, {transform_indices = @transform_2, window_bounds = array<i64: 16, 256>}]} {
    %c0_i32 = arith.constant 0 : i32
    %0 = arith.cmpi eq, %arg2, %c0_i32 : i32
    %1 = arith.extui %0 : i1 to i32
    %c0_i32_0 = arith.constant 0 : i32
    %2 = arith.cmpi ne, %1, %c0_i32_0 : i32
    scf.if %2 {
      %cst_10 = arith.constant 0.000000e+00 : f32
      %12 = vector.broadcast %cst_10 : f32 to vector<16x256xf32>
      %c0_11 = arith.constant 0 : index
      %c0_12 = arith.constant 0 : index
      %13 = vector.load %arg6[%c0_11, %c0_12] : memref<16x256xf32, #tpu.memory_space<vmem>>, vector<16x256xf32>
      tpu.vector_store %arg6[%c0_11, %c0_12], %12 {strides = array<i32>} : memref<16x256xf32, #tpu.memory_space<vmem>>, vector<16x256xf32>,
    } else {
    }
    %c0 = arith.constant 0 : index
    %c0_1 = arith.constant 0 : index
    %3 = vector.load %arg6[%c0, %c0_1] : memref<16x256xf32, #tpu.memory_space<vmem>>, vector<16x256xf32>
    %c0_2 = arith.constant 0 : index
    %c0_3 = arith.constant 0 : index
    %4 = vector.load %arg3[%c0_2, %c0_3] : memref<16x128xbf16, #tpu.memory_space<vmem>>, vector<16x128xbf16>
    %c0_4 = arith.constant 0 : index
    %c0_5 = arith.constant 0 : index
    %5 = vector.load %arg4[%c0_4, %c0_5] : memref<128x256xbf16, #tpu.memory_space<vmem>>, vector<128x256xbf16>
    %cst = arith.constant dense<0.000000e+00> : vector<16x256xf32>
    %6 = tpu.matmul %4, %5, %cst {dimension_numbers = #tpu.dot_dimension_numbers<[1], [0], [0], [1], [0, 0, 1, 1], [], []>} : vector<16x128xbf16>, vector<128x256xbf16>, vector<16x256xf32> -> vector<16x256xf32>
    %7 = arith.addf %3, %6 : vector<16x256xf32>
    %c0_6 = arith.constant 0 : index
    %c0_7 = arith.constant 0 : index
    %8 = vector.load %arg6[%c0_6, %c0_7] : memref<16x256xf32, #tpu.memory_space<vmem>>, vector<16x256xf32>
    tpu.vector_store %arg6[%c0_6, %c0_7], %7 {strides = array<i32>} : memref<16x256xf32, #tpu.memory_space<vmem>>, vector<16x256xf32>,
    %c0_i32_8 = arith.constant 0 : i32
    %9 = arith.cmpi eq, %arg2, %c0_i32_8 : i32
    %10 = arith.extui %9 : i1 to i32
    %c0_i32_9 = arith.constant 0 : i32
    %11 = arith.cmpi ne, %10, %c0_i32_9 : i32
    scf.if %11 {
      %c0_10 = arith.constant 0 : index
      %c0_11 = arith.constant 0 : index
      %12 = vector.load %arg6[%c0_10, %c0_11] : memref<16x256xf32, #tpu.memory_space<vmem>>, vector<16x256xf32>
      %c0_12 = arith.constant 0 : index
      %c0_13 = arith.constant 0 : index
      %13 = vector.load %arg5[%c0_12, %c0_13] : memref<16x256xf32, #tpu.memory_space<vmem>>, vector<16x256xf32>
      tpu.vector_store %arg5[%c0_12, %c0_13], %12 {strides = array<i32>} : memref<16x256xf32, #tpu.memory_space<vmem>>, vector<16x256xf32>,
    } else {
    }
    return
  }
  func.func @transform_0(%arg0: i32, %arg1: i32, %arg2: i32) -> (i32, i32) {
    %c0_i32 = arith.constant 0 : i32
    return %arg0, %arg2 : i32, i32
  }
  func.func @transform_1(%arg0: i32, %arg1: i32, %arg2: i32) -> (i32, i32) {
    %c0_i32 = arith.constant 0 : i32
    return %arg2, %arg1 : i32, i32
  }
  func.func @transform_2(%arg0: i32, %arg1: i32, %arg2: i32) -> (i32, i32) {
    %c0_i32 = arith.constant 0 : i32
    return %arg0, %arg1 : i32, i32
  }
}

module attributes {stable_mosaic.version = 11 : i64} {
  func.func @_bn_act_kernel(%arg0: i32, %arg1: memref<8x256xf32, #tpu.memory_space<vmem>>, %arg2: memref<1x256xf32, #tpu.memory_space<vmem>>, %arg3: memref<1x256xf32, #tpu.memory_space<vmem>>, %arg4: memref<8x256xf32, #tpu.memory_space<vmem>>) attributes {dimension_semantics = [#tpu.dimension_semantics<parallel>], iteration_bounds = array<i64: 1>, scalar_prefetch = 0 : i64, scratch_operands = 0 : i64, tpu.core_type = #tpu.core_type<tc>, window_params = [{transform_indices = @transform_0, window_bounds = array<i64: 8, 256>}, {pipeline_mode = #tpu.pipeline_mode<synchronous>, transform_indices = @transform_1, window_bounds = array<i64: 1, 256>}, {pipeline_mode = #tpu.pipeline_mode<synchronous>, transform_indices = @transform_2, window_bounds = array<i64: 1, 256>}, {transform_indices = @transform_3, window_bounds = array<i64: 8, 256>}]} {
    %c0 = arith.constant 0 : index
    %c0_0 = arith.constant 0 : index
    %0 = vector.load %arg1[%c0, %c0_0] : memref<8x256xf32, #tpu.memory_space<vmem>>, vector<8x256xf32>
    %c0_1 = arith.constant 0 : index
    %c0_2 = arith.constant 0 : index
    %1 = vector.load %arg2[%c0_1, %c0_2] : memref<1x256xf32, #tpu.memory_space<vmem>>, vector<1x256xf32>
    %2 = vector.broadcast %1 : vector<1x256xf32> to vector<8x256xf32>
    %3 = arith.mulf %0, %2 : vector<8x256xf32>
    %c0_3 = arith.constant 0 : index
    %c0_4 = arith.constant 0 : index
    %4 = vector.load %arg3[%c0_3, %c0_4] : memref<1x256xf32, #tpu.memory_space<vmem>>, vector<1x256xf32>
    %5 = vector.broadcast %4 : vector<1x256xf32> to vector<8x256xf32>
    %6 = arith.addf %3, %5 : vector<8x256xf32>
    %c0_5 = arith.constant 0 : index
    %c0_6 = arith.constant 0 : index
    %7 = vector.load %arg4[%c0_5, %c0_6] : memref<8x256xf32, #tpu.memory_space<vmem>>, vector<8x256xf32>
    tpu.vector_store %arg4[%c0_5, %c0_6], %6 {strides = array<i32>} : memref<8x256xf32, #tpu.memory_space<vmem>>, vector<8x256xf32>,
    return
  }
  func.func @transform_0(%arg0: i32) -> (i32, i32) {
    %c0_i32 = arith.constant 0 : i32
    %c0_i32_0 = arith.constant 0 : i32
    return %arg0, %c0_i32 : i32, i32
  }
  func.func @transform_1(%arg0: i32) -> (i32, i32) {
    %c0_i32 = arith.constant 0 : i32
    %c0_i32_0 = arith.constant 0 : i32
    %c0_i32_1 = arith.constant 0 : i32
    return %c0_i32, %c0_i32_0 : i32, i32
  }
  func.func @transform_2(%arg0: i32) -> (i32, i32) {
    %c0_i32 = arith.constant 0 : i32
    %c0_i32_0 = arith.constant 0 : i32
    %c0_i32_1 = arith.constant 0 : i32
    return %c0_i32, %c0_i32_0 : i32, i32
  }
  func.func @transform_3(%arg0: i32) -> (i32, i32) {
    %c0_i32 = arith.constant 0 : i32
    %c0_i32_0 = arith.constant 0 : i32
    return %arg0, %c0_i32 : i32, i32
  }
}

module attributes {stable_mosaic.version = 11 : i64} {
  func.func @_matmul_kernel(%arg0: i32, %arg1: i32, %arg2: i32, %arg3: memref<16x384xbf16, #tpu.memory_space<vmem>>, %arg4: memref<384x256xbf16, #tpu.memory_space<vmem>>, %arg5: memref<16x256xf32, #tpu.memory_space<vmem>>, %arg6: memref<16x256xf32, #tpu.memory_space<vmem>>) attributes {dimension_semantics = [#tpu.dimension_semantics<parallel>, #tpu.dimension_semantics<parallel>, #tpu.dimension_semantics<arbitrary>], iteration_bounds = array<i64: 1, 1, 3>, scalar_prefetch = 0 : i64, scratch_operands = 1 : i64, tpu.core_type = #tpu.core_type<tc>, window_params = [{transform_indices = @transform_0, window_bounds = array<i64: 16, 384>}, {transform_indices = @transform_1, window_bounds = array<i64: 384, 256>}, {transform_indices = @transform_2, window_bounds = array<i64: 16, 256>}]} {
    %c0_i32 = arith.constant 0 : i32
    %0 = arith.cmpi eq, %arg2, %c0_i32 : i32
    %1 = arith.extui %0 : i1 to i32
    %c0_i32_0 = arith.constant 0 : i32
    %2 = arith.cmpi ne, %1, %c0_i32_0 : i32
    scf.if %2 {
      %cst_9 = arith.constant 0.000000e+00 : f32
      %12 = vector.broadcast %cst_9 : f32 to vector<16x256xf32>
      %c0_10 = arith.constant 0 : index
      %c0_11 = arith.constant 0 : index
      %13 = vector.load %arg6[%c0_10, %c0_11] : memref<16x256xf32, #tpu.memory_space<vmem>>, vector<16x256xf32>
      tpu.vector_store %arg6[%c0_10, %c0_11], %12 {strides = array<i32>} : memref<16x256xf32, #tpu.memory_space<vmem>>, vector<16x256xf32>,
    } else {
    }
    %c0 = arith.constant 0 : index
    %c0_1 = arith.constant 0 : index
    %3 = vector.load %arg6[%c0, %c0_1] : memref<16x256xf32, #tpu.memory_space<vmem>>, vector<16x256xf32>
    %c0_2 = arith.constant 0 : index
    %c0_3 = arith.constant 0 : index
    %4 = vector.load %arg3[%c0_2, %c0_3] : memref<16x384xbf16, #tpu.memory_space<vmem>>, vector<16x384xbf16>
    %c0_4 = arith.constant 0 : index
    %c0_5 = arith.constant 0 : index
    %5 = vector.load %arg4[%c0_4, %c0_5] : memref<384x256xbf16, #tpu.memory_space<vmem>>, vector<384x256xbf16>
    %cst = arith.constant dense<0.000000e+00> : vector<16x256xf32>
    %6 = tpu.matmul %4, %5, %cst {dimension_numbers = #tpu.dot_dimension_numbers<[1], [0], [0], [1], [0, 0, 1, 1], [], []>} : vector<16x384xbf16>, vector<384x256xbf16>, vector<16x256xf32> -> vector<16x256xf32>
    %7 = arith.addf %3, %6 : vector<16x256xf32>
    %c0_6 = arith.constant 0 : index
    %c0_7 = arith.constant 0 : index
    %8 = vector.load %arg6[%c0_6, %c0_7] : memref<16x256xf32, #tpu.memory_space<vmem>>, vector<16x256xf32>
    tpu.vector_store %arg6[%c0_6, %c0_7], %7 {strides = array<i32>} : memref<16x256xf32, #tpu.memory_space<vmem>>, vector<16x256xf32>,
    %c2_i32 = arith.constant 2 : i32
    %9 = arith.cmpi eq, %arg2, %c2_i32 : i32
    %10 = arith.extui %9 : i1 to i32
    %c0_i32_8 = arith.constant 0 : i32
    %11 = arith.cmpi ne, %10, %c0_i32_8 : i32
    scf.if %11 {
      %c0_9 = arith.constant 0 : index
      %c0_10 = arith.constant 0 : index
      %12 = vector.load %arg6[%c0_9, %c0_10] : memref<16x256xf32, #tpu.memory_space<vmem>>, vector<16x256xf32>
      %c0_11 = arith.constant 0 : index
      %c0_12 = arith.constant 0 : index
      %13 = vector.load %arg5[%c0_11, %c0_12] : memref<16x256xf32, #tpu.memory_space<vmem>>, vector<16x256xf32>
      tpu.vector_store %arg5[%c0_11, %c0_12], %12 {strides = array<i32>} : memref<16x256xf32, #tpu.memory_space<vmem>>, vector<16x256xf32>,
    } else {
    }
    return
  }
  func.func @transform_0(%arg0: i32, %arg1: i32, %arg2: i32) -> (i32, i32) {
    %c0_i32 = arith.constant 0 : i32
    return %arg0, %arg2 : i32, i32
  }
  func.func @transform_1(%arg0: i32, %arg1: i32, %arg2: i32) -> (i32, i32) {
    %c0_i32 = arith.constant 0 : i32
    return %arg2, %arg1 : i32, i32
  }
  func.func @transform_2(%arg0: i32, %arg1: i32, %arg2: i32) -> (i32, i32) {
    %c0_i32 = arith.constant 0 : i32
    return %arg0, %arg1 : i32, i32
  }
}

module attributes {stable_mosaic.version = 11 : i64} {
  func.func @_bn_act_kernel(%arg0: i32, %arg1: memref<8x256xf32, #tpu.memory_space<vmem>>, %arg2: memref<1x256xf32, #tpu.memory_space<vmem>>, %arg3: memref<1x256xf32, #tpu.memory_space<vmem>>, %arg4: memref<8x256xf32, #tpu.memory_space<vmem>>) attributes {dimension_semantics = [#tpu.dimension_semantics<parallel>], iteration_bounds = array<i64: 1>, scalar_prefetch = 0 : i64, scratch_operands = 0 : i64, tpu.core_type = #tpu.core_type<tc>, window_params = [{transform_indices = @transform_0, window_bounds = array<i64: 8, 256>}, {pipeline_mode = #tpu.pipeline_mode<synchronous>, transform_indices = @transform_1, window_bounds = array<i64: 1, 256>}, {pipeline_mode = #tpu.pipeline_mode<synchronous>, transform_indices = @transform_2, window_bounds = array<i64: 1, 256>}, {transform_indices = @transform_3, window_bounds = array<i64: 8, 256>}]} {
    %c0 = arith.constant 0 : index
    %c0_0 = arith.constant 0 : index
    %0 = vector.load %arg1[%c0, %c0_0] : memref<8x256xf32, #tpu.memory_space<vmem>>, vector<8x256xf32>
    %c0_1 = arith.constant 0 : index
    %c0_2 = arith.constant 0 : index
    %1 = vector.load %arg2[%c0_1, %c0_2] : memref<1x256xf32, #tpu.memory_space<vmem>>, vector<1x256xf32>
    %2 = vector.broadcast %1 : vector<1x256xf32> to vector<8x256xf32>
    %3 = arith.mulf %0, %2 : vector<8x256xf32>
    %c0_3 = arith.constant 0 : index
    %c0_4 = arith.constant 0 : index
    %4 = vector.load %arg3[%c0_3, %c0_4] : memref<1x256xf32, #tpu.memory_space<vmem>>, vector<1x256xf32>
    %5 = vector.broadcast %4 : vector<1x256xf32> to vector<8x256xf32>
    %6 = arith.addf %3, %5 : vector<8x256xf32>
    %cst = arith.constant 0.000000e+00 : f32
    %7 = vector.broadcast %cst : f32 to vector<8x256xf32>
    %8 = arith.maximumf %6, %7 : vector<8x256xf32>
    %c0_5 = arith.constant 0 : index
    %c0_6 = arith.constant 0 : index
    %9 = vector.load %arg4[%c0_5, %c0_6] : memref<8x256xf32, #tpu.memory_space<vmem>>, vector<8x256xf32>
    tpu.vector_store %arg4[%c0_5, %c0_6], %8 {strides = array<i32>} : memref<8x256xf32, #tpu.memory_space<vmem>>, vector<8x256xf32>,
    return
  }
  func.func @transform_0(%arg0: i32) -> (i32, i32) {
    %c0_i32 = arith.constant 0 : i32
    %c0_i32_0 = arith.constant 0 : i32
    return %arg0, %c0_i32 : i32, i32
  }
  func.func @transform_1(%arg0: i32) -> (i32, i32) {
    %c0_i32 = arith.constant 0 : i32
    %c0_i32_0 = arith.constant 0 : i32
    %c0_i32_1 = arith.constant 0 : i32
    return %c0_i32, %c0_i32_0 : i32, i32
  }
  func.func @transform_2(%arg0: i32) -> (i32, i32) {
    %c0_i32 = arith.constant 0 : i32
    %c0_i32_0 = arith.constant 0 : i32
    %c0_i32_1 = arith.constant 0 : i32
    return %c0_i32, %c0_i32_0 : i32, i32
  }
  func.func @transform_3(%arg0: i32) -> (i32, i32) {
    %c0_i32 = arith.constant 0 : i32
    %c0_i32_0 = arith.constant 0 : i32
    return %arg0, %c0_i32 : i32, i32
  }
}

module attributes {stable_mosaic.version = 11 : i64} {
  func.func @_matmul_kernel(%arg0: i32, %arg1: i32, %arg2: i32, %arg3: memref<16x384xbf16, #tpu.memory_space<vmem>>, %arg4: memref<384x256xbf16, #tpu.memory_space<vmem>>, %arg5: memref<16x256xf32, #tpu.memory_space<vmem>>, %arg6: memref<16x256xf32, #tpu.memory_space<vmem>>) attributes {dimension_semantics = [#tpu.dimension_semantics<parallel>, #tpu.dimension_semantics<parallel>, #tpu.dimension_semantics<arbitrary>], iteration_bounds = array<i64: 1, 1, 6>, scalar_prefetch = 0 : i64, scratch_operands = 1 : i64, tpu.core_type = #tpu.core_type<tc>, window_params = [{transform_indices = @transform_0, window_bounds = array<i64: 16, 384>}, {transform_indices = @transform_1, window_bounds = array<i64: 384, 256>}, {transform_indices = @transform_2, window_bounds = array<i64: 16, 256>}]} {
    %c0_i32 = arith.constant 0 : i32
    %0 = arith.cmpi eq, %arg2, %c0_i32 : i32
    %1 = arith.extui %0 : i1 to i32
    %c0_i32_0 = arith.constant 0 : i32
    %2 = arith.cmpi ne, %1, %c0_i32_0 : i32
    scf.if %2 {
      %cst_9 = arith.constant 0.000000e+00 : f32
      %12 = vector.broadcast %cst_9 : f32 to vector<16x256xf32>
      %c0_10 = arith.constant 0 : index
      %c0_11 = arith.constant 0 : index
      %13 = vector.load %arg6[%c0_10, %c0_11] : memref<16x256xf32, #tpu.memory_space<vmem>>, vector<16x256xf32>
      tpu.vector_store %arg6[%c0_10, %c0_11], %12 {strides = array<i32>} : memref<16x256xf32, #tpu.memory_space<vmem>>, vector<16x256xf32>,
    } else {
    }
    %c0 = arith.constant 0 : index
    %c0_1 = arith.constant 0 : index
    %3 = vector.load %arg6[%c0, %c0_1] : memref<16x256xf32, #tpu.memory_space<vmem>>, vector<16x256xf32>
    %c0_2 = arith.constant 0 : index
    %c0_3 = arith.constant 0 : index
    %4 = vector.load %arg3[%c0_2, %c0_3] : memref<16x384xbf16, #tpu.memory_space<vmem>>, vector<16x384xbf16>
    %c0_4 = arith.constant 0 : index
    %c0_5 = arith.constant 0 : index
    %5 = vector.load %arg4[%c0_4, %c0_5] : memref<384x256xbf16, #tpu.memory_space<vmem>>, vector<384x256xbf16>
    %cst = arith.constant dense<0.000000e+00> : vector<16x256xf32>
    %6 = tpu.matmul %4, %5, %cst {dimension_numbers = #tpu.dot_dimension_numbers<[1], [0], [0], [1], [0, 0, 1, 1], [], []>} : vector<16x384xbf16>, vector<384x256xbf16>, vector<16x256xf32> -> vector<16x256xf32>
    %7 = arith.addf %3, %6 : vector<16x256xf32>
    %c0_6 = arith.constant 0 : index
    %c0_7 = arith.constant 0 : index
    %8 = vector.load %arg6[%c0_6, %c0_7] : memref<16x256xf32, #tpu.memory_space<vmem>>, vector<16x256xf32>
    tpu.vector_store %arg6[%c0_6, %c0_7], %7 {strides = array<i32>} : memref<16x256xf32, #tpu.memory_space<vmem>>, vector<16x256xf32>,
    %c5_i32 = arith.constant 5 : i32
    %9 = arith.cmpi eq, %arg2, %c5_i32 : i32
    %10 = arith.extui %9 : i1 to i32
    %c0_i32_8 = arith.constant 0 : i32
    %11 = arith.cmpi ne, %10, %c0_i32_8 : i32
    scf.if %11 {
      %c0_9 = arith.constant 0 : index
      %c0_10 = arith.constant 0 : index
      %12 = vector.load %arg6[%c0_9, %c0_10] : memref<16x256xf32, #tpu.memory_space<vmem>>, vector<16x256xf32>
      %c0_11 = arith.constant 0 : index
      %c0_12 = arith.constant 0 : index
      %13 = vector.load %arg5[%c0_11, %c0_12] : memref<16x256xf32, #tpu.memory_space<vmem>>, vector<16x256xf32>
      tpu.vector_store %arg5[%c0_11, %c0_12], %12 {strides = array<i32>} : memref<16x256xf32, #tpu.memory_space<vmem>>, vector<16x256xf32>,
    } else {
    }
    return
  }
  func.func @transform_0(%arg0: i32, %arg1: i32, %arg2: i32) -> (i32, i32) {
    %c0_i32 = arith.constant 0 : i32
    return %arg0, %arg2 : i32, i32
  }
  func.func @transform_1(%arg0: i32, %arg1: i32, %arg2: i32) -> (i32, i32) {
    %c0_i32 = arith.constant 0 : i32
    return %arg2, %arg1 : i32, i32
  }
  func.func @transform_2(%arg0: i32, %arg1: i32, %arg2: i32) -> (i32, i32) {
    %c0_i32 = arith.constant 0 : i32
    return %arg0, %arg1 : i32, i32
  }
}

module attributes {stable_mosaic.version = 11 : i64} {
  func.func @_bn_add_act_kernel(%arg0: i32, %arg1: memref<8x256xf32, #tpu.memory_space<vmem>>, %arg2: memref<1x256xf32, #tpu.memory_space<vmem>>, %arg3: memref<1x256xf32, #tpu.memory_space<vmem>>, %arg4: memref<8x256xf32, #tpu.memory_space<vmem>>, %arg5: memref<8x256xf32, #tpu.memory_space<vmem>>) attributes {dimension_semantics = [#tpu.dimension_semantics<parallel>], iteration_bounds = array<i64: 1>, scalar_prefetch = 0 : i64, scratch_operands = 0 : i64, tpu.core_type = #tpu.core_type<tc>, window_params = [{transform_indices = @transform_0, window_bounds = array<i64: 8, 256>}, {pipeline_mode = #tpu.pipeline_mode<synchronous>, transform_indices = @transform_1, window_bounds = array<i64: 1, 256>}, {pipeline_mode = #tpu.pipeline_mode<synchronous>, transform_indices = @transform_2, window_bounds = array<i64: 1, 256>}, {transform_indices = @transform_3, window_bounds = array<i64: 8, 256>}, {transform_indices = @transform_4, window_bounds = array<i64: 8, 256>}]} {
    %c0 = arith.constant 0 : index
    %c0_0 = arith.constant 0 : index
    %0 = vector.load %arg1[%c0, %c0_0] : memref<8x256xf32, #tpu.memory_space<vmem>>, vector<8x256xf32>
    %c0_1 = arith.constant 0 : index
    %c0_2 = arith.constant 0 : index
    %1 = vector.load %arg2[%c0_1, %c0_2] : memref<1x256xf32, #tpu.memory_space<vmem>>, vector<1x256xf32>
    %2 = vector.broadcast %1 : vector<1x256xf32> to vector<8x256xf32>
    %3 = arith.mulf %0, %2 : vector<8x256xf32>
    %c0_3 = arith.constant 0 : index
    %c0_4 = arith.constant 0 : index
    %4 = vector.load %arg3[%c0_3, %c0_4] : memref<1x256xf32, #tpu.memory_space<vmem>>, vector<1x256xf32>
    %5 = vector.broadcast %4 : vector<1x256xf32> to vector<8x256xf32>
    %6 = arith.addf %3, %5 : vector<8x256xf32>
    %c0_5 = arith.constant 0 : index
    %c0_6 = arith.constant 0 : index
    %7 = vector.load %arg4[%c0_5, %c0_6] : memref<8x256xf32, #tpu.memory_space<vmem>>, vector<8x256xf32>
    %8 = arith.addf %6, %7 : vector<8x256xf32>
    %cst = arith.constant 0.000000e+00 : f32
    %9 = vector.broadcast %cst : f32 to vector<8x256xf32>
    %10 = arith.maximumf %8, %9 : vector<8x256xf32>
    %c0_7 = arith.constant 0 : index
    %c0_8 = arith.constant 0 : index
    %11 = vector.load %arg5[%c0_7, %c0_8] : memref<8x256xf32, #tpu.memory_space<vmem>>, vector<8x256xf32>
    tpu.vector_store %arg5[%c0_7, %c0_8], %10 {strides = array<i32>} : memref<8x256xf32, #tpu.memory_space<vmem>>, vector<8x256xf32>,
    return
  }
  func.func @transform_0(%arg0: i32) -> (i32, i32) {
    %c0_i32 = arith.constant 0 : i32
    %c0_i32_0 = arith.constant 0 : i32
    return %arg0, %c0_i32 : i32, i32
  }
  func.func @transform_1(%arg0: i32) -> (i32, i32) {
    %c0_i32 = arith.constant 0 : i32
    %c0_i32_0 = arith.constant 0 : i32
    %c0_i32_1 = arith.constant 0 : i32
    return %c0_i32, %c0_i32_0 : i32, i32
  }
  func.func @transform_2(%arg0: i32) -> (i32, i32) {
    %c0_i32 = arith.constant 0 : i32
    %c0_i32_0 = arith.constant 0 : i32
    %c0_i32_1 = arith.constant 0 : i32
    return %c0_i32, %c0_i32_0 : i32, i32
  }
  func.func @transform_3(%arg0: i32) -> (i32, i32) {
    %c0_i32 = arith.constant 0 : i32
    %c0_i32_0 = arith.constant 0 : i32
    return %arg0, %c0_i32 : i32, i32
  }
  func.func @transform_4(%arg0: i32) -> (i32, i32) {
    %c0_i32 = arith.constant 0 : i32
    %c0_i32_0 = arith.constant 0 : i32
    return %arg0, %c0_i32 : i32, i32
  }
}

module attributes {stable_mosaic.version = 11 : i64} {
  func.func @_matmul_kernel(%arg0: i32, %arg1: i32, %arg2: i32, %arg3: memref<16x384xbf16, #tpu.memory_space<vmem>>, %arg4: memref<384x256xbf16, #tpu.memory_space<vmem>>, %arg5: memref<16x256xf32, #tpu.memory_space<vmem>>, %arg6: memref<16x256xf32, #tpu.memory_space<vmem>>) attributes {dimension_semantics = [#tpu.dimension_semantics<parallel>, #tpu.dimension_semantics<parallel>, #tpu.dimension_semantics<arbitrary>], iteration_bounds = array<i64: 1, 2, 6>, scalar_prefetch = 0 : i64, scratch_operands = 1 : i64, tpu.core_type = #tpu.core_type<tc>, window_params = [{transform_indices = @transform_0, window_bounds = array<i64: 16, 384>}, {transform_indices = @transform_1, window_bounds = array<i64: 384, 256>}, {transform_indices = @transform_2, window_bounds = array<i64: 16, 256>}]} {
    %c0_i32 = arith.constant 0 : i32
    %0 = arith.cmpi eq, %arg2, %c0_i32 : i32
    %1 = arith.extui %0 : i1 to i32
    %c0_i32_0 = arith.constant 0 : i32
    %2 = arith.cmpi ne, %1, %c0_i32_0 : i32
    scf.if %2 {
      %cst_9 = arith.constant 0.000000e+00 : f32
      %12 = vector.broadcast %cst_9 : f32 to vector<16x256xf32>
      %c0_10 = arith.constant 0 : index
      %c0_11 = arith.constant 0 : index
      %13 = vector.load %arg6[%c0_10, %c0_11] : memref<16x256xf32, #tpu.memory_space<vmem>>, vector<16x256xf32>
      tpu.vector_store %arg6[%c0_10, %c0_11], %12 {strides = array<i32>} : memref<16x256xf32, #tpu.memory_space<vmem>>, vector<16x256xf32>,
    } else {
    }
    %c0 = arith.constant 0 : index
    %c0_1 = arith.constant 0 : index
    %3 = vector.load %arg6[%c0, %c0_1] : memref<16x256xf32, #tpu.memory_space<vmem>>, vector<16x256xf32>
    %c0_2 = arith.constant 0 : index
    %c0_3 = arith.constant 0 : index
    %4 = vector.load %arg3[%c0_2, %c0_3] : memref<16x384xbf16, #tpu.memory_space<vmem>>, vector<16x384xbf16>
    %c0_4 = arith.constant 0 : index
    %c0_5 = arith.constant 0 : index
    %5 = vector.load %arg4[%c0_4, %c0_5] : memref<384x256xbf16, #tpu.memory_space<vmem>>, vector<384x256xbf16>
    %cst = arith.constant dense<0.000000e+00> : vector<16x256xf32>
    %6 = tpu.matmul %4, %5, %cst {dimension_numbers = #tpu.dot_dimension_numbers<[1], [0], [0], [1], [0, 0, 1, 1], [], []>} : vector<16x384xbf16>, vector<384x256xbf16>, vector<16x256xf32> -> vector<16x256xf32>
    %7 = arith.addf %3, %6 : vector<16x256xf32>
    %c0_6 = arith.constant 0 : index
    %c0_7 = arith.constant 0 : index
    %8 = vector.load %arg6[%c0_6, %c0_7] : memref<16x256xf32, #tpu.memory_space<vmem>>, vector<16x256xf32>
    tpu.vector_store %arg6[%c0_6, %c0_7], %7 {strides = array<i32>} : memref<16x256xf32, #tpu.memory_space<vmem>>, vector<16x256xf32>,
    %c5_i32 = arith.constant 5 : i32
    %9 = arith.cmpi eq, %arg2, %c5_i32 : i32
    %10 = arith.extui %9 : i1 to i32
    %c0_i32_8 = arith.constant 0 : i32
    %11 = arith.cmpi ne, %10, %c0_i32_8 : i32
    scf.if %11 {
      %c0_9 = arith.constant 0 : index
      %c0_10 = arith.constant 0 : index
      %12 = vector.load %arg6[%c0_9, %c0_10] : memref<16x256xf32, #tpu.memory_space<vmem>>, vector<16x256xf32>
      %c0_11 = arith.constant 0 : index
      %c0_12 = arith.constant 0 : index
      %13 = vector.load %arg5[%c0_11, %c0_12] : memref<16x256xf32, #tpu.memory_space<vmem>>, vector<16x256xf32>
      tpu.vector_store %arg5[%c0_11, %c0_12], %12 {strides = array<i32>} : memref<16x256xf32, #tpu.memory_space<vmem>>, vector<16x256xf32>,
    } else {
    }
    return
  }
  func.func @transform_0(%arg0: i32, %arg1: i32, %arg2: i32) -> (i32, i32) {
    %c0_i32 = arith.constant 0 : i32
    return %arg0, %arg2 : i32, i32
  }
  func.func @transform_1(%arg0: i32, %arg1: i32, %arg2: i32) -> (i32, i32) {
    %c0_i32 = arith.constant 0 : i32
    return %arg2, %arg1 : i32, i32
  }
  func.func @transform_2(%arg0: i32, %arg1: i32, %arg2: i32) -> (i32, i32) {
    %c0_i32 = arith.constant 0 : i32
    return %arg0, %arg1 : i32, i32
  }
}

module attributes {stable_mosaic.version = 11 : i64} {
  func.func @_matmul_kernel(%arg0: i32, %arg1: i32, %arg2: i32, %arg3: memref<16x256xbf16, #tpu.memory_space<vmem>>, %arg4: memref<256x256xbf16, #tpu.memory_space<vmem>>, %arg5: memref<16x256xf32, #tpu.memory_space<vmem>>, %arg6: memref<16x256xf32, #tpu.memory_space<vmem>>) attributes {dimension_semantics = [#tpu.dimension_semantics<parallel>, #tpu.dimension_semantics<parallel>, #tpu.dimension_semantics<arbitrary>], iteration_bounds = array<i64: 1, 2, 1>, scalar_prefetch = 0 : i64, scratch_operands = 1 : i64, tpu.core_type = #tpu.core_type<tc>, window_params = [{transform_indices = @transform_0, window_bounds = array<i64: 16, 256>}, {transform_indices = @transform_1, window_bounds = array<i64: 256, 256>}, {transform_indices = @transform_2, window_bounds = array<i64: 16, 256>}]} {
    %c0_i32 = arith.constant 0 : i32
    %0 = arith.cmpi eq, %arg2, %c0_i32 : i32
    %1 = arith.extui %0 : i1 to i32
    %c0_i32_0 = arith.constant 0 : i32
    %2 = arith.cmpi ne, %1, %c0_i32_0 : i32
    scf.if %2 {
      %cst_10 = arith.constant 0.000000e+00 : f32
      %12 = vector.broadcast %cst_10 : f32 to vector<16x256xf32>
      %c0_11 = arith.constant 0 : index
      %c0_12 = arith.constant 0 : index
      %13 = vector.load %arg6[%c0_11, %c0_12] : memref<16x256xf32, #tpu.memory_space<vmem>>, vector<16x256xf32>
      tpu.vector_store %arg6[%c0_11, %c0_12], %12 {strides = array<i32>} : memref<16x256xf32, #tpu.memory_space<vmem>>, vector<16x256xf32>,
    } else {
    }
    %c0 = arith.constant 0 : index
    %c0_1 = arith.constant 0 : index
    %3 = vector.load %arg6[%c0, %c0_1] : memref<16x256xf32, #tpu.memory_space<vmem>>, vector<16x256xf32>
    %c0_2 = arith.constant 0 : index
    %c0_3 = arith.constant 0 : index
    %4 = vector.load %arg3[%c0_2, %c0_3] : memref<16x256xbf16, #tpu.memory_space<vmem>>, vector<16x256xbf16>
    %c0_4 = arith.constant 0 : index
    %c0_5 = arith.constant 0 : index
    %5 = vector.load %arg4[%c0_4, %c0_5] : memref<256x256xbf16, #tpu.memory_space<vmem>>, vector<256x256xbf16>
    %cst = arith.constant dense<0.000000e+00> : vector<16x256xf32>
    %6 = tpu.matmul %4, %5, %cst {dimension_numbers = #tpu.dot_dimension_numbers<[1], [0], [0], [1], [0, 0, 1, 1], [], []>} : vector<16x256xbf16>, vector<256x256xbf16>, vector<16x256xf32> -> vector<16x256xf32>
    %7 = arith.addf %3, %6 : vector<16x256xf32>
    %c0_6 = arith.constant 0 : index
    %c0_7 = arith.constant 0 : index
    %8 = vector.load %arg6[%c0_6, %c0_7] : memref<16x256xf32, #tpu.memory_space<vmem>>, vector<16x256xf32>
    tpu.vector_store %arg6[%c0_6, %c0_7], %7 {strides = array<i32>} : memref<16x256xf32, #tpu.memory_space<vmem>>, vector<16x256xf32>,
    %c0_i32_8 = arith.constant 0 : i32
    %9 = arith.cmpi eq, %arg2, %c0_i32_8 : i32
    %10 = arith.extui %9 : i1 to i32
    %c0_i32_9 = arith.constant 0 : i32
    %11 = arith.cmpi ne, %10, %c0_i32_9 : i32
    scf.if %11 {
      %c0_10 = arith.constant 0 : index
      %c0_11 = arith.constant 0 : index
      %12 = vector.load %arg6[%c0_10, %c0_11] : memref<16x256xf32, #tpu.memory_space<vmem>>, vector<16x256xf32>
      %c0_12 = arith.constant 0 : index
      %c0_13 = arith.constant 0 : index
      %13 = vector.load %arg5[%c0_12, %c0_13] : memref<16x256xf32, #tpu.memory_space<vmem>>, vector<16x256xf32>
      tpu.vector_store %arg5[%c0_12, %c0_13], %12 {strides = array<i32>} : memref<16x256xf32, #tpu.memory_space<vmem>>, vector<16x256xf32>,
    } else {
    }
    return
  }
  func.func @transform_0(%arg0: i32, %arg1: i32, %arg2: i32) -> (i32, i32) {
    %c0_i32 = arith.constant 0 : i32
    return %arg0, %arg2 : i32, i32
  }
  func.func @transform_1(%arg0: i32, %arg1: i32, %arg2: i32) -> (i32, i32) {
    %c0_i32 = arith.constant 0 : i32
    return %arg2, %arg1 : i32, i32
  }
  func.func @transform_2(%arg0: i32, %arg1: i32, %arg2: i32) -> (i32, i32) {
    %c0_i32 = arith.constant 0 : i32
    return %arg0, %arg1 : i32, i32
  }
}

module attributes {stable_mosaic.version = 11 : i64} {
  func.func @_colstats_kernel(%arg0: i32, %arg1: memref<8x512xf32, #tpu.memory_space<vmem>>, %arg2: memref<1x512xf32, #tpu.memory_space<vmem>>, %arg3: memref<1x512xf32, #tpu.memory_space<vmem>>) attributes {dimension_semantics = [#tpu.dimension_semantics<arbitrary>], iteration_bounds = array<i64: 1>, scalar_prefetch = 0 : i64, scratch_operands = 0 : i64, tpu.core_type = #tpu.core_type<tc>, window_params = [{transform_indices = @transform_0, window_bounds = array<i64: 8, 512>}, {pipeline_mode = #tpu.pipeline_mode<synchronous>, transform_indices = @transform_1, window_bounds = array<i64: 1, 512>}, {pipeline_mode = #tpu.pipeline_mode<synchronous>, transform_indices = @transform_2, window_bounds = array<i64: 1, 512>}]} {
    %c0_i32 = arith.constant 0 : i32
    %0 = arith.cmpi eq, %arg0, %c0_i32 : i32
    %1 = arith.extui %0 : i1 to i32
    %c0_i32_0 = arith.constant 0 : i32
    %2 = arith.cmpi ne, %1, %c0_i32_0 : i32
    scf.if %2 {
      %cst_11 = arith.constant 0.000000e+00 : f32
      %15 = vector.broadcast %cst_11 : f32 to vector<1x512xf32>
      %c0_12 = arith.constant 0 : index
      %c0_13 = arith.constant 0 : index
      %16 = vector.load %arg2[%c0_12, %c0_13] : memref<1x512xf32, #tpu.memory_space<vmem>>, vector<1x512xf32>
      tpu.vector_store %arg2[%c0_12, %c0_13], %15 {strides = array<i32>} : memref<1x512xf32, #tpu.memory_space<vmem>>, vector<1x512xf32>,
      %cst_14 = arith.constant 0.000000e+00 : f32
      %17 = vector.broadcast %cst_14 : f32 to vector<1x512xf32>
      %c0_15 = arith.constant 0 : index
      %c0_16 = arith.constant 0 : index
      %18 = vector.load %arg3[%c0_15, %c0_16] : memref<1x512xf32, #tpu.memory_space<vmem>>, vector<1x512xf32>
      tpu.vector_store %arg3[%c0_15, %c0_16], %17 {strides = array<i32>} : memref<1x512xf32, #tpu.memory_space<vmem>>, vector<1x512xf32>,
    } else {
    }
    %c0 = arith.constant 0 : index
    %c0_1 = arith.constant 0 : index
    %3 = vector.load %arg1[%c0, %c0_1] : memref<8x512xf32, #tpu.memory_space<vmem>>, vector<8x512xf32>
    %c0_2 = arith.constant 0 : index
    %c0_3 = arith.constant 0 : index
    %4 = vector.load %arg2[%c0_2, %c0_3] : memref<1x512xf32, #tpu.memory_space<vmem>>, vector<1x512xf32>
    %cst = arith.constant dense<0.000000e+00> : vector<512xf32>
    %5 = vector.multi_reduction <add>, %3, %cst [0] : vector<8x512xf32> to vector<512xf32>
    %6 = vector.shape_cast %5 : vector<512xf32> to vector<1x512xf32>
    %7 = arith.addf %4, %6 : vector<1x512xf32>
    %c0_4 = arith.constant 0 : index
    %c0_5 = arith.constant 0 : index
    %8 = vector.load %arg2[%c0_4, %c0_5] : memref<1x512xf32, #tpu.memory_space<vmem>>, vector<1x512xf32>
    tpu.vector_store %arg2[%c0_4, %c0_5], %7 {strides = array<i32>} : memref<1x512xf32, #tpu.memory_space<vmem>>, vector<1x512xf32>,
    %c0_6 = arith.constant 0 : index
    %c0_7 = arith.constant 0 : index
    %9 = vector.load %arg3[%c0_6, %c0_7] : memref<1x512xf32, #tpu.memory_space<vmem>>, vector<1x512xf32>
    %10 = arith.mulf %3, %3 : vector<8x512xf32>
    %cst_8 = arith.constant dense<0.000000e+00> : vector<512xf32>
    %11 = vector.multi_reduction <add>, %10, %cst_8 [0] : vector<8x512xf32> to vector<512xf32>
    %12 = vector.shape_cast %11 : vector<512xf32> to vector<1x512xf32>
    %13 = arith.addf %9, %12 : vector<1x512xf32>
    %c0_9 = arith.constant 0 : index
    %c0_10 = arith.constant 0 : index
    %14 = vector.load %arg3[%c0_9, %c0_10] : memref<1x512xf32, #tpu.memory_space<vmem>>, vector<1x512xf32>
    tpu.vector_store %arg3[%c0_9, %c0_10], %13 {strides = array<i32>} : memref<1x512xf32, #tpu.memory_space<vmem>>, vector<1x512xf32>,
    return
  }
  func.func @transform_0(%arg0: i32) -> (i32, i32) {
    %c0_i32 = arith.constant 0 : i32
    %c0_i32_0 = arith.constant 0 : i32
    return %arg0, %c0_i32 : i32, i32
  }
  func.func @transform_1(%arg0: i32) -> (i32, i32) {
    %c0_i32 = arith.constant 0 : i32
    %c0_i32_0 = arith.constant 0 : i32
    %c0_i32_1 = arith.constant 0 : i32
    return %c0_i32, %c0_i32_0 : i32, i32
  }
  func.func @transform_2(%arg0: i32) -> (i32, i32) {
    %c0_i32 = arith.constant 0 : i32
    %c0_i32_0 = arith.constant 0 : i32
    %c0_i32_1 = arith.constant 0 : i32
    return %c0_i32, %c0_i32_0 : i32, i32
  }
}

module attributes {stable_mosaic.version = 11 : i64} {
  func.func @_bn_act_kernel(%arg0: i32, %arg1: memref<8x512xf32, #tpu.memory_space<vmem>>, %arg2: memref<1x512xf32, #tpu.memory_space<vmem>>, %arg3: memref<1x512xf32, #tpu.memory_space<vmem>>, %arg4: memref<8x512xf32, #tpu.memory_space<vmem>>) attributes {dimension_semantics = [#tpu.dimension_semantics<parallel>], iteration_bounds = array<i64: 1>, scalar_prefetch = 0 : i64, scratch_operands = 0 : i64, tpu.core_type = #tpu.core_type<tc>, window_params = [{transform_indices = @transform_0, window_bounds = array<i64: 8, 512>}, {pipeline_mode = #tpu.pipeline_mode<synchronous>, transform_indices = @transform_1, window_bounds = array<i64: 1, 512>}, {pipeline_mode = #tpu.pipeline_mode<synchronous>, transform_indices = @transform_2, window_bounds = array<i64: 1, 512>}, {transform_indices = @transform_3, window_bounds = array<i64: 8, 512>}]} {
    %c0 = arith.constant 0 : index
    %c0_0 = arith.constant 0 : index
    %0 = vector.load %arg1[%c0, %c0_0] : memref<8x512xf32, #tpu.memory_space<vmem>>, vector<8x512xf32>
    %c0_1 = arith.constant 0 : index
    %c0_2 = arith.constant 0 : index
    %1 = vector.load %arg2[%c0_1, %c0_2] : memref<1x512xf32, #tpu.memory_space<vmem>>, vector<1x512xf32>
    %2 = vector.broadcast %1 : vector<1x512xf32> to vector<8x512xf32>
    %3 = arith.mulf %0, %2 : vector<8x512xf32>
    %c0_3 = arith.constant 0 : index
    %c0_4 = arith.constant 0 : index
    %4 = vector.load %arg3[%c0_3, %c0_4] : memref<1x512xf32, #tpu.memory_space<vmem>>, vector<1x512xf32>
    %5 = vector.broadcast %4 : vector<1x512xf32> to vector<8x512xf32>
    %6 = arith.addf %3, %5 : vector<8x512xf32>
    %cst = arith.constant 0.000000e+00 : f32
    %7 = vector.broadcast %cst : f32 to vector<8x512xf32>
    %8 = arith.maximumf %6, %7 : vector<8x512xf32>
    %c0_5 = arith.constant 0 : index
    %c0_6 = arith.constant 0 : index
    %9 = vector.load %arg4[%c0_5, %c0_6] : memref<8x512xf32, #tpu.memory_space<vmem>>, vector<8x512xf32>
    tpu.vector_store %arg4[%c0_5, %c0_6], %8 {strides = array<i32>} : memref<8x512xf32, #tpu.memory_space<vmem>>, vector<8x512xf32>,
    return
  }
  func.func @transform_0(%arg0: i32) -> (i32, i32) {
    %c0_i32 = arith.constant 0 : i32
    %c0_i32_0 = arith.constant 0 : i32
    return %arg0, %c0_i32 : i32, i32
  }
  func.func @transform_1(%arg0: i32) -> (i32, i32) {
    %c0_i32 = arith.constant 0 : i32
    %c0_i32_0 = arith.constant 0 : i32
    %c0_i32_1 = arith.constant 0 : i32
    return %c0_i32, %c0_i32_0 : i32, i32
  }
  func.func @transform_2(%arg0: i32) -> (i32, i32) {
    %c0_i32 = arith.constant 0 : i32
    %c0_i32_0 = arith.constant 0 : i32
    %c0_i32_1 = arith.constant 0 : i32
    return %c0_i32, %c0_i32_0 : i32, i32
  }
  func.func @transform_3(%arg0: i32) -> (i32, i32) {
    %c0_i32 = arith.constant 0 : i32
    %c0_i32_0 = arith.constant 0 : i32
    return %arg0, %c0_i32 : i32, i32
  }
}

module attributes {stable_mosaic.version = 11 : i64} {
  func.func @_bn_act_kernel(%arg0: i32, %arg1: memref<8x512xf32, #tpu.memory_space<vmem>>, %arg2: memref<1x512xf32, #tpu.memory_space<vmem>>, %arg3: memref<1x512xf32, #tpu.memory_space<vmem>>, %arg4: memref<8x512xf32, #tpu.memory_space<vmem>>) attributes {dimension_semantics = [#tpu.dimension_semantics<parallel>], iteration_bounds = array<i64: 1>, scalar_prefetch = 0 : i64, scratch_operands = 0 : i64, tpu.core_type = #tpu.core_type<tc>, window_params = [{transform_indices = @transform_0, window_bounds = array<i64: 8, 512>}, {pipeline_mode = #tpu.pipeline_mode<synchronous>, transform_indices = @transform_1, window_bounds = array<i64: 1, 512>}, {pipeline_mode = #tpu.pipeline_mode<synchronous>, transform_indices = @transform_2, window_bounds = array<i64: 1, 512>}, {transform_indices = @transform_3, window_bounds = array<i64: 8, 512>}]} {
    %c0 = arith.constant 0 : index
    %c0_0 = arith.constant 0 : index
    %0 = vector.load %arg1[%c0, %c0_0] : memref<8x512xf32, #tpu.memory_space<vmem>>, vector<8x512xf32>
    %c0_1 = arith.constant 0 : index
    %c0_2 = arith.constant 0 : index
    %1 = vector.load %arg2[%c0_1, %c0_2] : memref<1x512xf32, #tpu.memory_space<vmem>>, vector<1x512xf32>
    %2 = vector.broadcast %1 : vector<1x512xf32> to vector<8x512xf32>
    %3 = arith.mulf %0, %2 : vector<8x512xf32>
    %c0_3 = arith.constant 0 : index
    %c0_4 = arith.constant 0 : index
    %4 = vector.load %arg3[%c0_3, %c0_4] : memref<1x512xf32, #tpu.memory_space<vmem>>, vector<1x512xf32>
    %5 = vector.broadcast %4 : vector<1x512xf32> to vector<8x512xf32>
    %6 = arith.addf %3, %5 : vector<8x512xf32>
    %c0_5 = arith.constant 0 : index
    %c0_6 = arith.constant 0 : index
    %7 = vector.load %arg4[%c0_5, %c0_6] : memref<8x512xf32, #tpu.memory_space<vmem>>, vector<8x512xf32>
    tpu.vector_store %arg4[%c0_5, %c0_6], %6 {strides = array<i32>} : memref<8x512xf32, #tpu.memory_space<vmem>>, vector<8x512xf32>,
    return
  }
  func.func @transform_0(%arg0: i32) -> (i32, i32) {
    %c0_i32 = arith.constant 0 : i32
    %c0_i32_0 = arith.constant 0 : i32
    return %arg0, %c0_i32 : i32, i32
  }
  func.func @transform_1(%arg0: i32) -> (i32, i32) {
    %c0_i32 = arith.constant 0 : i32
    %c0_i32_0 = arith.constant 0 : i32
    %c0_i32_1 = arith.constant 0 : i32
    return %c0_i32, %c0_i32_0 : i32, i32
  }
  func.func @transform_2(%arg0: i32) -> (i32, i32) {
    %c0_i32 = arith.constant 0 : i32
    %c0_i32_0 = arith.constant 0 : i32
    %c0_i32_1 = arith.constant 0 : i32
    return %c0_i32, %c0_i32_0 : i32, i32
  }
  func.func @transform_3(%arg0: i32) -> (i32, i32) {
    %c0_i32 = arith.constant 0 : i32
    %c0_i32_0 = arith.constant 0 : i32
    return %arg0, %c0_i32 : i32, i32
  }
}

module attributes {stable_mosaic.version = 11 : i64} {
  func.func @_matmul_kernel(%arg0: i32, %arg1: i32, %arg2: i32, %arg3: memref<16x512xbf16, #tpu.memory_space<vmem>>, %arg4: memref<512x256xbf16, #tpu.memory_space<vmem>>, %arg5: memref<16x256xf32, #tpu.memory_space<vmem>>, %arg6: memref<16x256xf32, #tpu.memory_space<vmem>>) attributes {dimension_semantics = [#tpu.dimension_semantics<parallel>, #tpu.dimension_semantics<parallel>, #tpu.dimension_semantics<arbitrary>], iteration_bounds = array<i64: 1, 2, 9>, scalar_prefetch = 0 : i64, scratch_operands = 1 : i64, tpu.core_type = #tpu.core_type<tc>, window_params = [{transform_indices = @transform_0, window_bounds = array<i64: 16, 512>}, {transform_indices = @transform_1, window_bounds = array<i64: 512, 256>}, {transform_indices = @transform_2, window_bounds = array<i64: 16, 256>}]} {
    %c0_i32 = arith.constant 0 : i32
    %0 = arith.cmpi eq, %arg2, %c0_i32 : i32
    %1 = arith.extui %0 : i1 to i32
    %c0_i32_0 = arith.constant 0 : i32
    %2 = arith.cmpi ne, %1, %c0_i32_0 : i32
    scf.if %2 {
      %cst_9 = arith.constant 0.000000e+00 : f32
      %12 = vector.broadcast %cst_9 : f32 to vector<16x256xf32>
      %c0_10 = arith.constant 0 : index
      %c0_11 = arith.constant 0 : index
      %13 = vector.load %arg6[%c0_10, %c0_11] : memref<16x256xf32, #tpu.memory_space<vmem>>, vector<16x256xf32>
      tpu.vector_store %arg6[%c0_10, %c0_11], %12 {strides = array<i32>} : memref<16x256xf32, #tpu.memory_space<vmem>>, vector<16x256xf32>,
    } else {
    }
    %c0 = arith.constant 0 : index
    %c0_1 = arith.constant 0 : index
    %3 = vector.load %arg6[%c0, %c0_1] : memref<16x256xf32, #tpu.memory_space<vmem>>, vector<16x256xf32>
    %c0_2 = arith.constant 0 : index
    %c0_3 = arith.constant 0 : index
    %4 = vector.load %arg3[%c0_2, %c0_3] : memref<16x512xbf16, #tpu.memory_space<vmem>>, vector<16x512xbf16>
    %c0_4 = arith.constant 0 : index
    %c0_5 = arith.constant 0 : index
    %5 = vector.load %arg4[%c0_4, %c0_5] : memref<512x256xbf16, #tpu.memory_space<vmem>>, vector<512x256xbf16>
    %cst = arith.constant dense<0.000000e+00> : vector<16x256xf32>
    %6 = tpu.matmul %4, %5, %cst {dimension_numbers = #tpu.dot_dimension_numbers<[1], [0], [0], [1], [0, 0, 1, 1], [], []>} : vector<16x512xbf16>, vector<512x256xbf16>, vector<16x256xf32> -> vector<16x256xf32>
    %7 = arith.addf %3, %6 : vector<16x256xf32>
    %c0_6 = arith.constant 0 : index
    %c0_7 = arith.constant 0 : index
    %8 = vector.load %arg6[%c0_6, %c0_7] : memref<16x256xf32, #tpu.memory_space<vmem>>, vector<16x256xf32>
    tpu.vector_store %arg6[%c0_6, %c0_7], %7 {strides = array<i32>} : memref<16x256xf32, #tpu.memory_space<vmem>>, vector<16x256xf32>,
    %c8_i32 = arith.constant 8 : i32
    %9 = arith.cmpi eq, %arg2, %c8_i32 : i32
    %10 = arith.extui %9 : i1 to i32
    %c0_i32_8 = arith.constant 0 : i32
    %11 = arith.cmpi ne, %10, %c0_i32_8 : i32
    scf.if %11 {
      %c0_9 = arith.constant 0 : index
      %c0_10 = arith.constant 0 : index
      %12 = vector.load %arg6[%c0_9, %c0_10] : memref<16x256xf32, #tpu.memory_space<vmem>>, vector<16x256xf32>
      %c0_11 = arith.constant 0 : index
      %c0_12 = arith.constant 0 : index
      %13 = vector.load %arg5[%c0_11, %c0_12] : memref<16x256xf32, #tpu.memory_space<vmem>>, vector<16x256xf32>
      tpu.vector_store %arg5[%c0_11, %c0_12], %12 {strides = array<i32>} : memref<16x256xf32, #tpu.memory_space<vmem>>, vector<16x256xf32>,
    } else {
    }
    return
  }
  func.func @transform_0(%arg0: i32, %arg1: i32, %arg2: i32) -> (i32, i32) {
    %c0_i32 = arith.constant 0 : i32
    return %arg0, %arg2 : i32, i32
  }
  func.func @transform_1(%arg0: i32, %arg1: i32, %arg2: i32) -> (i32, i32) {
    %c0_i32 = arith.constant 0 : i32
    return %arg2, %arg1 : i32, i32
  }
  func.func @transform_2(%arg0: i32, %arg1: i32, %arg2: i32) -> (i32, i32) {
    %c0_i32 = arith.constant 0 : i32
    return %arg0, %arg1 : i32, i32
  }
}

module attributes {stable_mosaic.version = 11 : i64} {
  func.func @_bn_add_act_kernel(%arg0: i32, %arg1: memref<8x512xf32, #tpu.memory_space<vmem>>, %arg2: memref<1x512xf32, #tpu.memory_space<vmem>>, %arg3: memref<1x512xf32, #tpu.memory_space<vmem>>, %arg4: memref<8x512xf32, #tpu.memory_space<vmem>>, %arg5: memref<8x512xf32, #tpu.memory_space<vmem>>) attributes {dimension_semantics = [#tpu.dimension_semantics<parallel>], iteration_bounds = array<i64: 1>, scalar_prefetch = 0 : i64, scratch_operands = 0 : i64, tpu.core_type = #tpu.core_type<tc>, window_params = [{transform_indices = @transform_0, window_bounds = array<i64: 8, 512>}, {pipeline_mode = #tpu.pipeline_mode<synchronous>, transform_indices = @transform_1, window_bounds = array<i64: 1, 512>}, {pipeline_mode = #tpu.pipeline_mode<synchronous>, transform_indices = @transform_2, window_bounds = array<i64: 1, 512>}, {transform_indices = @transform_3, window_bounds = array<i64: 8, 512>}, {transform_indices = @transform_4, window_bounds = array<i64: 8, 512>}]} {
    %c0 = arith.constant 0 : index
    %c0_0 = arith.constant 0 : index
    %0 = vector.load %arg1[%c0, %c0_0] : memref<8x512xf32, #tpu.memory_space<vmem>>, vector<8x512xf32>
    %c0_1 = arith.constant 0 : index
    %c0_2 = arith.constant 0 : index
    %1 = vector.load %arg2[%c0_1, %c0_2] : memref<1x512xf32, #tpu.memory_space<vmem>>, vector<1x512xf32>
    %2 = vector.broadcast %1 : vector<1x512xf32> to vector<8x512xf32>
    %3 = arith.mulf %0, %2 : vector<8x512xf32>
    %c0_3 = arith.constant 0 : index
    %c0_4 = arith.constant 0 : index
    %4 = vector.load %arg3[%c0_3, %c0_4] : memref<1x512xf32, #tpu.memory_space<vmem>>, vector<1x512xf32>
    %5 = vector.broadcast %4 : vector<1x512xf32> to vector<8x512xf32>
    %6 = arith.addf %3, %5 : vector<8x512xf32>
    %c0_5 = arith.constant 0 : index
    %c0_6 = arith.constant 0 : index
    %7 = vector.load %arg4[%c0_5, %c0_6] : memref<8x512xf32, #tpu.memory_space<vmem>>, vector<8x512xf32>
    %8 = arith.addf %6, %7 : vector<8x512xf32>
    %cst = arith.constant 0.000000e+00 : f32
    %9 = vector.broadcast %cst : f32 to vector<8x512xf32>
    %10 = arith.maximumf %8, %9 : vector<8x512xf32>
    %c0_7 = arith.constant 0 : index
    %c0_8 = arith.constant 0 : index
    %11 = vector.load %arg5[%c0_7, %c0_8] : memref<8x512xf32, #tpu.memory_space<vmem>>, vector<8x512xf32>
    tpu.vector_store %arg5[%c0_7, %c0_8], %10 {strides = array<i32>} : memref<8x512xf32, #tpu.memory_space<vmem>>, vector<8x512xf32>,
    return
  }
  func.func @transform_0(%arg0: i32) -> (i32, i32) {
    %c0_i32 = arith.constant 0 : i32
    %c0_i32_0 = arith.constant 0 : i32
    return %arg0, %c0_i32 : i32, i32
  }
  func.func @transform_1(%arg0: i32) -> (i32, i32) {
    %c0_i32 = arith.constant 0 : i32
    %c0_i32_0 = arith.constant 0 : i32
    %c0_i32_1 = arith.constant 0 : i32
    return %c0_i32, %c0_i32_0 : i32, i32
  }
  func.func @transform_2(%arg0: i32) -> (i32, i32) {
    %c0_i32 = arith.constant 0 : i32
    %c0_i32_0 = arith.constant 0 : i32
    %c0_i32_1 = arith.constant 0 : i32
    return %c0_i32, %c0_i32_0 : i32, i32
  }
  func.func @transform_3(%arg0: i32) -> (i32, i32) {
    %c0_i32 = arith.constant 0 : i32
    %c0_i32_0 = arith.constant 0 : i32
    return %arg0, %c0_i32 : i32, i32
  }
  func.func @transform_4(%arg0: i32) -> (i32, i32) {
    %c0_i32 = arith.constant 0 : i32
    %c0_i32_0 = arith.constant 0 : i32
    return %arg0, %c0_i32 : i32, i32
  }
}

module attributes {stable_mosaic.version = 11 : i64} {
  func.func @_matmul_bias_kernel(%arg0: i32, %arg1: i32, %arg2: i32, %arg3: memref<16x512xbf16, #tpu.memory_space<vmem>>, %arg4: memref<512x512xbf16, #tpu.memory_space<vmem>>, %arg5: memref<1x512xf32, #tpu.memory_space<vmem>>, %arg6: memref<16x512xf32, #tpu.memory_space<vmem>>, %arg7: memref<16x512xf32, #tpu.memory_space<vmem>>) attributes {dimension_semantics = [#tpu.dimension_semantics<parallel>, #tpu.dimension_semantics<parallel>, #tpu.dimension_semantics<arbitrary>], iteration_bounds = array<i64: 1, 2, 1>, scalar_prefetch = 0 : i64, scratch_operands = 1 : i64, tpu.core_type = #tpu.core_type<tc>, window_params = [{transform_indices = @transform_0, window_bounds = array<i64: 16, 512>}, {transform_indices = @transform_1, window_bounds = array<i64: 512, 512>}, {transform_indices = @transform_2, window_bounds = array<i64: 1, 512>}, {transform_indices = @transform_3, window_bounds = array<i64: 16, 512>}]} {
    %c0_i32 = arith.constant 0 : i32
    %0 = arith.cmpi eq, %arg2, %c0_i32 : i32
    %1 = arith.extui %0 : i1 to i32
    %c0_i32_0 = arith.constant 0 : i32
    %2 = arith.cmpi ne, %1, %c0_i32_0 : i32
    scf.if %2 {
      %cst_10 = arith.constant 0.000000e+00 : f32
      %12 = vector.broadcast %cst_10 : f32 to vector<16x512xf32>
      %c0_11 = arith.constant 0 : index
      %c0_12 = arith.constant 0 : index
      %13 = vector.load %arg7[%c0_11, %c0_12] : memref<16x512xf32, #tpu.memory_space<vmem>>, vector<16x512xf32>
      tpu.vector_store %arg7[%c0_11, %c0_12], %12 {strides = array<i32>} : memref<16x512xf32, #tpu.memory_space<vmem>>, vector<16x512xf32>,
    } else {
    }
    %c0 = arith.constant 0 : index
    %c0_1 = arith.constant 0 : index
    %3 = vector.load %arg7[%c0, %c0_1] : memref<16x512xf32, #tpu.memory_space<vmem>>, vector<16x512xf32>
    %c0_2 = arith.constant 0 : index
    %c0_3 = arith.constant 0 : index
    %4 = vector.load %arg3[%c0_2, %c0_3] : memref<16x512xbf16, #tpu.memory_space<vmem>>, vector<16x512xbf16>
    %c0_4 = arith.constant 0 : index
    %c0_5 = arith.constant 0 : index
    %5 = vector.load %arg4[%c0_4, %c0_5] : memref<512x512xbf16, #tpu.memory_space<vmem>>, vector<512x512xbf16>
    %cst = arith.constant dense<0.000000e+00> : vector<16x512xf32>
    %6 = tpu.matmul %4, %5, %cst {dimension_numbers = #tpu.dot_dimension_numbers<[1], [0], [0], [1], [0, 0, 1, 1], [], []>} : vector<16x512xbf16>, vector<512x512xbf16>, vector<16x512xf32> -> vector<16x512xf32>
    %7 = arith.addf %3, %6 : vector<16x512xf32>
    %c0_6 = arith.constant 0 : index
    %c0_7 = arith.constant 0 : index
    %8 = vector.load %arg7[%c0_6, %c0_7] : memref<16x512xf32, #tpu.memory_space<vmem>>, vector<16x512xf32>
    tpu.vector_store %arg7[%c0_6, %c0_7], %7 {strides = array<i32>} : memref<16x512xf32, #tpu.memory_space<vmem>>, vector<16x512xf32>,
    %c0_i32_8 = arith.constant 0 : i32
    %9 = arith.cmpi eq, %arg2, %c0_i32_8 : i32
    %10 = arith.extui %9 : i1 to i32
    %c0_i32_9 = arith.constant 0 : i32
    %11 = arith.cmpi ne, %10, %c0_i32_9 : i32
    scf.if %11 {
      %c0_10 = arith.constant 0 : index
      %c0_11 = arith.constant 0 : index
      %12 = vector.load %arg7[%c0_10, %c0_11] : memref<16x512xf32, #tpu.memory_space<vmem>>, vector<16x512xf32>
      %c0_12 = arith.constant 0 : index
      %c0_13 = arith.constant 0 : index
      %13 = vector.load %arg5[%c0_12, %c0_13] : memref<1x512xf32, #tpu.memory_space<vmem>>, vector<1x512xf32>
      %14 = vector.broadcast %13 : vector<1x512xf32> to vector<16x512xf32>
      %15 = arith.addf %12, %14 : vector<16x512xf32>
      %c0_14 = arith.constant 0 : index
      %c0_15 = arith.constant 0 : index
      %16 = vector.load %arg6[%c0_14, %c0_15] : memref<16x512xf32, #tpu.memory_space<vmem>>, vector<16x512xf32>
      tpu.vector_store %arg6[%c0_14, %c0_15], %15 {strides = array<i32>} : memref<16x512xf32, #tpu.memory_space<vmem>>, vector<16x512xf32>,
    } else {
    }
    return
  }
  func.func @transform_0(%arg0: i32, %arg1: i32, %arg2: i32) -> (i32, i32) {
    %c0_i32 = arith.constant 0 : i32
    return %arg0, %arg2 : i32, i32
  }
  func.func @transform_1(%arg0: i32, %arg1: i32, %arg2: i32) -> (i32, i32) {
    %c0_i32 = arith.constant 0 : i32
    return %arg2, %arg1 : i32, i32
  }
  func.func @transform_2(%arg0: i32, %arg1: i32, %arg2: i32) -> (i32, i32) {
    %c0_i32 = arith.constant 0 : i32
    %c0_i32_0 = arith.constant 0 : i32
    return %c0_i32, %arg1 : i32, i32
  }
  func.func @transform_3(%arg0: i32, %arg1: i32, %arg2: i32) -> (i32, i32) {
    %c0_i32 = arith.constant 0 : i32
    return %arg0, %arg1 : i32, i32
  }
}

</mosaic_0001>

<bundles_post_ra>
// kernel: squeeze.40
= control target key start
LH: loop header
LB: loop body
LE: loop exit
PB: predicated region body
PF: predicated region fallthrough
CT: control target
= control target key end

     0   :  { %vm8_vm0 = vcmask 523264   ;;  %s42_s0 = inlined_call_operand.vmem [shape: f32[128], index: 0, kind: input, shape index: {}]   ;;  %s43_s1 = inlined_call_operand.vmem [shape: f32[2,64], index: 1, kind: output, shape index: {}]  }
   0x1   :  { %v5_v0 = vld [vmem:[%s42_s0] sm:$0x1]  ;;  %s25_s0 = smov 64  }
   0x2   :  { %6 = vst [vmem:[#allocation1] sm:$0x1] %v5_v0 }
   0x9   :  { %v10_v1 = vld [vmem:[#allocation1] sm:$0x1]  }
   0xa   :  { %v7_v2 = vld [vmem:[#allocation1] sm:$0x1]   ;;  %11 = vrot.lane.b32.xlu0 %v10_v1, %s25_s0 }
   0xb   :  { %9 = vst.msk [vmem:[#allocation0] sm:$0x1] %vm8_vm0, %v7_v2  }
  0x7c   :  { %v12_v3 = vpop.permute.xlu0 %11  }
  0x7d   :  { %15 = vst.msk [vmem:[#allocation0 + $0x1] sm:$0x1] %vm8_vm0, %v12_v3  }
  0x84   :  { %v20_v4 = vld [vmem:[#allocation0] sm:$0x3] }
  0x85   :  { %23 = vst [vmem:[%s43_s1] sm:$0x3] %v20_v4 }

// kernel: tile.83
= control target key start
LH: loop header
LB: loop body
LE: loop exit
PB: predicated region body
PF: predicated region fallthrough
CT: control target
= control target key end

     0   :  { %s22_s0 = inlined_call_operand.vmem [shape: f32[64], index: 0, kind: input, shape index: {}]   ;;  %s23_s1 = inlined_call_operand.vmem [shape: f32[2,64], index: 1, kind: output, shape index: {}]  }
   0x1   :  { %v4_v0 = vld [vmem:[%s22_s0] ss:$0 sm:$0xff] }
   0x2   :  { %5 = vst [vmem:[%s23_s1] sm:$0x3] %v4_v0 }

// kernel: tile.84
= control target key start
LH: loop header
LB: loop body
LE: loop exit
PB: predicated region body
PF: predicated region fallthrough
CT: control target
= control target key end

     0   :  { %vm8_vm0 = vcmask 523264   ;;  %vm14_vm1 = vcmask 1048064   ;;  %s42_s0 = inlined_call_operand.vmem [shape: f32[2,64], index: 0, kind: input, shape index: {}]   ;;  %s43_s1 = inlined_call_operand.vmem [shape: f32[1,128], index: 1, kind: output, shape index: {}]  }
   0x1   :  { %v5_v0 = vld [vmem:[%s42_s0] sm:$0x3]  ;;  %s25_s0 = smov 64  }
   0x2   :  { %6 = vst [vmem:[#allocation1] sm:$0x3] %v5_v0 }
   0x9   :  { %v11_v1 = vld [vmem:[#allocation1 + $0x1] sm:$0x1]   ;;  %v7_v2 = vld [vmem:[#allocation1] sm:$0x1]  }
   0xa   :  { %12 = vrot.lane.b32.xlu0 %v11_v1, %s25_s0  ;;  %9 = vst.msk [vmem:[#allocation0] sm:$0x1] %vm8_vm0, %v7_v2  }
  0x7c   :  { %v13_v3 = vpop.permute.xlu0 %12  }
  0x7d   :  { %15 = vst.msk [vmem:[#allocation0] sm:$0x1] %vm14_vm1, %v13_v3  }
  0x84   :  { %v20_v4 = vld [vmem:[#allocation0] sm:$0x1] }
  0x85   :  { %23 = vst [vmem:[%s43_s1] sm:$0x1] %v20_v4 }

// kernel: quantized_resnet18_forward.63
= control target key start
LH: loop header
LB: loop body
LE: loop exit
PB: predicated region body
PF: predicated region fallthrough
CT: control target
= control target key end

     0   :  { %v169_v0 = vmov 0.0   ;;  %s299_s1 = inlined_call_operand.vmem [shape: f32[1,128], index: 1, kind: output, shape index: {0}]   ;;  %s300_s2 = inlined_call_operand.vmem [shape: f32[1,128], index: 2, kind: output, shape index: {1}]   ;;  %s301_s0 = inlined_call_operand.vmem [shape: f32[256,128], index: 0, kind: input, shape index: {}]  }
   0x1   :  { %14 = vst [vmem:[%s299_s1] sm:$0x1] %v169_v0  ;;  %15 = vst [vmem:[%s300_s2] sm:$0x1] %v169_v0  ;;  %v16_v1 = vld [vmem:[%s301_s0] sm:$0xff]  ;;  %v17_v2 = vld [vmem:[%s301_s0 + $0x8] sm:$0xff] }
   0x2   :  { %v18_v3 = vld [vmem:[%s301_s0 + $0x10] sm:$0xff]  ;;  %v19_v4 = vld [vmem:[%s301_s0 + $0x18] sm:$0xff]  ;;  %v49_v5 = vadd.f32 %v17_v2, %v16_v1  ;;  %v89_v6 = vmul.f32 %v16_v1, %v16_v1  ;;  %v90_v7 = vmul.f32 %v17_v2, %v17_v2  ;;  %v20_v9 = vld [vmem:[%s301_s0 + $0x20] sm:$0xff] }
   0x3   :  { %v91_v8 = vmul.f32 %v18_v3, %v18_v3  ;;  %v92_v11 = vmul.f32 %v19_v4, %v19_v4  ;;  %v21_v13 = vld [vmem:[%s301_s0 + $0x28] sm:$0xff]  ;;  %v93_v15 = vmul.f32 %v20_v9, %v20_v9  ;;  %v22_v17 = vld [vmem:[%s301_s0 + $0x30] sm:$0xff]  ;;  %v23_v21 = vld [vmem:[%s301_s0 + $0x38] sm:$0xff] }
   0x4   :  { %v50_v10 = vadd.f32 %v49_v5, %v18_v3  ;;  %v121_v12 = vadd.f32 %v90_v7, %v89_v6  ;;  %v94_v19 = vmul.f32 %v21_v13, %v21_v13  ;;  %v95_v23 = vmul.f32 %v22_v17, %v22_v17  ;;  %v24_v25 = vld [vmem:[%s301_s0 + $0x40] sm:$0xff]  ;;  %v25_v29 = vld [vmem:[%s301_s0 + $0x48] sm:$0xff]  ;;  %v26_v33 = vld [vmem:[%s301_s0 + $0x50] sm:$0xff] }
   0x5   :  { %v96_v27 = vmul.f32 %v23_v21, %v23_v21  ;;  %v97_v31 = vmul.f32 %v24_v25, %v24_v25  ;;  %v98_v35 = vmul.f32 %v25_v29, %v25_v29  ;;  %v27_v37 = vld [vmem:[%s301_s0 + $0x58] sm:$0xff]  ;;  %v99_v39 = vmul.f32 %v26_v33, %v26_v33  ;;  %v28_v41 = vld [vmem:[%s301_s0 + $0x60] sm:$0xff]  ;;  %v29_v45 = vld [vmem:[%s301_s0 + $0x68] sm:$0xff] }
   0x6   :  { %v51_v14 = vadd.f32 %v50_v10, %v19_v4  ;;  %v122_v16 = vadd.f32 %v121_v12, %v91_v8  ;;  %v100_v43 = vmul.f32 %v27_v37, %v27_v37  ;;  %v101_v47 = vmul.f32 %v28_v41, %v28_v41  ;;  %v30_v49 = vld [vmem:[%s301_s0 + $0x70] sm:$0xff]  ;;  %v31_v53 = vld [vmem:[%s301_s0 + $0x78] sm:$0xff]  ;;  %v32_v57 = vld [vmem:[%s301_s0 + $0x80] sm:$0xff] }
   0x7   :  { %v102_v51 = vmul.f32 %v29_v45, %v29_v45  ;;  %v103_v55 = vmul.f32 %v30_v49, %v30_v49  ;;  %v104_v59 = vmul.f32 %v31_v53, %v31_v53  ;;  %v33_v61 = vld [vmem:[%s301_s0 + $0x88] sm:$0xff]  ;;  %v105_v63 = vmul.f32 %v32_v57, %v32_v57  ;;  %v34_v1 = vld [vmem:[%s301_s0 + $0x90] sm:$0xff]  ;;  %v35_v5 = vld [vmem:[%s301_s0 + $0x98] sm:$0xff] }
   0x8   :  { %v52_v18 = vadd.f32 %v51_v14, %v20_v9  ;;  %v123_v20 = vadd.f32 %v122_v16, %v92_v11  ;;  %v106_v3 = vmul.f32 %v33_v61, %v33_v61  ;;  %v107_v7 = vmul.f32 %v34_v1, %v34_v1  ;;  %v36_v9 = vld [vmem:[%s301_s0 + $0xa0] sm:$0xff] }
   0x9   :  { %v108_v11 = vmul.f32 %v35_v5, %v35_v5 }
   0xa   :  { %v53_v22 = vadd.f32 %v52_v18, %v21_v13  ;;  %v124_v24 = vadd.f32 %v123_v20, %v93_v15  ;;  %v37_v13 = vld [vmem:[%s301_s0 + $0xa8] sm:$0xff]  ;;  %v109_v15 = vmul.f32 %v36_v9, %v36_v9 }
   0xc   :  { %v54_v26 = vadd.f32 %v53_v22, %v22_v17  ;;  %v125_v28 = vadd.f32 %v124_v24, %v94_v19  ;;  %v38_v17 = vld [vmem:[%s301_s0 + $0xb0] sm:$0xff]  ;;  %v110_v19 = vmul.f32 %v37_v13, %v37_v13 }
   0xe   :  { %v55_v30 = vadd.f32 %v54_v26, %v23_v21  ;;  %v126_v32 = vadd.f32 %v125_v28, %v95_v23  ;;  %v39_v21 = vld [vmem:[%s301_s0 + $0xb8] sm:$0xff]  ;;  %v111_v23 = vmul.f32 %v38_v17, %v38_v17 }
  0x10   :  { %v56_v34 = vadd.f32 %v55_v30, %v24_v25  ;;  %v127_v36 = vadd.f32 %v126_v32, %v96_v27  ;;  %v40_v25 = vld [vmem:[%s301_s0 + $0xc0] sm:$0xff]  ;;  %v112_v27 = vmul.f32 %v39_v21, %v39_v21 }
  0x12   :  { %v57_v38 = vadd.f32 %v56_v34, %v25_v29  ;;  %v128_v40 = vadd.f32 %v127_v36, %v97_v31  ;;  %v41_v29 = vld [vmem:[%s301_s0 + $0xc8] sm:$0xff]  ;;  %v113_v31 = vmul.f32 %v40_v25, %v40_v25 }
  0x14   :  { %v58_v42 = vadd.f32 %v57_v38, %v26_v33  ;;  %v129_v44 = vadd.f32 %v128_v40, %v98_v35  ;;  %v42_v33 = vld [vmem:[%s301_s0 + $0xd0] sm:$0xff]  ;;  %v114_v35 = vmul.f32 %v41_v29, %v41_v29 }
  0x16   :  { %v59_v46 = vadd.f32 %v58_v42, %v27_v37  ;;  %v130_v48 = vadd.f32 %v129_v44, %v99_v39  ;;  %v43_v37 = vld [vmem:[%s301_s0 + $0xd8] sm:$0xff]  ;;  %v115_v39 = vmul.f32 %v42_v33, %v42_v33 }
  0x18   :  { %v60_v50 = vadd.f32 %v59_v46, %v28_v41  ;;  %v131_v52 = vadd.f32 %v130_v48, %v100_v43  ;;  %v44_v41 = vld [vmem:[%s301_s0 + $0xe0] sm:$0xff]  ;;  %v116_v43 = vmul.f32 %v43_v37, %v43_v37 }
  0x1a   :  { %v61_v54 = vadd.f32 %v60_v50, %v29_v45  ;;  %v132_v56 = vadd.f32 %v131_v52, %v101_v47  ;;  %v45_v45 = vld [vmem:[%s301_s0 + $0xe8] sm:$0xff]  ;;  %v117_v47 = vmul.f32 %v44_v41, %v44_v41 }
  0x1c   :  { %v62_v58 = vadd.f32 %v61_v54, %v30_v49  ;;  %v133_v60 = vadd.f32 %v132_v56, %v102_v51  ;;  %v46_v49 = vld [vmem:[%s301_s0 + $0xf0] sm:$0xff]  ;;  %v118_v51 = vmul.f32 %v45_v45, %v45_v45 }
  0x1e   :  { %v63_v62 = vadd.f32 %v62_v58, %v31_v53  ;;  %v134_v0 = vadd.f32 %v133_v60, %v103_v55  ;;  %v47_v53 = vld [vmem:[%s301_s0 + $0xf8] sm:$0xff]  ;;  %v119_v55 = vmul.f32 %v46_v49, %v46_v49 }
  0x1f   :  { %v120_v58 = vmul.f32 %v47_v53, %v47_v53 }
  0x20   :  { %v64_v2 = vadd.f32 %v63_v62, %v32_v57  ;;  %v135_v4 = vadd.f32 %v134_v0, %v104_v59 }
  0x22   :  { %v65_v6 = vadd.f32 %v64_v2, %v33_v61  ;;  %v136_v8 = vadd.f32 %v135_v4, %v105_v63 }
  0x24   :  { %v66_v10 = vadd.f32 %v65_v6, %v34_v1  ;;  %v137_v12 = vadd.f32 %v136_v8, %v106_v3 }
  0x26   :  { %v67_v14 = vadd.f32 %v66_v10, %v35_v5  ;;  %v138_v16 = vadd.f32 %v137_v12, %v107_v7  ;;  %v48_v7 = vld [vmem:[%s299_s1] sm:$0x1] }
  0x27   :  { %v88_v12 = vld [vmem:[%s300_s2] sm:$0x1] }
  0x28   :  { %v68_v18 = vadd.f32 %v67_v14, %v36_v9  ;;  %v139_v20 = vadd.f32 %v138_v16, %v108_v11 }
  0x2a   :  { %v69_v22 = vadd.f32 %v68_v18, %v37_v13  ;;  %v140_v24 = vadd.f32 %v139_v20, %v109_v15 }
  0x2c   :  { %v70_v26 = vadd.f32 %v69_v22, %v38_v17  ;;  %v141_v28 = vadd.f32 %v140_v24, %v110_v19 }
  0x2e   :  { %v71_v30 = vadd.f32 %v70_v26, %v39_v21  ;;  %v142_v32 = vadd.f32 %v141_v28, %v111_v23 }
  0x30   :  { %v72_v34 = vadd.f32 %v71_v30, %v40_v25  ;;  %v143_v36 = vadd.f32 %v142_v32, %v112_v27 }
  0x32   :  { %v73_v38 = vadd.f32 %v72_v34, %v41_v29  ;;  %v144_v40 = vadd.f32 %v143_v36, %v113_v31 }
  0x34   :  { %v74_v42 = vadd.f32 %v73_v38, %v42_v33  ;;  %v145_v44 = vadd.f32 %v144_v40, %v114_v35 }
  0x36   :  { %v75_v46 = vadd.f32 %v74_v42, %v43_v37  ;;  %v146_v48 = vadd.f32 %v145_v44, %v115_v39 }
  0x38   :  { %v76_v50 = vadd.f32 %v75_v46, %v44_v41  ;;  %v147_v52 = vadd.f32 %v146_v48, %v116_v43 }
  0x3a   :  { %v77_v54 = vadd.f32 %v76_v50, %v45_v45  ;;  %v148_v56 = vadd.f32 %v147_v52, %v117_v47 }
  0x3c   :  { %v78_v57 = vadd.f32 %v77_v54, %v46_v49  ;;  %v149_v59 = vadd.f32 %v148_v56, %v118_v51 }
  0x3e   :  { %v79_v60 = vadd.f32 %v78_v57, %v47_v53  ;;  %v150_v61 = vadd.f32 %v149_v59, %v119_v55 }
  0x40   :  { %v80_v62 = vrot.slane %v79_v60, 4  ;;  %v151_v63 = vadd.f32 %v150_v61, %v120_v58 }
  0x42   :  { %v81_v0 = vadd.f32 %v80_v62, %v79_v60  ;;  %v152_v1 = vrot.slane %v151_v63, 4 }
  0x44   :  { %v82_v2 = vrot.slane %v81_v0, 2  ;;  %v153_v3 = vadd.f32 %v152_v1, %v151_v63 }
  0x46   :  { %v83_v4 = vadd.f32 %v82_v2, %v81_v0  ;;  %v154_v5 = vrot.slane %v153_v3, 2 }
  0x48   :  { %v84_v6 = vrot.slane %v83_v4, 1  ;;  %v155_v8 = vadd.f32 %v154_v5, %v153_v3 }
  0x4a   :  { %v85_v9 = vadd.f32 %v84_v6, %v83_v4  ;;  %v156_v10 = vrot.slane %v155_v8, 1 }
  0x4c   :  { %v86_v11 = vadd.f32 %v85_v9, %v48_v7  ;;  %v157_v13 = vadd.f32 %v156_v10, %v155_v8 }
  0x4e   :  { %87 = vst [vmem:[%s299_s1] sm:$0x1] %v86_v11  ;;  %v158_v14 = vadd.f32 %v157_v13, %v88_v12 }
  0x50   :  { %159 = vst [vmem:[%s300_s2] sm:$0x1] %v158_v14 }

// kernel: quantized_resnet18_forward.64
= control target key start
LH: loop header
LB: loop body
LE: loop exit
PB: predicated region body
PF: predicated region fallthrough
CT: control target
= control target key end

     0   :  { %s480_s0 = inlined_call_operand.vmem [shape: f32[256,128], index: 0, kind: input, shape index: {}]   ;;  %s481_s1 = inlined_call_operand.vmem [shape: f32[1,128], index: 1, kind: input, shape index: {}]   ;;  %s482_s2 = inlined_call_operand.vmem [shape: f32[1,128], index: 2, kind: input, shape index: {}]   ;;  %s483_s3 = inlined_call_operand.vmem [shape: f32[256,128], index: 3, kind: output, shape index: {}]  }
   0x1   :  { %v14_v0 = vld [vmem:[%s480_s0] sm:$0xff]  ;;  %v15_v4 = vld [vmem:[%s480_s0 + $0x8] sm:$0xff]  ;;  %v16_v5 = vld [vmem:[%s480_s0 + $0x10] sm:$0xff] }
   0x2   :  { %v220_v1 = vld [vmem:[%s481_s1] ss:$0 sm:$0xff]  ;;  %v17_v6 = vld [vmem:[%s480_s0 + $0x18] sm:$0xff]  ;;  %v19_v11 = vld [vmem:[%s480_s0 + $0x28] sm:$0xff] }
   0x3   :  { %v225_v2 = vld [vmem:[%s482_s2] ss:$0 sm:$0xff]  ;;  %v53_v3 = vmul.f32 %v220_v1, %v14_v0  ;;  %v54_v7 = vmul.f32 %v220_v1, %v15_v4  ;;  %v55_v8 = vmul.f32 %v220_v1, %v16_v5  ;;  %v56_v9 = vmul.f32 %v220_v1, %v17_v6  ;;  %v20_v12 = vld [vmem:[%s480_s0 + $0x30] sm:$0xff]  ;;  %v21_v17 = vld [vmem:[%s480_s0 + $0x38] sm:$0xff] }
   0x4   :  { %v18_v10 = vld [vmem:[%s480_s0 + $0x20] sm:$0xff]  ;;  %v58_v15 = vmul.f32 %v220_v1, %v19_v11  ;;  %v59_v16 = vmul.f32 %v220_v1, %v20_v12  ;;  %v60_v21 = vmul.f32 %v220_v1, %v21_v17  ;;  %v23_v27 = vld [vmem:[%s480_s0 + $0x48] sm:$0xff]  ;;  %v24_v28 = vld [vmem:[%s480_s0 + $0x50] sm:$0xff] }
   0x5   :  { %v92_v13 = vadd.f32 %v225_v2, %v53_v3  ;;  %v57_v14 = vmul.f32 %v220_v1, %v18_v10  ;;  %v93_v18 = vadd.f32 %v225_v2, %v54_v7  ;;  %v94_v19 = vadd.f32 %v225_v2, %v55_v8  ;;  %v22_v22 = vld [vmem:[%s480_s0 + $0x40] sm:$0xff]  ;;  %v25_v29 = vld [vmem:[%s480_s0 + $0x58] sm:$0xff]  ;;  %v27_v35 = vld [vmem:[%s480_s0 + $0x68] sm:$0xff] }
   0x6   :  { %v95_v20 = vadd.f32 %v225_v2, %v56_v9  ;;  %v97_v25 = vadd.f32 %v225_v2, %v58_v15  ;;  %v98_v26 = vadd.f32 %v225_v2, %v59_v16  ;;  %v99_v33 = vadd.f32 %v225_v2, %v60_v21  ;;  %v26_v34 = vld [vmem:[%s480_s0 + $0x60] sm:$0xff]  ;;  %v28_v36 = vld [vmem:[%s480_s0 + $0x70] sm:$0xff]  ;;  %v29_v41 = vld [vmem:[%s480_s0 + $0x78] sm:$0xff] }
   0x7   :  { %v124_v23 = vmax.f32 %v92_v13, 0.0  ;;  %v96_v24 = vadd.f32 %v225_v2, %v57_v14  ;;  %v125_v30 = vmax.f32 %v93_v18, 0.0  ;;  %v126_v31 = vmax.f32 %v94_v19, 0.0  ;;  %v30_v54 = vld [vmem:[%s480_s0 + $0x80] sm:$0xff]  ;;  %v31_v59 = vld [vmem:[%s480_s0 + $0x88] sm:$0xff]  ;;  %v32_v60 = vld [vmem:[%s480_s0 + $0x90] sm:$0xff] }
   0x8   :  { %v127_v32 = vmax.f32 %v95_v20, 0.0  ;;  %v129_v38 = vmax.f32 %v97_v25, 0.0  ;;  %v130_v39 = vmax.f32 %v98_v26, 0.0  ;;  %v61_v40 = vmul.f32 %v220_v1, %v22_v22  ;;  %v33_v61 = vld [vmem:[%s480_s0 + $0x98] sm:$0xff]  ;;  %v34_v4 = vld [vmem:[%s480_s0 + $0xa0] sm:$0xff]  ;;  %v35_v5 = vld [vmem:[%s480_s0 + $0xa8] sm:$0xff] }
   0x9   :  { %156 = vst [vmem:[%s483_s3] sm:$0xff] %v124_v23  ;;  %v128_v37 = vmax.f32 %v96_v24, 0.0  ;;  %157 = vst [vmem:[%s483_s3 + $0x8] sm:$0xff] %v125_v30  ;;  %v131_v42 = vmax.f32 %v99_v33, 0.0  ;;  %v62_v43 = vmul.f32 %v220_v1, %v23_v27  ;;  %v63_v44 = vmul.f32 %v220_v1, %v24_v28  ;;  %v36_v6 = vld [vmem:[%s480_s0 + $0xb0] sm:$0xff]  ;;  %v37_v11 = vld [vmem:[%s480_s0 + $0xb8] sm:$0xff] }
   0xa   :  { %158 = vst [vmem:[%s483_s3 + $0x10] sm:$0xff] %v126_v31  ;;  %159 = vst [vmem:[%s483_s3 + $0x18] sm:$0xff] %v127_v32  ;;  %v64_v45 = vmul.f32 %v220_v1, %v25_v29  ;;  %v100_v46 = vadd.f32 %v225_v2, %v61_v40  ;;  %v65_v47 = vmul.f32 %v220_v1, %v26_v34  ;;  %v38_v24 = vld [vmem:[%s480_s0 + $0xc0] sm:$0xff]  ;;  %v39_v29 = vld [vmem:[%s480_s0 + $0xc8] sm:$0xff] }
   0xb   :  { %160 = vst [vmem:[%s483_s3 + $0x20] sm:$0xff] %v128_v37  ;;  %161 = vst [vmem:[%s483_s3 + $0x28] sm:$0xff] %v129_v38  ;;  %v66_v48 = vmul.f32 %v220_v1, %v27_v35  ;;  %v67_v49 = vmul.f32 %v220_v1, %v28_v36  ;;  %v101_v50 = vadd.f32 %v225_v2, %v62_v43  ;;  %v40_v30 = vld [vmem:[%s480_s0 + $0xd0] sm:$0xff]  ;;  %v41_v31 = vld [vmem:[%s480_s0 + $0xd8] sm:$0xff] }
   0xc   :  { %162 = vst [vmem:[%s483_s3 + $0x30] sm:$0xff] %v130_v39  ;;  %163 = vst [vmem:[%s483_s3 + $0x38] sm:$0xff] %v131_v42  ;;  %v102_v51 = vadd.f32 %v225_v2, %v63_v44  ;;  %v103_v52 = vadd.f32 %v225_v2, %v64_v45  ;;  %v68_v53 = vmul.f32 %v220_v1, %v29_v41  ;;  %v132_v55 = vmax.f32 %v100_v46, 0.0  ;;  %v42_v36 = vld [vmem:[%s480_s0 + $0xe0] sm:$0xff]  ;;  %v43_v37 = vld [vmem:[%s480_s0 + $0xe8] sm:$0xff] }
   0xd   :  { %v104_v56 = vadd.f32 %v225_v2, %v65_v47  ;;  %v105_v57 = vadd.f32 %v225_v2, %v66_v48  ;;  %v106_v58 = vadd.f32 %v225_v2, %v67_v49  ;;  %v133_v62 = vmax.f32 %v101_v50, 0.0  ;;  %v44_v38 = vld [vmem:[%s480_s0 + $0xf0] sm:$0xff]  ;;  %v45_v43 = vld [vmem:[%s480_s0 + $0xf8] sm:$0xff] }
   0xe   :  { %v134_v63 = vmax.f32 %v102_v51, 0.0  ;;  %v135_v0 = vmax.f32 %v103_v52, 0.0  ;;  %v107_v3 = vadd.f32 %v225_v2, %v68_v53  ;;  %164 = vst [vmem:[%s483_s3 + $0x40] sm:$0xff] %v132_v55  ;;  %v69_v10 = vmul.f32 %v220_v1, %v30_v54 }
   0xf   :  { %v136_v7 = vmax.f32 %v104_v56, 0.0  ;;  %v137_v8 = vmax.f32 %v105_v57, 0.0  ;;  %v138_v9 = vmax.f32 %v106_v58, 0.0  ;;  %165 = vst [vmem:[%s483_s3 + $0x48] sm:$0xff] %v133_v62  ;;  %v70_v13 = vmul.f32 %v220_v1, %v31_v59 }
  0x10   :  { %166 = vst [vmem:[%s483_s3 + $0x50] sm:$0xff] %v134_v63  ;;  %167 = vst [vmem:[%s483_s3 + $0x58] sm:$0xff] %v135_v0  ;;  %v139_v12 = vmax.f32 %v107_v3, 0.0  ;;  %v71_v14 = vmul.f32 %v220_v1, %v32_v60  ;;  %v72_v15 = vmul.f32 %v220_v1, %v33_v61  ;;  %v108_v16 = vadd.f32 %v225_v2, %v69_v10 }
  0x11   :  { %168 = vst [vmem:[%s483_s3 + $0x60] sm:$0xff] %v136_v7  ;;  %169 = vst [vmem:[%s483_s3 + $0x68] sm:$0xff] %v137_v8  ;;  %v73_v17 = vmul.f32 %v220_v1, %v34_v4  ;;  %v74_v18 = vmul.f32 %v220_v1, %v35_v5  ;;  %v75_v19 = vmul.f32 %v220_v1, %v36_v6 }
  0x12   :  { %170 = vst [vmem:[%s483_s3 + $0x70] sm:$0xff] %v138_v9  ;;  %171 = vst [vmem:[%s483_s3 + $0x78] sm:$0xff] %v139_v12  ;;  %v109_v20 = vadd.f32 %v225_v2, %v70_v13  ;;  %v110_v21 = vadd.f32 %v225_v2, %v71_v14  ;;  %v111_v22 = vadd.f32 %v225_v2, %v72_v15  ;;  %v140_v25 = vmax.f32 %v108_v16, 0.0 }
  0x13   :  { %v76_v23 = vmul.f32 %v220_v1, %v37_v11  ;;  %v112_v26 = vadd.f32 %v225_v2, %v73_v17  ;;  %v113_v27 = vadd.f32 %v225_v2, %v74_v18  ;;  %v114_v28 = vadd.f32 %v225_v2, %v75_v19 }
  0x14   :  { %v141_v32 = vmax.f32 %v109_v20, 0.0  ;;  %v142_v33 = vmax.f32 %v110_v21, 0.0  ;;  %v143_v34 = vmax.f32 %v111_v22, 0.0  ;;  %172 = vst [vmem:[%s483_s3 + $0x80] sm:$0xff] %v140_v25  ;;  %v77_v42 = vmul.f32 %v220_v1, %v38_v24 }
  0x15   :  { %v115_v35 = vadd.f32 %v225_v2, %v76_v23  ;;  %v144_v39 = vmax.f32 %v112_v26, 0.0  ;;  %v145_v40 = vmax.f32 %v113_v27, 0.0  ;;  %v146_v41 = vmax.f32 %v114_v28, 0.0 }
  0x16   :  { %173 = vst [vmem:[%s483_s3 + $0x88] sm:$0xff] %v141_v32  ;;  %174 = vst [vmem:[%s483_s3 + $0x90] sm:$0xff] %v142_v33  ;;  %v78_v45 = vmul.f32 %v220_v1, %v39_v29  ;;  %v79_v46 = vmul.f32 %v220_v1, %v40_v30  ;;  %v80_v47 = vmul.f32 %v220_v1, %v41_v31 }
  0x17   :  { %175 = vst [vmem:[%s483_s3 + $0x98] sm:$0xff] %v143_v34  ;;  %v147_v44 = vmax.f32 %v115_v35, 0.0  ;;  %176 = vst [vmem:[%s483_s3 + $0xa0] sm:$0xff] %v144_v39  ;;  %v116_v48 = vadd.f32 %v225_v2, %v77_v42  ;;  %v81_v49 = vmul.f32 %v220_v1, %v42_v36  ;;  %v82_v50 = vmul.f32 %v220_v1, %v43_v37 }
  0x18   :  { %177 = vst [vmem:[%s483_s3 + $0xa8] sm:$0xff] %v145_v40  ;;  %178 = vst [vmem:[%s483_s3 + $0xb0] sm:$0xff] %v146_v41  ;;  %v83_v51 = vmul.f32 %v220_v1, %v44_v38  ;;  %v117_v52 = vadd.f32 %v225_v2, %v78_v45  ;;  %v118_v53 = vadd.f32 %v225_v2, %v79_v46 }
  0x19   :  { %179 = vst [vmem:[%s483_s3 + $0xb8] sm:$0xff] %v147_v44  ;;  %v119_v54 = vadd.f32 %v225_v2, %v80_v47  ;;  %v84_v55 = vmul.f32 %v220_v1, %v45_v43  ;;  %v148_v56 = vmax.f32 %v116_v48, 0.0  ;;  %v120_v57 = vadd.f32 %v225_v2, %v81_v49 }
  0x1a   :  { %v121_v58 = vadd.f32 %v225_v2, %v82_v50  ;;  %v122_v59 = vadd.f32 %v225_v2, %v83_v51  ;;  %v149_v60 = vmax.f32 %v117_v52, 0.0  ;;  %v150_v61 = vmax.f32 %v118_v53, 0.0 }
  0x1b   :  { %v151_v62 = vmax.f32 %v119_v54, 0.0  ;;  %v123_v63 = vadd.f32 %v225_v2, %v84_v55  ;;  %180 = vst [vmem:[%s483_s3 + $0xc0] sm:$0xff] %v148_v56  ;;  %v152_v0 = vmax.f32 %v120_v57, 0.0 }
  0x1c   :  { %v153_v3 = vmax.f32 %v121_v58, 0.0  ;;  %v154_v4 = vmax.f32 %v122_v59, 0.0  ;;  %181 = vst [vmem:[%s483_s3 + $0xc8] sm:$0xff] %v149_v60  ;;  %182 = vst [vmem:[%s483_s3 + $0xd0] sm:$0xff] %v150_v61 }
  0x1d   :  { %183 = vst [vmem:[%s483_s3 + $0xd8] sm:$0xff] %v151_v62  ;;  %v155_v1 = vmax.f32 %v123_v63, 0.0  ;;  %184 = vst [vmem:[%s483_s3 + $0xe0] sm:$0xff] %v152_v0 }
  0x1e   :  { %185 = vst [vmem:[%s483_s3 + $0xe8] sm:$0xff] %v153_v3  ;;  %186 = vst [vmem:[%s483_s3 + $0xf0] sm:$0xff] %v154_v4 }
  0x1f   :  { %187 = vst [vmem:[%s483_s3 + $0xf8] sm:$0xff] %v155_v1 }

// kernel: quantized_resnet18_forward.62
= control target key start
LH: loop header
LB: loop body
LE: loop exit
PB: predicated region body
PF: predicated region fallthrough
CT: control target
= control target key end

     0   :  { %s1326_s9 = smov 0   ;;  %s1328_s10 = smov 0   ;;  %s1482_s0 = inlined_call_operand.vmem [shape: bf16[512,256], index: 0, kind: input, shape index: {}]   ;;  %s1483_s1 = inlined_call_operand.vmem [shape: bf16[256,128], index: 1, kind: input, shape index: {}]   ;;  %s1484_s2 = inlined_call_operand.vmem [shape: f32[512,128], index: 2, kind: output, shape index: {}]  }
   0x1   :  { %s1330_s11 = smov 0  }
   0x2 LB: > { %s31_s12 = sadd.s32 1, %s1305_s10  ;;  %p1014_p0 = scmp.ge.s32.totalorder %s1309_s11, 1  ;;  %s1309_s11 = sphi %s1330_s11, %s12_s11   ;;  %s1305_s10 = sphi %s1328_s10, %s1486_s10   ;;  %s1301_s9 = sphi %s1326_s9, %s1485_s9  }
   0x3   : > { %p33_p1 = scmp.ge.s32.totalorder %s31_s12, 2  ;;  %p158_p2 = scmp.lt.s32.totalorder %s1309_s11, 3 }
   0x5   : > { %s1488_s12 = smov (%p33_p1, %s31_s12), 0  ;;  %p159_p3 = pnand %p1014_p0, %p158_p2 }
   0x6   : > { %s1015_s15 = sshll.u32 (!%p159_p3), %s1301_s9, 5 }
   0x7   : > { %162 = sbr.rel (%p159_p3) target bundleno = 303 (0x12f), region = 28  ;;  %p198_p4 = scmp.lt.s32.totalorder (!%p159_p3), %s1015_s15, 63 }
   0xc   : > { %v1223_v0 = vld [vmem:[%s1483_s1 + $0x78] sm:$0xff]   ;;  %v1225_v2 = vld [vmem:[%s1483_s1 + $0x70] sm:$0xff]   ;;  %v1227_v4 = vld [vmem:[%s1483_s1 + $0x68] sm:$0xff]   ;;  %s1490_s15 = smov (!%p198_p4, %s1015_s15), 63 }
   0xd   : > { %v1224_v1 = vld [vmem:[%s1483_s1 + $0x38] sm:$0xff]   ;;  %1071 = vmatprep.subr.bf16.mxu0 %v1223_v0  ;;  %1183 = vmatprep.subr.bf16.mxu1 %v1223_v0  ;;  %v1226_v3 = vld [vmem:[%s1483_s1 + $0x30] sm:$0xff]   ;;  %v1228_v5 = vld [vmem:[%s1483_s1 + $0x28] sm:$0xff]   ;;  %s1070_s30 = sshll.u32 %s1490_s15, 3 }
   0xe   : > { %1072 = vmatpush3.bf16.msra.mxu0 %v1224_v1  ;;  %1191 = vmatpush3.bf16.msra.mxu1 %v1224_v1  ;;  %v1229_v6 = vld [vmem:[%s1483_s1 + $0x60] sm:$0xff]   ;;  %v1231_v8 = vld [vmem:[%s1483_s1 + $0x58] sm:$0xff]   ;;  %s1379_s7 = scalar_lea.vmem %s1482_s0, %s1070_s30  ;;  %v1233_v10 = vld [vmem:[%s1483_s1 + $0x50] sm:$0xff]   ;;  %s1439_s28 = scalar_lea.vmem %s1484_s2, %s1070_s30 }
   0xf   : > { %1073 = vmatprep.subr.bf16.mxu0 %v1225_v2  ;;  %1184 = vmatprep.subr.bf16.mxu1 %v1225_v2  ;;  %v1230_v7 = vld [vmem:[%s1483_s1 + $0x20] sm:$0xff]   ;;  %v1232_v9 = vld [vmem:[%s1483_s1 + $0x18] sm:$0xff]   ;;  %v1234_v13 = vld [vmem:[%s1483_s1 + $0x10] sm:$0xff]  }
  0x10   : > { %v1241_v11 = vld [vmem:[%s1379_s7 + $0x4] ss:$8 sps:$4 sm:$0xff]   ;;  %v1239_v18 = vld [vmem:[%s1379_s7] ss:$8 sps:$4 sm:$0xff]   ;;  %v1245_v20 = vld [vmem:[%s1379_s7 + $0x14] ss:$8 sps:$4 sm:$0xff]  }
  0x11   : > { %v1244_v12 = vld [vmem:[%s1379_s7 + $0x84] ss:$8 sps:$4 sm:$0xff]   ;;  %647 = vmatprep.mubr.bf16.mxu0 %v1241_v11  ;;  %v1242_v19 = vld [vmem:[%s1379_s7 + $0x80] ss:$8 sps:$4 sm:$0xff]   ;;  %v1247_v21 = vld [vmem:[%s1379_s7 + $0x94] ss:$8 sps:$4 sm:$0xff]  }
  0x12   : > { %1074 = vmatpush3.bf16.msra.mxu0 %v1226_v3  ;;  %1192 = vmatpush3.bf16.msra.mxu1 %v1226_v3  ;;  %v1235_v14 = vld [vmem:[%s1483_s1 + $0x48] sm:$0xff]   ;;  %v1237_v16 = vld [vmem:[%s1483_s1 + $0x40] sm:$0xff]   ;;  %v1249_v22 = vld [vmem:[%s1379_s7 + $0x10] ss:$8 sps:$4 sm:$0xff]  }
  0x13   : > { %1075 = vmatprep.subr.bf16.mxu0 %v1227_v4  ;;  %1185 = vmatprep.subr.bf16.mxu1 %v1227_v4  ;;  %v1236_v15 = vld [vmem:[%s1483_s1 + $0x8] sm:$0xff]   ;;  %v1238_v17 = vld [vmem:[%s1483_s1] sm:$0xff]   ;;  %v1250_v23 = vld [vmem:[%s1379_s7 + $0x90] ss:$8 sps:$4 sm:$0xff]  }
  0x14   : > { %711 = vmatprep.mubr.bf16.mxu1 %v1244_v12  ;;  %v1251_v24 = vld [vmem:[%s1379_s7 + $0x24] ss:$8 sps:$4 sm:$0xff]   ;;  %v1255_v26 = vld [vmem:[%s1379_s7 + $0x20] ss:$8 sps:$4 sm:$0xff]   ;;  %v1257_v28 = vld [vmem:[%s1379_s7 + $0x34] ss:$8 sps:$4 sm:$0xff]  }
  0x15   : > { %v1253_v25 = vld [vmem:[%s1379_s7 + $0xa4] ss:$8 sps:$4 sm:$0xff]   ;;  %v1256_v27 = vld [vmem:[%s1379_s7 + $0xa0] ss:$8 sps:$4 sm:$0xff]   ;;  %v1259_v29 = vld [vmem:[%s1379_s7 + $0xb4] ss:$8 sps:$4 sm:$0xff]  }
  0x16   : > { %1076 = vmatpush3.bf16.msra.mxu0 %v1228_v5  ;;  %1193 = vmatpush3.bf16.msra.mxu1 %v1228_v5  ;;  %v1261_v30 = vld [vmem:[%s1379_s7 + $0x30] ss:$8 sps:$4 sm:$0xff]   ;;  %v1263_v32 = vld [vmem:[%s1379_s7 + $0x44] ss:$8 sps:$4 sm:$0xff]   ;;  %v1267_v34 = vld [vmem:[%s1379_s7 + $0x40] ss:$8 sps:$4 sm:$0xff]  }
  0x17   : > { %1077 = vmatprep.subr.bf16.mxu0 %v1229_v6  ;;  %1186 = vmatprep.subr.bf16.mxu1 %v1229_v6  ;;  %v1262_v31 = vld [vmem:[%s1379_s7 + $0xb0] ss:$8 sps:$4 sm:$0xff]   ;;  %v1265_v33 = vld [vmem:[%s1379_s7 + $0xc4] ss:$8 sps:$4 sm:$0xff]   ;;  %v1268_v35 = vld [vmem:[%s1379_s7 + $0xc0] ss:$8 sps:$4 sm:$0xff]  }
  0x18   : > { %v1269_v36 = vld [vmem:[%s1379_s7 + $0x54] ss:$8 sps:$4 sm:$0xff]   ;;  %v1273_v38 = vld [vmem:[%s1379_s7 + $0x50] ss:$8 sps:$4 sm:$0xff]   ;;  %v1275_v40 = vld [vmem:[%s1379_s7 + $0x64] ss:$8 sps:$4 sm:$0xff]  }
  0x19   : > { %v1271_v37 = vld [vmem:[%s1379_s7 + $0xd4] ss:$8 sps:$4 sm:$0xff]   ;;  %v1274_v39 = vld [vmem:[%s1379_s7 + $0xd0] ss:$8 sps:$4 sm:$0xff]   ;;  %v1277_v41 = vld [vmem:[%s1379_s7 + $0xe4] ss:$8 sps:$4 sm:$0xff]  }
  0x1a   : > { %1078 = vmatpush3.bf16.msra.mxu0 %v1230_v7  ;;  %1194 = vmatpush3.bf16.msra.mxu1 %v1230_v7  ;;  %v1279_v42 = vld [vmem:[%s1379_s7 + $0x60] ss:$8 sps:$4 sm:$0xff]   ;;  %v1281_v44 = vld [vmem:[%s1379_s7 + $0x74] ss:$8 sps:$4 sm:$0xff]   ;;  %v1285_v46 = vld [vmem:[%s1379_s7 + $0x70] ss:$8 sps:$4 sm:$0xff]  }
  0x1b   : > { %1079 = vmatprep.subr.bf16.mxu0 %v1231_v8  ;;  %1187 = vmatprep.subr.bf16.mxu1 %v1231_v8  ;;  %v1280_v43 = vld [vmem:[%s1379_s7 + $0xe0] ss:$8 sps:$4 sm:$0xff]   ;;  %v1283_v45 = vld [vmem:[%s1379_s7 + $0xf4] ss:$8 sps:$4 sm:$0xff]   ;;  %v1286_v47 = vld [vmem:[%s1379_s7 + $0xf0] ss:$8 sps:$4 sm:$0xff]  }
  0x1e   : > { %1080 = vmatpush3.bf16.msra.mxu0 %v1232_v9  ;;  %1195 = vmatpush3.bf16.msra.mxu1 %v1232_v9 }
  0x1f   : > { %1081 = vmatprep.subr.bf16.mxu0 %v1233_v10  ;;  %1188 = vmatprep.subr.bf16.mxu1 %v1233_v10 }
  0x22   : > { %1082 = vmatpush3.bf16.msra.mxu0 %v1234_v13  ;;  %1196 = vmatpush3.bf16.msra.mxu1 %v1234_v13 }
  0x23   : > { %1083 = vmatprep.subr.bf16.mxu0 %v1235_v14  ;;  %1189 = vmatprep.subr.bf16.mxu1 %v1235_v14 }
  0x26   : > { %1084 = vmatpush3.bf16.msra.mxu0 %v1236_v15  ;;  %1197 = vmatpush3.bf16.msra.mxu1 %v1236_v15 }
  0x27   : > { %1085 = vmatprep.subr.bf16.mxu0 %v1237_v16  ;;  %1190 = vmatprep.subr.bf16.mxu1 %v1237_v16 }
  0x2a   : > { %1086 = vmatpush3.bf16.msra.mxu0 %v1238_v17  ;;  %1198 = vmatpush3.bf16.msra.mxu1 %v1238_v17 }
  0x2d   : > { %648 = vmatmul.mubr.bf16.vlgmr.msra.gmra.mxu0 %v1239_v18  ;;  %712 = vmatmul.mubr.bf16.vlgmr.msra.gmra.mxu1 %v1242_v19 }
  0x2e   : > { %655 = vmatprep.mubr.bf16.mxu0 %v1245_v20  ;;  %719 = vmatprep.mubr.bf16.mxu1 %v1247_v21 }
  0x35   : > { %656 = vmatmul.mubr.bf16.gmra.mxu0 %v1249_v22  ;;  %720 = vmatmul.mubr.bf16.gmra.mxu1 %v1250_v23 }
  0x36   : > { %663 = vmatprep.mubr.bf16.mxu0 %v1251_v24  ;;  %727 = vmatprep.mubr.bf16.mxu1 %v1253_v25 }
  0x3d   : > { %664 = vmatmul.mubr.bf16.gmra.mxu0 %v1255_v26  ;;  %728 = vmatmul.mubr.bf16.gmra.mxu1 %v1256_v27 }
  0x3e   : > { %671 = vmatprep.mubr.bf16.mxu0 %v1257_v28  ;;  %735 = vmatprep.mubr.bf16.mxu1 %v1259_v29 }
  0x45   : > { %672 = vmatmul.mubr.bf16.gmra.mxu0 %v1261_v30  ;;  %736 = vmatmul.mubr.bf16.gmra.mxu1 %v1262_v31 }
  0x46   : > { %679 = vmatprep.mubr.bf16.mxu0 %v1263_v32  ;;  %743 = vmatprep.mubr.bf16.mxu1 %v1265_v33 }
  0x4d   : > { %680 = vmatmul.mubr.bf16.gmra.mxu0 %v1267_v34  ;;  %744 = vmatmul.mubr.bf16.gmra.mxu1 %v1268_v35 }
  0x4e   : > { %687 = vmatprep.mubr.bf16.mxu0 %v1269_v36  ;;  %751 = vmatprep.mubr.bf16.mxu1 %v1271_v37 }
  0x55   : > { %688 = vmatmul.mubr.bf16.gmra.mxu0 %v1273_v38  ;;  %752 = vmatmul.mubr.bf16.gmra.mxu1 %v1274_v39 }
  0x56   : > { %695 = vmatprep.mubr.bf16.mxu0 %v1275_v40  ;;  %759 = vmatprep.mubr.bf16.mxu1 %v1277_v41 }
  0x5d   : > { %696 = vmatmul.mubr.bf16.gmra.mxu0 %v1279_v42  ;;  %760 = vmatmul.mubr.bf16.gmra.mxu1 %v1280_v43 }
  0x5e   : > { %703 = vmatprep.mubr.bf16.mxu0 %v1281_v44  ;;  %767 = vmatprep.mubr.bf16.mxu1 %v1283_v45 }
  0x65   : > { %704 = vmatmul.mubr.bf16.gmra.mxu0 %v1285_v46  ;;  %768 = vmatmul.mubr.bf16.gmra.mxu1 %v1286_v47 }
  0xed   : > { %v1087_v48 = vpop.f32.mrf.mxu0  ;;  %v1135_v49 = vpop.f32.mrf.mxu1 }
  0xef   : > { %v1088_v50 = vpop.f32.mrf.mxu0  ;;  %v1136_v51 = vpop.f32.mrf.mxu1 }
  0xf0   : > { %v1089_v52 = vadd.f32 %v1088_v50, %v1087_v48  ;;  %v1137_v53 = vadd.f32 %v1136_v51, %v1135_v49 }
  0xf1   : > { %v1090_v54 = vpop.f32.mrf.mxu0  ;;  %v1138_v55 = vpop.f32.mrf.mxu1 }
  0xf2   : > { %875 = vst [vmem:[%s1439_s28] sm:$0xff] %v1089_v52  ;;  %891 = vst [vmem:[%s1439_s28 + $0x80] sm:$0xff] %v1137_v53 }
  0xf3   : > { %v1091_v56 = vpop.f32.mrf.mxu0  ;;  %v1139_v57 = vpop.f32.mrf.mxu1 }
  0xf4   : > { %v1092_v58 = vadd.f32 %v1091_v56, %v1090_v54  ;;  %v1140_v59 = vadd.f32 %v1139_v57, %v1138_v55 }
  0xf5   : > { %v1093_v60 = vpop.f32.mrf.mxu0  ;;  %v1141_v61 = vpop.f32.mrf.mxu1 }
  0xf6   : > { %876 = vst [vmem:[%s1439_s28 + $0x8] sm:$0xff] %v1092_v58  ;;  %892 = vst [vmem:[%s1439_s28 + $0x88] sm:$0xff] %v1140_v59 }
  0xf7   : > { %v1094_v62 = vpop.f32.mrf.mxu0  ;;  %v1142_v63 = vpop.f32.mrf.mxu1 }
  0xf8   : > { %v1095_v0 = vadd.f32 %v1094_v62, %v1093_v60  ;;  %v1143_v1 = vadd.f32 %v1142_v63, %v1141_v61 }
  0xf9   : > { %v1096_v2 = vpop.f32.mrf.mxu0  ;;  %v1144_v3 = vpop.f32.mrf.mxu1 }
  0xfa   : > { %877 = vst [vmem:[%s1439_s28 + $0x10] sm:$0xff] %v1095_v0  ;;  %893 = vst [vmem:[%s1439_s28 + $0x90] sm:$0xff] %v1143_v1 }
  0xfb   : > { %v1097_v4 = vpop.f32.mrf.mxu0  ;;  %v1145_v5 = vpop.f32.mrf.mxu1 }
  0xfc   : > { %v1098_v6 = vadd.f32 %v1097_v4, %v1096_v2  ;;  %v1146_v7 = vadd.f32 %v1145_v5, %v1144_v3 }
  0xfd   : > { %v1099_v8 = vpop.f32.mrf.mxu0  ;;  %v1147_v9 = vpop.f32.mrf.mxu1 }
  0xfe   : > { %878 = vst [vmem:[%s1439_s28 + $0x18] sm:$0xff] %v1098_v6  ;;  %894 = vst [vmem:[%s1439_s28 + $0x98] sm:$0xff] %v1146_v7 }
  0xff   : > { %v1100_v10 = vpop.f32.mrf.mxu0  ;;  %v1148_v11 = vpop.f32.mrf.mxu1 }
 0x100   : > { %v1101_v12 = vadd.f32 %v1100_v10, %v1099_v8  ;;  %v1149_v13 = vadd.f32 %v1148_v11, %v1147_v9 }
 0x101   : > { %v1102_v14 = vpop.f32.mrf.mxu0  ;;  %v1150_v15 = vpop.f32.mrf.mxu1 }
 0x102   : > { %879 = vst [vmem:[%s1439_s28 + $0x20] sm:$0xff] %v1101_v12  ;;  %895 = vst [vmem:[%s1439_s28 + $0xa0] sm:$0xff] %v1149_v13 }
 0x103   : > { %v1103_v16 = vpop.f32.mrf.mxu0  ;;  %v1151_v17 = vpop.f32.mrf.mxu1 }
 0x104   : > { %v1104_v18 = vadd.f32 %v1103_v16, %v1102_v14  ;;  %v1152_v19 = vadd.f32 %v1151_v17, %v1150_v15 }
 0x105   : > { %v1105_v20 = vpop.f32.mrf.mxu0  ;;  %v1153_v21 = vpop.f32.mrf.mxu1 }
 0x106   : > { %880 = vst [vmem:[%s1439_s28 + $0x28] sm:$0xff] %v1104_v18  ;;  %896 = vst [vmem:[%s1439_s28 + $0xa8] sm:$0xff] %v1152_v19 }
 0x107   : > { %v1106_v22 = vpop.f32.mrf.mxu0  ;;  %v1154_v23 = vpop.f32.mrf.mxu1 }
 0x108   : > { %v1107_v24 = vadd.f32 %v1106_v22, %v1105_v20  ;;  %v1155_v25 = vadd.f32 %v1154_v23, %v1153_v21 }
 0x109   : > { %v1108_v26 = vpop.f32.mrf.mxu0  ;;  %v1156_v27 = vpop.f32.mrf.mxu1 }
 0x10a   : > { %881 = vst [vmem:[%s1439_s28 + $0x30] sm:$0xff] %v1107_v24  ;;  %897 = vst [vmem:[%s1439_s28 + $0xb0] sm:$0xff] %v1155_v25 }
 0x10b   : > { %v1109_v28 = vpop.f32.mrf.mxu0  ;;  %v1157_v29 = vpop.f32.mrf.mxu1 }
 0x10c   : > { %v1110_v30 = vadd.f32 %v1109_v28, %v1108_v26  ;;  %v1158_v31 = vadd.f32 %v1157_v29, %v1156_v27 }
 0x10d   : > { %v1111_v32 = vpop.f32.mrf.mxu0  ;;  %v1159_v33 = vpop.f32.mrf.mxu1 }
 0x10e   : > { %882 = vst [vmem:[%s1439_s28 + $0x38] sm:$0xff] %v1110_v30  ;;  %898 = vst [vmem:[%s1439_s28 + $0xb8] sm:$0xff] %v1158_v31 }
 0x10f   : > { %v1112_v34 = vpop.f32.mrf.mxu0  ;;  %v1160_v35 = vpop.f32.mrf.mxu1 }
 0x110   : > { %v1113_v36 = vadd.f32 %v1112_v34, %v1111_v32  ;;  %v1161_v37 = vadd.f32 %v1160_v35, %v1159_v33 }
 0x111   : > { %v1114_v38 = vpop.f32.mrf.mxu0  ;;  %v1162_v39 = vpop.f32.mrf.mxu1 }
 0x112   : > { %883 = vst [vmem:[%s1439_s28 + $0x40] sm:$0xff] %v1113_v36  ;;  %899 = vst [vmem:[%s1439_s28 + $0xc0] sm:$0xff] %v1161_v37 }
 0x113   : > { %v1115_v40 = vpop.f32.mrf.mxu0  ;;  %v1163_v41 = vpop.f32.mrf.mxu1 }
 0x114   : > { %v1116_v42 = vadd.f32 %v1115_v40, %v1114_v38  ;;  %v1164_v43 = vadd.f32 %v1163_v41, %v1162_v39 }
 0x115   : > { %v1117_v44 = vpop.f32.mrf.mxu0  ;;  %v1165_v45 = vpop.f32.mrf.mxu1 }
 0x116   : > { %884 = vst [vmem:[%s1439_s28 + $0x48] sm:$0xff] %v1116_v42  ;;  %900 = vst [vmem:[%s1439_s28 + $0xc8] sm:$0xff] %v1164_v43 }
 0x117   : > { %v1118_v46 = vpop.f32.mrf.mxu0  ;;  %v1166_v47 = vpop.f32.mrf.mxu1 }
 0x118   : > { %v1119_v48 = vadd.f32 %v1118_v46, %v1117_v44  ;;  %v1167_v49 = vadd.f32 %v1166_v47, %v1165_v45 }
 0x119   : > { %v1120_v50 = vpop.f32.mrf.mxu0  ;;  %v1168_v51 = vpop.f32.mrf.mxu1 }
 0x11a   : > { %885 = vst [vmem:[%s1439_s28 + $0x50] sm:$0xff] %v1119_v48  ;;  %901 = vst [vmem:[%s1439_s28 + $0xd0] sm:$0xff] %v1167_v49 }
 0x11b   : > { %v1121_v52 = vpop.f32.mrf.mxu0  ;;  %v1169_v53 = vpop.f32.mrf.mxu1 }
 0x11c   : > { %v1122_v54 = vadd.f32 %v1121_v52, %v1120_v50  ;;  %v1170_v55 = vadd.f32 %v1169_v53, %v1168_v51 }
 0x11d   : > { %v1123_v56 = vpop.f32.mrf.mxu0  ;;  %v1171_v57 = vpop.f32.mrf.mxu1 }
 0x11e   : > { %886 = vst [vmem:[%s1439_s28 + $0x58] sm:$0xff] %v1122_v54  ;;  %902 = vst [vmem:[%s1439_s28 + $0xd8] sm:$0xff] %v1170_v55 }
 0x11f   : > { %v1124_v58 = vpop.f32.mrf.mxu0  ;;  %v1172_v59 = vpop.f32.mrf.mxu1 }
 0x120   : > { %v1125_v60 = vadd.f32 %v1124_v58, %v1123_v56  ;;  %v1173_v61 = vadd.f32 %v1172_v59, %v1171_v57 }
 0x121   : > { %v1126_v62 = vpop.f32.mrf.mxu0  ;;  %v1174_v63 = vpop.f32.mrf.mxu1 }
 0x122   : > { %887 = vst [vmem:[%s1439_s28 + $0x60] sm:$0xff] %v1125_v60  ;;  %903 = vst [vmem:[%s1439_s28 + $0xe0] sm:$0xff] %v1173_v61 }
 0x123   : > { %v1127_v0 = vpop.f32.mrf.mxu0  ;;  %v1175_v1 = vpop.f32.mrf.mxu1 }
 0x124   : > { %v1128_v2 = vadd.f32 %v1127_v0, %v1126_v62  ;;  %v1176_v3 = vadd.f32 %v1175_v1, %v1174_v63 }
 0x125   : > { %v1129_v4 = vpop.f32.mrf.mxu0  ;;  %v1177_v5 = vpop.f32.mrf.mxu1 }
 0x126   : > { %888 = vst [vmem:[%s1439_s28 + $0x68] sm:$0xff] %v1128_v2  ;;  %904 = vst [vmem:[%s1439_s28 + $0xe8] sm:$0xff] %v1176_v3 }
 0x127   : > { %v1130_v6 = vpop.f32.mrf.mxu0  ;;  %v1178_v7 = vpop.f32.mrf.mxu1 }
 0x128   : > { %v1131_v8 = vadd.f32 %v1130_v6, %v1129_v4  ;;  %v1179_v9 = vadd.f32 %v1178_v7, %v1177_v5 }
 0x129   : > { %v1132_v10 = vpop.f32.mrf.mxu0  ;;  %v1180_v11 = vpop.f32.mrf.mxu1 }
 0x12a   : > { %889 = vst [vmem:[%s1439_s28 + $0x70] sm:$0xff] %v1131_v8  ;;  %905 = vst [vmem:[%s1439_s28 + $0xf0] sm:$0xff] %v1179_v9 }
 0x12b   : > { %v1133_v12 = vpop.f32.mrf.mxu0  ;;  %v1181_v13 = vpop.f32.mrf.mxu1 }
 0x12c   : > { %v1134_v14 = vadd.f32 %v1133_v12, %v1132_v10  ;;  %v1182_v15 = vadd.f32 %v1181_v13, %v1180_v11 }
 0x12e   : > { %890 = vst [vmem:[%s1439_s28 + $0x78] sm:$0xff] %v1134_v14  ;;  %906 = vst [vmem:[%s1439_s28 + $0xf8] sm:$0xff] %v1182_v15 }
 0x12f PF: > { %s12_s11 = sadd.s32 1, %s1309_s11   ;;  %s1485_s9 = smov %s1305_s10 }
 0x130   : > { %p9_p5 = scmp.ge.s32.totalorder %s12_s11, 4   ;;  %s1486_s10 = smov %s1488_s12 }
 0x132   :  { %11 = sbr.rel (!%p9_p5) target bundleno = 2 (0x2), region = 69 }

// kernel: quantized_resnet18_forward.65
= control target key start
LH: loop header
LB: loop body
LE: loop exit
PB: predicated region body
PF: predicated region fallthrough
CT: control target
= control target key end

     0   :  { %s470_s0 = inlined_call_operand.vmem [shape: f32[64,128], index: 0, kind: input, shape index: {}]   ;;  %s471_s1 = inlined_call_operand.vmem [shape: f32[64,128], index: 1, kind: input, shape index: {}]   ;;  %s472_s2 = inlined_call_operand.vmem [shape: f32[64,128], index: 2, kind: input, shape index: {}]   ;;  %s473_s3 = inlined_call_operand.vmem [shape: f32[64,128], index: 3, kind: input, shape index: {}]   ;;  %s474_s4 = inlined_call_operand.vmem [shape: f32[64,128], index: 4, kind: input, shape index: {}]   ;;  %s475_s5 = inlined_call_operand.vmem [shape: f32[64,128], index: 5, kind: input, shape index: {}]   ;;  %s476_s6 = inlined_call_operand.vmem [shape: f32[64,128], index: 6, kind: input, shape index: {}]   ;;  %s477_s7 = inlined_call_operand.vmem [shape: f32[64,128], index: 7, kind: input, shape index: {}]   ;;  %s478_s8 = inlined_call_operand.vmem [shape: f32[64,128], index: 8, kind: input, shape index: {}]   ;;  %s479_s9 = inlined_call_operand.vmem [shape: f32[64,128], index: 9, kind: output, shape index: {}]  }
   0x1   :  { %v32_v0 = vld [vmem:[%s470_s0] sm:$0xff]  ;;  %v33_v6 = vld [vmem:[%s470_s0 + $0x8] sm:$0xff]  ;;  %v34_v15 = vld [vmem:[%s470_s0 + $0x10] sm:$0xff] }
   0x2   :  { %v40_v1 = vld [vmem:[%s471_s1] sm:$0xff]  ;;  %v41_v7 = vld [vmem:[%s471_s1 + $0x8] sm:$0xff]  ;;  %v42_v16 = vld [vmem:[%s471_s1 + $0x10] sm:$0xff] }
   0x3   :  { %v56_v2 = vld [vmem:[%s472_s2] sm:$0xff]  ;;  %v48_v3 = vmax.f32 %v32_v0, %v40_v1  ;;  %v57_v8 = vld [vmem:[%s472_s2 + $0x8] sm:$0xff]  ;;  %v49_v10 = vmax.f32 %v33_v6, %v41_v7  ;;  %v58_v17 = vld [vmem:[%s472_s2 + $0x10] sm:$0xff]  ;;  %v50_v20 = vmax.f32 %v34_v15, %v42_v16 }
   0x4   :  { %v72_v4 = vld [vmem:[%s473_s3] sm:$0xff]  ;;  %v73_v13 = vld [vmem:[%s473_s3 + $0x8] sm:$0xff]  ;;  %v74_v24 = vld [vmem:[%s473_s3 + $0x10] sm:$0xff] }
   0x5   :  { %v64_v5 = vmax.f32 %v48_v3, %v56_v2  ;;  %v88_v9 = vld [vmem:[%s474_s4] sm:$0xff]  ;;  %v65_v14 = vmax.f32 %v49_v10, %v57_v8  ;;  %v89_v19 = vld [vmem:[%s474_s4 + $0x8] sm:$0xff]  ;;  %v66_v26 = vmax.f32 %v50_v20, %v58_v17  ;;  %v35_v27 = vld [vmem:[%s470_s0 + $0x18] sm:$0xff] }
   0x6   :  { %v104_v12 = vld [vmem:[%s475_s5] sm:$0xff]  ;;  %v105_v23 = vld [vmem:[%s475_s5 + $0x8] sm:$0xff]  ;;  %v43_v28 = vld [vmem:[%s471_s1 + $0x18] sm:$0xff] }
   0x7   :  { %v80_v11 = vmax.f32 %v64_v5, %v72_v4  ;;  %v120_v21 = vld [vmem:[%s476_s6] sm:$0xff]  ;;  %v81_v22 = vmax.f32 %v65_v14, %v73_v13  ;;  %v59_v29 = vld [vmem:[%s472_s2 + $0x18] sm:$0xff]  ;;  %v90_v33 = vld [vmem:[%s474_s4 + $0x10] sm:$0xff]  ;;  %v51_v34 = vmax.f32 %v35_v27, %v43_v28  ;;  %v82_v37 = vmax.f32 %v66_v26, %v74_v24 }
   0x8   :  { %v136_v30 = vld [vmem:[%s477_s7] sm:$0xff]  ;;  %v121_v36 = vld [vmem:[%s476_s6 + $0x8] sm:$0xff]  ;;  %v106_v38 = vld [vmem:[%s475_s5 + $0x10] sm:$0xff] }
   0x9   :  { %v96_v18 = vmax.f32 %v80_v11, %v88_v9  ;;  %v152_v31 = vld [vmem:[%s478_s8] sm:$0xff]  ;;  %v97_v32 = vmax.f32 %v81_v22, %v89_v19  ;;  %v75_v39 = vld [vmem:[%s473_s3 + $0x18] sm:$0xff]  ;;  %v67_v41 = vmax.f32 %v51_v34, %v59_v29  ;;  %v137_v46 = vld [vmem:[%s477_s7 + $0x8] sm:$0xff]  ;;  %v98_v48 = vmax.f32 %v82_v37, %v90_v33 }
   0xa   :  { %v36_v42 = vld [vmem:[%s470_s0 + $0x20] sm:$0xff]  ;;  %v153_v47 = vld [vmem:[%s478_s8 + $0x8] sm:$0xff]  ;;  %v91_v49 = vld [vmem:[%s474_s4 + $0x18] sm:$0xff] }
   0xb   :  { %v112_v25 = vmax.f32 %v96_v18, %v104_v12  ;;  %v113_v40 = vmax.f32 %v97_v32, %v105_v23  ;;  %v44_v43 = vld [vmem:[%s471_s1 + $0x20] sm:$0xff]  ;;  %v122_v52 = vld [vmem:[%s476_s6 + $0x10] sm:$0xff]  ;;  %v83_v53 = vmax.f32 %v67_v41, %v75_v39  ;;  %v107_v54 = vld [vmem:[%s475_s5 + $0x18] sm:$0xff]  ;;  %v114_v57 = vmax.f32 %v98_v48, %v106_v38 }
   0xc   :  { %v60_v44 = vld [vmem:[%s472_s2 + $0x20] sm:$0xff]  ;;  %v52_v50 = vmax.f32 %v36_v42, %v44_v43  ;;  %v37_v59 = vld [vmem:[%s470_s0 + $0x28] sm:$0xff]  ;;  %v138_v63 = vld [vmem:[%s477_s7 + $0x10] sm:$0xff] }
   0xd   :  { %v128_v35 = vmax.f32 %v112_v25, %v120_v21  ;;  %v129_v51 = vmax.f32 %v113_v40, %v121_v36  ;;  %v76_v55 = vld [vmem:[%s473_s3 + $0x20] sm:$0xff]  ;;  %v45_v60 = vld [vmem:[%s471_s1 + $0x28] sm:$0xff]  ;;  %v154_v0 = vld [vmem:[%s478_s8 + $0x10] sm:$0xff]  ;;  %v99_v1 = vmax.f32 %v83_v53, %v91_v49  ;;  %v130_v4 = vmax.f32 %v114_v57, %v122_v52 }
   0xe   :  { %v68_v58 = vmax.f32 %v52_v50, %v60_v44  ;;  %v61_v61 = vld [vmem:[%s472_s2 + $0x28] sm:$0xff]  ;;  %v92_v2 = vld [vmem:[%s474_s4 + $0x20] sm:$0xff]  ;;  %v53_v3 = vmax.f32 %v37_v59, %v45_v60  ;;  %v123_v5 = vld [vmem:[%s476_s6 + $0x18] sm:$0xff] }
   0xf   :  { %v144_v45 = vmax.f32 %v128_v35, %v136_v30  ;;  %v145_v62 = vmax.f32 %v129_v51, %v137_v46  ;;  %v108_v7 = vld [vmem:[%s475_s5 + $0x20] sm:$0xff]  ;;  %v77_v8 = vld [vmem:[%s473_s3 + $0x28] sm:$0xff]  ;;  %v115_v10 = vmax.f32 %v99_v1, %v107_v54  ;;  %v38_v12 = vld [vmem:[%s470_s0 + $0x30] sm:$0xff]  ;;  %v146_v15 = vmax.f32 %v130_v4, %v138_v63 }
  0x10   :  { %v84_v6 = vmax.f32 %v68_v58, %v76_v55  ;;  %v69_v11 = vmax.f32 %v53_v3, %v61_v61  ;;  %v46_v13 = vld [vmem:[%s471_s1 + $0x30] sm:$0xff]  ;;  %v139_v16 = vld [vmem:[%s477_s7 + $0x18] sm:$0xff]  ;;  %v93_v19 = vld [vmem:[%s474_s4 + $0x28] sm:$0xff] }
  0x11   :  { %v160_v56 = vmax.f32 %v144_v45, %v152_v31  ;;  %v161_v9 = vmax.f32 %v145_v62, %v153_v47  ;;  %v62_v14 = vld [vmem:[%s472_s2 + $0x30] sm:$0xff]  ;;  %v155_v17 = vld [vmem:[%s478_s8 + $0x18] sm:$0xff]  ;;  %v54_v20 = vmax.f32 %v38_v12, %v46_v13  ;;  %v131_v21 = vmax.f32 %v115_v10, %v123_v5  ;;  %v124_v22 = vld [vmem:[%s476_s6 + $0x20] sm:$0xff] }
  0x12   :  { %v100_v18 = vmax.f32 %v84_v6, %v92_v2  ;;  %v85_v23 = vmax.f32 %v69_v11, %v77_v8  ;;  %v109_v24 = vld [vmem:[%s475_s5 + $0x28] sm:$0xff]  ;;  %v78_v25 = vld [vmem:[%s473_s3 + $0x30] sm:$0xff]  ;;  %v162_v26 = vmax.f32 %v146_v15, %v154_v0  ;;  %v39_v29 = vld [vmem:[%s470_s0 + $0x38] sm:$0xff] }
  0x13   :  { %168 = vst [vmem:[%s479_s9] sm:$0xff] %v160_v56  ;;  %169 = vst [vmem:[%s479_s9 + $0x8] sm:$0xff] %v161_v9  ;;  %v70_v28 = vmax.f32 %v54_v20, %v62_v14  ;;  %v47_v30 = vld [vmem:[%s471_s1 + $0x38] sm:$0xff]  ;;  %v147_v32 = vmax.f32 %v131_v21, %v139_v16  ;;  %v140_v33 = vld [vmem:[%s477_s7 + $0x20] sm:$0xff] }
  0x14   :  { %v116_v27 = vmax.f32 %v100_v18, %v108_v7  ;;  %v63_v31 = vld [vmem:[%s472_s2 + $0x38] sm:$0xff]  ;;  %v101_v34 = vmax.f32 %v85_v23, %v93_v19  ;;  %v94_v35 = vld [vmem:[%s474_s4 + $0x30] sm:$0xff]  ;;  %v55_v36 = vmax.f32 %v39_v29, %v47_v30  ;;  %170 = vst [vmem:[%s479_s9 + $0x10] sm:$0xff] %v162_v26  ;;  %v125_v38 = vld [vmem:[%s476_s6 + $0x28] sm:$0xff] }
  0x15   :  { %v86_v39 = vmax.f32 %v70_v28, %v78_v25  ;;  %v79_v40 = vld [vmem:[%s473_s3 + $0x38] sm:$0xff]  ;;  %v163_v41 = vmax.f32 %v147_v32, %v155_v17  ;;  %v156_v42 = vld [vmem:[%s478_s8 + $0x20] sm:$0xff]  ;;  %v110_v44 = vld [vmem:[%s475_s5 + $0x30] sm:$0xff] }
  0x16   :  { %v132_v37 = vmax.f32 %v116_v27, %v124_v22  ;;  %v117_v43 = vmax.f32 %v101_v34, %v109_v24  ;;  %v71_v45 = vmax.f32 %v55_v36, %v63_v31  ;;  %v141_v47 = vld [vmem:[%s477_s7 + $0x28] sm:$0xff]  ;;  %v95_v49 = vld [vmem:[%s474_s4 + $0x38] sm:$0xff]  ;;  %v126_v51 = vld [vmem:[%s476_s6 + $0x30] sm:$0xff] }
  0x17   :  { %v102_v48 = vmax.f32 %v86_v39, %v94_v35  ;;  %171 = vst [vmem:[%s479_s9 + $0x18] sm:$0xff] %v163_v41  ;;  %v157_v54 = vld [vmem:[%s478_s8 + $0x28] sm:$0xff]  ;;  %v111_v56 = vld [vmem:[%s475_s5 + $0x38] sm:$0xff]  ;;  %v142_v58 = vld [vmem:[%s477_s7 + $0x30] sm:$0xff] }
  0x18   :  { %v148_v46 = vmax.f32 %v132_v37, %v140_v33  ;;  %v133_v50 = vmax.f32 %v117_v43, %v125_v38  ;;  %v87_v52 = vmax.f32 %v71_v45, %v79_v40  ;;  %v127_v61 = vld [vmem:[%s476_s6 + $0x38] sm:$0xff]  ;;  %v158_v63 = vld [vmem:[%s478_s8 + $0x30] sm:$0xff] }
  0x19   :  { %v118_v55 = vmax.f32 %v102_v48, %v110_v44  ;;  %v143_v2 = vld [vmem:[%s477_s7 + $0x38] sm:$0xff] }
  0x1a   :  { %v164_v53 = vmax.f32 %v148_v46, %v156_v42  ;;  %v149_v57 = vmax.f32 %v133_v50, %v141_v47  ;;  %v103_v59 = vmax.f32 %v87_v52, %v95_v49  ;;  %v159_v5 = vld [vmem:[%s478_s8 + $0x38] sm:$0xff] }
  0x1b   :  { %v134_v60 = vmax.f32 %v118_v55, %v126_v51 }
  0x1c   :  { %172 = vst [vmem:[%s479_s9 + $0x20] sm:$0xff] %v164_v53  ;;  %v165_v62 = vmax.f32 %v149_v57, %v157_v54  ;;  %v119_v0 = vmax.f32 %v103_v59, %v111_v56 }
  0x1d   :  { %v150_v1 = vmax.f32 %v134_v60, %v142_v58 }
  0x1e   :  { %173 = vst [vmem:[%s479_s9 + $0x28] sm:$0xff] %v165_v62  ;;  %v135_v3 = vmax.f32 %v119_v0, %v127_v61 }
  0x1f   :  { %v166_v4 = vmax.f32 %v150_v1, %v158_v63 }
  0x20   :  { %v151_v6 = vmax.f32 %v135_v3, %v143_v2 }
  0x21   :  { %174 = vst [vmem:[%s479_s9 + $0x30] sm:$0xff] %v166_v4 }
  0x22   :  { %v167_v7 = vmax.f32 %v151_v6, %v159_v5 }
  0x24   :  { %175 = vst [vmem:[%s479_s9 + $0x38] sm:$0xff] %v167_v7 }

// kernel: quantized_resnet18_forward.66
= control target key start
LH: loop header
LB: loop body
LE: loop exit
PB: predicated region body
PF: predicated region fallthrough
CT: control target
= control target key end

     0   :  { %s950_s9 = smov 0   ;;  %s952_s10 = smov 0   ;;  %s1103_s0 = inlined_call_operand.vmem [shape: bf16[128,640], index: 0, kind: input, shape index: {}]   ;;  %s1104_s1 = inlined_call_operand.vmem [shape: bf16[640,128], index: 1, kind: input, shape index: {}]   ;;  %s1105_s2 = inlined_call_operand.vmem [shape: f32[128,128], index: 2, kind: output, shape index: {}]  }
   0x1   :  { %s954_s11 = smov 0   ;;  %s956_s12 = smov 0  }
   0x2   :  { %s958_s13 = smov 0  }
   0x3 LB: > { %s24_s14 = sadd.s32 1, %s928_s12  ;;  %p47_p1 = scmp.ne.s32.totalorder %s920_s10, %s916_s9  ;;  %s932_s13 = sphi %s958_s13, %s12_s13   ;;  %s928_s12 = sphi %s956_s12, %s1109_s12   ;;  %s924_s11 = sphi %s954_s11, %s1108_s11   ;;  %s920_s10 = sphi %s952_s10, %s1107_s10   ;;  %s916_s9 = sphi %s950_s9, %s1106_s9  }
   0x4   : > { %p25_p0 = scmp.ge.s32.totalorder %s24_s14, 5  ;;  %p48_p2 = scmp.eq.s32.totalorder %s932_s13, 0 }
   0x5   : > { %s40_s16 = sadd.s32 1, %s920_s10  ;;  %p744_p5 = scmp.ge.s32.totalorder %s932_s13, 5 }
   0x6   : > { %s1111_s14 = smov (%p25_p0, %s24_s14), 0  ;;  %p49_p3 = por %p48_p2, %p47_p1 }
   0x7   : > { %s36_s15 = ssub.s32 %s928_s12, %s1111_s14  ;;  %129 = sbr.rel (%p744_p5) target bundleno = 26 (0x1a), region = 16 }
   0x8   : > { %p38_p4 = scmp.eq.s32.totalorder %s36_s15, 0 }
   0xa   : > { %s985_s17 = scalar_select %p38_p4, %s920_s10, %s40_s16  }
   0xc   : > { %132 = sbr.rel (!%p49_p3) target bundleno = 26 (0x1a), region = 20  ;;  %s134_s18 = sand.u32 (%p49_p3), 1, %s920_s10  }
   0xd   : > { %s746_s19 = sshll.u32 (%p49_p3), %s928_s12, 2  ;;  %s745_s20 = sshll.u32 (%p49_p3), %s134_s18, 6 }
   0xe   : > { %s993_s23 = scalar_lea.vmem (%p49_p3), %s1103_s0, %s746_s19  ;;  %s136_s24 = scalar_lea.vmem (%p49_p3), [#allocation3], %s745_s20 }
   0xf   : > { %v158_v0 = vld [vmem:[%s993_s23] sm:$0xf] (%p49_p3)  ;;  %v160_v1 = vld [vmem:[%s993_s23 + $0x14] sm:$0xf] (%p49_p3)  ;;  %v162_v2 = vld [vmem:[%s993_s23 + $0x28] sm:$0xf] (%p49_p3) }
  0x10   : > { %159 = vst [vmem:[%s136_s24] sm:$0xf] (%p49_p3), %v158_v0  ;;  %161 = vst [vmem:[%s136_s24 + $0x4] sm:$0xf] (%p49_p3), %v160_v1  ;;  %v164_v3 = vld [vmem:[%s993_s23 + $0x3c] sm:$0xf] (%p49_p3) }
  0x11   : > { %v166_v4 = vld [vmem:[%s993_s23 + $0x50] sm:$0xf]  ;;  %163 = vst [vmem:[%s136_s24 + $0x8] sm:$0xf] %v162_v2  ;;  %165 = vst [vmem:[%s136_s24 + $0xc] sm:$0xf] %v164_v3 }
  0x12   : > { %167 = vst [vmem:[%s136_s24 + $0x10] sm:$0xf] %v166_v4  ;;  %v168_v5 = vld [vmem:[%s993_s23 + $0x64] sm:$0xf]  ;;  %v170_v6 = vld [vmem:[%s993_s23 + $0x78] sm:$0xf] }
  0x13   : > { %v172_v7 = vld [vmem:[%s993_s23 + $0x8c] sm:$0xf]  ;;  %169 = vst [vmem:[%s136_s24 + $0x14] sm:$0xf] %v168_v5  ;;  %171 = vst [vmem:[%s136_s24 + $0x18] sm:$0xf] %v170_v6 }
  0x14   : > { %173 = vst [vmem:[%s136_s24 + $0x1c] sm:$0xf] %v172_v7  ;;  %v174_v8 = vld [vmem:[%s993_s23 + $0xa0] sm:$0xf]  ;;  %v176_v9 = vld [vmem:[%s993_s23 + $0xb4] sm:$0xf] }
  0x15   : > { %v178_v10 = vld [vmem:[%s993_s23 + $0xc8] sm:$0xf]  ;;  %175 = vst [vmem:[%s136_s24 + $0x20] sm:$0xf] %v174_v8  ;;  %177 = vst [vmem:[%s136_s24 + $0x24] sm:$0xf] %v176_v9 }
  0x16   : > { %179 = vst [vmem:[%s136_s24 + $0x28] sm:$0xf] %v178_v10  ;;  %v180_v11 = vld [vmem:[%s993_s23 + $0xdc] sm:$0xf]  ;;  %v182_v12 = vld [vmem:[%s993_s23 + $0xf0] sm:$0xf] }
  0x17   : > { %v184_v13 = vld [vmem:[%s993_s23 + $0x104] sm:$0xf]  ;;  %181 = vst [vmem:[%s136_s24 + $0x2c] sm:$0xf] %v180_v11  ;;  %183 = vst [vmem:[%s136_s24 + $0x30] sm:$0xf] %v182_v12 }
  0x18   : > { %185 = vst [vmem:[%s136_s24 + $0x34] sm:$0xf] %v184_v13  ;;  %v186_v14 = vld [vmem:[%s993_s23 + $0x118] sm:$0xf]  ;;  %v188_v15 = vld [vmem:[%s993_s23 + $0x12c] sm:$0xf] }
  0x19   : > { %187 = vst [vmem:[%s136_s24 + $0x38] sm:$0xf] %v186_v14  ;;  %189 = vst [vmem:[%s136_s24 + $0x3c] sm:$0xf] %v188_v15 }
  0x1a PF: > { %p747_p6 = scmp.ge.s32.totalorder %s932_s13, 1  ;;  %p256_p7 = scmp.lt.s32.totalorder %s932_s13, 6 }
  0x1c   : > { %p257_p8 = pnand %p747_p6, %p256_p7 }
  0x1d   : > { %s263_s25 = sand.u32 (!%p257_p8), 1, %s916_s9   ;;  %s749_s26 = sshll.u32 (!%p257_p8), %s924_s11, 4 }
  0x1e   : > { %260 = sbr.rel (%p257_p8) target bundleno = 301 (0x12d), region = 65  ;;  %s748_s27 = sshll.u32 (!%p257_p8), %s263_s25, 6 }
  0x1f   : > { %p297_p9 = scmp.lt.s32.totalorder (!%p257_p8), %s749_s26, 79  ;;  %s1020_s4 = scalar_lea.vmem (!%p257_p8), [#allocation3], %s748_s27 }
  0x20   : > { %p751_p10 = scmp.ne.s32.totalorder (!%p257_p8), %s924_s11, 0 }
  0x23   : > { %s1113_s26 = smov (!%p297_p9, %s749_s26), 79  ;;  %318 = sbr.rel (%p751_p10) target bundleno = 49 (0x31), region = 73 }
  0x24   : > { %s750_s28 = sshll.u32 %s1113_s26, 2 }
  0x25   : > { %s1018_s3 = scalar_lea.vmem %s1104_s1, %s750_s28 }
  0x28   : > { %v934_v16 = vmov 0.0  }
  0x29   : > { %319 = vst [vmem:[#allocation2 + $0x30] sm:$0xff] %v934_v16  ;;  %320 = vst [vmem:[#allocation2] sm:$0xff] %v934_v16 }
  0x2a   : > { %321 = vst [vmem:[#allocation2 + $0x58] sm:$0xff] %v934_v16  ;;  %322 = vst [vmem:[#allocation2 + $0x18] sm:$0xff] %v934_v16 }
  0x2b   : > { %323 = vst [vmem:[#allocation2 + $0x50] sm:$0xff] %v934_v16  ;;  %324 = vst [vmem:[#allocation2 + $0x68] sm:$0xff] %v934_v16 }
  0x2c   : > { %325 = vst [vmem:[#allocation2 + $0x8] sm:$0xff] %v934_v16  ;;  %326 = vst [vmem:[#allocation2 + $0x48] sm:$0xff] %v934_v16 }
  0x2d   : > { %327 = vst [vmem:[#allocation2 + $0x40] sm:$0xff] %v934_v16  ;;  %328 = vst [vmem:[#allocation2 + $0x20] sm:$0xff] %v934_v16 }
  0x2e   : > { %329 = vst [vmem:[#allocation2 + $0x10] sm:$0xff] %v934_v16  ;;  %330 = vst [vmem:[#allocation2 + $0x38] sm:$0xff] %v934_v16 }
  0x2f   : > { %331 = vst [vmem:[#allocation2 + $0x60] sm:$0xff] %v934_v16  ;;  %332 = vst [vmem:[#allocation2 + $0x70] sm:$0xff] %v934_v16 }
  0x30   : > { %333 = vst [vmem:[#allocation2 + $0x78] sm:$0xff] %v934_v16  ;;  %334 = vst [vmem:[#allocation2 + $0x28] sm:$0xff] %v934_v16 }
  0x31 PF: > { %v878_v17 = vld [vmem:[%s1018_s3 + $0x38] sm:$0xff]   ;;  %v879_v18 = vld [vmem:[%s1018_s3 + $0x30] sm:$0xff]   ;;  %v880_v19 = vld [vmem:[%s1018_s3 + $0x28] sm:$0xff]   ;;  %p768_p11 = scmp.ne.s32.totalorder %s924_s11, 4 }
  0x32   : > { %789 = vmatprep.subr.bf16.mxu0 %v878_v17  ;;  %821 = vmatprep.subr.bf16.mxu1 %v878_v17  ;;  %v881_v20 = vld [vmem:[%s1018_s3 + $0x20] sm:$0xff]   ;;  %v882_v23 = vld [vmem:[%s1018_s3 + $0x18] sm:$0xff]   ;;  %v883_v24 = vld [vmem:[%s1018_s3 + $0x10] sm:$0xff]  }
  0x33   : > { %790 = vmatpush3.bf16.msra.mxu0 %v878_v17  ;;  %829 = vmatpush3.bf16.msra.mxu1 %v878_v17  ;;  %v886_v21 = vld [vmem:[%s1020_s4] sm:$0xff]   ;;  %v884_v25 = vld [vmem:[%s1018_s3 + $0x8] sm:$0xff]   ;;  %v890_v29 = vld [vmem:[%s1020_s4 + $0x10] sm:$0xff]  }
  0x34   : > { %791 = vmatprep.subr.bf16.mxu0 %v879_v18  ;;  %822 = vmatprep.subr.bf16.mxu1 %v879_v18  ;;  %v887_v22 = vld [vmem:[%s1020_s4 + $0x20] sm:$0xff]   ;;  %v888_v27 = vld [vmem:[%s1020_s4 + $0x8] sm:$0xff]   ;;  %v891_v30 = vld [vmem:[%s1020_s4 + $0x30] sm:$0xff]  }
  0x35   : > { %805 = vmatprep.mubr.bf16.mxu0 %v886_v21  ;;  %813 = vmatprep.mubr.bf16.mxu1 %v887_v22  ;;  %v885_v26 = vld [vmem:[%s1018_s3] sm:$0xff]   ;;  %v889_v28 = vld [vmem:[%s1020_s4 + $0x28] sm:$0xff]   ;;  %v892_v31 = vld [vmem:[%s1020_s4 + $0x18] sm:$0xff]  }
  0x36   : > { %v893_v32 = vld [vmem:[%s1020_s4 + $0x38] sm:$0xff]   ;;  %v345_v34 = vld [vmem:[#allocation2 + $0x10] sm:$0xff]  ;;  %v343_v38 = vld [vmem:[#allocation2 + $0x40] sm:$0xff] }
  0x37   : > { %792 = vmatpush3.bf16.msra.mxu0 %v879_v18  ;;  %830 = vmatpush3.bf16.msra.mxu1 %v879_v18  ;;  %v337_v33 = vld [vmem:[#allocation2 + $0x58] sm:$0xff]  ;;  %v335_v37 = vld [vmem:[#allocation2 + $0x30] sm:$0xff]  ;;  %v336_v49 = vld [vmem:[#allocation2] sm:$0xff] }
  0x38   : > { %793 = vmatprep.subr.bf16.mxu0 %v880_v19  ;;  %823 = vmatprep.subr.bf16.mxu1 %v880_v19  ;;  %v338_v43 = vld [vmem:[#allocation2 + $0x18] sm:$0xff]  ;;  %v344_v50 = vld [vmem:[#allocation2 + $0x20] sm:$0xff]  ;;  %v341_v55 = vld [vmem:[#allocation2 + $0x8] sm:$0xff] }
  0x39   : > { %v346_v44 = vld [vmem:[#allocation2 + $0x38] sm:$0xff]  ;;  %v339_v61 = vld [vmem:[#allocation2 + $0x50] sm:$0xff]  ;;  %v347_v62 = vld [vmem:[#allocation2 + $0x60] sm:$0xff] }
  0x3a   : > { %v349_v56 = vld [vmem:[#allocation2 + $0x78] sm:$0xff]  ;;  %v342_v3 = vld [vmem:[#allocation2 + $0x48] sm:$0xff]  ;;  %v348_v10 = vld [vmem:[#allocation2 + $0x70] sm:$0xff] }
  0x3b   : > { %794 = vmatpush3.bf16.msra.mxu0 %v880_v19  ;;  %831 = vmatpush3.bf16.msra.mxu1 %v880_v19  ;;  %v350_v4 = vld [vmem:[#allocation2 + $0x28] sm:$0xff] }
  0x3c   : > { %795 = vmatprep.subr.bf16.mxu0 %v881_v20  ;;  %824 = vmatprep.subr.bf16.mxu1 %v881_v20  ;;  %v340_v9 = vld [vmem:[#allocation2 + $0x68] sm:$0xff] }
  0x3f   : > { %796 = vmatpush3.bf16.msra.mxu0 %v881_v20  ;;  %832 = vmatpush3.bf16.msra.mxu1 %v881_v20 }
  0x40   : > { %797 = vmatprep.subr.bf16.mxu0 %v882_v23  ;;  %825 = vmatprep.subr.bf16.mxu1 %v882_v23 }
  0x43   : > { %798 = vmatpush3.bf16.msra.mxu0 %v882_v23  ;;  %833 = vmatpush3.bf16.msra.mxu1 %v882_v23 }
  0x44   : > { %799 = vmatprep.subr.bf16.mxu0 %v883_v24  ;;  %826 = vmatprep.subr.bf16.mxu1 %v883_v24 }
  0x47   : > { %800 = vmatpush3.bf16.msra.mxu0 %v883_v24  ;;  %834 = vmatpush3.bf16.msra.mxu1 %v883_v24 }
  0x48   : > { %801 = vmatprep.subr.bf16.mxu0 %v884_v25  ;;  %827 = vmatprep.subr.bf16.mxu1 %v884_v25 }
  0x4b   : > { %802 = vmatpush3.bf16.msra.mxu0 %v884_v25  ;;  %835 = vmatpush3.bf16.msra.mxu1 %v884_v25 }
  0x4c   : > { %803 = vmatprep.subr.bf16.mxu0 %v885_v26  ;;  %828 = vmatprep.subr.bf16.mxu1 %v885_v26 }
  0x4f   : > { %804 = vmatpush3.bf16.msra.mxu0 %v885_v26  ;;  %836 = vmatpush3.bf16.msra.mxu1 %v885_v26 }
  0x52   : > { %806 = vmatmul.mubr.bf16.vlgmr.msra.gmra.mxu0 %v888_v27  ;;  %814 = vmatmul.mubr.bf16.vlgmr.msra.gmra.mxu1 %v889_v28 }
  0x53   : > { %809 = vmatprep.mubr.bf16.mxu0 %v890_v29  ;;  %817 = vmatprep.mubr.bf16.mxu1 %v891_v30 }
  0x5a   : > { %810 = vmatmul.mubr.bf16.gmra.mxu0 %v892_v31  ;;  %818 = vmatmul.mubr.bf16.gmra.mxu1 %v893_v32 }
 0x112   : > { %v807_v35 = vpop.f32.mrf.mxu0  ;;  %v815_v36 = vpop.f32.mrf.mxu1 }
 0x113   : > { %v578_v39 = vadd.f32 %v807_v35, %v337_v33  ;;  %v586_v40 = vadd.f32 %v815_v36, %v345_v34 }
 0x114   : > { %v513_v41 = vpop.f32.mrf.mxu0  ;;  %v545_v42 = vpop.f32.mrf.mxu1 }
 0x115   : > { %594 = vst [vmem:[#allocation2 + $0x58] sm:$0xff] %v578_v39  ;;  %602 = vst [vmem:[#allocation2 + $0x10] sm:$0xff] %v586_v40  ;;  %v576_v45 = vadd.f32 %v513_v41, %v335_v37  ;;  %v584_v46 = vadd.f32 %v545_v42, %v343_v38 }
 0x116   : > { %v808_v47 = vpop.f32.mrf.mxu0  ;;  %v816_v48 = vpop.f32.mrf.mxu1 }
 0x117   : > { %592 = vst [vmem:[#allocation2 + $0x30] sm:$0xff] %v576_v45  ;;  %600 = vst [vmem:[#allocation2 + $0x40] sm:$0xff] %v584_v46  ;;  %v579_v51 = vadd.f32 %v808_v47, %v338_v43  ;;  %v587_v52 = vadd.f32 %v816_v48, %v346_v44 }
 0x118   : > { %v516_v53 = vpop.f32.mrf.mxu0  ;;  %v548_v54 = vpop.f32.mrf.mxu1 }
 0x119   : > { %595 = vst [vmem:[#allocation2 + $0x18] sm:$0xff] %v579_v51  ;;  %603 = vst [vmem:[#allocation2 + $0x38] sm:$0xff] %v587_v52  ;;  %v577_v57 = vadd.f32 %v516_v53, %v336_v49  ;;  %v585_v58 = vadd.f32 %v548_v54, %v344_v50 }
 0x11a   : > { %v811_v59 = vpop.f32.mrf.mxu0  ;;  %v819_v60 = vpop.f32.mrf.mxu1 }
 0x11b   : > { %593 = vst [vmem:[#allocation2] sm:$0xff] %v577_v57  ;;  %601 = vst [vmem:[#allocation2 + $0x20] sm:$0xff] %v585_v58  ;;  %v582_v63 = vadd.f32 %v811_v59, %v341_v55  ;;  %v590_v0 = vadd.f32 %v819_v60, %v349_v56 }
 0x11c   : > { %v529_v1 = vpop.f32.mrf.mxu0  ;;  %v561_v2 = vpop.f32.mrf.mxu1 }
 0x11d   : > { %598 = vst [vmem:[#allocation2 + $0x8] sm:$0xff] %v582_v63  ;;  %606 = vst [vmem:[#allocation2 + $0x78] sm:$0xff] %v590_v0  ;;  %v580_v5 = vadd.f32 %v529_v1, %v339_v61  ;;  %v588_v6 = vadd.f32 %v561_v2, %v347_v62 }
 0x11e   : > { %v812_v7 = vpop.f32.mrf.mxu0  ;;  %v820_v8 = vpop.f32.mrf.mxu1 }
 0x11f   : > { %596 = vst [vmem:[#allocation2 + $0x50] sm:$0xff] %v580_v5  ;;  %604 = vst [vmem:[#allocation2 + $0x60] sm:$0xff] %v588_v6  ;;  %v583_v11 = vadd.f32 %v812_v7, %v342_v3  ;;  %v591_v12 = vadd.f32 %v820_v8, %v350_v4  ;;  %611 = sbr.rel (%p768_p11) target bundleno = 301 (0x12d), region = 77 }
 0x120   : > { %v532_v13 = vpop.f32.mrf.mxu0  ;;  %v564_v14 = vpop.f32.mrf.mxu1 }
 0x121   : > { %599 = vst [vmem:[#allocation2 + $0x48] sm:$0xff] %v583_v11  ;;  %607 = vst [vmem:[#allocation2 + $0x28] sm:$0xff] %v591_v12  ;;  %v581_v15 = vadd.f32 %v532_v13, %v340_v9  ;;  %v589_v16 = vadd.f32 %v564_v14, %v348_v10 }
 0x123   : > { %597 = vst [vmem:[#allocation2 + $0x68] sm:$0xff] %v581_v15  ;;  %605 = vst [vmem:[#allocation2 + $0x70] sm:$0xff] %v589_v16 }
 0x124   : > { %v612_v17 = vld [vmem:[#allocation2 + $0x30] sm:$0xff]  ;;  %v613_v18 = vld [vmem:[#allocation2] sm:$0xff]  ;;  %v614_v19 = vld [vmem:[#allocation2 + $0x58] sm:$0xff] }
 0x125   : > { %628 = vst [vmem:[%s1105_s2] sm:$0xff] %v612_v17  ;;  %629 = vst [vmem:[%s1105_s2 + $0x8] sm:$0xff] %v613_v18  ;;  %v615_v20 = vld [vmem:[#allocation2 + $0x18] sm:$0xff]  ;;  %v618_v23 = vld [vmem:[#allocation2 + $0x8] sm:$0xff] }
 0x126   : > { %630 = vst [vmem:[%s1105_s2 + $0x10] sm:$0xff] %v614_v19  ;;  %v616_v21 = vld [vmem:[#allocation2 + $0x50] sm:$0xff]  ;;  %631 = vst [vmem:[%s1105_s2 + $0x18] sm:$0xff] %v615_v20  ;;  %v620_v25 = vld [vmem:[#allocation2 + $0x40] sm:$0xff] }
 0x127   : > { %632 = vst [vmem:[%s1105_s2 + $0x20] sm:$0xff] %v616_v21  ;;  %634 = vst [vmem:[%s1105_s2 + $0x30] sm:$0xff] %v618_v23  ;;  %v621_v26 = vld [vmem:[#allocation2 + $0x20] sm:$0xff]  ;;  %v622_v27 = vld [vmem:[#allocation2 + $0x10] sm:$0xff] }
 0x128   : > { %v619_v24 = vld [vmem:[#allocation2 + $0x48] sm:$0xff]  ;;  %636 = vst [vmem:[%s1105_s2 + $0x40] sm:$0xff] %v620_v25  ;;  %v623_v28 = vld [vmem:[#allocation2 + $0x38] sm:$0xff]  ;;  %637 = vst [vmem:[%s1105_s2 + $0x48] sm:$0xff] %v621_v26 }
 0x129   : > { %635 = vst [vmem:[%s1105_s2 + $0x38] sm:$0xff] %v619_v24  ;;  %638 = vst [vmem:[%s1105_s2 + $0x50] sm:$0xff] %v622_v27  ;;  %v624_v29 = vld [vmem:[#allocation2 + $0x60] sm:$0xff]  ;;  %v626_v31 = vld [vmem:[#allocation2 + $0x78] sm:$0xff] }
 0x12a   : > { %v617_v22 = vld [vmem:[#allocation2 + $0x68] sm:$0xff]  ;;  %639 = vst [vmem:[%s1105_s2 + $0x58] sm:$0xff] %v623_v28  ;;  %v625_v30 = vld [vmem:[#allocation2 + $0x70] sm:$0xff]  ;;  %640 = vst [vmem:[%s1105_s2 + $0x60] sm:$0xff] %v624_v29 }
 0x12b   : > { %633 = vst [vmem:[%s1105_s2 + $0x28] sm:$0xff] %v617_v22  ;;  %641 = vst [vmem:[%s1105_s2 + $0x68] sm:$0xff] %v625_v30  ;;  %v627_v32 = vld [vmem:[#allocation2 + $0x28] sm:$0xff] }
 0x12c   : > { %642 = vst [vmem:[%s1105_s2 + $0x70] sm:$0xff] %v626_v31  ;;  %643 = vst [vmem:[%s1105_s2 + $0x78] sm:$0xff] %v627_v32 }
 0x12d PF: > { %s12_s13 = sadd.s32 1, %s932_s13   ;;  %s1106_s9 = smov %s920_s10 }
 0x12e   : > { %p9_p12 = scmp.ge.s32.totalorder %s12_s13, 7   ;;  %s1107_s10 = smov %s985_s17 }
 0x12f   : > { %s1108_s11 = smov %s928_s12  ;;  %s1109_s12 = smov %s1111_s14 }
 0x130   :  { %11 = sbr.rel (!%p9_p12) target bundleno = 3 (0x3), region = 115 }

// kernel: quantized_resnet18_forward.67
= control target key start
LH: loop header
LB: loop body
LE: loop exit
PB: predicated region body
PF: predicated region fallthrough
CT: control target
= control target key end

     0   :  { %v73_v0 = vmov 0.0   ;;  %s131_s1 = inlined_call_operand.vmem [shape: f32[1,128], index: 1, kind: output, shape index: {0}]   ;;  %s132_s2 = inlined_call_operand.vmem [shape: f32[1,128], index: 2, kind: output, shape index: {1}]   ;;  %s133_s0 = inlined_call_operand.vmem [shape: f32[64,128], index: 0, kind: input, shape index: {}]  }
   0x1   :  { %14 = vst [vmem:[%s131_s1] sm:$0x1] %v73_v0  ;;  %15 = vst [vmem:[%s132_s2] sm:$0x1] %v73_v0  ;;  %v16_v1 = vld [vmem:[%s133_s0] sm:$0xff]  ;;  %v17_v2 = vld [vmem:[%s133_s0 + $0x8] sm:$0xff] }
   0x2   :  { %v18_v3 = vld [vmem:[%s133_s0 + $0x10] sm:$0xff]  ;;  %v19_v4 = vld [vmem:[%s133_s0 + $0x18] sm:$0xff]  ;;  %v25_v5 = vadd.f32 %v17_v2, %v16_v1  ;;  %v41_v6 = vmul.f32 %v16_v1, %v16_v1  ;;  %v42_v7 = vmul.f32 %v17_v2, %v17_v2  ;;  %v20_v9 = vld [vmem:[%s133_s0 + $0x20] sm:$0xff] }
   0x3   :  { %v43_v8 = vmul.f32 %v18_v3, %v18_v3  ;;  %v44_v11 = vmul.f32 %v19_v4, %v19_v4  ;;  %v21_v13 = vld [vmem:[%s133_s0 + $0x28] sm:$0xff]  ;;  %v45_v15 = vmul.f32 %v20_v9, %v20_v9  ;;  %v22_v17 = vld [vmem:[%s133_s0 + $0x30] sm:$0xff]  ;;  %v23_v21 = vld [vmem:[%s133_s0 + $0x38] sm:$0xff] }
   0x4   :  { %v26_v10 = vadd.f32 %v25_v5, %v18_v3  ;;  %v49_v12 = vadd.f32 %v42_v7, %v41_v6  ;;  %v46_v19 = vmul.f32 %v21_v13, %v21_v13  ;;  %v47_v23 = vmul.f32 %v22_v17, %v22_v17 }
   0x5   :  { %v48_v26 = vmul.f32 %v23_v21, %v23_v21 }
   0x6   :  { %v27_v14 = vadd.f32 %v26_v10, %v19_v4  ;;  %v50_v16 = vadd.f32 %v49_v12, %v43_v8 }
   0x8   :  { %v28_v18 = vadd.f32 %v27_v14, %v20_v9  ;;  %v51_v20 = vadd.f32 %v50_v16, %v44_v11  ;;  %v24_v40 = vld [vmem:[%s131_s1] sm:$0x1] }
   0x9   :  { %v40_v43 = vld [vmem:[%s132_s2] sm:$0x1] }
   0xa   :  { %v29_v22 = vadd.f32 %v28_v18, %v21_v13  ;;  %v52_v24 = vadd.f32 %v51_v20, %v45_v15 }
   0xc   :  { %v30_v25 = vadd.f32 %v29_v22, %v22_v17  ;;  %v53_v27 = vadd.f32 %v52_v24, %v46_v19 }
   0xe   :  { %v31_v28 = vadd.f32 %v30_v25, %v23_v21  ;;  %v54_v29 = vadd.f32 %v53_v27, %v47_v23 }
  0x10   :  { %v32_v30 = vrot.slane %v31_v28, 4  ;;  %v55_v31 = vadd.f32 %v54_v29, %v48_v26 }
  0x12   :  { %v33_v32 = vadd.f32 %v32_v30, %v31_v28  ;;  %v56_v33 = vrot.slane %v55_v31, 4 }
  0x14   :  { %v34_v34 = vrot.slane %v33_v32, 2  ;;  %v57_v35 = vadd.f32 %v56_v33, %v55_v31 }
  0x16   :  { %v35_v36 = vadd.f32 %v34_v34, %v33_v32  ;;  %v58_v37 = vrot.slane %v57_v35, 2 }
  0x18   :  { %v36_v38 = vrot.slane %v35_v36, 1  ;;  %v59_v39 = vadd.f32 %v58_v37, %v57_v35 }
  0x1a   :  { %v37_v41 = vadd.f32 %v36_v38, %v35_v36  ;;  %v60_v42 = vrot.slane %v59_v39, 1 }
  0x1c   :  { %v38_v44 = vadd.f32 %v37_v41, %v24_v40  ;;  %v61_v45 = vadd.f32 %v60_v42, %v59_v39 }
  0x1e   :  { %39 = vst [vmem:[%s131_s1] sm:$0x1] %v38_v44  ;;  %v62_v46 = vadd.f32 %v61_v45, %v40_v43 }
  0x20   :  { %63 = vst [vmem:[%s132_s2] sm:$0x1] %v62_v46 }

// kernel: quantized_resnet18_forward.71
= control target key start
LH: loop header
LB: loop body
LE: loop exit
PB: predicated region body
PF: predicated region fallthrough
CT: control target
= control target key end

     0   :  { %s196_s0 = inlined_call_operand.vmem [shape: f32[64,128], index: 0, kind: input, shape index: {}]   ;;  %s197_s1 = inlined_call_operand.vmem [shape: f32[1,128], index: 1, kind: input, shape index: {}]   ;;  %s198_s2 = inlined_call_operand.vmem [shape: f32[1,128], index: 2, kind: input, shape index: {}]   ;;  %s199_s3 = inlined_call_operand.vmem [shape: f32[64,128], index: 3, kind: input, shape index: {}]   ;;  %s200_s4 = inlined_call_operand.vmem [shape: f32[64,128], index: 4, kind: output, shape index: {}]  }
   0x1   :  { %v17_v0 = vld [vmem:[%s196_s0] sm:$0xff]  ;;  %v18_v4 = vld [vmem:[%s196_s0 + $0x8] sm:$0xff]  ;;  %v19_v7 = vld [vmem:[%s196_s0 + $0x10] sm:$0xff] }
   0x2   :  { %v91_v1 = vld [vmem:[%s197_s1] ss:$0 sm:$0xff]  ;;  %v20_v8 = vld [vmem:[%s196_s0 + $0x18] sm:$0xff]  ;;  %v56_v10 = vld [vmem:[%s199_s3 + $0x8] sm:$0xff] }
   0x3   :  { %v92_v2 = vld [vmem:[%s198_s2] ss:$0 sm:$0xff]  ;;  %v32_v3 = vmul.f32 %v91_v1, %v17_v0  ;;  %v33_v6 = vmul.f32 %v91_v1, %v18_v4  ;;  %v34_v11 = vmul.f32 %v91_v1, %v19_v7  ;;  %v57_v12 = vld [vmem:[%s199_s3 + $0x10] sm:$0xff]  ;;  %v35_v13 = vmul.f32 %v91_v1, %v20_v8  ;;  %v58_v16 = vld [vmem:[%s199_s3 + $0x18] sm:$0xff] }
   0x4   :  { %v55_v5 = vld [vmem:[%s199_s3] sm:$0xff]  ;;  %v22_v18 = vld [vmem:[%s196_s0 + $0x28] sm:$0xff]  ;;  %v23_v19 = vld [vmem:[%s196_s0 + $0x30] sm:$0xff] }
   0x5   :  { %v47_v9 = vadd.f32 %v92_v2, %v32_v3  ;;  %v21_v14 = vld [vmem:[%s196_s0 + $0x20] sm:$0xff]  ;;  %v48_v15 = vadd.f32 %v92_v2, %v33_v6  ;;  %v49_v21 = vadd.f32 %v92_v2, %v34_v11  ;;  %v50_v22 = vadd.f32 %v92_v2, %v35_v13  ;;  %v24_v25 = vld [vmem:[%s196_s0 + $0x38] sm:$0xff]  ;;  %v60_v28 = vld [vmem:[%s199_s3 + $0x28] sm:$0xff] }
   0x6   :  { %v36_v17 = vmul.f32 %v91_v1, %v21_v14  ;;  %v59_v23 = vld [vmem:[%s199_s3 + $0x20] sm:$0xff]  ;;  %v37_v24 = vmul.f32 %v91_v1, %v22_v18  ;;  %v38_v29 = vmul.f32 %v91_v1, %v23_v19  ;;  %v39_v30 = vmul.f32 %v91_v1, %v24_v25  ;;  %v61_v35 = vld [vmem:[%s199_s3 + $0x30] sm:$0xff]  ;;  %v62_v36 = vld [vmem:[%s199_s3 + $0x38] sm:$0xff] }
   0x7   :  { %v63_v20 = vadd.f32 %v55_v5, %v47_v9  ;;  %v64_v26 = vadd.f32 %v56_v10, %v48_v15  ;;  %v65_v32 = vadd.f32 %v57_v12, %v49_v21  ;;  %v66_v33 = vadd.f32 %v58_v16, %v50_v22 }
   0x8   :  { %v51_v27 = vadd.f32 %v92_v2, %v36_v17  ;;  %v52_v34 = vadd.f32 %v92_v2, %v37_v24  ;;  %v53_v39 = vadd.f32 %v92_v2, %v38_v29  ;;  %v54_v40 = vadd.f32 %v92_v2, %v39_v30 }
   0x9   :  { %v71_v31 = vmax.f32 %v63_v20, 0.0  ;;  %v72_v37 = vmax.f32 %v64_v26, 0.0  ;;  %v73_v41 = vmax.f32 %v65_v32, 0.0  ;;  %v74_v42 = vmax.f32 %v66_v33, 0.0 }
   0xa   :  { %v67_v38 = vadd.f32 %v59_v23, %v51_v27  ;;  %v68_v43 = vadd.f32 %v60_v28, %v52_v34  ;;  %v69_v45 = vadd.f32 %v61_v35, %v53_v39  ;;  %v70_v46 = vadd.f32 %v62_v36, %v54_v40 }
   0xb   :  { %79 = vst [vmem:[%s200_s4] sm:$0xff] %v71_v31  ;;  %80 = vst [vmem:[%s200_s4 + $0x8] sm:$0xff] %v72_v37 }
   0xc   :  { %v75_v44 = vmax.f32 %v67_v38, 0.0  ;;  %81 = vst [vmem:[%s200_s4 + $0x10] sm:$0xff] %v73_v41  ;;  %82 = vst [vmem:[%s200_s4 + $0x18] sm:$0xff] %v74_v42  ;;  %v76_v47 = vmax.f32 %v68_v43, 0.0  ;;  %v77_v48 = vmax.f32 %v69_v45, 0.0  ;;  %v78_v49 = vmax.f32 %v70_v46, 0.0 }
   0xe   :  { %83 = vst [vmem:[%s200_s4 + $0x20] sm:$0xff] %v75_v44  ;;  %84 = vst [vmem:[%s200_s4 + $0x28] sm:$0xff] %v76_v47 }
   0xf   :  { %85 = vst [vmem:[%s200_s4 + $0x30] sm:$0xff] %v77_v48  ;;  %86 = vst [vmem:[%s200_s4 + $0x38] sm:$0xff] %v78_v49 }

// kernel: quantized_resnet18_forward.68
= control target key start
LH: loop header
LB: loop body
LE: loop exit
PB: predicated region body
PF: predicated region fallthrough
CT: control target
= control target key end

     0   :  { %s148_s0 = inlined_call_operand.vmem [shape: f32[64,128], index: 0, kind: input, shape index: {}]   ;;  %s149_s1 = inlined_call_operand.vmem [shape: f32[1,128], index: 1, kind: input, shape index: {}]   ;;  %s150_s2 = inlined_call_operand.vmem [shape: f32[1,128], index: 2, kind: input, shape index: {}]   ;;  %s151_s3 = inlined_call_operand.vmem [shape: f32[64,128], index: 3, kind: output, shape index: {}]  }
   0x1   :  { %v14_v0 = vld [vmem:[%s148_s0] sm:$0xff]  ;;  %v15_v4 = vld [vmem:[%s148_s0 + $0x8] sm:$0xff]  ;;  %v16_v5 = vld [vmem:[%s148_s0 + $0x10] sm:$0xff] }
   0x2   :  { %v72_v1 = vld [vmem:[%s149_s1] ss:$0 sm:$0xff]  ;;  %v17_v6 = vld [vmem:[%s148_s0 + $0x18] sm:$0xff]  ;;  %v19_v11 = vld [vmem:[%s148_s0 + $0x28] sm:$0xff] }
   0x3   :  { %v73_v2 = vld [vmem:[%s150_s2] ss:$0 sm:$0xff]  ;;  %v29_v3 = vmul.f32 %v72_v1, %v14_v0  ;;  %v30_v7 = vmul.f32 %v72_v1, %v15_v4  ;;  %v31_v8 = vmul.f32 %v72_v1, %v16_v5  ;;  %v32_v9 = vmul.f32 %v72_v1, %v17_v6  ;;  %v20_v12 = vld [vmem:[%s148_s0 + $0x30] sm:$0xff]  ;;  %v21_v17 = vld [vmem:[%s148_s0 + $0x38] sm:$0xff] }
   0x4   :  { %v18_v10 = vld [vmem:[%s148_s0 + $0x20] sm:$0xff]  ;;  %v34_v15 = vmul.f32 %v72_v1, %v19_v11  ;;  %v35_v16 = vmul.f32 %v72_v1, %v20_v12  ;;  %v36_v21 = vmul.f32 %v72_v1, %v21_v17 }
   0x5   :  { %v44_v13 = vadd.f32 %v73_v2, %v29_v3  ;;  %v33_v14 = vmul.f32 %v72_v1, %v18_v10  ;;  %v45_v18 = vadd.f32 %v73_v2, %v30_v7  ;;  %v46_v19 = vadd.f32 %v73_v2, %v31_v8 }
   0x6   :  { %v47_v20 = vadd.f32 %v73_v2, %v32_v9  ;;  %v49_v24 = vadd.f32 %v73_v2, %v34_v15  ;;  %v50_v25 = vadd.f32 %v73_v2, %v35_v16  ;;  %v51_v29 = vadd.f32 %v73_v2, %v36_v21 }
   0x7   :  { %v52_v22 = vmax.f32 %v44_v13, 0.0  ;;  %v48_v23 = vadd.f32 %v73_v2, %v33_v14  ;;  %v53_v26 = vmax.f32 %v45_v18, 0.0  ;;  %v54_v27 = vmax.f32 %v46_v19, 0.0 }
   0x8   :  { %v55_v28 = vmax.f32 %v47_v20, 0.0  ;;  %v57_v31 = vmax.f32 %v49_v24, 0.0  ;;  %v58_v32 = vmax.f32 %v50_v25, 0.0  ;;  %v59_v33 = vmax.f32 %v51_v29, 0.0 }
   0x9   :  { %60 = vst [vmem:[%s151_s3] sm:$0xff] %v52_v22  ;;  %v56_v30 = vmax.f32 %v48_v23, 0.0  ;;  %61 = vst [vmem:[%s151_s3 + $0x8] sm:$0xff] %v53_v26 }
   0xa   :  { %62 = vst [vmem:[%s151_s3 + $0x10] sm:$0xff] %v54_v27  ;;  %63 = vst [vmem:[%s151_s3 + $0x18] sm:$0xff] %v55_v28 }
   0xb   :  { %64 = vst [vmem:[%s151_s3 + $0x20] sm:$0xff] %v56_v30  ;;  %65 = vst [vmem:[%s151_s3 + $0x28] sm:$0xff] %v57_v31 }
   0xc   :  { %66 = vst [vmem:[%s151_s3 + $0x30] sm:$0xff] %v58_v32  ;;  %67 = vst [vmem:[%s151_s3 + $0x38] sm:$0xff] %v59_v33 }

// kernel: quantized_resnet18_forward.79
= control target key start
LH: loop header
LB: loop body
LE: loop exit
PB: predicated region body
PF: predicated region fallthrough
CT: control target
= control target key end

     0   :  { %v57_v0 = vmov 0.0   ;;  %s103_s1 = inlined_call_operand.vmem [shape: f32[1,128], index: 1, kind: output, shape index: {0}]   ;;  %s104_s2 = inlined_call_operand.vmem [shape: f32[1,128], index: 2, kind: output, shape index: {1}]   ;;  %s105_s0 = inlined_call_operand.vmem [shape: f32[32,128], index: 0, kind: input, shape index: {}]  }
   0x1   :  { %14 = vst [vmem:[%s103_s1] sm:$0x1] %v57_v0  ;;  %15 = vst [vmem:[%s104_s2] sm:$0x1] %v57_v0  ;;  %v16_v1 = vld [vmem:[%s105_s0] sm:$0xff]  ;;  %v17_v2 = vld [vmem:[%s105_s0 + $0x8] sm:$0xff] }
   0x2   :  { %v18_v3 = vld [vmem:[%s105_s0 + $0x10] sm:$0xff]  ;;  %v19_v4 = vld [vmem:[%s105_s0 + $0x18] sm:$0xff]  ;;  %v21_v5 = vadd.f32 %v17_v2, %v16_v1  ;;  %v33_v6 = vmul.f32 %v16_v1, %v16_v1  ;;  %v34_v7 = vmul.f32 %v17_v2, %v17_v2 }
   0x3   :  { %v35_v8 = vmul.f32 %v18_v3, %v18_v3  ;;  %v36_v10 = vmul.f32 %v19_v4, %v19_v4 }
   0x4   :  { %v22_v9 = vadd.f32 %v21_v5, %v18_v3  ;;  %v37_v11 = vadd.f32 %v34_v7, %v33_v6 }
   0x6   :  { %v23_v12 = vadd.f32 %v22_v9, %v19_v4  ;;  %v38_v13 = vadd.f32 %v37_v11, %v35_v8 }
   0x8   :  { %v24_v14 = vrot.slane %v23_v12, 4  ;;  %v39_v15 = vadd.f32 %v38_v13, %v36_v10  ;;  %v20_v24 = vld [vmem:[%s103_s1] sm:$0x1] }
   0x9   :  { %v32_v27 = vld [vmem:[%s104_s2] sm:$0x1] }
   0xa   :  { %v25_v16 = vadd.f32 %v24_v14, %v23_v12  ;;  %v40_v17 = vrot.slane %v39_v15, 4 }
   0xc   :  { %v26_v18 = vrot.slane %v25_v16, 2  ;;  %v41_v19 = vadd.f32 %v40_v17, %v39_v15 }
   0xe   :  { %v27_v20 = vadd.f32 %v26_v18, %v25_v16  ;;  %v42_v21 = vrot.slane %v41_v19, 2 }
  0x10   :  { %v28_v22 = vrot.slane %v27_v20, 1  ;;  %v43_v23 = vadd.f32 %v42_v21, %v41_v19 }
  0x12   :  { %v29_v25 = vadd.f32 %v28_v22, %v27_v20  ;;  %v44_v26 = vrot.slane %v43_v23, 1 }
  0x14   :  { %v30_v28 = vadd.f32 %v29_v25, %v20_v24  ;;  %v45_v29 = vadd.f32 %v44_v26, %v43_v23 }
  0x16   :  { %31 = vst [vmem:[%s103_s1] sm:$0x1] %v30_v28  ;;  %v46_v30 = vadd.f32 %v45_v29, %v32_v27 }
  0x18   :  { %47 = vst [vmem:[%s104_s2] sm:$0x1] %v46_v30 }

// kernel: quantized_resnet18_forward.80
= control target key start
LH: loop header
LB: loop body
LE: loop exit
PB: predicated region body
PF: predicated region fallthrough
CT: control target
= control target key end

     0   :  { %s100_s0 = inlined_call_operand.vmem [shape: f32[32,128], index: 0, kind: input, shape index: {}]   ;;  %s101_s1 = inlined_call_operand.vmem [shape: f32[1,128], index: 1, kind: input, shape index: {}]   ;;  %s102_s2 = inlined_call_operand.vmem [shape: f32[1,128], index: 2, kind: input, shape index: {}]   ;;  %s103_s3 = inlined_call_operand.vmem [shape: f32[32,128], index: 3, kind: output, shape index: {}]  }
   0x1   :  { %v14_v0 = vld [vmem:[%s100_s0] sm:$0xff]  ;;  %v15_v4 = vld [vmem:[%s100_s0 + $0x8] sm:$0xff]  ;;  %v16_v5 = vld [vmem:[%s100_s0 + $0x10] sm:$0xff] }
   0x2   :  { %v48_v1 = vld [vmem:[%s101_s1] ss:$0 sm:$0xff]  ;;  %v17_v6 = vld [vmem:[%s100_s0 + $0x18] sm:$0xff] }
   0x3   :  { %v49_v2 = vld [vmem:[%s102_s2] ss:$0 sm:$0xff]  ;;  %v25_v3 = vmul.f32 %v48_v1, %v14_v0  ;;  %v26_v7 = vmul.f32 %v48_v1, %v15_v4  ;;  %v27_v8 = vmul.f32 %v48_v1, %v16_v5  ;;  %v28_v9 = vmul.f32 %v48_v1, %v17_v6 }
   0x5   :  { %v36_v10 = vadd.f32 %v49_v2, %v25_v3  ;;  %v37_v11 = vadd.f32 %v49_v2, %v26_v7  ;;  %v38_v12 = vadd.f32 %v49_v2, %v27_v8  ;;  %v39_v13 = vadd.f32 %v49_v2, %v28_v9 }
   0x7   :  { %40 = vst [vmem:[%s103_s3] sm:$0xff] %v36_v10  ;;  %41 = vst [vmem:[%s103_s3 + $0x8] sm:$0xff] %v37_v11 }
   0x8   :  { %42 = vst [vmem:[%s103_s3 + $0x10] sm:$0xff] %v38_v12  ;;  %43 = vst [vmem:[%s103_s3 + $0x18] sm:$0xff] %v39_v13 }

// kernel: quantized_resnet18_forward.78
= control target key start
LH: loop header
LB: loop body
LE: loop exit
PB: predicated region body
PF: predicated region fallthrough
CT: control target
= control target key end

     0   :  { %s283_s1 = inlined_call_operand.vmem [shape: bf16[128,128], index: 1, kind: input, shape index: {}]   ;;  %s284_s0 = inlined_call_operand.vmem [shape: bf16[32,128], index: 0, kind: input, shape index: {}]   ;;  %s285_s2 = inlined_call_operand.vmem [shape: f32[32,128], index: 2, kind: output, shape index: {}]  }
   0x1   :  { %v216_v0 = vld [vmem:[%s283_s1 + $0x38] sm:$0xff]   ;;  %v217_v1 = vld [vmem:[%s283_s1 + $0x30] sm:$0xff]   ;;  %v218_v2 = vld [vmem:[%s283_s1 + $0x28] sm:$0xff]  }
   0x2   :  { %196 = vmatprep.subr.bf16.mxu0 %v216_v0  ;;  %v219_v3 = vld [vmem:[%s283_s1 + $0x20] sm:$0xff]   ;;  %v220_v5 = vld [vmem:[%s283_s1 + $0x18] sm:$0xff]   ;;  %v221_v6 = vld [vmem:[%s283_s1 + $0x10] sm:$0xff]  }
   0x3   :  { %197 = vmatpush3.bf16.msra.mxu0 %v216_v0  ;;  %v224_v4 = vld [vmem:[%s284_s0] sm:$0xff]   ;;  %v222_v7 = vld [vmem:[%s283_s1 + $0x8] sm:$0xff]  }
   0x4   :  { %198 = vmatprep.subr.bf16.mxu0 %v217_v1  ;;  %212 = vmatprep.mubr.bf16.mxu0 %v224_v4  ;;  %v223_v8 = vld [vmem:[%s283_s1] sm:$0xff]   ;;  %v225_v9 = vld [vmem:[%s284_s0 + $0x8] sm:$0xff]  }
   0x7   :  { %199 = vmatpush3.bf16.msra.mxu0 %v217_v1 }
   0x8   :  { %200 = vmatprep.subr.bf16.mxu0 %v218_v2 }
   0xb   :  { %201 = vmatpush3.bf16.msra.mxu0 %v218_v2 }
   0xc   :  { %202 = vmatprep.subr.bf16.mxu0 %v219_v3 }
   0xf   :  { %203 = vmatpush3.bf16.msra.mxu0 %v219_v3 }
  0x10   :  { %204 = vmatprep.subr.bf16.mxu0 %v220_v5 }
  0x13   :  { %205 = vmatpush3.bf16.msra.mxu0 %v220_v5 }
  0x14   :  { %206 = vmatprep.subr.bf16.mxu0 %v221_v6 }
  0x17   :  { %207 = vmatpush3.bf16.msra.mxu0 %v221_v6 }
  0x18   :  { %208 = vmatprep.subr.bf16.mxu0 %v222_v7 }
  0x1b   :  { %209 = vmatpush3.bf16.msra.mxu0 %v222_v7 }
  0x1c   :  { %210 = vmatprep.subr.bf16.mxu0 %v223_v8 }
  0x1f   :  { %211 = vmatpush3.bf16.msra.mxu0 %v223_v8 }
  0x22   :  { %213 = vmatmul.mubr.bf16.vlgmr.msra.gmra.mxu0 %v225_v9 }
  0xe2   :  { %v214_v10 = vpop.f32.mrf.mxu0 }
  0xe3   :  { %170 = vst [vmem:[%s285_s2 + $0x10] sm:$0xff] %v214_v10 }
  0xe4   :  { %v138_v11 = vpop.f32.mrf.mxu0 }
  0xe5   :  { %168 = vst [vmem:[%s285_s2] sm:$0xff] %v138_v11 }
  0xe6   :  { %v215_v12 = vpop.f32.mrf.mxu0 }
  0xe7   :  { %171 = vst [vmem:[%s285_s2 + $0x18] sm:$0xff] %v215_v12 }
  0xe8   :  { %v141_v13 = vpop.f32.mrf.mxu0 }
  0xe9   :  { %169 = vst [vmem:[%s285_s2 + $0x8] sm:$0xff] %v141_v13 }

// kernel: quantized_resnet18_forward.83
= control target key start
LH: loop header
LB: loop body
LE: loop exit
PB: predicated region body
PF: predicated region fallthrough
CT: control target
= control target key end

     0   :  { %s104_s0 = inlined_call_operand.vmem [shape: f32[32,128], index: 0, kind: input, shape index: {}]   ;;  %s105_s1 = inlined_call_operand.vmem [shape: f32[1,128], index: 1, kind: input, shape index: {}]   ;;  %s106_s2 = inlined_call_operand.vmem [shape: f32[1,128], index: 2, kind: input, shape index: {}]   ;;  %s107_s3 = inlined_call_operand.vmem [shape: f32[32,128], index: 3, kind: output, shape index: {}]  }
   0x1   :  { %v14_v0 = vld [vmem:[%s104_s0] sm:$0xff]  ;;  %v15_v4 = vld [vmem:[%s104_s0 + $0x8] sm:$0xff]  ;;  %v16_v5 = vld [vmem:[%s104_s0 + $0x10] sm:$0xff] }
   0x2   :  { %v52_v1 = vld [vmem:[%s105_s1] ss:$0 sm:$0xff]  ;;  %v17_v6 = vld [vmem:[%s104_s0 + $0x18] sm:$0xff] }
   0x3   :  { %v53_v2 = vld [vmem:[%s106_s2] ss:$0 sm:$0xff]  ;;  %v25_v3 = vmul.f32 %v52_v1, %v14_v0  ;;  %v26_v7 = vmul.f32 %v52_v1, %v15_v4  ;;  %v27_v8 = vmul.f32 %v52_v1, %v16_v5  ;;  %v28_v9 = vmul.f32 %v52_v1, %v17_v6 }
   0x5   :  { %v36_v10 = vadd.f32 %v53_v2, %v25_v3  ;;  %v37_v11 = vadd.f32 %v53_v2, %v26_v7  ;;  %v38_v12 = vadd.f32 %v53_v2, %v27_v8  ;;  %v39_v13 = vadd.f32 %v53_v2, %v28_v9 }
   0x7   :  { %v40_v14 = vmax.f32 %v36_v10, 0.0  ;;  %v41_v15 = vmax.f32 %v37_v11, 0.0  ;;  %v42_v16 = vmax.f32 %v38_v12, 0.0  ;;  %v43_v17 = vmax.f32 %v39_v13, 0.0 }
   0x9   :  { %44 = vst [vmem:[%s107_s3] sm:$0xff] %v40_v14  ;;  %45 = vst [vmem:[%s107_s3 + $0x8] sm:$0xff] %v41_v15 }
   0xa   :  { %46 = vst [vmem:[%s107_s3 + $0x10] sm:$0xff] %v42_v16  ;;  %47 = vst [vmem:[%s107_s3 + $0x18] sm:$0xff] %v43_v17 }

// kernel: quantized_resnet18_forward.81
= control target key start
LH: loop header
LB: loop body
LE: loop exit
PB: predicated region body
PF: predicated region fallthrough
CT: control target
= control target key end

     0   :  { %s688_s9 = smov 0   ;;  %s690_s10 = smov 0   ;;  %s784_s0 = inlined_call_operand.vmem [shape: bf16[32,640], index: 0, kind: input, shape index: {}]   ;;  %s785_s1 = inlined_call_operand.vmem [shape: bf16[640,128], index: 1, kind: input, shape index: {}]   ;;  %s786_s2 = inlined_call_operand.vmem [shape: f32[32,128], index: 2, kind: output, shape index: {}]  }
   0x1   :  { %s692_s11 = smov 0   ;;  %s694_s12 = smov 0  }
   0x2   :  { %s696_s13 = smov 0  }
   0x3 LB: > { %s24_s14 = sadd.s32 1, %s666_s12  ;;  %p47_p1 = scmp.ne.s32.totalorder %s658_s10, %s654_s9  ;;  %s670_s13 = sphi %s696_s13, %s12_s13   ;;  %s666_s12 = sphi %s694_s12, %s790_s12   ;;  %s662_s11 = sphi %s692_s11, %s789_s11   ;;  %s658_s10 = sphi %s690_s10, %s788_s10   ;;  %s654_s9 = sphi %s688_s9, %s787_s9  }
   0x4   : > { %p25_p0 = scmp.ge.s32.totalorder %s24_s14, 5  ;;  %p48_p2 = scmp.eq.s32.totalorder %s670_s13, 0 }
   0x5   : > { %s40_s16 = sadd.s32 1, %s658_s10  ;;  %p528_p5 = scmp.ge.s32.totalorder %s670_s13, 5 }
   0x6   : > { %s792_s14 = smov (%p25_p0, %s24_s14), 0  ;;  %p49_p3 = por %p48_p2, %p47_p1 }
   0x7   : > { %s36_s15 = ssub.s32 %s666_s12, %s792_s14  ;;  %129 = sbr.rel (%p528_p5) target bundleno = 18 (0x12), region = 16 }
   0x8   : > { %p38_p4 = scmp.eq.s32.totalorder %s36_s15, 0 }
   0xa   : > { %s723_s17 = scalar_select %p38_p4, %s658_s10, %s40_s16  }
   0xc   : > { %132 = sbr.rel (!%p49_p3) target bundleno = 18 (0x12), region = 20  ;;  %s134_s18 = sand.u32 (%p49_p3), 1, %s658_s10  }
   0xd   : > { %s530_s19 = sshll.u32 (%p49_p3), %s666_s12, 2  ;;  %s529_s20 = sshll.u32 (%p49_p3), %s134_s18, 4 }
   0xe   : > { %s141_s23 = scalar_lea.vmem (%p49_p3), %s784_s0, %s530_s19  ;;  %s136_s24 = scalar_lea.vmem (%p49_p3), [#allocation3], %s529_s20 }
   0xf   : > { %v158_v0 = vld [vmem:[%s141_s23] sm:$0xf] (%p49_p3)  ;;  %v160_v1 = vld [vmem:[%s141_s23 + $0x14] sm:$0xf] (%p49_p3)  ;;  %v162_v2 = vld [vmem:[%s141_s23 + $0x28] sm:$0xf] (%p49_p3) }
  0x10   : > { %159 = vst [vmem:[%s136_s24] sm:$0xf] (%p49_p3), %v158_v0  ;;  %161 = vst [vmem:[%s136_s24 + $0x4] sm:$0xf] (%p49_p3), %v160_v1  ;;  %v164_v3 = vld [vmem:[%s141_s23 + $0x3c] sm:$0xf] (%p49_p3) }
  0x11   : > { %163 = vst [vmem:[%s136_s24 + $0x8] sm:$0xf] %v162_v2  ;;  %165 = vst [vmem:[%s136_s24 + $0xc] sm:$0xf] %v164_v3 }
  0x12 PF: > { %p531_p6 = scmp.ge.s32.totalorder %s670_s13, 1  ;;  %p208_p7 = scmp.lt.s32.totalorder %s670_s13, 6 }
  0x14   : > { %p209_p8 = pnand %p531_p6, %p208_p7 }
  0x15   : > { %s215_s25 = sand.u32 (!%p209_p8), 1, %s654_s9   ;;  %s533_s26 = sshll.u32 (!%p209_p8), %s662_s11, 4 }
  0x16   : > { %212 = sbr.rel (%p209_p8) target bundleno = 278 (0x116), region = 65  ;;  %s735_s27 = sshll.u32 (!%p209_p8), %s215_s25, 4 }
  0x17   : > { %p249_p9 = scmp.lt.s32.totalorder (!%p209_p8), %s533_s26, 79  ;;  %s217_s4 = scalar_lea.vmem (!%p209_p8), [#allocation3], %s735_s27 }
  0x18   : > { %p535_p10 = scmp.ne.s32.totalorder (!%p209_p8), %s662_s11, 0 }
  0x1b   : > { %s794_s26 = smov (!%p249_p9, %s533_s26), 79  ;;  %270 = sbr.rel (%p535_p10) target bundleno = 35 (0x23), region = 73 }
  0x1c   : > { %s534_s28 = sshll.u32 %s794_s26, 2 }
  0x1d   : > { %s740_s3 = scalar_lea.vmem %s785_s1, %s534_s28 }
  0x20   : > { %v672_v4 = vmov 0.0  }
  0x21   : > { %271 = vst [vmem:[#allocation2 + $0x10] sm:$0xff] %v672_v4  ;;  %272 = vst [vmem:[#allocation2] sm:$0xff] %v672_v4 }
  0x22   : > { %273 = vst [vmem:[#allocation2 + $0x18] sm:$0xff] %v672_v4  ;;  %274 = vst [vmem:[#allocation2 + $0x8] sm:$0xff] %v672_v4 }
  0x23 PF: > { %v622_v5 = vld [vmem:[%s740_s3 + $0x38] sm:$0xff]   ;;  %v623_v6 = vld [vmem:[%s740_s3 + $0x30] sm:$0xff]   ;;  %v624_v7 = vld [vmem:[%s740_s3 + $0x28] sm:$0xff]   ;;  %p546_p11 = scmp.ne.s32.totalorder %s662_s11, 4 }
  0x24   : > { %561 = vmatprep.subr.bf16.mxu0 %v622_v5  ;;  %v625_v8 = vld [vmem:[%s740_s3 + $0x20] sm:$0xff]   ;;  %v626_v10 = vld [vmem:[%s740_s3 + $0x18] sm:$0xff]   ;;  %v627_v11 = vld [vmem:[%s740_s3 + $0x10] sm:$0xff]  }
  0x25   : > { %562 = vmatpush3.bf16.msra.mxu0 %v622_v5  ;;  %v630_v9 = vld [vmem:[%s217_s4] sm:$0xff]   ;;  %v628_v12 = vld [vmem:[%s740_s3 + $0x8] sm:$0xff]  }
  0x26   : > { %563 = vmatprep.subr.bf16.mxu0 %v623_v6  ;;  %577 = vmatprep.mubr.bf16.mxu0 %v630_v9  ;;  %v629_v13 = vld [vmem:[%s740_s3] sm:$0xff]   ;;  %v631_v14 = vld [vmem:[%s217_s4 + $0x8] sm:$0xff]  }
  0x28   : > { %v275_v17 = vld [vmem:[#allocation2 + $0x10] sm:$0xff]  ;;  %v276_v23 = vld [vmem:[#allocation2] sm:$0xff] }
  0x29   : > { %564 = vmatpush3.bf16.msra.mxu0 %v623_v6  ;;  %v277_v15 = vld [vmem:[#allocation2 + $0x18] sm:$0xff]  ;;  %v278_v20 = vld [vmem:[#allocation2 + $0x8] sm:$0xff] }
  0x2a   : > { %565 = vmatprep.subr.bf16.mxu0 %v624_v7 }
  0x2d   : > { %566 = vmatpush3.bf16.msra.mxu0 %v624_v7 }
  0x2e   : > { %567 = vmatprep.subr.bf16.mxu0 %v625_v8 }
  0x31   : > { %568 = vmatpush3.bf16.msra.mxu0 %v625_v8 }
  0x32   : > { %569 = vmatprep.subr.bf16.mxu0 %v626_v10 }
  0x35   : > { %570 = vmatpush3.bf16.msra.mxu0 %v626_v10 }
  0x36   : > { %571 = vmatprep.subr.bf16.mxu0 %v627_v11 }
  0x39   : > { %572 = vmatpush3.bf16.msra.mxu0 %v627_v11 }
  0x3a   : > { %573 = vmatprep.subr.bf16.mxu0 %v628_v12 }
  0x3d   : > { %574 = vmatpush3.bf16.msra.mxu0 %v628_v12 }
  0x3e   : > { %575 = vmatprep.subr.bf16.mxu0 %v629_v13 }
  0x41   : > { %576 = vmatpush3.bf16.msra.mxu0 %v629_v13 }
  0x44   : > { %578 = vmatmul.mubr.bf16.vlgmr.msra.gmra.mxu0 %v631_v14 }
 0x104   : > { %v579_v16 = vpop.f32.mrf.mxu0 }
 0x105   : > { %v410_v18 = vadd.f32 %v579_v16, %v277_v15 }
 0x106   : > { %v393_v19 = vpop.f32.mrf.mxu0 }
 0x107   : > { %414 = vst [vmem:[#allocation2 + $0x18] sm:$0xff] %v410_v18  ;;  %v408_v21 = vadd.f32 %v393_v19, %v275_v17 }
 0x108   : > { %v580_v22 = vpop.f32.mrf.mxu0 }
 0x109   : > { %412 = vst [vmem:[#allocation2 + $0x10] sm:$0xff] %v408_v21  ;;  %v411_v24 = vadd.f32 %v580_v22, %v278_v20  ;;  %419 = sbr.rel (%p546_p11) target bundleno = 278 (0x116), region = 77 }
 0x10a   : > { %v396_v25 = vpop.f32.mrf.mxu0 }
 0x10b   : > { %415 = vst [vmem:[#allocation2 + $0x8] sm:$0xff] %v411_v24  ;;  %v409_v26 = vadd.f32 %v396_v25, %v276_v23 }
 0x10d   : > { %413 = vst [vmem:[#allocation2] sm:$0xff] %v409_v26 }
 0x10e   : > { %v422_v29 = vld [vmem:[#allocation2 + $0x18] sm:$0xff] }
 0x10f   : > { %426 = vst [vmem:[%s786_s2 + $0x10] sm:$0xff] %v422_v29 }
 0x110   : > { %v420_v27 = vld [vmem:[#allocation2 + $0x10] sm:$0xff] }
 0x111   : > { %424 = vst [vmem:[%s786_s2] sm:$0xff] %v420_v27 }
 0x112   : > { %v423_v30 = vld [vmem:[#allocation2 + $0x8] sm:$0xff] }
 0x113   : > { %427 = vst [vmem:[%s786_s2 + $0x18] sm:$0xff] %v423_v30 }
 0x114   : > { %v421_v28 = vld [vmem:[#allocation2] sm:$0xff] }
 0x115   : > { %425 = vst [vmem:[%s786_s2 + $0x8] sm:$0xff] %v421_v28 }
 0x116 PF: > { %s12_s13 = sadd.s32 1, %s670_s13   ;;  %s787_s9 = smov %s658_s10 }
 0x117   : > { %p9_p12 = scmp.ge.s32.totalorder %s12_s13, 7   ;;  %s788_s10 = smov %s723_s17 }
 0x118   : > { %s789_s11 = smov %s666_s12  ;;  %s790_s12 = smov %s792_s14 }
 0x119   :  { %11 = sbr.rel (!%p9_p12) target bundleno = 3 (0x3), region = 115 }

// kernel: quantized_resnet18_forward.86
= control target key start
LH: loop header
LB: loop body
LE: loop exit
PB: predicated region body
PF: predicated region fallthrough
CT: control target
= control target key end

     0   :  { %s132_s0 = inlined_call_operand.vmem [shape: f32[32,128], index: 0, kind: input, shape index: {}]   ;;  %s133_s1 = inlined_call_operand.vmem [shape: f32[1,128], index: 1, kind: input, shape index: {}]   ;;  %s134_s2 = inlined_call_operand.vmem [shape: f32[1,128], index: 2, kind: input, shape index: {}]   ;;  %s135_s3 = inlined_call_operand.vmem [shape: f32[32,128], index: 3, kind: input, shape index: {}]   ;;  %s136_s4 = inlined_call_operand.vmem [shape: f32[32,128], index: 4, kind: output, shape index: {}]  }
   0x1   :  { %v17_v0 = vld [vmem:[%s132_s0] sm:$0xff]  ;;  %v18_v4 = vld [vmem:[%s132_s0 + $0x8] sm:$0xff]  ;;  %v19_v7 = vld [vmem:[%s132_s0 + $0x10] sm:$0xff] }
   0x2   :  { %v63_v1 = vld [vmem:[%s133_s1] ss:$0 sm:$0xff]  ;;  %v20_v8 = vld [vmem:[%s132_s0 + $0x18] sm:$0xff]  ;;  %v44_v10 = vld [vmem:[%s135_s3 + $0x8] sm:$0xff] }
   0x3   :  { %v64_v2 = vld [vmem:[%s134_s2] ss:$0 sm:$0xff]  ;;  %v28_v3 = vmul.f32 %v63_v1, %v17_v0  ;;  %v29_v6 = vmul.f32 %v63_v1, %v18_v4  ;;  %v30_v11 = vmul.f32 %v63_v1, %v19_v7  ;;  %v31_v12 = vmul.f32 %v63_v1, %v20_v8  ;;  %v45_v14 = vld [vmem:[%s135_s3 + $0x10] sm:$0xff]  ;;  %v46_v15 = vld [vmem:[%s135_s3 + $0x18] sm:$0xff] }
   0x4   :  { %v43_v5 = vld [vmem:[%s135_s3] sm:$0xff] }
   0x5   :  { %v39_v9 = vadd.f32 %v64_v2, %v28_v3  ;;  %v40_v13 = vadd.f32 %v64_v2, %v29_v6  ;;  %v41_v17 = vadd.f32 %v64_v2, %v30_v11  ;;  %v42_v18 = vadd.f32 %v64_v2, %v31_v12 }
   0x7   :  { %v47_v16 = vadd.f32 %v43_v5, %v39_v9  ;;  %v48_v19 = vadd.f32 %v44_v10, %v40_v13  ;;  %v49_v21 = vadd.f32 %v45_v14, %v41_v17  ;;  %v50_v22 = vadd.f32 %v46_v15, %v42_v18 }
   0x9   :  { %v51_v20 = vmax.f32 %v47_v16, 0.0  ;;  %v52_v23 = vmax.f32 %v48_v19, 0.0  ;;  %v53_v24 = vmax.f32 %v49_v21, 0.0  ;;  %v54_v25 = vmax.f32 %v50_v22, 0.0 }
   0xb   :  { %55 = vst [vmem:[%s136_s4] sm:$0xff] %v51_v20  ;;  %56 = vst [vmem:[%s136_s4 + $0x8] sm:$0xff] %v52_v23 }
   0xc   :  { %57 = vst [vmem:[%s136_s4 + $0x10] sm:$0xff] %v53_v24  ;;  %58 = vst [vmem:[%s136_s4 + $0x18] sm:$0xff] %v54_v25 }

// kernel: quantized_resnet18_forward.84
= control target key start
LH: loop header
LB: loop body
LE: loop exit
PB: predicated region body
PF: predicated region fallthrough
CT: control target
= control target key end

     0   :  { %s962_s9 = smov 0   ;;  %s964_s10 = smov 0   ;;  %s1075_s0 = inlined_call_operand.vmem [shape: bf16[32,1152], index: 0, kind: input, shape index: {}]   ;;  %s1076_s1 = inlined_call_operand.vmem [shape: bf16[1152,128], index: 1, kind: input, shape index: {}]   ;;  %s1077_s2 = inlined_call_operand.vmem [shape: f32[32,128], index: 2, kind: output, shape index: {}]  }
   0x1   :  { %s966_s11 = smov 0   ;;  %s968_s12 = smov 0  }
   0x2   :  { %s970_s13 = smov 0  }
   0x3 LB: > { %s24_s14 = sadd.s32 1, %s940_s12  ;;  %p47_p1 = scmp.ne.s32.totalorder %s932_s10, %s928_s9  ;;  %s944_s13 = sphi %s970_s13, %s12_s13   ;;  %s940_s12 = sphi %s968_s12, %s1081_s12   ;;  %s936_s11 = sphi %s966_s11, %s1080_s11   ;;  %s932_s10 = sphi %s964_s10, %s1079_s10   ;;  %s928_s9 = sphi %s962_s9, %s1078_s9  }
   0x4   : > { %p25_p0 = scmp.ge.s32.totalorder %s24_s14, 3  ;;  %p48_p2 = scmp.eq.s32.totalorder %s944_s13, 0 }
   0x5   : > { %s40_s16 = sadd.s32 1, %s932_s10  ;;  %p724_p5 = scmp.ge.s32.totalorder %s944_s13, 3 }
   0x6   : > { %s1083_s14 = smov (%p25_p0, %s24_s14), 0  ;;  %p49_p3 = por %p48_p2, %p47_p1 }
   0x7   : > { %s36_s15 = ssub.s32 %s940_s12, %s1083_s14  ;;  %129 = sbr.rel (%p724_p5) target bundleno = 21 (0x15), region = 16 }
   0x8   : > { %p38_p4 = scmp.eq.s32.totalorder %s36_s15, 0 }
   0xa   : > { %s997_s17 = scalar_select %p38_p4, %s932_s10, %s40_s16  }
   0xc   : > { %132 = sbr.rel (!%p49_p3) target bundleno = 21 (0x15), region = 20  ;;  %s134_s18 = sand.u32 (%p49_p3), 1, %s932_s10  }
   0xd   : > { %s772_s19 = smul.u32 (%p49_p3), 12, %s940_s12 }
   0xe   : > { %s831_s20 = smul.u32 (%p49_p3), 48, %s134_s18 }
   0xf   : > { %s142_s23 = scalar_lea.vmem (%p49_p3), %s1075_s0, %s772_s19 }
  0x10   : > { %v157_v0 = vld [vmem:[%s142_s23] sm:$0xff] (%p49_p3)  ;;  %v161_v2 = vld [vmem:[%s142_s23 + $0x48] sm:$0xff] (%p49_p3)  ;;  %s136_s24 = scalar_lea.vmem (%p49_p3), [#allocation3], %s831_s20  ;;  %v730_v6 = vld [vmem:[%s142_s23 + $0x50] sm:$0xf] (%p49_p3) }
  0x11   : > { %v159_v1 = vld [vmem:[%s142_s23 + $0x24] sm:$0xff]  ;;  %158 = vst [vmem:[%s136_s24] sm:$0xff] %v157_v0  ;;  %162 = vst [vmem:[%s136_s24 + $0x18] sm:$0xff] %v161_v2  ;;  %v163_v3 = vld [vmem:[%s142_s23 + $0x6c] sm:$0xff] }
  0x12   : > { %160 = vst [vmem:[%s136_s24 + $0xc] sm:$0xff] %v159_v1  ;;  %v726_v4 = vld [vmem:[%s142_s23 + $0x8] sm:$0xf]  ;;  %v728_v5 = vld [vmem:[%s142_s23 + $0x2c] sm:$0xf]  ;;  %164 = vst [vmem:[%s136_s24 + $0x24] sm:$0xff] %v163_v3 }
  0x13   : > { %727 = vst [vmem:[%s136_s24 + $0x8] sm:$0xf] %v726_v4  ;;  %729 = vst [vmem:[%s136_s24 + $0x14] sm:$0xf] %v728_v5  ;;  %v732_v7 = vld [vmem:[%s142_s23 + $0x74] sm:$0xf] }
  0x14   : > { %731 = vst [vmem:[%s136_s24 + $0x20] sm:$0xf] %v730_v6  ;;  %733 = vst [vmem:[%s136_s24 + $0x2c] sm:$0xf] %v732_v7 }
  0x15 PF: > { %p734_p6 = scmp.ge.s32.totalorder %s944_s13, 1  ;;  %p197_p7 = scmp.lt.s32.totalorder %s944_s13, 4 }
  0x17   : > { %p198_p8 = pnand %p734_p6, %p197_p7 }
  0x18   : > { %s204_s25 = sand.u32 (!%p198_p8), 1, %s928_s9   ;;  %s238_s26 = smul.u32 (!%p198_p8), 48, %s936_s11 }
  0x19   : > { %201 = sbr.rel (%p198_p8) target bundleno = 293 (0x125), region = 50  ;;  %p736_p10 = scmp.ne.s32.totalorder (!%p198_p8), %s936_s11, 0 }
  0x1a   : > { %s832_s27 = smul.u32 (!%p198_p8), 48, %s204_s25  ;;  %p239_p9 = scmp.lt.s32.totalorder (!%p198_p8), %s238_s26, 143 }
  0x1c   : > { %s1014_s4 = scalar_lea.vmem (!%p198_p8), [#allocation3], %s832_s27 }
  0x1e   : > { %s1085_s26 = smov (!%p239_p9, %s238_s26), 143  ;;  %260 = sbr.rel (%p736_p10) target bundleno = 38 (0x26), region = 58 }
  0x1f   : > { %s735_s28 = sshll.u32 %s1085_s26, 2 }
  0x20   : > { %s1012_s3 = scalar_lea.vmem %s1076_s1, %s735_s28 }
  0x23   : > { %v946_v8 = vmov 0.0  }
  0x24   : > { %261 = vst [vmem:[#allocation2 + $0x10] sm:$0xff] %v946_v8  ;;  %262 = vst [vmem:[#allocation2] sm:$0xff] %v946_v8 }
  0x25   : > { %263 = vst [vmem:[#allocation2 + $0x18] sm:$0xff] %v946_v8  ;;  %264 = vst [vmem:[#allocation2 + $0x8] sm:$0xff] %v946_v8 }
  0x26 PF: > { %v874_v9 = vld [vmem:[%s1012_s3 + $0x78] sm:$0xff]   ;;  %v877_v12 = vld [vmem:[%s1012_s3 + $0x70] sm:$0xff]   ;;  %v880_v15 = vld [vmem:[%s1012_s3 + $0x68] sm:$0xff]   ;;  %p767_p11 = scmp.ne.s32.totalorder %s936_s11, 2 }
  0x27   : > { %v875_v10 = vld [vmem:[%s1012_s3 + $0x38] sm:$0xff]   ;;  %773 = vmatprep.subr.bf16.mxu0 %v874_v9  ;;  %v878_v13 = vld [vmem:[%s1012_s3 + $0x30] sm:$0xff]   ;;  %v881_v16 = vld [vmem:[%s1012_s3 + $0x28] sm:$0xff]  }
  0x28   : > { %v876_v11 = vld [vmem:[%s1012_s3 + $0xb8] sm:$0xff]   ;;  %774 = vmatpush3.bf16.msra.mxu0 %v875_v10  ;;  %v879_v14 = vld [vmem:[%s1012_s3 + $0xb0] sm:$0xff]   ;;  %v882_v17 = vld [vmem:[%s1012_s3 + $0xa8] sm:$0xff]  }
  0x29   : > { %811 = vmatprep.subr.bf16.mxu1 %v876_v11  ;;  %775 = vmatprep.subr.bf16.mxu0 %v877_v12  ;;  %v883_v18 = vld [vmem:[%s1012_s3 + $0x60] sm:$0xff]   ;;  %v886_v21 = vld [vmem:[%s1012_s3 + $0x58] sm:$0xff]   ;;  %v889_v24 = vld [vmem:[%s1012_s3 + $0x50] sm:$0xff]  }
  0x2a   : > { %812 = vmatpush3.bf16.msra.mxu1 %v876_v11  ;;  %v884_v19 = vld [vmem:[%s1012_s3 + $0x20] sm:$0xff]   ;;  %v888_v22 = vld [vmem:[%s1012_s3 + $0x98] sm:$0xff]   ;;  %v891_v25 = vld [vmem:[%s1012_s3 + $0x90] sm:$0xff]  }
  0x2b   : > { %813 = vmatprep.subr.bf16.mxu1 %v879_v14  ;;  %v885_v20 = vld [vmem:[%s1012_s3 + $0xa0] sm:$0xff]   ;;  %v887_v23 = vld [vmem:[%s1012_s3 + $0x18] sm:$0xff]   ;;  %v890_v26 = vld [vmem:[%s1012_s3 + $0x10] sm:$0xff]  }
  0x2c   : > { %776 = vmatpush3.bf16.msra.mxu0 %v878_v13  ;;  %v892_v27 = vld [vmem:[%s1012_s3 + $0x48] sm:$0xff]   ;;  %v895_v30 = vld [vmem:[%s1012_s3 + $0x40] sm:$0xff]   ;;  %v265_v44 = vld [vmem:[#allocation2 + $0x10] sm:$0xff] }
  0x2d   : > { %777 = vmatprep.subr.bf16.mxu0 %v880_v15  ;;  %v893_v28 = vld [vmem:[%s1012_s3 + $0x8] sm:$0xff]   ;;  %v897_v31 = vld [vmem:[%s1012_s3 + $0x80] sm:$0xff]   ;;  %v267_v58 = vld [vmem:[#allocation2 + $0x18] sm:$0xff] }
  0x2e   : > { %814 = vmatpush3.bf16.msra.mxu1 %v879_v14  ;;  %v894_v29 = vld [vmem:[%s1012_s3 + $0x88] sm:$0xff]   ;;  %v900_v32 = vld [vmem:[%s1014_s4 + $0x4] ss:$12 sps:$4 sm:$0xff]  }
  0x2f   : > { %815 = vmatprep.subr.bf16.mxu1 %v882_v17  ;;  %v901_v33 = vld [vmem:[%s1014_s4 + $0x8] ss:$12 sps:$4 sm:$0xff]   ;;  %533 = vmatprep.mubr.bf16.mxu0 %v900_v32  ;;  %v898_v35 = vld [vmem:[%s1014_s4] ss:$12 sps:$4 sm:$0xff]   ;;  %v905_v38 = vld [vmem:[%s1014_s4 + $0x18] ss:$12 sps:$4 sm:$0xff]  }
  0x30   : > { %778 = vmatpush3.bf16.msra.mxu0 %v881_v16  ;;  %v896_v34 = vld [vmem:[%s1012_s3] sm:$0xff]   ;;  %827 = vmatprep.mubr.bf16.mxu1 %v901_v33  ;;  %v903_v36 = vld [vmem:[%s1014_s4 + $0x1c] ss:$12 sps:$4 sm:$0xff]  }
  0x31   : > { %779 = vmatprep.subr.bf16.mxu0 %v883_v18  ;;  %v902_v37 = vld [vmem:[%s1014_s4 + $0x20] ss:$12 sps:$4 sm:$0xff]  }
  0x32   : > { %816 = vmatpush3.bf16.msra.mxu1 %v882_v17  ;;  %v266_v52 = vld [vmem:[#allocation2] sm:$0xff]  ;;  %v268_v0 = vld [vmem:[#allocation2 + $0x8] sm:$0xff] }
  0x33   : > { %817 = vmatprep.subr.bf16.mxu1 %v885_v20 }
  0x34   : > { %780 = vmatpush3.bf16.msra.mxu0 %v884_v19 }
  0x35   : > { %781 = vmatprep.subr.bf16.mxu0 %v886_v21 }
  0x36   : > { %818 = vmatpush3.bf16.msra.mxu1 %v885_v20 }
  0x37   : > { %819 = vmatprep.subr.bf16.mxu1 %v888_v22 }
  0x38   : > { %782 = vmatpush3.bf16.msra.mxu0 %v887_v23 }
  0x39   : > { %783 = vmatprep.subr.bf16.mxu0 %v889_v24 }
  0x3a   : > { %820 = vmatpush3.bf16.msra.mxu1 %v888_v22 }
  0x3b   : > { %821 = vmatprep.subr.bf16.mxu1 %v891_v25 }
  0x3c   : > { %784 = vmatpush3.bf16.msra.mxu0 %v890_v26 }
  0x3d   : > { %785 = vmatprep.subr.bf16.mxu0 %v892_v27 }
  0x3e   : > { %822 = vmatpush3.bf16.msra.mxu1 %v891_v25 }
  0x3f   : > { %823 = vmatprep.subr.bf16.mxu1 %v894_v29 }
  0x40   : > { %786 = vmatpush3.bf16.msra.mxu0 %v893_v28 }
  0x41   : > { %787 = vmatprep.subr.bf16.mxu0 %v895_v30 }
  0x42   : > { %824 = vmatpush3.bf16.msra.mxu1 %v894_v29 }
  0x43   : > { %825 = vmatprep.subr.bf16.mxu1 %v897_v31 }
  0x44   : > { %788 = vmatpush3.bf16.msra.mxu0 %v896_v34 }
  0x46   : > { %826 = vmatpush3.bf16.msra.mxu1 %v897_v31 }
  0x47   : > { %534 = vmatmul.mubr.bf16.vlgmr.msra.gmra.mxu0 %v898_v35 }
  0x48   : > { %541 = vmatprep.mubr.bf16.mxu0 %v903_v36 }
  0x49   : > { %828 = vmatmul.mubr.bf16.vlgmr.msra.gmra.mxu1 %v902_v37 }
  0x4f   : > { %542 = vmatmul.mubr.bf16.gmra.mxu0 %v905_v38 }
 0x107   : > { %v789_v39 = vpop.f32.mrf.mxu0 }
 0x109   : > { %v790_v40 = vpop.f32.mrf.mxu0  ;;  %v829_v41 = vpop.f32.mrf.mxu1 }
 0x10a   : > { %v791_v42 = vadd.f32 %v790_v40, %v789_v39 }
 0x10b   : > { %v792_v43 = vpop.f32.mrf.mxu0  ;;  %v584_v45 = vpop.f32.mrf.mxu1 }
 0x10c   : > { %v585_v46 = vadd.f32 %v791_v42, %v584_v45 }
 0x10d   : > { %v793_v47 = vpop.f32.mrf.mxu0  ;;  %v830_v48 = vpop.f32.mrf.mxu1 }
 0x10e   : > { %v599_v49 = vadd.f32 %v585_v46, %v265_v44  ;;  %v794_v50 = vadd.f32 %v793_v47, %v792_v43 }
 0x10f   : > { %v795_v51 = vpop.f32.mrf.mxu0  ;;  %v587_v53 = vpop.f32.mrf.mxu1 }
 0x110   : > { %603 = vst [vmem:[#allocation2 + $0x10] sm:$0xff] %v599_v49  ;;  %v588_v54 = vadd.f32 %v794_v50, %v587_v53 }
 0x111   : > { %v796_v55 = vpop.f32.mrf.mxu0 }
 0x112   : > { %v600_v56 = vadd.f32 %v588_v54, %v266_v52  ;;  %v797_v57 = vadd.f32 %v796_v55, %v795_v51 }
 0x113   : > { %v798_v59 = vpop.f32.mrf.mxu0 }
 0x114   : > { %604 = vst [vmem:[#allocation2] sm:$0xff] %v600_v56  ;;  %v593_v60 = vadd.f32 %v829_v41, %v797_v57 }
 0x115   : > { %v799_v61 = vpop.f32.mrf.mxu0 }
 0x116   : > { %v601_v62 = vadd.f32 %v593_v60, %v267_v58  ;;  %v800_v63 = vadd.f32 %v799_v61, %v798_v59 }
 0x118   : > { %605 = vst [vmem:[#allocation2 + $0x18] sm:$0xff] %v601_v62  ;;  %v596_v1 = vadd.f32 %v830_v48, %v800_v63  ;;  %610 = sbr.rel (%p767_p11) target bundleno = 293 (0x125), region = 62 }
 0x11a   : > { %v602_v2 = vadd.f32 %v596_v1, %v268_v0 }
 0x11c   : > { %606 = vst [vmem:[#allocation2 + $0x8] sm:$0xff] %v602_v2 }
 0x11d   : > { %v611_v3 = vld [vmem:[#allocation2 + $0x10] sm:$0xff]  ;;  %v612_v4 = vld [vmem:[#allocation2] sm:$0xff] }
 0x11e   : > { %615 = vst [vmem:[%s1077_s2] sm:$0xff] %v611_v3  ;;  %616 = vst [vmem:[%s1077_s2 + $0x8] sm:$0xff] %v612_v4 }
 0x11f   : > { %v613_v5 = vld [vmem:[#allocation2 + $0x18] sm:$0xff] }
 0x120   : > { %617 = vst [vmem:[%s1077_s2 + $0x10] sm:$0xff] %v613_v5 }
 0x123   : > { %v614_v6 = vld [vmem:[#allocation2 + $0x8] sm:$0xff] }
 0x124   : > { %618 = vst [vmem:[%s1077_s2 + $0x18] sm:$0xff] %v614_v6 }
 0x125 PF: > { %s12_s13 = sadd.s32 1, %s944_s13   ;;  %s1078_s9 = smov %s932_s10 }
 0x126   : > { %p9_p12 = scmp.ge.s32.totalorder %s12_s13, 5   ;;  %s1079_s10 = smov %s997_s17 }
 0x127   : > { %s1080_s11 = smov %s940_s12  ;;  %s1081_s12 = smov %s1083_s14 }
 0x128   :  { %11 = sbr.rel (!%p9_p12) target bundleno = 3 (0x3), region = 106 }

// kernel: quantized_resnet18_forward.94
= control target key start
LH: loop header
LB: loop body
LE: loop exit
PB: predicated region body
PF: predicated region fallthrough
CT: control target
= control target key end

     0   :  { %v14_v0 = vlaneseq  ;;  %v104_v6 = vmov 0.0   ;;  %v105_v11 = vmov 1966171168   ;;  %s157_s0 = inlined_call_operand.vmem [shape: f32[8,256], index: 0, kind: input, shape index: {}]   ;;  %s158_s1 = inlined_call_operand.vmem [shape: f32[1,256], index: 1, kind: output, shape index: {0}]   ;;  %s159_s2 = inlined_call_operand.vmem [shape: f32[1,256], index: 2, kind: output, shape index: {1}]  }
   0x1   :  { %v20_v1 = vld [vmem:[%s157_s0] sm:$0xff]  ;;  %v21_v2 = vld [vmem:[%s157_s0 + $0x8] sm:$0xff]  ;;  %v39_v12 = vunpack.c.l.s4 %v105_v11 }
   0x2   :  { %vm127_vm0 = vcmp.lt.s32.totalorder %v14_v0, 256  ;;  %v23_v4 = vrot.slane %v20_v1, 4  ;;  %v29_v5 = vrot.slane %v21_v2, 4  ;;  %v60_v7 = vmul.f32 %v20_v1, %v20_v1 }
   0x3   :  { %18 = vst.msk [vmem:[%s158_s1] sm:$0x3] %vm127_vm0, %v104_v6  ;;  %19 = vst.msk [vmem:[%s159_s2] sm:$0x3] %vm127_vm0, %v104_v6  ;;  %v61_v8 = vmul.f32 %v21_v2, %v21_v2  ;;  %v40_v21 = vunpack.c.0.s8 %v39_v12  ;;  %v42_v22 = vshrl.u32 %v14_v0, 7 }
   0x4   :  { %v24_v9 = vadd.f32 %v23_v4, %v20_v1  ;;  %v30_v10 = vadd.f32 %v29_v5, %v21_v2  ;;  %v62_v13 = vrot.slane %v60_v7, 4 }
   0x5   :  { %v68_v14 = vrot.slane %v61_v8, 4  ;;  %v43_v31 = vsub.s32 %v40_v21, %v42_v22 }
   0x6   :  { %v25_v15 = vrot.slane %v24_v9, 2  ;;  %v31_v16 = vrot.slane %v30_v10, 2  ;;  %v63_v17 = vadd.f32 %v62_v13, %v60_v7 }
   0x7   :  { %v69_v18 = vadd.f32 %v68_v14, %v61_v8 }
   0x8   :  { %v26_v19 = vadd.f32 %v25_v15, %v24_v9  ;;  %v32_v20 = vadd.f32 %v31_v16, %v30_v10  ;;  %v64_v23 = vrot.slane %v63_v17, 2 }
   0x9   :  { %v70_v24 = vrot.slane %v69_v18, 2 }
   0xa   :  { %v27_v25 = vrot.slane %v26_v19, 1  ;;  %v33_v26 = vrot.slane %v32_v20, 1  ;;  %v65_v27 = vadd.f32 %v64_v23, %v63_v17  ;;  %v22_v38 = vld [vmem:[%s158_s1] sm:$0x3] }
   0xb   :  { %v71_v28 = vadd.f32 %v70_v24, %v69_v18  ;;  %v59_v43 = vld [vmem:[%s159_s2] sm:$0x3] }
   0xc   :  { %v28_v29 = vadd.f32 %v27_v25, %v26_v19  ;;  %v34_v30 = vadd.f32 %v33_v26, %v32_v20  ;;  %v66_v32 = vrot.slane %v65_v27, 1 }
   0xd   :  { %v72_v33 = vrot.slane %v71_v28, 1 }
   0xe   :  { %v37_v34 = vcombine.low %v28_v29, %v34_v30  ;;  %v67_v35 = vadd.f32 %v66_v32, %v65_v27 }
   0xf   :  { %v73_v36 = vadd.f32 %v72_v33, %v71_v28 }
  0x10   :  { %v44_v37 = vrot.slane %v37_v34, %v43_v31 }
  0x11   :  { %v76_v39 = vcombine.low %v67_v35, %v73_v36 }
  0x12   :  { %v51_v40 = vrot.slane %v44_v37, %v43_v31 }
  0x13   :  { %v83_v41 = vrot.slane %v76_v39, %v43_v31 }
  0x14   :  { %v53_v42 = vadd.f32 %v51_v40, %v22_v38 }
  0x15   :  { %v90_v44 = vrot.slane %v83_v41, %v43_v31 }
  0x16   :  { %58 = vst.msk [vmem:[%s158_s1] sm:$0x3] %vm127_vm0, %v53_v42 }
  0x17   :  { %v92_v45 = vadd.f32 %v90_v44, %v59_v43 }
  0x19   :  { %93 = vst.msk [vmem:[%s159_s2] sm:$0x3] %vm127_vm0, %v92_v45 }

// kernel: quantized_resnet18_forward.95
= control target key start
LH: loop header
LB: loop body
LE: loop exit
PB: predicated region body
PF: predicated region fallthrough
CT: control target
= control target key end

     0   :  { %v18_v0 = vlaneseq  ;;  %s88_s1 = inlined_call_operand.vmem [shape: f32[1,256], index: 1, kind: input, shape index: {}]   ;;  %s89_s2 = inlined_call_operand.vmem [shape: f32[1,256], index: 2, kind: input, shape index: {}]   ;;  %s90_s0 = inlined_call_operand.vmem [shape: f32[8,256], index: 0, kind: input, shape index: {}]   ;;  %s91_s3 = inlined_call_operand.vmem [shape: f32[8,256], index: 3, kind: output, shape index: {}]  }
   0x1   :  { %v16_v2 = vld [vmem:[%s88_s1] sm:$0x3]  ;;  %v15_v7 = vld [vmem:[%s90_s0 + $0x8] sm:$0xff] }
   0x2   :  { %v19_v1 = vshrl.u32 %v18_v0, 7  ;;  %v30_v3 = vld [vmem:[%s89_s2] sm:$0x3] }
   0x3   :  { %v14_v6 = vld [vmem:[%s90_s0] sm:$0xff] }
   0x4   :  { %v20_v4 = vsub.s32 0, %v19_v1  ;;  %v24_v5 = vsub.s32 1, %v19_v1 }
   0x6   :  { %v21_v8 = vrot.slane %v16_v2, %v20_v4  ;;  %v35_v9 = vrot.slane %v30_v3, %v20_v4  ;;  %v25_v10 = vrot.slane %v16_v2, %v24_v5  ;;  %v39_v11 = vrot.slane %v30_v3, %v24_v5 }
   0x8   :  { %v28_v12 = vmul.f32 %v21_v8, %v14_v6  ;;  %v29_v13 = vmul.f32 %v25_v10, %v15_v7 }
   0xa   :  { %v42_v14 = vadd.f32 %v35_v9, %v28_v12  ;;  %v43_v15 = vadd.f32 %v39_v11, %v29_v13 }
   0xc   :  { %44 = vst [vmem:[%s91_s3] sm:$0xff] %v42_v14  ;;  %45 = vst [vmem:[%s91_s3 + $0x8] sm:$0xff] %v43_v15 }

// kernel: quantized_resnet18_forward.93
= control target key start
LH: loop header
LB: loop body
LE: loop exit
PB: predicated region body
PF: predicated region fallthrough
CT: control target
= control target key end

     0   :  { %v237_v1 = vmov 0   ;;  %s316_s1 = inlined_call_operand.vmem [shape: bf16[128,256], index: 1, kind: input, shape index: {}]   ;;  %s317_s0 = inlined_call_operand.vmem [shape: bf16[16,128], index: 0, kind: input, shape index: {}]   ;;  %s318_s2 = inlined_call_operand.vmem [shape: f32[16,256], index: 2, kind: output, shape index: {}]  }
   0x1   :  { %v212_v0 = vld [vmem:[%s316_s1 + $0x74] ss:$8 sps:$4 sm:$0xff]   ;;  %160 = vmatprep.mubr.bf16.mxu0 %v237_v1  ;;  %v214_v2 = vld [vmem:[%s316_s1 + $0x70] ss:$8 sps:$4 sm:$0xff]   ;;  %v215_v3 = vld [vmem:[%s316_s1 + $0x64] ss:$8 sps:$4 sm:$0xff]  }
   0x2   :  { %128 = vmatprep.subr.bf16.mxu0 %v212_v0  ;;  %v217_v4 = vld [vmem:[%s316_s1 + $0x60] ss:$8 sps:$4 sm:$0xff]   ;;  %v218_v5 = vld [vmem:[%s316_s1 + $0x54] ss:$8 sps:$4 sm:$0xff]   ;;  %v220_v6 = vld [vmem:[%s316_s1 + $0x50] ss:$8 sps:$4 sm:$0xff]  }
   0x3   :  { %129 = vmatpush1.bf16.msra.mxu0 %v214_v2  ;;  %v221_v7 = vld [vmem:[%s316_s1 + $0x44] ss:$8 sps:$4 sm:$0xff]   ;;  %v223_v8 = vld [vmem:[%s316_s1 + $0x40] ss:$8 sps:$4 sm:$0xff]   ;;  %v224_v9 = vld [vmem:[%s316_s1 + $0x34] ss:$8 sps:$4 sm:$0xff]  }
   0x4   :  { %130 = vmatprep.subr.bf16.mxu0 %v215_v3  ;;  %v226_v10 = vld [vmem:[%s316_s1 + $0x30] ss:$8 sps:$4 sm:$0xff]   ;;  %v227_v11 = vld [vmem:[%s316_s1 + $0x24] ss:$8 sps:$4 sm:$0xff]   ;;  %v229_v12 = vld [vmem:[%s316_s1 + $0x20] ss:$8 sps:$4 sm:$0xff]  }
   0x5   :  { %v230_v13 = vld [vmem:[%s316_s1 + $0x14] ss:$8 sps:$4 sm:$0xff]   ;;  %v232_v14 = vld [vmem:[%s316_s1 + $0x10] ss:$8 sps:$4 sm:$0xff]   ;;  %v233_v15 = vld [vmem:[%s316_s1 + $0x4] ss:$8 sps:$4 sm:$0xff]  }
   0x6   :  { %v235_v16 = vld [vmem:[%s316_s1] ss:$8 sps:$4 sm:$0xff]  }
   0x7   :  { %131 = vmatpush1.bf16.msra.mxu0 %v217_v4  ;;  %v236_v17 = vld [vmem:[%s317_s0] sm:$0xff]  }
   0x8   :  { %132 = vmatprep.subr.bf16.mxu0 %v218_v5 }
   0xb   :  { %133 = vmatpush1.bf16.msra.mxu0 %v220_v6 }
   0xc   :  { %134 = vmatprep.subr.bf16.mxu0 %v221_v7 }
   0xf   :  { %135 = vmatpush1.bf16.msra.mxu0 %v223_v8 }
  0x10   :  { %136 = vmatprep.subr.bf16.mxu0 %v224_v9 }
  0x13   :  { %137 = vmatpush1.bf16.msra.mxu0 %v226_v10 }
  0x14   :  { %138 = vmatprep.subr.bf16.mxu0 %v227_v11 }
  0x17   :  { %139 = vmatpush1.bf16.msra.mxu0 %v229_v12 }
  0x18   :  { %140 = vmatprep.subr.bf16.mxu0 %v230_v13 }
  0x1b   :  { %141 = vmatpush1.bf16.msra.mxu0 %v232_v14 }
  0x1c   :  { %142 = vmatprep.subr.bf16.mxu0 %v233_v15 }
  0x1f   :  { %143 = vmatpush1.bf16.msra.mxu0 %v235_v16 }
  0x22   :  { %161 = vmatmul.mubr.bf16.vlgmr.msra.gmra.mxu0 %v236_v17 }
  0xe2   :  { %v162_v18 = vpop.f32.mrf.mxu0 }
  0xe3   :  { %186 = vst [vmem:[%s318_s2] sm:$0xff] %v162_v18 }
  0xe4   :  { %v164_v19 = vpop.f32.mrf.mxu0 }
  0xe5   :  { %187 = vst [vmem:[%s318_s2 + $0x8] sm:$0xff] %v164_v19 }
  0xe6   :  { %v166_v20 = vpop.f32.mrf.mxu0 }
  0xe7   :  { %188 = vst [vmem:[%s318_s2 + $0x10] sm:$0xff] %v166_v20 }
  0xe8   :  { %v168_v21 = vpop.f32.mrf.mxu0 }
  0xe9   :  { %189 = vst [vmem:[%s318_s2 + $0x18] sm:$0xff] %v168_v21 }

// kernel: quantized_resnet18_forward.98
= control target key start
LH: loop header
LB: loop body
LE: loop exit
PB: predicated region body
PF: predicated region fallthrough
CT: control target
= control target key end

     0   :  { %v18_v0 = vlaneseq  ;;  %s90_s1 = inlined_call_operand.vmem [shape: f32[1,256], index: 1, kind: input, shape index: {}]   ;;  %s91_s2 = inlined_call_operand.vmem [shape: f32[1,256], index: 2, kind: input, shape index: {}]   ;;  %s92_s0 = inlined_call_operand.vmem [shape: f32[8,256], index: 0, kind: input, shape index: {}]   ;;  %s93_s3 = inlined_call_operand.vmem [shape: f32[8,256], index: 3, kind: output, shape index: {}]  }
   0x1   :  { %v16_v2 = vld [vmem:[%s90_s1] sm:$0x3]  ;;  %v15_v7 = vld [vmem:[%s92_s0 + $0x8] sm:$0xff] }
   0x2   :  { %v19_v1 = vshrl.u32 %v18_v0, 7  ;;  %v30_v3 = vld [vmem:[%s91_s2] sm:$0x3] }
   0x3   :  { %v14_v6 = vld [vmem:[%s92_s0] sm:$0xff] }
   0x4   :  { %v20_v4 = vsub.s32 0, %v19_v1  ;;  %v24_v5 = vsub.s32 1, %v19_v1 }
   0x6   :  { %v21_v8 = vrot.slane %v16_v2, %v20_v4  ;;  %v35_v9 = vrot.slane %v30_v3, %v20_v4  ;;  %v25_v10 = vrot.slane %v16_v2, %v24_v5  ;;  %v39_v11 = vrot.slane %v30_v3, %v24_v5 }
   0x8   :  { %v28_v12 = vmul.f32 %v21_v8, %v14_v6  ;;  %v29_v13 = vmul.f32 %v25_v10, %v15_v7 }
   0xa   :  { %v42_v14 = vadd.f32 %v35_v9, %v28_v12  ;;  %v43_v15 = vadd.f32 %v39_v11, %v29_v13 }
   0xc   :  { %v44_v16 = vmax.f32 %v42_v14, 0.0  ;;  %v45_v17 = vmax.f32 %v43_v15, 0.0 }
   0xe   :  { %46 = vst [vmem:[%s93_s3] sm:$0xff] %v44_v16  ;;  %47 = vst [vmem:[%s93_s3 + $0x8] sm:$0xff] %v45_v17 }

// kernel: quantized_resnet18_forward.96
= control target key start
LH: loop header
LB: loop body
LE: loop exit
PB: predicated region body
PF: predicated region fallthrough
CT: control target
= control target key end

     0   :  { %s1050_s9 = smov 0   ;;  %s1052_s10 = smov 0   ;;  %s1184_s0 = inlined_call_operand.vmem [shape: bf16[16,1152], index: 0, kind: input, shape index: {}]   ;;  %s1185_s1 = inlined_call_operand.vmem [shape: bf16[1152,256], index: 1, kind: input, shape index: {}]   ;;  %s1186_s2 = inlined_call_operand.vmem [shape: f32[16,256], index: 2, kind: output, shape index: {}]  }
   0x1   :  { %s1054_s11 = smov 0   ;;  %s1056_s12 = smov 0  }
   0x2   :  { %s1058_s13 = smov 0  }
   0x3 LB: > { %s24_s14 = sadd.s32 1, %s1027_s12  ;;  %p47_p1 = scmp.ne.s32.totalorder %s1019_s10, %s1015_s9  ;;  %s1031_s13 = sphi %s1058_s13, %s12_s13   ;;  %s1027_s12 = sphi %s1056_s12, %s1190_s12   ;;  %s1023_s11 = sphi %s1054_s11, %s1189_s11   ;;  %s1019_s10 = sphi %s1052_s10, %s1188_s10   ;;  %s1015_s9 = sphi %s1050_s9, %s1187_s9  }
   0x4   : > { %p25_p0 = scmp.ge.s32.totalorder %s24_s14, 3  ;;  %p48_p2 = scmp.eq.s32.totalorder %s1031_s13, 0 }
   0x5   : > { %s40_s16 = sadd.s32 1, %s1019_s10  ;;  %p805_p5 = scmp.ge.s32.totalorder %s1031_s13, 3 }
   0x6   : > { %s1192_s14 = smov (%p25_p0, %s24_s14), 0  ;;  %p49_p3 = por %p48_p2, %p47_p1 }
   0x7   : > { %s36_s15 = ssub.s32 %s1027_s12, %s1192_s14  ;;  %129 = sbr.rel (%p805_p5) target bundleno = 19 (0x13), region = 16 }
   0x8   : > { %p38_p4 = scmp.eq.s32.totalorder %s36_s15, 0 }
   0xa   : > { %s1085_s17 = scalar_select %p38_p4, %s1019_s10, %s40_s16  }
   0xc   : > { %132 = sbr.rel (!%p49_p3) target bundleno = 19 (0x13), region = 20  ;;  %s134_s18 = sand.u32 (%p49_p3), 1, %s1019_s10  }
   0xd   : > { %s871_s19 = smul.u32 (%p49_p3), 12, %s1027_s12 }
   0xe   : > { %s873_s20 = smul.u32 (%p49_p3), 24, %s134_s18 }
   0xf   : > { %s142_s23 = scalar_lea.vmem (%p49_p3), %s1184_s0, %s871_s19 }
  0x10   : > { %v157_v0 = vld [vmem:[%s142_s23] sm:$0xff] (%p49_p3)  ;;  %v807_v2 = vld [vmem:[%s142_s23 + $0x8] sm:$0xf] (%p49_p3)  ;;  %s136_s24 = scalar_lea.vmem (%p49_p3), [#allocation3], %s873_s20  ;;  %v809_v3 = vld [vmem:[%s142_s23 + $0x2c] sm:$0xf] (%p49_p3) }
  0x11   : > { %v159_v1 = vld [vmem:[%s142_s23 + $0x24] sm:$0xff]  ;;  %158 = vst [vmem:[%s136_s24] sm:$0xff] %v157_v0  ;;  %808 = vst [vmem:[%s136_s24 + $0x8] sm:$0xf] %v807_v2 }
  0x12   : > { %160 = vst [vmem:[%s136_s24 + $0xc] sm:$0xff] %v159_v1  ;;  %810 = vst [vmem:[%s136_s24 + $0x14] sm:$0xf] %v809_v3 }
  0x13 PF: > { %p811_p6 = scmp.ge.s32.totalorder %s1031_s13, 1  ;;  %p192_p7 = scmp.lt.s32.totalorder %s1031_s13, 4 }
  0x15   : > { %p193_p8 = pnand %p811_p6, %p192_p7 }
  0x16   : > { %s199_s25 = sand.u32 (!%p193_p8), 1, %s1015_s9   ;;  %s237_s26 = smul.u32 (!%p193_p8), 48, %s1023_s11 }
  0x17   : > { %196 = sbr.rel (%p193_p8) target bundleno = 313 (0x139), region = 50  ;;  %p814_p10 = scmp.ne.s32.totalorder (!%p193_p8), %s1023_s11, 0 }
  0x18   : > { %s874_s27 = smul.u32 (!%p193_p8), 24, %s199_s25  ;;  %p239_p9 = scmp.lt.s32.totalorder (!%p193_p8), %s237_s26, 143 }
  0x1a   : > { %s1102_s4 = scalar_lea.vmem (!%p193_p8), [#allocation3], %s874_s27 }
  0x1c   : > { %s1194_s26 = smov (!%p239_p9, %s237_s26), 143  ;;  %265 = sbr.rel (%p814_p10) target bundleno = 36 (0x24), region = 58 }
  0x1d   : > { %s872_s28 = sshll.u32 %s1194_s26, 3 }
  0x1e   : > { %s1100_s3 = scalar_lea.vmem %s1185_s1, %s872_s28 }
  0x21   : > { %v1033_v4 = vmov 0.0  }
  0x22   : > { %266 = vst [vmem:[#allocation2 + $0x10] sm:$0xff] %v1033_v4  ;;  %267 = vst [vmem:[#allocation2] sm:$0xff] %v1033_v4 }
  0x23   : > { %268 = vst [vmem:[#allocation2 + $0x18] sm:$0xff] %v1033_v4  ;;  %269 = vst [vmem:[#allocation2 + $0x8] sm:$0xff] %v1033_v4 }
  0x24 PF: > { %v917_v5 = vld [vmem:[%s1100_s3 + $0x74] ss:$8 sps:$4 sm:$0xff]   ;;  %v919_v6 = vld [vmem:[%s1100_s3 + $0x70] ss:$8 sps:$4 sm:$0xff]   ;;  %v1034_v7 = vmov 0   ;;  %p866_p11 = scmp.ne.s32.totalorder %s1023_s11, 2 }
  0x25   : > { %657 = vmatprep.mubr.bf16.mxu1 %v1034_v7  ;;  %582 = vmatprep.subr.bf16.mxu0 %v917_v5  ;;  %v920_v8 = vld [vmem:[%s1100_s3 + $0x64] ss:$8 sps:$4 sm:$0xff]   ;;  %v922_v9 = vld [vmem:[%s1100_s3 + $0x60] ss:$8 sps:$4 sm:$0xff]   ;;  %v923_v10 = vld [vmem:[%s1100_s3 + $0x54] ss:$8 sps:$4 sm:$0xff]  }
  0x26   : > { %583 = vmatpush1.bf16.msra.mxu0 %v919_v6  ;;  %v925_v11 = vld [vmem:[%s1100_s3 + $0x50] ss:$8 sps:$4 sm:$0xff]   ;;  %v926_v12 = vld [vmem:[%s1100_s3 + $0x44] ss:$8 sps:$4 sm:$0xff]   ;;  %v938_v13 = vld [vmem:[%s1100_s3 + $0x174] ss:$8 sps:$4 sm:$0xff]  }
  0x27   : > { %584 = vmatprep.subr.bf16.mxu0 %v920_v8  ;;  %v940_v14 = vld [vmem:[%s1100_s3 + $0x170] ss:$8 sps:$4 sm:$0xff]   ;;  %v928_v15 = vld [vmem:[%s1100_s3 + $0x40] ss:$8 sps:$4 sm:$0xff]   ;;  %v929_v16 = vld [vmem:[%s1100_s3 + $0x34] ss:$8 sps:$4 sm:$0xff]   ;;  %625 = vmatprep.subr.bf16.mxu1 %v938_v13 }
  0x28   : > { %v944_v17 = vld [vmem:[%s1100_s3 + $0x164] ss:$8 sps:$4 sm:$0xff]   ;;  %626 = vmatpush1.bf16.msra.mxu1 %v940_v14  ;;  %v946_v18 = vld [vmem:[%s1100_s3 + $0x160] ss:$8 sps:$4 sm:$0xff]   ;;  %v931_v19 = vld [vmem:[%s1100_s3 + $0x30] ss:$8 sps:$4 sm:$0xff]  }
  0x29   : > { %627 = vmatprep.subr.bf16.mxu1 %v944_v17  ;;  %v950_v20 = vld [vmem:[%s1100_s3 + $0x154] ss:$8 sps:$4 sm:$0xff]   ;;  %v932_v21 = vld [vmem:[%s1100_s3 + $0x24] ss:$8 sps:$4 sm:$0xff]   ;;  %v952_v22 = vld [vmem:[%s1100_s3 + $0x150] ss:$8 sps:$4 sm:$0xff]  }
  0x2a   : > { %585 = vmatpush1.bf16.msra.mxu0 %v922_v9  ;;  %v956_v23 = vld [vmem:[%s1100_s3 + $0x144] ss:$8 sps:$4 sm:$0xff]   ;;  %v934_v24 = vld [vmem:[%s1100_s3 + $0x20] ss:$8 sps:$4 sm:$0xff]   ;;  %v935_v25 = vld [vmem:[%s1100_s3 + $0x14] ss:$8 sps:$4 sm:$0xff]  }
  0x2b   : > { %586 = vmatprep.subr.bf16.mxu0 %v923_v10  ;;  %v958_v26 = vld [vmem:[%s1100_s3 + $0x140] ss:$8 sps:$4 sm:$0xff]   ;;  %v962_v27 = vld [vmem:[%s1100_s3 + $0x134] ss:$8 sps:$4 sm:$0xff]   ;;  %v937_v28 = vld [vmem:[%s1100_s3 + $0x10] ss:$8 sps:$4 sm:$0xff]  }
  0x2c   : > { %628 = vmatpush1.bf16.msra.mxu1 %v946_v18  ;;  %v941_v29 = vld [vmem:[%s1100_s3 + $0x4] ss:$8 sps:$4 sm:$0xff]   ;;  %v964_v30 = vld [vmem:[%s1100_s3 + $0x130] ss:$8 sps:$4 sm:$0xff]   ;;  %v943_v32 = vld [vmem:[%s1100_s3] ss:$8 sps:$4 sm:$0xff]  }
  0x2d   : > { %629 = vmatprep.subr.bf16.mxu1 %v950_v20  ;;  %v968_v31 = vld [vmem:[%s1100_s3 + $0x124] ss:$8 sps:$4 sm:$0xff]   ;;  %v947_v33 = vld [vmem:[%s1100_s3 + $0xf4] ss:$8 sps:$4 sm:$0xff]   ;;  %v970_v34 = vld [vmem:[%s1100_s3 + $0x120] ss:$8 sps:$4 sm:$0xff]  }
  0x2e   : > { %587 = vmatpush1.bf16.msra.mxu0 %v925_v11  ;;  %v974_v35 = vld [vmem:[%s1100_s3 + $0x114] ss:$8 sps:$4 sm:$0xff]   ;;  %v949_v36 = vld [vmem:[%s1100_s3 + $0xf0] ss:$8 sps:$4 sm:$0xff]   ;;  %v953_v37 = vld [vmem:[%s1100_s3 + $0xe4] ss:$8 sps:$4 sm:$0xff]  }
  0x2f   : > { %588 = vmatprep.subr.bf16.mxu0 %v926_v12  ;;  %v976_v38 = vld [vmem:[%s1100_s3 + $0x110] ss:$8 sps:$4 sm:$0xff]   ;;  %v980_v39 = vld [vmem:[%s1100_s3 + $0x104] ss:$8 sps:$4 sm:$0xff]   ;;  %v955_v41 = vld [vmem:[%s1100_s3 + $0xe0] ss:$8 sps:$4 sm:$0xff]  }
  0x30   : > { %630 = vmatpush1.bf16.msra.mxu1 %v952_v22  ;;  %v992_v40 = vld [vmem:[%s1102_s4 + $0x4] ss:$12 sps:$4 sm:$0xff]   ;;  %v986_v46 = vld [vmem:[%s1102_s4 + $0x8] ss:$12 sps:$4 sm:$0xff]   ;;  %v990_v56 = vld [vmem:[%s1102_s4] ss:$12 sps:$4 sm:$0xff]  }
  0x31   : > { %631 = vmatprep.subr.bf16.mxu1 %v956_v23  ;;  %v959_v42 = vld [vmem:[%s1100_s3 + $0xd4] ss:$8 sps:$4 sm:$0xff]   ;;  %614 = vmatprep.mubr.bf16.mxu0 %v992_v40  ;;  %v982_v43 = vld [vmem:[%s1100_s3 + $0x100] ss:$8 sps:$4 sm:$0xff]   ;;  %v961_v44 = vld [vmem:[%s1100_s3 + $0xd0] ss:$8 sps:$4 sm:$0xff]  }
  0x32   : > { %589 = vmatpush1.bf16.msra.mxu0 %v928_v15  ;;  %v965_v45 = vld [vmem:[%s1100_s3 + $0xc4] ss:$8 sps:$4 sm:$0xff]   ;;  %v967_v47 = vld [vmem:[%s1100_s3 + $0xc0] ss:$8 sps:$4 sm:$0xff]   ;;  %v971_v48 = vld [vmem:[%s1100_s3 + $0xb4] ss:$8 sps:$4 sm:$0xff]  }
  0x33   : > { %590 = vmatprep.subr.bf16.mxu0 %v929_v16  ;;  %v973_v49 = vld [vmem:[%s1100_s3 + $0xb0] ss:$8 sps:$4 sm:$0xff]   ;;  %v977_v50 = vld [vmem:[%s1100_s3 + $0xa4] ss:$8 sps:$4 sm:$0xff]   ;;  %v979_v51 = vld [vmem:[%s1100_s3 + $0xa0] ss:$8 sps:$4 sm:$0xff]  }
  0x34   : > { %632 = vmatpush1.bf16.msra.mxu1 %v958_v26  ;;  %v983_v52 = vld [vmem:[%s1100_s3 + $0x94] ss:$8 sps:$4 sm:$0xff]   ;;  %v985_v53 = vld [vmem:[%s1100_s3 + $0x90] ss:$8 sps:$4 sm:$0xff]   ;;  %v987_v54 = vld [vmem:[%s1100_s3 + $0x84] ss:$8 sps:$4 sm:$0xff]  }
  0x35   : > { %633 = vmatprep.subr.bf16.mxu1 %v962_v27  ;;  %v989_v55 = vld [vmem:[%s1100_s3 + $0x80] ss:$8 sps:$4 sm:$0xff]   ;;  %v270_v59 = vld [vmem:[#allocation2 + $0x10] sm:$0xff]  ;;  %v272_v3 = vld [vmem:[#allocation2 + $0x18] sm:$0xff] }
  0x36   : > { %591 = vmatpush1.bf16.msra.mxu0 %v931_v19  ;;  %v271_v63 = vld [vmem:[#allocation2] sm:$0xff]  ;;  %v273_v8 = vld [vmem:[#allocation2 + $0x8] sm:$0xff] }
  0x37   : > { %592 = vmatprep.subr.bf16.mxu0 %v932_v21 }
  0x38   : > { %634 = vmatpush1.bf16.msra.mxu1 %v964_v30 }
  0x39   : > { %635 = vmatprep.subr.bf16.mxu1 %v968_v31 }
  0x3a   : > { %593 = vmatpush1.bf16.msra.mxu0 %v934_v24 }
  0x3b   : > { %594 = vmatprep.subr.bf16.mxu0 %v935_v25 }
  0x3c   : > { %636 = vmatpush1.bf16.msra.mxu1 %v970_v34 }
  0x3d   : > { %637 = vmatprep.subr.bf16.mxu1 %v974_v35 }
  0x3e   : > { %595 = vmatpush1.bf16.msra.mxu0 %v937_v28 }
  0x3f   : > { %596 = vmatprep.subr.bf16.mxu0 %v941_v29 }
  0x40   : > { %638 = vmatpush1.bf16.msra.mxu1 %v976_v38 }
  0x41   : > { %639 = vmatprep.subr.bf16.mxu1 %v980_v39 }
  0x42   : > { %597 = vmatpush1.bf16.msra.mxu0 %v943_v32 }
  0x43   : > { %598 = vmatprep.subr.bf16.mxu0 %v947_v33 }
  0x44   : > { %640 = vmatpush1.bf16.msra.mxu1 %v982_v43 }
  0x46   : > { %599 = vmatpush2.bf16.msra.mxu0 %v949_v36 }
  0x47   : > { %600 = vmatprep.subr.bf16.mxu0 %v953_v37  ;;  %658 = vmatmul.mubr.bf16.vlgmr.msra.gmra.mxu1 %v986_v46 }
  0x4a   : > { %601 = vmatpush2.bf16.msra.mxu0 %v955_v41 }
  0x4b   : > { %602 = vmatprep.subr.bf16.mxu0 %v959_v42 }
  0x4e   : > { %603 = vmatpush2.bf16.msra.mxu0 %v961_v44 }
  0x4f   : > { %604 = vmatprep.subr.bf16.mxu0 %v965_v45 }
  0x52   : > { %605 = vmatpush2.bf16.msra.mxu0 %v967_v47 }
  0x53   : > { %606 = vmatprep.subr.bf16.mxu0 %v971_v48 }
  0x56   : > { %607 = vmatpush2.bf16.msra.mxu0 %v973_v49 }
  0x57   : > { %608 = vmatprep.subr.bf16.mxu0 %v977_v50 }
  0x5a   : > { %609 = vmatpush2.bf16.msra.mxu0 %v979_v51 }
  0x5b   : > { %610 = vmatprep.subr.bf16.mxu0 %v983_v52 }
  0x5e   : > { %611 = vmatpush2.bf16.msra.mxu0 %v985_v53 }
  0x5f   : > { %612 = vmatprep.subr.bf16.mxu0 %v987_v54 }
  0x62   : > { %613 = vmatpush2.bf16.msra.mxu0 %v989_v55 }
  0x65   : > { %615 = vmatmul.mubr.bf16.vlgmr.msra.gmra.mxu0 %v990_v56 }
 0x107   : > { %v659_v57 = vpop.f32.mrf.mxu1 }
 0x109   : > { %v661_v58 = vpop.f32.mrf.mxu1 }
 0x10b   : > { %v663_v62 = vpop.f32.mrf.mxu1 }
 0x10d   : > { %v665_v7 = vpop.f32.mrf.mxu1 }
 0x125   : > { %v616_v60 = vpop.f32.mrf.mxu0 }
 0x126   : > { %v660_v61 = vadd.f32 %v659_v57, %v616_v60 }
 0x127   : > { %v618_v0 = vpop.f32.mrf.mxu0 }
 0x128   : > { %v668_v1 = vadd.f32 %v660_v61, %v270_v59  ;;  %v662_v2 = vadd.f32 %v661_v58, %v618_v0 }
 0x129   : > { %v620_v4 = vpop.f32.mrf.mxu0 }
 0x12a   : > { %672 = vst [vmem:[#allocation2 + $0x10] sm:$0xff] %v668_v1  ;;  %v669_v5 = vadd.f32 %v662_v2, %v271_v63  ;;  %v664_v6 = vadd.f32 %v663_v62, %v620_v4 }
 0x12b   : > { %v622_v9 = vpop.f32.mrf.mxu0 }
 0x12c   : > { %673 = vst [vmem:[#allocation2] sm:$0xff] %v669_v5  ;;  %v670_v10 = vadd.f32 %v664_v6, %v272_v3  ;;  %v666_v11 = vadd.f32 %v665_v7, %v622_v9  ;;  %679 = sbr.rel (%p866_p11) target bundleno = 313 (0x139), region = 62 }
 0x12e   : > { %674 = vst [vmem:[#allocation2 + $0x18] sm:$0xff] %v670_v10  ;;  %v671_v12 = vadd.f32 %v666_v11, %v273_v8 }
 0x130   : > { %675 = vst [vmem:[#allocation2 + $0x8] sm:$0xff] %v671_v12 }
 0x131   : > { %v680_v13 = vld [vmem:[#allocation2 + $0x10] sm:$0xff] }
 0x132   : > { %684 = vst [vmem:[%s1186_s2] sm:$0xff] %v680_v13 }
 0x133   : > { %v681_v14 = vld [vmem:[#allocation2] sm:$0xff] }
 0x134   : > { %685 = vst [vmem:[%s1186_s2 + $0x8] sm:$0xff] %v681_v14 }
 0x135   : > { %v682_v15 = vld [vmem:[#allocation2 + $0x18] sm:$0xff] }
 0x136   : > { %686 = vst [vmem:[%s1186_s2 + $0x10] sm:$0xff] %v682_v15 }
 0x137   : > { %v683_v16 = vld [vmem:[#allocation2 + $0x8] sm:$0xff] }
 0x138   : > { %687 = vst [vmem:[%s1186_s2 + $0x18] sm:$0xff] %v683_v16 }
 0x139 PF: > { %s12_s13 = sadd.s32 1, %s1031_s13   ;;  %s1187_s9 = smov %s1019_s10 }
 0x13a   : > { %p9_p12 = scmp.ge.s32.totalorder %s12_s13, 5   ;;  %s1188_s10 = smov %s1085_s17 }
 0x13b   : > { %s1189_s11 = smov %s1027_s12  ;;  %s1190_s12 = smov %s1192_s14 }
 0x13c   :  { %11 = sbr.rel (!%p9_p12) target bundleno = 3 (0x3), region = 106 }

// kernel: quantized_resnet18_forward.99
= control target key start
LH: loop header
LB: loop body
LE: loop exit
PB: predicated region body
PF: predicated region fallthrough
CT: control target
= control target key end

     0   :  { %s1050_s9 = smov 0   ;;  %s1052_s10 = smov 0   ;;  %s1184_s0 = inlined_call_operand.vmem [shape: bf16[16,2304], index: 0, kind: input, shape index: {}]   ;;  %s1185_s1 = inlined_call_operand.vmem [shape: bf16[2304,256], index: 1, kind: input, shape index: {}]   ;;  %s1186_s2 = inlined_call_operand.vmem [shape: f32[16,256], index: 2, kind: output, shape index: {}]  }
   0x1   :  { %s1054_s11 = smov 0   ;;  %s1056_s12 = smov 0  }
   0x2   :  { %s1058_s13 = smov 0  }
   0x3 LB: > { %s24_s14 = sadd.s32 1, %s1027_s12  ;;  %p47_p1 = scmp.ne.s32.totalorder %s1019_s10, %s1015_s9  ;;  %s1031_s13 = sphi %s1058_s13, %s12_s13   ;;  %s1027_s12 = sphi %s1056_s12, %s1190_s12   ;;  %s1023_s11 = sphi %s1054_s11, %s1189_s11   ;;  %s1019_s10 = sphi %s1052_s10, %s1188_s10   ;;  %s1015_s9 = sphi %s1050_s9, %s1187_s9  }
   0x4   : > { %p25_p0 = scmp.ge.s32.totalorder %s24_s14, 6  ;;  %p48_p2 = scmp.eq.s32.totalorder %s1031_s13, 0 }
   0x5   : > { %s40_s16 = sadd.s32 1, %s1019_s10  ;;  %p805_p5 = scmp.ge.s32.totalorder %s1031_s13, 6 }
   0x6   : > { %s1192_s14 = smov (%p25_p0, %s24_s14), 0  ;;  %p49_p3 = por %p48_p2, %p47_p1 }
   0x7   : > { %s36_s15 = ssub.s32 %s1027_s12, %s1192_s14  ;;  %129 = sbr.rel (%p805_p5) target bundleno = 19 (0x13), region = 16 }
   0x8   : > { %p38_p4 = scmp.eq.s32.totalorder %s36_s15, 0 }
   0xa   : > { %s1085_s17 = scalar_select %p38_p4, %s1019_s10, %s40_s16  }
   0xc   : > { %132 = sbr.rel (!%p49_p3) target bundleno = 19 (0x13), region = 20  ;;  %s134_s18 = sand.u32 (%p49_p3), 1, %s1019_s10  }
   0xd   : > { %s871_s19 = smul.u32 (%p49_p3), 12, %s1027_s12 }
   0xe   : > { %s873_s20 = smul.u32 (%p49_p3), 24, %s134_s18 }
   0xf   : > { %s142_s23 = scalar_lea.vmem (%p49_p3), %s1184_s0, %s871_s19 }
  0x10   : > { %v157_v0 = vld [vmem:[%s142_s23] sm:$0xff] (%p49_p3)  ;;  %v159_v1 = vld [vmem:[%s142_s23 + $0x48] sm:$0xff] (%p49_p3)  ;;  %s136_s24 = scalar_lea.vmem (%p49_p3), [#allocation3], %s873_s20  ;;  %v809_v3 = vld [vmem:[%s142_s23 + $0x50] sm:$0xf] (%p49_p3) }
  0x11   : > { %v807_v2 = vld [vmem:[%s142_s23 + $0x8] sm:$0xf]  ;;  %158 = vst [vmem:[%s136_s24] sm:$0xff] %v157_v0  ;;  %160 = vst [vmem:[%s136_s24 + $0xc] sm:$0xff] %v159_v1 }
  0x12   : > { %808 = vst [vmem:[%s136_s24 + $0x8] sm:$0xf] %v807_v2  ;;  %810 = vst [vmem:[%s136_s24 + $0x14] sm:$0xf] %v809_v3 }
  0x13 PF: > { %p811_p6 = scmp.ge.s32.totalorder %s1031_s13, 1  ;;  %p192_p7 = scmp.lt.s32.totalorder %s1031_s13, 7 }
  0x15   : > { %p193_p8 = pnand %p811_p6, %p192_p7 }
  0x16   : > { %s199_s25 = sand.u32 (!%p193_p8), 1, %s1015_s9   ;;  %s237_s26 = smul.u32 (!%p193_p8), 48, %s1023_s11 }
  0x17   : > { %196 = sbr.rel (%p193_p8) target bundleno = 313 (0x139), region = 50  ;;  %p814_p10 = scmp.ne.s32.totalorder (!%p193_p8), %s1023_s11, 0 }
  0x18   : > { %s874_s27 = smul.u32 (!%p193_p8), 24, %s199_s25  ;;  %p239_p9 = scmp.lt.s32.totalorder (!%p193_p8), %s237_s26, 287 }
  0x1a   : > { %s1102_s4 = scalar_lea.vmem (!%p193_p8), [#allocation3], %s874_s27 }
  0x1c   : > { %s1194_s26 = smov (!%p239_p9, %s237_s26), 287  ;;  %265 = sbr.rel (%p814_p10) target bundleno = 36 (0x24), region = 58 }
  0x1d   : > { %s872_s28 = sshll.u32 %s1194_s26, 3 }
  0x1e   : > { %s1100_s3 = scalar_lea.vmem %s1185_s1, %s872_s28 }
  0x21   : > { %v1033_v4 = vmov 0.0  }
  0x22   : > { %266 = vst [vmem:[#allocation2 + $0x10] sm:$0xff] %v1033_v4  ;;  %267 = vst [vmem:[#allocation2] sm:$0xff] %v1033_v4 }
  0x23   : > { %268 = vst [vmem:[#allocation2 + $0x18] sm:$0xff] %v1033_v4  ;;  %269 = vst [vmem:[#allocation2 + $0x8] sm:$0xff] %v1033_v4 }
  0x24 PF: > { %v917_v5 = vld [vmem:[%s1100_s3 + $0x74] ss:$8 sps:$4 sm:$0xff]   ;;  %v919_v6 = vld [vmem:[%s1100_s3 + $0x70] ss:$8 sps:$4 sm:$0xff]   ;;  %v1034_v7 = vmov 0   ;;  %p866_p11 = scmp.ne.s32.totalorder %s1023_s11, 5 }
  0x25   : > { %657 = vmatprep.mubr.bf16.mxu1 %v1034_v7  ;;  %582 = vmatprep.subr.bf16.mxu0 %v917_v5  ;;  %v920_v8 = vld [vmem:[%s1100_s3 + $0x64] ss:$8 sps:$4 sm:$0xff]   ;;  %v922_v9 = vld [vmem:[%s1100_s3 + $0x60] ss:$8 sps:$4 sm:$0xff]   ;;  %v923_v10 = vld [vmem:[%s1100_s3 + $0x54] ss:$8 sps:$4 sm:$0xff]  }
  0x26   : > { %583 = vmatpush1.bf16.msra.mxu0 %v919_v6  ;;  %v925_v11 = vld [vmem:[%s1100_s3 + $0x50] ss:$8 sps:$4 sm:$0xff]   ;;  %v926_v12 = vld [vmem:[%s1100_s3 + $0x44] ss:$8 sps:$4 sm:$0xff]   ;;  %v938_v13 = vld [vmem:[%s1100_s3 + $0x174] ss:$8 sps:$4 sm:$0xff]  }
  0x27   : > { %584 = vmatprep.subr.bf16.mxu0 %v920_v8  ;;  %v940_v14 = vld [vmem:[%s1100_s3 + $0x170] ss:$8 sps:$4 sm:$0xff]   ;;  %v928_v15 = vld [vmem:[%s1100_s3 + $0x40] ss:$8 sps:$4 sm:$0xff]   ;;  %v929_v16 = vld [vmem:[%s1100_s3 + $0x34] ss:$8 sps:$4 sm:$0xff]   ;;  %625 = vmatprep.subr.bf16.mxu1 %v938_v13 }
  0x28   : > { %v944_v17 = vld [vmem:[%s1100_s3 + $0x164] ss:$8 sps:$4 sm:$0xff]   ;;  %626 = vmatpush1.bf16.msra.mxu1 %v940_v14  ;;  %v946_v18 = vld [vmem:[%s1100_s3 + $0x160] ss:$8 sps:$4 sm:$0xff]   ;;  %v931_v19 = vld [vmem:[%s1100_s3 + $0x30] ss:$8 sps:$4 sm:$0xff]  }
  0x29   : > { %627 = vmatprep.subr.bf16.mxu1 %v944_v17  ;;  %v950_v20 = vld [vmem:[%s1100_s3 + $0x154] ss:$8 sps:$4 sm:$0xff]   ;;  %v932_v21 = vld [vmem:[%s1100_s3 + $0x24] ss:$8 sps:$4 sm:$0xff]   ;;  %v952_v22 = vld [vmem:[%s1100_s3 + $0x150] ss:$8 sps:$4 sm:$0xff]  }
  0x2a   : > { %585 = vmatpush1.bf16.msra.mxu0 %v922_v9  ;;  %v956_v23 = vld [vmem:[%s1100_s3 + $0x144] ss:$8 sps:$4 sm:$0xff]   ;;  %v934_v24 = vld [vmem:[%s1100_s3 + $0x20] ss:$8 sps:$4 sm:$0xff]   ;;  %v935_v25 = vld [vmem:[%s1100_s3 + $0x14] ss:$8 sps:$4 sm:$0xff]  }
  0x2b   : > { %586 = vmatprep.subr.bf16.mxu0 %v923_v10  ;;  %v958_v26 = vld [vmem:[%s1100_s3 + $0x140] ss:$8 sps:$4 sm:$0xff]   ;;  %v962_v27 = vld [vmem:[%s1100_s3 + $0x134] ss:$8 sps:$4 sm:$0xff]   ;;  %v937_v28 = vld [vmem:[%s1100_s3 + $0x10] ss:$8 sps:$4 sm:$0xff]  }
  0x2c   : > { %628 = vmatpush1.bf16.msra.mxu1 %v946_v18  ;;  %v941_v29 = vld [vmem:[%s1100_s3 + $0x4] ss:$8 sps:$4 sm:$0xff]   ;;  %v964_v30 = vld [vmem:[%s1100_s3 + $0x130] ss:$8 sps:$4 sm:$0xff]   ;;  %v943_v32 = vld [vmem:[%s1100_s3] ss:$8 sps:$4 sm:$0xff]  }
  0x2d   : > { %629 = vmatprep.subr.bf16.mxu1 %v950_v20  ;;  %v968_v31 = vld [vmem:[%s1100_s3 + $0x124] ss:$8 sps:$4 sm:$0xff]   ;;  %v947_v33 = vld [vmem:[%s1100_s3 + $0xf4] ss:$8 sps:$4 sm:$0xff]   ;;  %v970_v34 = vld [vmem:[%s1100_s3 + $0x120] ss:$8 sps:$4 sm:$0xff]  }
  0x2e   : > { %587 = vmatpush1.bf16.msra.mxu0 %v925_v11  ;;  %v974_v35 = vld [vmem:[%s1100_s3 + $0x114] ss:$8 sps:$4 sm:$0xff]   ;;  %v949_v36 = vld [vmem:[%s1100_s3 + $0xf0] ss:$8 sps:$4 sm:$0xff]   ;;  %v953_v37 = vld [vmem:[%s1100_s3 + $0xe4] ss:$8 sps:$4 sm:$0xff]  }
  0x2f   : > { %588 = vmatprep.subr.bf16.mxu0 %v926_v12  ;;  %v976_v38 = vld [vmem:[%s1100_s3 + $0x110] ss:$8 sps:$4 sm:$0xff]   ;;  %v980_v39 = vld [vmem:[%s1100_s3 + $0x104] ss:$8 sps:$4 sm:$0xff]   ;;  %v955_v41 = vld [vmem:[%s1100_s3 + $0xe0] ss:$8 sps:$4 sm:$0xff]  }
  0x30   : > { %630 = vmatpush1.bf16.msra.mxu1 %v952_v22  ;;  %v992_v40 = vld [vmem:[%s1102_s4 + $0x4] ss:$12 sps:$4 sm:$0xff]   ;;  %v986_v46 = vld [vmem:[%s1102_s4 + $0x8] ss:$12 sps:$4 sm:$0xff]   ;;  %v990_v56 = vld [vmem:[%s1102_s4] ss:$12 sps:$4 sm:$0xff]  }
  0x31   : > { %631 = vmatprep.subr.bf16.mxu1 %v956_v23  ;;  %v959_v42 = vld [vmem:[%s1100_s3 + $0xd4] ss:$8 sps:$4 sm:$0xff]   ;;  %614 = vmatprep.mubr.bf16.mxu0 %v992_v40  ;;  %v982_v43 = vld [vmem:[%s1100_s3 + $0x100] ss:$8 sps:$4 sm:$0xff]   ;;  %v961_v44 = vld [vmem:[%s1100_s3 + $0xd0] ss:$8 sps:$4 sm:$0xff]  }
  0x32   : > { %589 = vmatpush1.bf16.msra.mxu0 %v928_v15  ;;  %v965_v45 = vld [vmem:[%s1100_s3 + $0xc4] ss:$8 sps:$4 sm:$0xff]   ;;  %v967_v47 = vld [vmem:[%s1100_s3 + $0xc0] ss:$8 sps:$4 sm:$0xff]   ;;  %v971_v48 = vld [vmem:[%s1100_s3 + $0xb4] ss:$8 sps:$4 sm:$0xff]  }
  0x33   : > { %590 = vmatprep.subr.bf16.mxu0 %v929_v16  ;;  %v973_v49 = vld [vmem:[%s1100_s3 + $0xb0] ss:$8 sps:$4 sm:$0xff]   ;;  %v977_v50 = vld [vmem:[%s1100_s3 + $0xa4] ss:$8 sps:$4 sm:$0xff]   ;;  %v979_v51 = vld [vmem:[%s1100_s3 + $0xa0] ss:$8 sps:$4 sm:$0xff]  }
  0x34   : > { %632 = vmatpush1.bf16.msra.mxu1 %v958_v26  ;;  %v983_v52 = vld [vmem:[%s1100_s3 + $0x94] ss:$8 sps:$4 sm:$0xff]   ;;  %v985_v53 = vld [vmem:[%s1100_s3 + $0x90] ss:$8 sps:$4 sm:$0xff]   ;;  %v987_v54 = vld [vmem:[%s1100_s3 + $0x84] ss:$8 sps:$4 sm:$0xff]  }
  0x35   : > { %633 = vmatprep.subr.bf16.mxu1 %v962_v27  ;;  %v989_v55 = vld [vmem:[%s1100_s3 + $0x80] ss:$8 sps:$4 sm:$0xff]   ;;  %v270_v59 = vld [vmem:[#allocation2 + $0x10] sm:$0xff]  ;;  %v272_v3 = vld [vmem:[#allocation2 + $0x18] sm:$0xff] }
  0x36   : > { %591 = vmatpush1.bf16.msra.mxu0 %v931_v19  ;;  %v271_v63 = vld [vmem:[#allocation2] sm:$0xff]  ;;  %v273_v8 = vld [vmem:[#allocation2 + $0x8] sm:$0xff] }
  0x37   : > { %592 = vmatprep.subr.bf16.mxu0 %v932_v21 }
  0x38   : > { %634 = vmatpush1.bf16.msra.mxu1 %v964_v30 }
  0x39   : > { %635 = vmatprep.subr.bf16.mxu1 %v968_v31 }
  0x3a   : > { %593 = vmatpush1.bf16.msra.mxu0 %v934_v24 }
  0x3b   : > { %594 = vmatprep.subr.bf16.mxu0 %v935_v25 }
  0x3c   : > { %636 = vmatpush1.bf16.msra.mxu1 %v970_v34 }
  0x3d   : > { %637 = vmatprep.subr.bf16.mxu1 %v974_v35 }
  0x3e   : > { %595 = vmatpush1.bf16.msra.mxu0 %v937_v28 }
  0x3f   : > { %596 = vmatprep.subr.bf16.mxu0 %v941_v29 }
  0x40   : > { %638 = vmatpush1.bf16.msra.mxu1 %v976_v38 }
  0x41   : > { %639 = vmatprep.subr.bf16.mxu1 %v980_v39 }
  0x42   : > { %597 = vmatpush1.bf16.msra.mxu0 %v943_v32 }
  0x43   : > { %598 = vmatprep.subr.bf16.mxu0 %v947_v33 }
  0x44   : > { %640 = vmatpush1.bf16.msra.mxu1 %v982_v43 }
  0x46   : > { %599 = vmatpush2.bf16.msra.mxu0 %v949_v36 }
  0x47   : > { %600 = vmatprep.subr.bf16.mxu0 %v953_v37  ;;  %658 = vmatmul.mubr.bf16.vlgmr.msra.gmra.mxu1 %v986_v46 }
  0x4a   : > { %601 = vmatpush2.bf16.msra.mxu0 %v955_v41 }
  0x4b   : > { %602 = vmatprep.subr.bf16.mxu0 %v959_v42 }
  0x4e   : > { %603 = vmatpush2.bf16.msra.mxu0 %v961_v44 }
  0x4f   : > { %604 = vmatprep.subr.bf16.mxu0 %v965_v45 }
  0x52   : > { %605 = vmatpush2.bf16.msra.mxu0 %v967_v47 }
  0x53   : > { %606 = vmatprep.subr.bf16.mxu0 %v971_v48 }
  0x56   : > { %607 = vmatpush2.bf16.msra.mxu0 %v973_v49 }
  0x57   : > { %608 = vmatprep.subr.bf16.mxu0 %v977_v50 }
  0x5a   : > { %609 = vmatpush2.bf16.msra.mxu0 %v979_v51 }
  0x5b   : > { %610 = vmatprep.subr.bf16.mxu0 %v983_v52 }
  0x5e   : > { %611 = vmatpush2.bf16.msra.mxu0 %v985_v53 }
  0x5f   : > { %612 = vmatprep.subr.bf16.mxu0 %v987_v54 }
  0x62   : > { %613 = vmatpush2.bf16.msra.mxu0 %v989_v55 }
  0x65   : > { %615 = vmatmul.mubr.bf16.vlgmr.msra.gmra.mxu0 %v990_v56 }
 0x107   : > { %v659_v57 = vpop.f32.mrf.mxu1 }
 0x109   : > { %v661_v58 = vpop.f32.mrf.mxu1 }
 0x10b   : > { %v663_v62 = vpop.f32.mrf.mxu1 }
 0x10d   : > { %v665_v7 = vpop.f32.mrf.mxu1 }
 0x125   : > { %v616_v60 = vpop.f32.mrf.mxu0 }
 0x126   : > { %v660_v61 = vadd.f32 %v659_v57, %v616_v60 }
 0x127   : > { %v618_v0 = vpop.f32.mrf.mxu0 }
 0x128   : > { %v668_v1 = vadd.f32 %v660_v61, %v270_v59  ;;  %v662_v2 = vadd.f32 %v661_v58, %v618_v0 }
 0x129   : > { %v620_v4 = vpop.f32.mrf.mxu0 }
 0x12a   : > { %672 = vst [vmem:[#allocation2 + $0x10] sm:$0xff] %v668_v1  ;;  %v669_v5 = vadd.f32 %v662_v2, %v271_v63  ;;  %v664_v6 = vadd.f32 %v663_v62, %v620_v4 }
 0x12b   : > { %v622_v9 = vpop.f32.mrf.mxu0 }
 0x12c   : > { %673 = vst [vmem:[#allocation2] sm:$0xff] %v669_v5  ;;  %v670_v10 = vadd.f32 %v664_v6, %v272_v3  ;;  %v666_v11 = vadd.f32 %v665_v7, %v622_v9  ;;  %679 = sbr.rel (%p866_p11) target bundleno = 313 (0x139), region = 62 }
 0x12e   : > { %674 = vst [vmem:[#allocation2 + $0x18] sm:$0xff] %v670_v10  ;;  %v671_v12 = vadd.f32 %v666_v11, %v273_v8 }
 0x130   : > { %675 = vst [vmem:[#allocation2 + $0x8] sm:$0xff] %v671_v12 }
 0x131   : > { %v680_v13 = vld [vmem:[#allocation2 + $0x10] sm:$0xff] }
 0x132   : > { %684 = vst [vmem:[%s1186_s2] sm:$0xff] %v680_v13 }
 0x133   : > { %v681_v14 = vld [vmem:[#allocation2] sm:$0xff] }
 0x134   : > { %685 = vst [vmem:[%s1186_s2 + $0x8] sm:$0xff] %v681_v14 }
 0x135   : > { %v682_v15 = vld [vmem:[#allocation2 + $0x18] sm:$0xff] }
 0x136   : > { %686 = vst [vmem:[%s1186_s2 + $0x10] sm:$0xff] %v682_v15 }
 0x137   : > { %v683_v16 = vld [vmem:[#allocation2 + $0x8] sm:$0xff] }
 0x138   : > { %687 = vst [vmem:[%s1186_s2 + $0x18] sm:$0xff] %v683_v16 }
 0x139 PF: > { %s12_s13 = sadd.s32 1, %s1031_s13   ;;  %s1187_s9 = smov %s1019_s10 }
 0x13a   : > { %p9_p12 = scmp.ge.s32.totalorder %s12_s13, 8   ;;  %s1188_s10 = smov %s1085_s17 }
 0x13b   : > { %s1189_s11 = smov %s1027_s12  ;;  %s1190_s12 = smov %s1192_s14 }
 0x13c   :  { %11 = sbr.rel (!%p9_p12) target bundleno = 3 (0x3), region = 106 }

// kernel: quantized_resnet18_forward.101
= control target key start
LH: loop header
LB: loop body
LE: loop exit
PB: predicated region body
PF: predicated region fallthrough
CT: control target
= control target key end

     0   :  { %v21_v0 = vlaneseq  ;;  %s108_s1 = inlined_call_operand.vmem [shape: f32[1,256], index: 1, kind: input, shape index: {}]   ;;  %s109_s2 = inlined_call_operand.vmem [shape: f32[1,256], index: 2, kind: input, shape index: {}]   ;;  %s110_s0 = inlined_call_operand.vmem [shape: f32[8,256], index: 0, kind: input, shape index: {}]   ;;  %s111_s3 = inlined_call_operand.vmem [shape: f32[8,256], index: 3, kind: input, shape index: {}]   ;;  %s112_s4 = inlined_call_operand.vmem [shape: f32[8,256], index: 4, kind: output, shape index: {}]  }
   0x1   :  { %v19_v2 = vld [vmem:[%s108_s1] sm:$0x3]  ;;  %v18_v7 = vld [vmem:[%s110_s0 + $0x8] sm:$0xff] }
   0x2   :  { %v22_v1 = vshrl.u32 %v21_v0, 7  ;;  %v33_v3 = vld [vmem:[%s109_s2] sm:$0x3]  ;;  %v48_v15 = vld [vmem:[%s111_s3 + $0x8] sm:$0xff] }
   0x3   :  { %v17_v6 = vld [vmem:[%s110_s0] sm:$0xff] }
   0x4   :  { %v23_v4 = vsub.s32 0, %v22_v1  ;;  %v27_v5 = vsub.s32 1, %v22_v1  ;;  %v47_v14 = vld [vmem:[%s111_s3] sm:$0xff] }
   0x6   :  { %v24_v8 = vrot.slane %v19_v2, %v23_v4  ;;  %v38_v9 = vrot.slane %v33_v3, %v23_v4  ;;  %v28_v10 = vrot.slane %v19_v2, %v27_v5  ;;  %v42_v11 = vrot.slane %v33_v3, %v27_v5 }
   0x8   :  { %v31_v12 = vmul.f32 %v24_v8, %v17_v6  ;;  %v32_v13 = vmul.f32 %v28_v10, %v18_v7 }
   0xa   :  { %v45_v16 = vadd.f32 %v38_v9, %v31_v12  ;;  %v46_v17 = vadd.f32 %v42_v11, %v32_v13 }
   0xc   :  { %v49_v18 = vadd.f32 %v47_v14, %v45_v16  ;;  %v50_v19 = vadd.f32 %v48_v15, %v46_v17 }
   0xe   :  { %v51_v20 = vmax.f32 %v49_v18, 0.0  ;;  %v52_v21 = vmax.f32 %v50_v19, 0.0 }
  0x10   :  { %53 = vst [vmem:[%s112_s4] sm:$0xff] %v51_v20  ;;  %54 = vst [vmem:[%s112_s4 + $0x8] sm:$0xff] %v52_v21 }

// kernel: quantized_resnet18_forward.111
= control target key start
LH: loop header
LB: loop body
LE: loop exit
PB: predicated region body
PF: predicated region fallthrough
CT: control target
= control target key end

     0   :  { %s1695_s0 = inlined_call_operand.vmem [shape: bf16[16,2304], index: 0, kind: input, shape index: {}]   ;;  %s1696_s1 = inlined_call_operand.vmem [shape: bf16[2304,512], index: 1, kind: input, shape index: {}]   ;;  %s1697_s2 = inlined_call_operand.vmem [shape: f32[16,512], index: 2, kind: output, shape index: {}]  }
   0x1   :  { %1698 = sst [smem:[#allocation6_spill]] %s1695_s0 }
   0x2   :  { %s1370_s9 = smov 0   ;;  %s1372_s10 = smov 0  }
   0x3   :  { %s1374_s11 = smov 0   ;;  %s1376_s12 = smov 0  }
   0x4   :  { %s1378_s13 = smov 0   ;;  %s1380_s14 = smov 0  }
   0x5   :  { %s1382_s15 = smov 0   ;;  %s1384_s16 = smov 0  }
   0x6   :  { %s1386_s17 = smov 0   ;;  %s1388_s18 = smov 0  }
   0x7   :  { %s1390_s19 = smov 0  }
   0x8 LB: > { %s1020_s20 = sadd.s32 4294967295, %s1351_s19   ;;  %s24_s21 = sadd.s32 1, %s1343_s17  ;;  %s1351_s19 = sphi %s1390_s19, %s12_s19   ;;  %s1347_s18 = sphi %s1388_s18, %s1712_s18   ;;  %s1343_s17 = sphi %s1386_s17, %s1711_s17   ;;  %s1339_s16 = sphi %s1384_s16, %s1710_s16   ;;  %s1335_s15 = sphi %s1382_s15, %s1709_s15   ;;  %s1331_s14 = sphi %s1380_s14, %s1708_s14   ;;  %s1327_s13 = sphi %s1378_s13, %s1707_s13   ;;  %s1323_s12 = sphi %s1376_s12, %s1706_s12   ;;  %s1319_s11 = sphi %s1374_s11, %s1705_s11   ;;  %s1315_s10 = sphi %s1372_s10, %s1704_s10   ;;  %s1311_s9 = sphi %s1370_s9, %s1703_s9  }
   0x9   : > { %p25_p0 = scmp.ge.s32.totalorder %s24_s21, 6  ;;  %s27_s22 = sadd.s32 1, %s1347_s18 }
   0xa   : > { %s40_s23 = sadd.s32 1, %s1331_s14  ;;  %p47_p1 = scmp.ne.s32.totalorder %s1331_s14, %s1327_s13 }
   0xb   : > { %s1714_s21 = smov (%p25_p0, %s24_s21), 0  ;;  %s1716_s22 = smov (!%p25_p0, %s27_s22), %s1347_s18 }
   0xc   : > { %s36_s24 = ssub.s32 %s1343_s17, %s1714_s21  ;;  %p48_p2 = scmp.eq.s32.totalorder %s1351_s19, 0 }
   0xd   : > { %p29_p3 = scmp.ge.s32.totalorder %s1716_s22, 2  ;;  %p38_p4 = scmp.eq.s32.totalorder %s36_s24, 0 }
   0xe   : > { %p1437_p5 = por %p48_p2, %p47_p1  ;;  %s68_s26 = sadd.s32 1, %s1323_s12 }
   0xf   : > { %s1718_s22 = smov (%p29_p3, %s1716_s22), 0  ;;  %p75_p6 = scmp.ne.s32.totalorder %s1323_s12, %s1319_s11 }
  0x10   : > { %s1445_s27 = scalar_select %p38_p4, %s1331_s14, %s40_s23  }
  0x11   : > { %s64_s28 = ssub.s32 %s1347_s18, %s1718_s22  ;;  %p1451_p9 = por %p75_p6, %p48_p2 }
  0x12   : > { %s65_s29 = sor.u32 %s64_s28, %s36_s24  ;;  %p94_p7 = scmp.eq.s32.totalorder %s64_s28, 0 }
  0x13   : > { %p66_p8 = scmp.eq.s32.totalorder %s65_s29, 0  ;;  %s96_s3 = sadd.s32 1, %s1315_s10 }
  0x14   : > { %p106_p10 = scmp.ne.s32.totalorder %s1315_s10, %s1311_s9  ;;  %p107_p11 = scmp.eq.s32.totalorder %s1020_s20, 11 }
  0x15   : > { %s1459_s4 = scalar_select %p66_p8, %s1323_s12, %s68_s26  }
  0x16   : > { %s1462_s5 = scalar_select %p94_p7, %s1315_s10, %s96_s3  }
  0x17   : > { %p1464_p12 = por %p107_p11, %p106_p10  ;;  %p1023_p13 = scmp.ge.s32.totalorder %s1351_s19, 12 }
  0x19   : > { %129 = sbr.rel (%p1023_p13) target bundleno = 73 (0x49), region = 16 }
  0x1e   : > { %132 = sbr.rel (!%p1437_p5) target bundleno = 41 (0x29), region = 20  ;;  %s134_s7 = sand.u32 (%p1437_p5), 1, %s1331_s14  }
  0x1f   : > { %s1092_s8 = smul.u32 (%p1437_p5), 12, %s1343_s17  ;;  %s1702_s0 = sld [smem:[#allocation6_spill]] (%p1437_p5) }
  0x20   : > { %s1095_s23 = smul.u32 (%p1437_p5), 24, %s134_s7 }
  0x22   : > { %s136_s20 = scalar_lea.vmem (%p1437_p5), [#allocation3], %s1095_s23 }
  0x25   : > { %s142_s28 = scalar_lea.vmem %s1702_s0, %s1092_s8 }
  0x26   : > { %v157_v0 = vld [vmem:[%s142_s28] sm:$0xff]  ;;  %v159_v1 = vld [vmem:[%s142_s28 + $0x48] sm:$0xff]  ;;  %v1027_v3 = vld [vmem:[%s142_s28 + $0x50] sm:$0xf] }
  0x27   : > { %v1025_v2 = vld [vmem:[%s142_s28 + $0x8] sm:$0xf]  ;;  %158 = vst [vmem:[%s136_s20] sm:$0xff] %v157_v0  ;;  %160 = vst [vmem:[%s136_s20 + $0xc] sm:$0xff] %v159_v1 }
  0x28   : > { %1026 = vst [vmem:[%s136_s20 + $0x8] sm:$0xf] %v1025_v2  ;;  %1028 = vst [vmem:[%s136_s20 + $0x14] sm:$0xf] %v1027_v3 }
  0x29 PF: > { %178 = sbr.rel (!%p1451_p9) target bundleno = 73 (0x49), region = 46  ;;  %s180_s25 = sand.u32 (%p1451_p9), 1, %s1323_s12  }
  0x2a   : > { %s1096_s29 = smul.u32 (%p1451_p9), 384, %s180_s25  ;;  %s1029_s3 = sshll.u32 (%p1451_p9), %s1347_s18, 1 }
  0x2b   : > { %s1093_s7 = smul.u32 (%p1451_p9), 192, %s1343_s17 }
  0x2c   : > { %s1489_s30 = scalar_lea.vmem (%p1451_p9), [#allocation4], %s1096_s29 }
  0x2d   : > { %s186_s8 = sadd.s32 (%p1451_p9), %s1093_s7, %s1029_s3 }
  0x2e   : > { %s1031_s24 = sshll.u32 %s186_s8, 2 }
  0x2f   : > { %s1484_s0 = scalar_lea.vmem %s1696_s1, %s1031_s24 }
  0x30   : > { %v311_v4 = vld [vmem:[%s1484_s0] sm:$0xff]  ;;  %v313_v5 = vld [vmem:[%s1484_s0 + $0x10] sm:$0xff] }
  0x31   : > { %v315_v6 = vld [vmem:[%s1484_s0 + $0x20] sm:$0xff]  ;;  %312 = vst [vmem:[%s1489_s30] sm:$0xff] %v311_v4  ;;  %314 = vst [vmem:[%s1489_s30 + $0x8] sm:$0xff] %v313_v5  ;;  %v317_v7 = vld [vmem:[%s1484_s0 + $0x30] sm:$0xff] }
  0x32   : > { %316 = vst [vmem:[%s1489_s30 + $0x10] sm:$0xff] %v315_v6  ;;  %v319_v8 = vld [vmem:[%s1484_s0 + $0x40] sm:$0xff]  ;;  %v321_v9 = vld [vmem:[%s1484_s0 + $0x50] sm:$0xff]  ;;  %318 = vst [vmem:[%s1489_s30 + $0x18] sm:$0xff] %v317_v7 }
  0x33   : > { %320 = vst [vmem:[%s1489_s30 + $0x20] sm:$0xff] %v319_v8  ;;  %322 = vst [vmem:[%s1489_s30 + $0x28] sm:$0xff] %v321_v9  ;;  %v323_v10 = vld [vmem:[%s1484_s0 + $0x60] sm:$0xff]  ;;  %v325_v11 = vld [vmem:[%s1484_s0 + $0x70] sm:$0xff] }
  0x34   : > { %v327_v12 = vld [vmem:[%s1484_s0 + $0x80] sm:$0xff]  ;;  %324 = vst [vmem:[%s1489_s30 + $0x30] sm:$0xff] %v323_v10  ;;  %326 = vst [vmem:[%s1489_s30 + $0x38] sm:$0xff] %v325_v11  ;;  %v329_v13 = vld [vmem:[%s1484_s0 + $0x90] sm:$0xff] }
  0x35   : > { %328 = vst [vmem:[%s1489_s30 + $0x40] sm:$0xff] %v327_v12  ;;  %v331_v14 = vld [vmem:[%s1484_s0 + $0xa0] sm:$0xff]  ;;  %v333_v15 = vld [vmem:[%s1484_s0 + $0xb0] sm:$0xff]  ;;  %330 = vst [vmem:[%s1489_s30 + $0x48] sm:$0xff] %v329_v13 }
  0x36   : > { %332 = vst [vmem:[%s1489_s30 + $0x50] sm:$0xff] %v331_v14  ;;  %334 = vst [vmem:[%s1489_s30 + $0x58] sm:$0xff] %v333_v15  ;;  %v335_v16 = vld [vmem:[%s1484_s0 + $0xc0] sm:$0xff]  ;;  %v337_v17 = vld [vmem:[%s1484_s0 + $0xd0] sm:$0xff] }
  0x37   : > { %v339_v18 = vld [vmem:[%s1484_s0 + $0xe0] sm:$0xff]  ;;  %336 = vst [vmem:[%s1489_s30 + $0x60] sm:$0xff] %v335_v16  ;;  %338 = vst [vmem:[%s1489_s30 + $0x68] sm:$0xff] %v337_v17  ;;  %v341_v19 = vld [vmem:[%s1484_s0 + $0xf0] sm:$0xff] }
  0x38   : > { %340 = vst [vmem:[%s1489_s30 + $0x70] sm:$0xff] %v339_v18  ;;  %v343_v20 = vld [vmem:[%s1484_s0 + $0x100] sm:$0xff]  ;;  %v345_v21 = vld [vmem:[%s1484_s0 + $0x110] sm:$0xff]  ;;  %342 = vst [vmem:[%s1489_s30 + $0x78] sm:$0xff] %v341_v19 }
  0x39   : > { %344 = vst [vmem:[%s1489_s30 + $0x80] sm:$0xff] %v343_v20  ;;  %346 = vst [vmem:[%s1489_s30 + $0x88] sm:$0xff] %v345_v21  ;;  %v347_v22 = vld [vmem:[%s1484_s0 + $0x120] sm:$0xff]  ;;  %v349_v23 = vld [vmem:[%s1484_s0 + $0x130] sm:$0xff] }
  0x3a   : > { %v351_v24 = vld [vmem:[%s1484_s0 + $0x140] sm:$0xff]  ;;  %348 = vst [vmem:[%s1489_s30 + $0x90] sm:$0xff] %v347_v22  ;;  %350 = vst [vmem:[%s1489_s30 + $0x98] sm:$0xff] %v349_v23  ;;  %v353_v25 = vld [vmem:[%s1484_s0 + $0x150] sm:$0xff] }
  0x3b   : > { %352 = vst [vmem:[%s1489_s30 + $0xa0] sm:$0xff] %v351_v24  ;;  %v355_v26 = vld [vmem:[%s1484_s0 + $0x160] sm:$0xff]  ;;  %v357_v27 = vld [vmem:[%s1484_s0 + $0x170] sm:$0xff]  ;;  %354 = vst [vmem:[%s1489_s30 + $0xa8] sm:$0xff] %v353_v25 }
  0x3c   : > { %356 = vst [vmem:[%s1489_s30 + $0xb0] sm:$0xff] %v355_v26  ;;  %358 = vst [vmem:[%s1489_s30 + $0xb8] sm:$0xff] %v357_v27  ;;  %v359_v28 = vld [vmem:[%s1484_s0 + $0x180] sm:$0xff]  ;;  %v361_v29 = vld [vmem:[%s1484_s0 + $0x190] sm:$0xff] }
  0x3d   : > { %v363_v30 = vld [vmem:[%s1484_s0 + $0x1a0] sm:$0xff]  ;;  %360 = vst [vmem:[%s1489_s30 + $0xc0] sm:$0xff] %v359_v28  ;;  %362 = vst [vmem:[%s1489_s30 + $0xc8] sm:$0xff] %v361_v29  ;;  %v365_v31 = vld [vmem:[%s1484_s0 + $0x1b0] sm:$0xff] }
  0x3e   : > { %364 = vst [vmem:[%s1489_s30 + $0xd0] sm:$0xff] %v363_v30  ;;  %v367_v32 = vld [vmem:[%s1484_s0 + $0x1c0] sm:$0xff]  ;;  %v369_v33 = vld [vmem:[%s1484_s0 + $0x1d0] sm:$0xff]  ;;  %366 = vst [vmem:[%s1489_s30 + $0xd8] sm:$0xff] %v365_v31 }
  0x3f   : > { %368 = vst [vmem:[%s1489_s30 + $0xe0] sm:$0xff] %v367_v32  ;;  %370 = vst [vmem:[%s1489_s30 + $0xe8] sm:$0xff] %v369_v33  ;;  %v371_v34 = vld [vmem:[%s1484_s0 + $0x1e0] sm:$0xff]  ;;  %v373_v35 = vld [vmem:[%s1484_s0 + $0x1f0] sm:$0xff] }
  0x40   : > { %v375_v36 = vld [vmem:[%s1484_s0 + $0x200] sm:$0xff]  ;;  %372 = vst [vmem:[%s1489_s30 + $0xf0] sm:$0xff] %v371_v34  ;;  %374 = vst [vmem:[%s1489_s30 + $0xf8] sm:$0xff] %v373_v35  ;;  %v377_v37 = vld [vmem:[%s1484_s0 + $0x210] sm:$0xff] }
  0x41   : > { %376 = vst [vmem:[%s1489_s30 + $0x100] sm:$0xff] %v375_v36  ;;  %v379_v38 = vld [vmem:[%s1484_s0 + $0x220] sm:$0xff]  ;;  %v381_v39 = vld [vmem:[%s1484_s0 + $0x230] sm:$0xff]  ;;  %378 = vst [vmem:[%s1489_s30 + $0x108] sm:$0xff] %v377_v37 }
  0x42   : > { %380 = vst [vmem:[%s1489_s30 + $0x110] sm:$0xff] %v379_v38  ;;  %382 = vst [vmem:[%s1489_s30 + $0x118] sm:$0xff] %v381_v39  ;;  %v383_v40 = vld [vmem:[%s1484_s0 + $0x240] sm:$0xff]  ;;  %v385_v41 = vld [vmem:[%s1484_s0 + $0x250] sm:$0xff] }
  0x43   : > { %v387_v42 = vld [vmem:[%s1484_s0 + $0x260] sm:$0xff]  ;;  %384 = vst [vmem:[%s1489_s30 + $0x120] sm:$0xff] %v383_v40  ;;  %386 = vst [vmem:[%s1489_s30 + $0x128] sm:$0xff] %v385_v41  ;;  %v389_v43 = vld [vmem:[%s1484_s0 + $0x270] sm:$0xff] }
  0x44   : > { %388 = vst [vmem:[%s1489_s30 + $0x130] sm:$0xff] %v387_v42  ;;  %v391_v44 = vld [vmem:[%s1484_s0 + $0x280] sm:$0xff]  ;;  %v393_v45 = vld [vmem:[%s1484_s0 + $0x290] sm:$0xff]  ;;  %390 = vst [vmem:[%s1489_s30 + $0x138] sm:$0xff] %v389_v43 }
  0x45   : > { %392 = vst [vmem:[%s1489_s30 + $0x140] sm:$0xff] %v391_v44  ;;  %394 = vst [vmem:[%s1489_s30 + $0x148] sm:$0xff] %v393_v45  ;;  %v395_v46 = vld [vmem:[%s1484_s0 + $0x2a0] sm:$0xff]  ;;  %v397_v47 = vld [vmem:[%s1484_s0 + $0x2b0] sm:$0xff] }
  0x46   : > { %v399_v48 = vld [vmem:[%s1484_s0 + $0x2c0] sm:$0xff]  ;;  %396 = vst [vmem:[%s1489_s30 + $0x150] sm:$0xff] %v395_v46  ;;  %398 = vst [vmem:[%s1489_s30 + $0x158] sm:$0xff] %v397_v47  ;;  %v401_v49 = vld [vmem:[%s1484_s0 + $0x2d0] sm:$0xff] }
  0x47   : > { %400 = vst [vmem:[%s1489_s30 + $0x160] sm:$0xff] %v399_v48  ;;  %v403_v50 = vld [vmem:[%s1484_s0 + $0x2e0] sm:$0xff]  ;;  %v405_v51 = vld [vmem:[%s1484_s0 + $0x2f0] sm:$0xff]  ;;  %402 = vst [vmem:[%s1489_s30 + $0x168] sm:$0xff] %v401_v49 }
  0x48   : > { %404 = vst [vmem:[%s1489_s30 + $0x170] sm:$0xff] %v403_v50  ;;  %406 = vst [vmem:[%s1489_s30 + $0x178] sm:$0xff] %v405_v51 }
  0x49 PF: > { %p1032_p0 = scmp.ge.s32.totalorder %s1351_s19, 1  ;;  %p411_p1 = scmp.lt.s32.totalorder %s1351_s19, 13 }
  0x4b   : > { %p412_p2 = pnand %p1032_p0, %p411_p1 }
  0x4c   : > { %s418_s28 = sand.u32 (!%p412_p2), 1, %s1327_s13   ;;  %s425_s20 = sand.u32 (!%p412_p2), 1, %s1319_s11  }
  0x4d   : > { %415 = sbr.rel (%p412_p2) target bundleno = 375 (0x177), region = 84  ;;  %s446_s29 = sand.u32 (!%p412_p2), 1, %s1311_s9  }
  0x4e   : > { %s1097_s25 = smul.u32 (!%p412_p2), 24, %s418_s28  ;;  %s1033_s0 = sshll.u32 (!%p412_p2), %s446_s29, 5 }
  0x4f   : > { %s1098_s3 = smul.u32 (!%p412_p2), 384, %s425_s20  ;;  %s1593_s24 = scalar_lea.vmem (!%p412_p2), [#allocation5], %s1033_s0 }
  0x50   : > { %s1589_s7 = scalar_lea.vmem (!%p412_p2), [#allocation3], %s1097_s25  ;;  %p1034_p3 = scmp.ne.s32.totalorder (!%p412_p2), %s1335_s15, 0 }
  0x51   : > { %s1591_s8 = scalar_lea.vmem (!%p412_p2), [#allocation4], %s1098_s3 }
  0x52   : > { %459 = sbr.rel (%p1034_p3) target bundleno = 90 (0x5a), region = 96 }
  0x57   : > { %v1353_v52 = vmov 0.0  }
  0x58   : > { %460 = vst [vmem:[#allocation2 + $0x10] sm:$0xff] %v1353_v52  ;;  %461 = vst [vmem:[#allocation2] sm:$0xff] %v1353_v52 }
  0x59   : > { %462 = vst [vmem:[#allocation2 + $0x18] sm:$0xff] %v1353_v52  ;;  %463 = vst [vmem:[#allocation2 + $0x8] sm:$0xff] %v1353_v52 }
  0x5a PF: > { %v1189_v53 = vld [vmem:[%s1591_s8 + $0x74] ss:$8 sps:$4 sm:$0xff]   ;;  %v1191_v54 = vld [vmem:[%s1591_s8 + $0x70] ss:$8 sps:$4 sm:$0xff]   ;;  %v1354_v55 = vmov 0   ;;  %p1086_p4 = scmp.ne.s32.totalorder %s1335_s15, 5 }
  0x5b   : > { %851 = vmatprep.mubr.bf16.mxu1 %v1354_v55  ;;  %776 = vmatprep.subr.bf16.mxu0 %v1189_v53  ;;  %v1192_v56 = vld [vmem:[%s1591_s8 + $0x64] ss:$8 sps:$4 sm:$0xff]   ;;  %v1194_v57 = vld [vmem:[%s1591_s8 + $0x60] ss:$8 sps:$4 sm:$0xff]   ;;  %v1195_v58 = vld [vmem:[%s1591_s8 + $0x54] ss:$8 sps:$4 sm:$0xff]  }
  0x5c   : > { %777 = vmatpush1.bf16.msra.mxu0 %v1191_v54  ;;  %v1197_v59 = vld [vmem:[%s1591_s8 + $0x50] ss:$8 sps:$4 sm:$0xff]   ;;  %v1198_v60 = vld [vmem:[%s1591_s8 + $0x44] ss:$8 sps:$4 sm:$0xff]   ;;  %v1210_v61 = vld [vmem:[%s1591_s8 + $0x174] ss:$8 sps:$4 sm:$0xff]  }
  0x5d   : > { %778 = vmatprep.subr.bf16.mxu0 %v1192_v56  ;;  %v1212_v62 = vld [vmem:[%s1591_s8 + $0x170] ss:$8 sps:$4 sm:$0xff]   ;;  %v1200_v63 = vld [vmem:[%s1591_s8 + $0x40] ss:$8 sps:$4 sm:$0xff]   ;;  %v1201_v0 = vld [vmem:[%s1591_s8 + $0x34] ss:$8 sps:$4 sm:$0xff]   ;;  %819 = vmatprep.subr.bf16.mxu1 %v1210_v61 }
  0x5e   : > { %v1216_v1 = vld [vmem:[%s1591_s8 + $0x164] ss:$8 sps:$4 sm:$0xff]   ;;  %820 = vmatpush1.bf16.msra.mxu1 %v1212_v62  ;;  %v1218_v2 = vld [vmem:[%s1591_s8 + $0x160] ss:$8 sps:$4 sm:$0xff]   ;;  %v1203_v3 = vld [vmem:[%s1591_s8 + $0x30] ss:$8 sps:$4 sm:$0xff]  }
  0x5f   : > { %821 = vmatprep.subr.bf16.mxu1 %v1216_v1  ;;  %v1222_v4 = vld [vmem:[%s1591_s8 + $0x154] ss:$8 sps:$4 sm:$0xff]   ;;  %v1204_v5 = vld [vmem:[%s1591_s8 + $0x24] ss:$8 sps:$4 sm:$0xff]   ;;  %v1224_v6 = vld [vmem:[%s1591_s8 + $0x150] ss:$8 sps:$4 sm:$0xff]  }
  0x60   : > { %779 = vmatpush1.bf16.msra.mxu0 %v1194_v57  ;;  %v1228_v7 = vld [vmem:[%s1591_s8 + $0x144] ss:$8 sps:$4 sm:$0xff]   ;;  %v1206_v8 = vld [vmem:[%s1591_s8 + $0x20] ss:$8 sps:$4 sm:$0xff]   ;;  %v1207_v9 = vld [vmem:[%s1591_s8 + $0x14] ss:$8 sps:$4 sm:$0xff]  }
  0x61   : > { %780 = vmatprep.subr.bf16.mxu0 %v1195_v58  ;;  %v1230_v10 = vld [vmem:[%s1591_s8 + $0x140] ss:$8 sps:$4 sm:$0xff]   ;;  %v1234_v11 = vld [vmem:[%s1591_s8 + $0x134] ss:$8 sps:$4 sm:$0xff]   ;;  %v1209_v12 = vld [vmem:[%s1591_s8 + $0x10] ss:$8 sps:$4 sm:$0xff]  }
  0x62   : > { %822 = vmatpush1.bf16.msra.mxu1 %v1218_v2  ;;  %v1213_v13 = vld [vmem:[%s1591_s8 + $0x4] ss:$8 sps:$4 sm:$0xff]   ;;  %v1236_v14 = vld [vmem:[%s1591_s8 + $0x130] ss:$8 sps:$4 sm:$0xff]   ;;  %v1215_v16 = vld [vmem:[%s1591_s8] ss:$8 sps:$4 sm:$0xff]  }
  0x63   : > { %823 = vmatprep.subr.bf16.mxu1 %v1222_v4  ;;  %v1240_v15 = vld [vmem:[%s1591_s8 + $0x124] ss:$8 sps:$4 sm:$0xff]   ;;  %v1219_v17 = vld [vmem:[%s1591_s8 + $0xf4] ss:$8 sps:$4 sm:$0xff]   ;;  %v1242_v18 = vld [vmem:[%s1591_s8 + $0x120] ss:$8 sps:$4 sm:$0xff]  }
  0x64   : > { %781 = vmatpush1.bf16.msra.mxu0 %v1197_v59  ;;  %v1246_v19 = vld [vmem:[%s1591_s8 + $0x114] ss:$8 sps:$4 sm:$0xff]   ;;  %v1221_v20 = vld [vmem:[%s1591_s8 + $0xf0] ss:$8 sps:$4 sm:$0xff]   ;;  %v1225_v21 = vld [vmem:[%s1591_s8 + $0xe4] ss:$8 sps:$4 sm:$0xff]  }
  0x65   : > { %782 = vmatprep.subr.bf16.mxu0 %v1198_v60  ;;  %v1248_v22 = vld [vmem:[%s1591_s8 + $0x110] ss:$8 sps:$4 sm:$0xff]   ;;  %v1252_v23 = vld [vmem:[%s1591_s8 + $0x104] ss:$8 sps:$4 sm:$0xff]   ;;  %v1227_v25 = vld [vmem:[%s1591_s8 + $0xe0] ss:$8 sps:$4 sm:$0xff]  }
  0x66   : > { %824 = vmatpush1.bf16.msra.mxu1 %v1224_v6  ;;  %v1264_v24 = vld [vmem:[%s1589_s7 + $0x4] ss:$12 sps:$4 sm:$0xff]   ;;  %v1258_v30 = vld [vmem:[%s1589_s7 + $0x8] ss:$12 sps:$4 sm:$0xff]   ;;  %v1262_v40 = vld [vmem:[%s1589_s7] ss:$12 sps:$4 sm:$0xff]  }
  0x67   : > { %825 = vmatprep.subr.bf16.mxu1 %v1228_v7  ;;  %v1231_v26 = vld [vmem:[%s1591_s8 + $0xd4] ss:$8 sps:$4 sm:$0xff]   ;;  %808 = vmatprep.mubr.bf16.mxu0 %v1264_v24  ;;  %v1254_v27 = vld [vmem:[%s1591_s8 + $0x100] ss:$8 sps:$4 sm:$0xff]   ;;  %v1233_v28 = vld [vmem:[%s1591_s8 + $0xd0] ss:$8 sps:$4 sm:$0xff]  }
  0x68   : > { %783 = vmatpush1.bf16.msra.mxu0 %v1200_v63  ;;  %v1237_v29 = vld [vmem:[%s1591_s8 + $0xc4] ss:$8 sps:$4 sm:$0xff]   ;;  %v1239_v31 = vld [vmem:[%s1591_s8 + $0xc0] ss:$8 sps:$4 sm:$0xff]   ;;  %v1243_v32 = vld [vmem:[%s1591_s8 + $0xb4] ss:$8 sps:$4 sm:$0xff]  }
  0x69   : > { %784 = vmatprep.subr.bf16.mxu0 %v1201_v0  ;;  %v1245_v33 = vld [vmem:[%s1591_s8 + $0xb0] ss:$8 sps:$4 sm:$0xff]   ;;  %v1249_v34 = vld [vmem:[%s1591_s8 + $0xa4] ss:$8 sps:$4 sm:$0xff]   ;;  %v1251_v35 = vld [vmem:[%s1591_s8 + $0xa0] ss:$8 sps:$4 sm:$0xff]  }
  0x6a   : > { %826 = vmatpush1.bf16.msra.mxu1 %v1230_v10  ;;  %v1255_v36 = vld [vmem:[%s1591_s8 + $0x94] ss:$8 sps:$4 sm:$0xff]   ;;  %v1257_v37 = vld [vmem:[%s1591_s8 + $0x90] ss:$8 sps:$4 sm:$0xff]   ;;  %v1259_v38 = vld [vmem:[%s1591_s8 + $0x84] ss:$8 sps:$4 sm:$0xff]  }
  0x6b   : > { %827 = vmatprep.subr.bf16.mxu1 %v1234_v11  ;;  %v1261_v39 = vld [vmem:[%s1591_s8 + $0x80] ss:$8 sps:$4 sm:$0xff]   ;;  %v465_v47 = vld [vmem:[#allocation2] sm:$0xff]  ;;  %v467_v56 = vld [vmem:[#allocation2 + $0x8] sm:$0xff] }
  0x6c   : > { %785 = vmatpush1.bf16.msra.mxu0 %v1203_v3  ;;  %v464_v43 = vld [vmem:[#allocation2 + $0x10] sm:$0xff]  ;;  %v466_v51 = vld [vmem:[#allocation2 + $0x18] sm:$0xff] }
  0x6d   : > { %786 = vmatprep.subr.bf16.mxu0 %v1204_v5 }
  0x6e   : > { %828 = vmatpush1.bf16.msra.mxu1 %v1236_v14 }
  0x6f   : > { %829 = vmatprep.subr.bf16.mxu1 %v1240_v15 }
  0x70   : > { %787 = vmatpush1.bf16.msra.mxu0 %v1206_v8 }
  0x71   : > { %788 = vmatprep.subr.bf16.mxu0 %v1207_v9 }
  0x72   : > { %830 = vmatpush1.bf16.msra.mxu1 %v1242_v18 }
  0x73   : > { %831 = vmatprep.subr.bf16.mxu1 %v1246_v19 }
  0x74   : > { %789 = vmatpush1.bf16.msra.mxu0 %v1209_v12 }
  0x75   : > { %790 = vmatprep.subr.bf16.mxu0 %v1213_v13 }
  0x76   : > { %832 = vmatpush1.bf16.msra.mxu1 %v1248_v22 }
  0x77   : > { %833 = vmatprep.subr.bf16.mxu1 %v1252_v23 }
  0x78   : > { %791 = vmatpush1.bf16.msra.mxu0 %v1215_v16 }
  0x79   : > { %792 = vmatprep.subr.bf16.mxu0 %v1219_v17 }
  0x7a   : > { %834 = vmatpush1.bf16.msra.mxu1 %v1254_v27 }
  0x7c   : > { %793 = vmatpush2.bf16.msra.mxu0 %v1221_v20 }
  0x7d   : > { %794 = vmatprep.subr.bf16.mxu0 %v1225_v21  ;;  %852 = vmatmul.mubr.bf16.vlgmr.msra.gmra.mxu1 %v1258_v30 }
  0x80   : > { %795 = vmatpush2.bf16.msra.mxu0 %v1227_v25 }
  0x81   : > { %796 = vmatprep.subr.bf16.mxu0 %v1231_v26 }
  0x84   : > { %797 = vmatpush2.bf16.msra.mxu0 %v1233_v28 }
  0x85   : > { %798 = vmatprep.subr.bf16.mxu0 %v1237_v29 }
  0x88   : > { %799 = vmatpush2.bf16.msra.mxu0 %v1239_v31 }
  0x89   : > { %800 = vmatprep.subr.bf16.mxu0 %v1243_v32 }
  0x8c   : > { %801 = vmatpush2.bf16.msra.mxu0 %v1245_v33 }
  0x8d   : > { %802 = vmatprep.subr.bf16.mxu0 %v1249_v34 }
  0x90   : > { %803 = vmatpush2.bf16.msra.mxu0 %v1251_v35 }
  0x91   : > { %804 = vmatprep.subr.bf16.mxu0 %v1255_v36 }
  0x94   : > { %805 = vmatpush2.bf16.msra.mxu0 %v1257_v37 }
  0x95   : > { %806 = vmatprep.subr.bf16.mxu0 %v1259_v38 }
  0x98   : > { %807 = vmatpush2.bf16.msra.mxu0 %v1261_v39 }
  0x9b   : > { %809 = vmatmul.mubr.bf16.vlgmr.msra.gmra.mxu0 %v1262_v40 }
 0x13d   : > { %v853_v41 = vpop.f32.mrf.mxu1 }
 0x13f   : > { %v855_v42 = vpop.f32.mrf.mxu1 }
 0x141   : > { %v857_v46 = vpop.f32.mrf.mxu1 }
 0x143   : > { %v859_v55 = vpop.f32.mrf.mxu1 }
 0x15b   : > { %v810_v44 = vpop.f32.mrf.mxu0 }
 0x15c   : > { %v854_v45 = vadd.f32 %v853_v41, %v810_v44 }
 0x15d   : > { %v812_v48 = vpop.f32.mrf.mxu0 }
 0x15e   : > { %v862_v49 = vadd.f32 %v854_v45, %v464_v43  ;;  %v856_v50 = vadd.f32 %v855_v42, %v812_v48 }
 0x15f   : > { %v814_v52 = vpop.f32.mrf.mxu0 }
 0x160   : > { %866 = vst [vmem:[#allocation2 + $0x10] sm:$0xff] %v862_v49  ;;  %v863_v53 = vadd.f32 %v856_v50, %v465_v47  ;;  %v858_v54 = vadd.f32 %v857_v46, %v814_v52 }
 0x161   : > { %v816_v57 = vpop.f32.mrf.mxu0 }
 0x162   : > { %867 = vst [vmem:[#allocation2] sm:$0xff] %v863_v53  ;;  %v864_v58 = vadd.f32 %v858_v54, %v466_v51  ;;  %v860_v59 = vadd.f32 %v859_v55, %v816_v57  ;;  %873 = sbr.rel (%p1086_p4) target bundleno = 367 (0x16f), region = 100 }
 0x164   : > { %868 = vst [vmem:[#allocation2 + $0x18] sm:$0xff] %v864_v58  ;;  %v865_v60 = vadd.f32 %v860_v59, %v467_v56 }
 0x166   : > { %869 = vst [vmem:[#allocation2 + $0x8] sm:$0xff] %v865_v60 }
 0x167   : > { %v874_v61 = vld [vmem:[#allocation2 + $0x10] sm:$0xff] }
 0x168   : > { %878 = vst [vmem:[%s1593_s24] sm:$0xff] %v874_v61 }
 0x169   : > { %v875_v62 = vld [vmem:[#allocation2] sm:$0xff] }
 0x16a   : > { %879 = vst [vmem:[%s1593_s24 + $0x8] sm:$0xff] %v875_v62 }
 0x16b   : > { %v876_v63 = vld [vmem:[#allocation2 + $0x18] sm:$0xff] }
 0x16c   : > { %880 = vst [vmem:[%s1593_s24 + $0x10] sm:$0xff] %v876_v63 }
 0x16d   : > { %v877_v0 = vld [vmem:[#allocation2 + $0x8] sm:$0xff] }
 0x16e   : > { %881 = vst [vmem:[%s1593_s24 + $0x18] sm:$0xff] %v877_v0 }
 0x16f PF: > { %888 = sbr.rel (!%p1464_p12) target bundleno = 375 (0x177), region = 104  ;;  %s1094_s9 = sshll.u32 (%p1464_p12), %s1339_s16, 4  ;;  %v907_v1 = vld [vmem:[%s1593_s24] sm:$0xff] (%p1464_p12) }
 0x170   : > { %s894_s15 = scalar_lea.vmem (%p1464_p12), %s1697_s2, %s1094_s9 }
 0x171   : > { %v909_v2 = vld [vmem:[%s1593_s24 + $0x8] sm:$0xff] (%p1464_p12)  ;;  %908 = vst [vmem:[%s894_s15] sm:$0xff] (%p1464_p12), %v907_v1 }
 0x172   : > { %910 = vst [vmem:[%s894_s15 + $0x8] sm:$0xff] (%p1464_p12), %v909_v2 }
 0x173   : > { %v911_v3 = vld [vmem:[%s1593_s24 + $0x10] sm:$0xff] (%p1464_p12) }
 0x174   : > { %912 = vst [vmem:[%s894_s15 + $0x20] sm:$0xff] %v911_v3 }
 0x175   : > { %v913_v4 = vld [vmem:[%s1593_s24 + $0x18] sm:$0xff] }
 0x176   : > { %914 = vst [vmem:[%s894_s15 + $0x28] sm:$0xff] %v913_v4 }
 0x177 PF: > { %s12_s19 = sadd.s32 1, %s1351_s19   ;;  %s1703_s9 = smov %s1315_s10 }
 0x178   : > { %p9_p5 = scmp.ge.s32.totalorder %s12_s19, 14   ;;  %s1704_s10 = smov %s1462_s5 }
 0x179   : > { %s1705_s11 = smov %s1323_s12  ;;  %s1706_s12 = smov %s1459_s4 }
 0x17a   : > { %s1707_s13 = smov %s1331_s14  ;;  %s1708_s14 = smov %s1445_s27 }
 0x17b   : > { %s1709_s15 = smov %s1343_s17  ;;  %s1710_s16 = smov %s1347_s18 }
 0x17c   : > { %s1711_s17 = smov %s1714_s21  ;;  %s1712_s18 = smov %s1718_s22 }
 0x17d   :  { %11 = sbr.rel (!%p9_p5) target bundleno = 8 (0x8), region = 172 }

// kernel: quantized_resnet18_forward.108
= control target key start
LH: loop header
LB: loop body
LE: loop exit
PB: predicated region body
PF: predicated region fallthrough
CT: control target
= control target key end

     0   :  { %s976_s9 = smov 0   ;;  %s978_s10 = smov 0   ;;  %s1160_s0 = inlined_call_operand.vmem [shape: bf16[16,256], index: 0, kind: input, shape index: {}]   ;;  %s1161_s1 = inlined_call_operand.vmem [shape: bf16[256,512], index: 1, kind: input, shape index: {}]   ;;  %s1162_s2 = inlined_call_operand.vmem [shape: f32[16,512], index: 2, kind: output, shape index: {}]  }
   0x1   :  { %s980_s11 = smov 0   ;;  %s982_s12 = smov 0  }
   0x2   :  { %s984_s13 = smov 0  }
   0x3 LB: > { %s27_s14 = sadd.s32 1, %s955_s12  ;;  %s778_s15 = sadd.s32 4294967295, %s959_s13   ;;  %s959_s13 = sphi %s984_s13, %s12_s13   ;;  %s955_s12 = sphi %s982_s12, %s1167_s12   ;;  %s951_s11 = sphi %s980_s11, %s1166_s11   ;;  %s947_s10 = sphi %s978_s10, %s1165_s10   ;;  %s943_s9 = sphi %s976_s9, %s1164_s9  }
   0x4   : > { %p29_p0 = scmp.ge.s32.totalorder %s27_s14, 2  ;;  %p75_p1 = scmp.ne.s32.totalorder %s947_s10, %s943_s9 }
   0x5   : > { %p76_p2 = scmp.eq.s32.totalorder %s959_s13, 0  ;;  %p107_p4 = scmp.eq.s32.totalorder %s778_s15, 1 }
   0x6   : > { %s1169_s14 = smov (%p29_p0, %s27_s14), 0  ;;  %s68_s17 = sadd.s32 1, %s947_s10 }
   0x7   : > { %p77_p3 = por %p76_p2, %p75_p1  ;;  %s64_s16 = ssub.s32 %s955_s12, %s1169_s14 }
   0x8   : > { %p66_p5 = scmp.eq.s32.totalorder %s64_s16, 0  ;;  %p1011_p6 = por %p107_p4, %p75_p1 }
   0x9   : > { %p782_p7 = scmp.ge.s32.totalorder %s959_s13, 2 }
   0xa   : > { %s1016_s19 = scalar_select %p66_p5, %s947_s10, %s68_s17  }
   0xb   : > { %144 = sbr.rel (%p782_p7) target bundleno = 36 (0x24), region = 20 }
  0x10   : > { %147 = sbr.rel (!%p77_p3) target bundleno = 36 (0x24), region = 24  ;;  %s149_s20 = sand.u32 (%p77_p3), 1, %s947_s10  }
  0x11   : > { %s828_s21 = sshll.u32 (%p77_p3), %s955_s12, 3  ;;  %s783_s22 = sshll.u32 (%p77_p3), %s149_s20, 8 }
  0x12   : > { %s1024_s25 = scalar_lea.vmem (%p77_p3), %s1161_s1, %s828_s21  ;;  %s1029_s26 = scalar_lea.vmem (%p77_p3), [#allocation3], %s783_s22 }
  0x13   : > { %v248_v0 = vld [vmem:[%s1024_s25] sm:$0xff] (%p77_p3)  ;;  %v250_v1 = vld [vmem:[%s1024_s25 + $0x10] sm:$0xff] (%p77_p3) }
  0x14   : > { %v252_v2 = vld [vmem:[%s1024_s25 + $0x20] sm:$0xff] (%p77_p3)  ;;  %249 = vst [vmem:[%s1029_s26] sm:$0xff] (%p77_p3), %v248_v0  ;;  %251 = vst [vmem:[%s1029_s26 + $0x8] sm:$0xff] (%p77_p3), %v250_v1  ;;  %v254_v3 = vld [vmem:[%s1024_s25 + $0x30] sm:$0xff] (%p77_p3) }
  0x15   : > { %253 = vst [vmem:[%s1029_s26 + $0x10] sm:$0xff] %v252_v2  ;;  %v256_v4 = vld [vmem:[%s1024_s25 + $0x40] sm:$0xff]  ;;  %v258_v5 = vld [vmem:[%s1024_s25 + $0x50] sm:$0xff]  ;;  %255 = vst [vmem:[%s1029_s26 + $0x18] sm:$0xff] %v254_v3 }
  0x16   : > { %257 = vst [vmem:[%s1029_s26 + $0x20] sm:$0xff] %v256_v4  ;;  %259 = vst [vmem:[%s1029_s26 + $0x28] sm:$0xff] %v258_v5  ;;  %v260_v6 = vld [vmem:[%s1024_s25 + $0x60] sm:$0xff]  ;;  %v262_v7 = vld [vmem:[%s1024_s25 + $0x70] sm:$0xff] }
  0x17   : > { %v264_v8 = vld [vmem:[%s1024_s25 + $0x80] sm:$0xff]  ;;  %261 = vst [vmem:[%s1029_s26 + $0x30] sm:$0xff] %v260_v6  ;;  %263 = vst [vmem:[%s1029_s26 + $0x38] sm:$0xff] %v262_v7  ;;  %v266_v9 = vld [vmem:[%s1024_s25 + $0x90] sm:$0xff] }
  0x18   : > { %265 = vst [vmem:[%s1029_s26 + $0x40] sm:$0xff] %v264_v8  ;;  %v268_v10 = vld [vmem:[%s1024_s25 + $0xa0] sm:$0xff]  ;;  %v270_v11 = vld [vmem:[%s1024_s25 + $0xb0] sm:$0xff]  ;;  %267 = vst [vmem:[%s1029_s26 + $0x48] sm:$0xff] %v266_v9 }
  0x19   : > { %269 = vst [vmem:[%s1029_s26 + $0x50] sm:$0xff] %v268_v10  ;;  %271 = vst [vmem:[%s1029_s26 + $0x58] sm:$0xff] %v270_v11  ;;  %v272_v12 = vld [vmem:[%s1024_s25 + $0xc0] sm:$0xff]  ;;  %v274_v13 = vld [vmem:[%s1024_s25 + $0xd0] sm:$0xff] }
  0x1a   : > { %v276_v14 = vld [vmem:[%s1024_s25 + $0xe0] sm:$0xff]  ;;  %273 = vst [vmem:[%s1029_s26 + $0x60] sm:$0xff] %v272_v12  ;;  %275 = vst [vmem:[%s1029_s26 + $0x68] sm:$0xff] %v274_v13  ;;  %v278_v15 = vld [vmem:[%s1024_s25 + $0xf0] sm:$0xff] }
  0x1b   : > { %277 = vst [vmem:[%s1029_s26 + $0x70] sm:$0xff] %v276_v14  ;;  %v280_v16 = vld [vmem:[%s1024_s25 + $0x100] sm:$0xff]  ;;  %v282_v17 = vld [vmem:[%s1024_s25 + $0x110] sm:$0xff]  ;;  %279 = vst [vmem:[%s1029_s26 + $0x78] sm:$0xff] %v278_v15 }
  0x1c   : > { %281 = vst [vmem:[%s1029_s26 + $0x80] sm:$0xff] %v280_v16  ;;  %283 = vst [vmem:[%s1029_s26 + $0x88] sm:$0xff] %v282_v17  ;;  %v284_v18 = vld [vmem:[%s1024_s25 + $0x120] sm:$0xff]  ;;  %v286_v19 = vld [vmem:[%s1024_s25 + $0x130] sm:$0xff] }
  0x1d   : > { %v288_v20 = vld [vmem:[%s1024_s25 + $0x140] sm:$0xff]  ;;  %285 = vst [vmem:[%s1029_s26 + $0x90] sm:$0xff] %v284_v18  ;;  %287 = vst [vmem:[%s1029_s26 + $0x98] sm:$0xff] %v286_v19  ;;  %v290_v21 = vld [vmem:[%s1024_s25 + $0x150] sm:$0xff] }
  0x1e   : > { %289 = vst [vmem:[%s1029_s26 + $0xa0] sm:$0xff] %v288_v20  ;;  %v292_v22 = vld [vmem:[%s1024_s25 + $0x160] sm:$0xff]  ;;  %v294_v23 = vld [vmem:[%s1024_s25 + $0x170] sm:$0xff]  ;;  %291 = vst [vmem:[%s1029_s26 + $0xa8] sm:$0xff] %v290_v21 }
  0x1f   : > { %293 = vst [vmem:[%s1029_s26 + $0xb0] sm:$0xff] %v292_v22  ;;  %295 = vst [vmem:[%s1029_s26 + $0xb8] sm:$0xff] %v294_v23  ;;  %v296_v24 = vld [vmem:[%s1024_s25 + $0x180] sm:$0xff]  ;;  %v298_v25 = vld [vmem:[%s1024_s25 + $0x190] sm:$0xff] }
  0x20   : > { %v300_v26 = vld [vmem:[%s1024_s25 + $0x1a0] sm:$0xff]  ;;  %297 = vst [vmem:[%s1029_s26 + $0xc0] sm:$0xff] %v296_v24  ;;  %299 = vst [vmem:[%s1029_s26 + $0xc8] sm:$0xff] %v298_v25  ;;  %v302_v27 = vld [vmem:[%s1024_s25 + $0x1b0] sm:$0xff] }
  0x21   : > { %301 = vst [vmem:[%s1029_s26 + $0xd0] sm:$0xff] %v300_v26  ;;  %v304_v28 = vld [vmem:[%s1024_s25 + $0x1c0] sm:$0xff]  ;;  %v306_v29 = vld [vmem:[%s1024_s25 + $0x1d0] sm:$0xff]  ;;  %303 = vst [vmem:[%s1029_s26 + $0xd8] sm:$0xff] %v302_v27 }
  0x22   : > { %305 = vst [vmem:[%s1029_s26 + $0xe0] sm:$0xff] %v304_v28  ;;  %307 = vst [vmem:[%s1029_s26 + $0xe8] sm:$0xff] %v306_v29  ;;  %v308_v30 = vld [vmem:[%s1024_s25 + $0x1e0] sm:$0xff]  ;;  %v310_v31 = vld [vmem:[%s1024_s25 + $0x1f0] sm:$0xff] }
  0x23   : > { %309 = vst [vmem:[%s1029_s26 + $0xf0] sm:$0xff] %v308_v30  ;;  %311 = vst [vmem:[%s1029_s26 + $0xf8] sm:$0xff] %v310_v31 }
  0x24 PF: > { %p786_p8 = scmp.ge.s32.totalorder %s959_s13, 1  ;;  %p316_p9 = scmp.lt.s32.totalorder %s959_s13, 3 }
  0x26   : > { %p317_p10 = pnand %p786_p8, %p316_p9 }
  0x27   : > { %s323_s27 = sand.u32 (!%p317_p10), 1, %s943_s9  }
  0x28   : > { %320 = sbr.rel (%p317_p10) target bundleno = 318 (0x13e), region = 62  ;;  %s787_s28 = sshll.u32 (!%p317_p10), %s323_s27, 8 }
  0x29   : > { %s1100_s3 = scalar_lea.vmem (!%p317_p10), [#allocation3], %s787_s28  ;;  %s788_s6 = sshll.u32 (!%p317_p10), %s323_s27, 5 }
  0x2a   : > { %s352_s7 = scalar_lea.vmem (!%p317_p10), [#allocation4], %s788_s6 }
  0x2d   : > { %v920_v32 = vld [vmem:[%s1160_s0 + $0x4] ss:$8 sps:$4 sm:$0xff]   ;;  %v870_v33 = vld [vmem:[%s1100_s3 + $0x74] ss:$8 sps:$4 sm:$0xff]   ;;  %v872_v34 = vld [vmem:[%s1100_s3 + $0x70] ss:$8 sps:$4 sm:$0xff]  }
  0x2e   : > { %617 = vmatprep.mubr.bf16.mxu0 %v920_v32  ;;  %585 = vmatprep.subr.bf16.mxu0 %v870_v33  ;;  %v873_v35 = vld [vmem:[%s1100_s3 + $0x64] ss:$8 sps:$4 sm:$0xff]   ;;  %v875_v36 = vld [vmem:[%s1100_s3 + $0x60] ss:$8 sps:$4 sm:$0xff]   ;;  %v876_v37 = vld [vmem:[%s1100_s3 + $0x54] ss:$8 sps:$4 sm:$0xff]  }
  0x2f   : > { %586 = vmatpush1.bf16.msra.mxu0 %v872_v34  ;;  %v878_v38 = vld [vmem:[%s1100_s3 + $0x50] ss:$8 sps:$4 sm:$0xff]   ;;  %v879_v39 = vld [vmem:[%s1100_s3 + $0x44] ss:$8 sps:$4 sm:$0xff]   ;;  %v881_v40 = vld [vmem:[%s1100_s3 + $0x40] ss:$8 sps:$4 sm:$0xff]  }
  0x30   : > { %587 = vmatprep.subr.bf16.mxu0 %v873_v35  ;;  %v882_v41 = vld [vmem:[%s1100_s3 + $0x34] ss:$8 sps:$4 sm:$0xff]   ;;  %v884_v42 = vld [vmem:[%s1100_s3 + $0x30] ss:$8 sps:$4 sm:$0xff]   ;;  %v885_v43 = vld [vmem:[%s1100_s3 + $0x24] ss:$8 sps:$4 sm:$0xff]  }
  0x31   : > { %v887_v44 = vld [vmem:[%s1100_s3 + $0x20] ss:$8 sps:$4 sm:$0xff]   ;;  %v888_v45 = vld [vmem:[%s1100_s3 + $0x14] ss:$8 sps:$4 sm:$0xff]   ;;  %v890_v46 = vld [vmem:[%s1100_s3 + $0x10] ss:$8 sps:$4 sm:$0xff]  }
  0x32   : > { %v891_v47 = vld [vmem:[%s1100_s3 + $0x4] ss:$8 sps:$4 sm:$0xff]   ;;  %v893_v48 = vld [vmem:[%s1100_s3] ss:$8 sps:$4 sm:$0xff]   ;;  %v894_v49 = vld [vmem:[%s1100_s3 + $0xf4] ss:$8 sps:$4 sm:$0xff]  }
  0x33   : > { %588 = vmatpush1.bf16.msra.mxu0 %v875_v36  ;;  %v896_v50 = vld [vmem:[%s1100_s3 + $0xf0] ss:$8 sps:$4 sm:$0xff]   ;;  %v897_v51 = vld [vmem:[%s1100_s3 + $0xe4] ss:$8 sps:$4 sm:$0xff]   ;;  %v899_v52 = vld [vmem:[%s1100_s3 + $0xe0] ss:$8 sps:$4 sm:$0xff]  }
  0x34   : > { %589 = vmatprep.subr.bf16.mxu0 %v876_v37  ;;  %v900_v53 = vld [vmem:[%s1100_s3 + $0xd4] ss:$8 sps:$4 sm:$0xff]   ;;  %v902_v54 = vld [vmem:[%s1100_s3 + $0xd0] ss:$8 sps:$4 sm:$0xff]   ;;  %v903_v55 = vld [vmem:[%s1100_s3 + $0xc4] ss:$8 sps:$4 sm:$0xff]  }
  0x35   : > { %v905_v56 = vld [vmem:[%s1100_s3 + $0xc0] ss:$8 sps:$4 sm:$0xff]   ;;  %v906_v57 = vld [vmem:[%s1100_s3 + $0xb4] ss:$8 sps:$4 sm:$0xff]   ;;  %v908_v58 = vld [vmem:[%s1100_s3 + $0xb0] ss:$8 sps:$4 sm:$0xff]  }
  0x36   : > { %v909_v59 = vld [vmem:[%s1100_s3 + $0xa4] ss:$8 sps:$4 sm:$0xff]   ;;  %v911_v60 = vld [vmem:[%s1100_s3 + $0xa0] ss:$8 sps:$4 sm:$0xff]   ;;  %v912_v61 = vld [vmem:[%s1100_s3 + $0x94] ss:$8 sps:$4 sm:$0xff]  }
  0x37   : > { %590 = vmatpush1.bf16.msra.mxu0 %v878_v38  ;;  %v914_v62 = vld [vmem:[%s1100_s3 + $0x90] ss:$8 sps:$4 sm:$0xff]   ;;  %v915_v63 = vld [vmem:[%s1100_s3 + $0x84] ss:$8 sps:$4 sm:$0xff]   ;;  %v917_v0 = vld [vmem:[%s1100_s3 + $0x80] ss:$8 sps:$4 sm:$0xff]  }
  0x38   : > { %591 = vmatprep.subr.bf16.mxu0 %v879_v39  ;;  %v918_v1 = vld [vmem:[%s1160_s0] ss:$8 sps:$4 sm:$0xff]   ;;  %s829_s8 = sshll.u32 (%p1011_p6), %s951_s11, 4 }
  0x39   : > { %s659_s16 = scalar_lea.vmem (%p1011_p6), %s1162_s2, %s829_s8 }
  0x3b   : > { %592 = vmatpush1.bf16.msra.mxu0 %v881_v40 }
  0x3c   : > { %593 = vmatprep.subr.bf16.mxu0 %v882_v41 }
  0x3f   : > { %594 = vmatpush1.bf16.msra.mxu0 %v884_v42 }
  0x40   : > { %595 = vmatprep.subr.bf16.mxu0 %v885_v43 }
  0x43   : > { %596 = vmatpush1.bf16.msra.mxu0 %v887_v44 }
  0x44   : > { %597 = vmatprep.subr.bf16.mxu0 %v888_v45 }
  0x47   : > { %598 = vmatpush1.bf16.msra.mxu0 %v890_v46 }
  0x48   : > { %599 = vmatprep.subr.bf16.mxu0 %v891_v47 }
  0x4b   : > { %600 = vmatpush1.bf16.msra.mxu0 %v893_v48 }
  0x4c   : > { %601 = vmatprep.subr.bf16.mxu0 %v894_v49 }
  0x4f   : > { %602 = vmatpush2.bf16.msra.mxu0 %v896_v50 }
  0x50   : > { %603 = vmatprep.subr.bf16.mxu0 %v897_v51 }
  0x53   : > { %604 = vmatpush2.bf16.msra.mxu0 %v899_v52 }
  0x54   : > { %605 = vmatprep.subr.bf16.mxu0 %v900_v53 }
  0x57   : > { %606 = vmatpush2.bf16.msra.mxu0 %v902_v54 }
  0x58   : > { %607 = vmatprep.subr.bf16.mxu0 %v903_v55 }
  0x5b   : > { %608 = vmatpush2.bf16.msra.mxu0 %v905_v56 }
  0x5c   : > { %609 = vmatprep.subr.bf16.mxu0 %v906_v57 }
  0x5f   : > { %610 = vmatpush2.bf16.msra.mxu0 %v908_v58 }
  0x60   : > { %611 = vmatprep.subr.bf16.mxu0 %v909_v59 }
  0x63   : > { %612 = vmatpush2.bf16.msra.mxu0 %v911_v60 }
  0x64   : > { %613 = vmatprep.subr.bf16.mxu0 %v912_v61 }
  0x67   : > { %614 = vmatpush2.bf16.msra.mxu0 %v914_v62 }
  0x68   : > { %615 = vmatprep.subr.bf16.mxu0 %v915_v63 }
  0x6b   : > { %616 = vmatpush2.bf16.msra.mxu0 %v917_v0 }
  0x6e   : > { %618 = vmatmul.mubr.bf16.vlgmr.msra.gmra.mxu0 %v918_v1 }
 0x12e   : > { %v619_v2 = vpop.f32.mrf.mxu0 }
 0x12f   : > { %643 = vst [vmem:[%s352_s7] sm:$0xff] %v619_v2 }
 0x130   : > { %v621_v3 = vpop.f32.mrf.mxu0 }
 0x131   : > { %644 = vst [vmem:[%s352_s7 + $0x8] sm:$0xff] %v621_v3  ;;  %653 = sbr.rel (!%p1011_p6) target bundleno = 318 (0x13e), region = 78 }
 0x132   : > { %v623_v4 = vpop.f32.mrf.mxu0 }
 0x133   : > { %645 = vst [vmem:[%s352_s7 + $0x10] sm:$0xff] %v623_v4 }
 0x134   : > { %v625_v5 = vpop.f32.mrf.mxu0 }
 0x135   : > { %646 = vst [vmem:[%s352_s7 + $0x18] sm:$0xff] %v625_v5 }
 0x136   : > { %v672_v6 = vld [vmem:[%s352_s7] sm:$0xff] }
 0x137   : > { %673 = vst [vmem:[%s659_s16] sm:$0xff] %v672_v6 }
 0x138   : > { %v674_v7 = vld [vmem:[%s352_s7 + $0x8] sm:$0xff] }
 0x139   : > { %675 = vst [vmem:[%s659_s16 + $0x8] sm:$0xff] %v674_v7 }
 0x13a   : > { %v676_v8 = vld [vmem:[%s352_s7 + $0x10] sm:$0xff] }
 0x13b   : > { %677 = vst [vmem:[%s659_s16 + $0x20] sm:$0xff] %v676_v8 }
 0x13c   : > { %v678_v9 = vld [vmem:[%s352_s7 + $0x18] sm:$0xff] }
 0x13d   : > { %679 = vst [vmem:[%s659_s16 + $0x28] sm:$0xff] %v678_v9 }
 0x13e PF: > { %s12_s13 = sadd.s32 1, %s959_s13   ;;  %s1164_s9 = smov %s947_s10 }
 0x13f   : > { %p9_p11 = scmp.ge.s32.totalorder %s12_s13, 4   ;;  %s1165_s10 = smov %s1016_s19 }
 0x140   : > { %s1166_s11 = smov %s955_s12  ;;  %s1167_s12 = smov %s1169_s14 }
 0x141   :  { %11 = sbr.rel (!%p9_p11) target bundleno = 3 (0x3), region = 135 }

// kernel: quantized_resnet18_forward.112
= control target key start
LH: loop header
LB: loop body
LE: loop exit
PB: predicated region body
PF: predicated region fallthrough
CT: control target
= control target key end

     0   :  { %v14_v0 = vlaneseq  ;;  %v154_v4 = vmov 1966171168   ;;  %v155_v11 = vmov 0.0   ;;  %s213_s0 = inlined_call_operand.vmem [shape: f32[8,512], index: 0, kind: input, shape index: {}]   ;;  %s214_s1 = inlined_call_operand.vmem [shape: f32[1,512], index: 1, kind: output, shape index: {0}]   ;;  %s215_s2 = inlined_call_operand.vmem [shape: f32[1,512], index: 2, kind: output, shape index: {1}]  }
   0x1   :  { %v20_v1 = vld [vmem:[%s213_s0] sm:$0xff]  ;;  %v21_v2 = vld [vmem:[%s213_s0 + $0x8] sm:$0xff]  ;;  %v22_v3 = vld [vmem:[%s213_s0 + $0x10] sm:$0xff]  ;;  %v56_v5 = vunpack.c.l.s4 %v154_v4 }
   0x2   :  { %vm180_vm0 = vcmp.lt.s32.totalorder %v14_v0, 512  ;;  %v23_v7 = vld [vmem:[%s213_s0 + $0x18] sm:$0xff]  ;;  %v25_v8 = vrot.slane %v20_v1, 4  ;;  %v31_v9 = vrot.slane %v21_v2, 4  ;;  %v37_v10 = vrot.slane %v22_v3, 4 }
   0x3   :  { %18 = vst.msk [vmem:[%s214_s1] sm:$0xf] %vm180_vm0, %v155_v11  ;;  %v43_v12 = vrot.slane %v23_v7, 4  ;;  %v57_v13 = vunpack.c.0.s8 %v56_v5  ;;  %v59_v14 = vshrl.u32 %v14_v0, 7  ;;  %19 = vst.msk [vmem:[%s215_s2] sm:$0xf] %vm180_vm0, %v155_v11  ;;  %v85_v15 = vmul.f32 %v20_v1, %v20_v1 }
   0x4   :  { %v26_v16 = vadd.f32 %v25_v8, %v20_v1  ;;  %v32_v17 = vadd.f32 %v31_v9, %v21_v2  ;;  %v38_v18 = vadd.f32 %v37_v10, %v22_v3  ;;  %v86_v19 = vmul.f32 %v21_v2, %v21_v2 }
   0x5   :  { %v44_v20 = vadd.f32 %v43_v12, %v23_v7  ;;  %v60_v21 = vsub.s32 %v57_v13, %v59_v14  ;;  %v87_v22 = vmul.f32 %v22_v3, %v22_v3  ;;  %v88_v23 = vmul.f32 %v23_v7, %v23_v7 }
   0x6   :  { %v27_v24 = vrot.slane %v26_v16, 2  ;;  %v33_v25 = vrot.slane %v32_v17, 2  ;;  %v39_v26 = vrot.slane %v38_v18, 2  ;;  %v89_v27 = vrot.slane %v85_v15, 4 }
   0x7   :  { %v45_v28 = vrot.slane %v44_v20, 2  ;;  %v95_v29 = vrot.slane %v86_v19, 4  ;;  %v101_v30 = vrot.slane %v87_v22, 4  ;;  %v107_v31 = vrot.slane %v88_v23, 4 }
   0x8   :  { %v28_v32 = vadd.f32 %v27_v24, %v26_v16  ;;  %v34_v33 = vadd.f32 %v33_v25, %v32_v17  ;;  %v40_v34 = vadd.f32 %v39_v26, %v38_v18  ;;  %v90_v35 = vadd.f32 %v89_v27, %v85_v15 }
   0x9   :  { %v46_v36 = vadd.f32 %v45_v28, %v44_v20  ;;  %v96_v37 = vadd.f32 %v95_v29, %v86_v19  ;;  %v102_v38 = vadd.f32 %v101_v30, %v87_v22  ;;  %v108_v39 = vadd.f32 %v107_v31, %v88_v23 }
   0xa   :  { %v29_v40 = vrot.slane %v28_v32, 1  ;;  %v35_v41 = vrot.slane %v34_v33, 1  ;;  %v41_v42 = vrot.slane %v40_v34, 1  ;;  %v91_v43 = vrot.slane %v90_v35, 2  ;;  %v24_v8 = vld [vmem:[%s214_s1] sm:$0xf] }
   0xb   :  { %v47_v44 = vrot.slane %v46_v36, 1  ;;  %v97_v45 = vrot.slane %v96_v37, 2  ;;  %v103_v46 = vrot.slane %v102_v38, 2  ;;  %v109_v47 = vrot.slane %v108_v39, 2  ;;  %v84_v14 = vld [vmem:[%s215_s2] sm:$0xf] }
   0xc   :  { %v30_v48 = vadd.f32 %v29_v40, %v28_v32  ;;  %v36_v49 = vadd.f32 %v35_v41, %v34_v33  ;;  %v42_v50 = vadd.f32 %v41_v42, %v40_v34  ;;  %v92_v51 = vadd.f32 %v91_v43, %v90_v35 }
   0xd   :  { %v48_v52 = vadd.f32 %v47_v44, %v46_v36  ;;  %v98_v53 = vadd.f32 %v97_v45, %v96_v37  ;;  %v104_v54 = vadd.f32 %v103_v46, %v102_v38  ;;  %v110_v55 = vadd.f32 %v109_v47, %v108_v39 }
   0xe   :  { %v53_v56 = vcombine.low %v30_v48, %v36_v49  ;;  %v93_v57 = vrot.slane %v92_v51, 1 }
   0xf   :  { %v54_v58 = vcombine.low %v42_v50, %v48_v52  ;;  %v99_v59 = vrot.slane %v98_v53, 1  ;;  %v105_v60 = vrot.slane %v104_v54, 1  ;;  %v111_v61 = vrot.slane %v110_v55, 1 }
  0x10   :  { %v61_v62 = vrot.slane %v53_v56, %v60_v21  ;;  %v94_v63 = vadd.f32 %v93_v57, %v92_v51 }
  0x11   :  { %v68_v0 = vrot.slane %v54_v58, %v60_v21  ;;  %v100_v1 = vadd.f32 %v99_v59, %v98_v53  ;;  %v106_v2 = vadd.f32 %v105_v60, %v104_v54  ;;  %v112_v3 = vadd.f32 %v111_v61, %v110_v55 }
  0x13   :  { %v69_v4 = vcombine.low %v61_v62, %v68_v0  ;;  %v117_v5 = vcombine.low %v94_v63, %v100_v1  ;;  %v118_v7 = vcombine.low %v106_v2, %v112_v3 }
  0x15   :  { %v76_v9 = vrot.slane %v69_v4, %v60_v21  ;;  %v125_v10 = vrot.slane %v117_v5, %v60_v21  ;;  %v132_v11 = vrot.slane %v118_v7, %v60_v21 }
  0x17   :  { %v78_v12 = vadd.f32 %v76_v9, %v24_v8  ;;  %v133_v13 = vcombine.low %v125_v10, %v132_v11 }
  0x19   :  { %83 = vst.msk [vmem:[%s214_s1] sm:$0xf] %vm180_vm0, %v78_v12  ;;  %v140_v15 = vrot.slane %v133_v13, %v60_v21 }
  0x1b   :  { %v142_v16 = vadd.f32 %v140_v15, %v84_v14 }
  0x1d   :  { %143 = vst.msk [vmem:[%s215_s2] sm:$0xf] %vm180_vm0, %v142_v16 }

// kernel: quantized_resnet18_forward.113
= control target key start
LH: loop header
LB: loop body
LE: loop exit
PB: predicated region body
PF: predicated region fallthrough
CT: control target
= control target key end

     0   :  { %v20_v0 = vlaneseq  ;;  %s132_s1 = inlined_call_operand.vmem [shape: f32[1,512], index: 1, kind: input, shape index: {}]   ;;  %s133_s2 = inlined_call_operand.vmem [shape: f32[1,512], index: 2, kind: input, shape index: {}]   ;;  %s134_s0 = inlined_call_operand.vmem [shape: f32[8,512], index: 0, kind: input, shape index: {}]   ;;  %s135_s3 = inlined_call_operand.vmem [shape: f32[8,512], index: 3, kind: output, shape index: {}]  }
   0x1   :  { %v18_v2 = vld [vmem:[%s132_s1] sm:$0xf]  ;;  %v15_v9 = vld [vmem:[%s134_s0 + $0x8] sm:$0xff]  ;;  %v16_v14 = vld [vmem:[%s134_s0 + $0x10] sm:$0xff] }
   0x2   :  { %v21_v1 = vshrl.u32 %v20_v0, 7  ;;  %v44_v3 = vld [vmem:[%s133_s2] sm:$0xf]  ;;  %v17_v15 = vld [vmem:[%s134_s0 + $0x18] sm:$0xff] }
   0x3   :  { %v14_v8 = vld [vmem:[%s134_s0] sm:$0xff] }
   0x4   :  { %v22_v4 = vsub.s32 0, %v21_v1  ;;  %v26_v5 = vsub.s32 1, %v21_v1  ;;  %v30_v6 = vsub.s32 2, %v21_v1  ;;  %v34_v7 = vsub.s32 3, %v21_v1 }
   0x6   :  { %v23_v10 = vrot.slane %v18_v2, %v22_v4  ;;  %v49_v11 = vrot.slane %v44_v3, %v22_v4  ;;  %v27_v12 = vrot.slane %v18_v2, %v26_v5  ;;  %v53_v13 = vrot.slane %v44_v3, %v26_v5 }
   0x7   :  { %v31_v16 = vrot.slane %v18_v2, %v30_v6  ;;  %v57_v17 = vrot.slane %v44_v3, %v30_v6  ;;  %v35_v18 = vrot.slane %v18_v2, %v34_v7  ;;  %v61_v19 = vrot.slane %v44_v3, %v34_v7 }
   0x8   :  { %v40_v20 = vmul.f32 %v23_v10, %v14_v8  ;;  %v41_v21 = vmul.f32 %v27_v12, %v15_v9 }
   0x9   :  { %v42_v22 = vmul.f32 %v31_v16, %v16_v14  ;;  %v43_v23 = vmul.f32 %v35_v18, %v17_v15 }
   0xa   :  { %v66_v24 = vadd.f32 %v49_v11, %v40_v20  ;;  %v67_v25 = vadd.f32 %v53_v13, %v41_v21 }
   0xb   :  { %v68_v26 = vadd.f32 %v57_v17, %v42_v22  ;;  %v69_v27 = vadd.f32 %v61_v19, %v43_v23 }
   0xc   :  { %v70_v28 = vmax.f32 %v66_v24, 0.0  ;;  %v71_v29 = vmax.f32 %v67_v25, 0.0 }
   0xd   :  { %v72_v30 = vmax.f32 %v68_v26, 0.0  ;;  %v73_v31 = vmax.f32 %v69_v27, 0.0 }
   0xe   :  { %74 = vst [vmem:[%s135_s3] sm:$0xff] %v70_v28  ;;  %75 = vst [vmem:[%s135_s3 + $0x8] sm:$0xff] %v71_v29 }
   0xf   :  { %76 = vst [vmem:[%s135_s3 + $0x10] sm:$0xff] %v72_v30  ;;  %77 = vst [vmem:[%s135_s3 + $0x18] sm:$0xff] %v73_v31 }

// kernel: quantized_resnet18_forward.110
= control target key start
LH: loop header
LB: loop body
LE: loop exit
PB: predicated region body
PF: predicated region fallthrough
CT: control target
= control target key end

     0   :  { %v20_v0 = vlaneseq  ;;  %s128_s1 = inlined_call_operand.vmem [shape: f32[1,512], index: 1, kind: input, shape index: {}]   ;;  %s129_s2 = inlined_call_operand.vmem [shape: f32[1,512], index: 2, kind: input, shape index: {}]   ;;  %s130_s0 = inlined_call_operand.vmem [shape: f32[8,512], index: 0, kind: input, shape index: {}]   ;;  %s131_s3 = inlined_call_operand.vmem [shape: f32[8,512], index: 3, kind: output, shape index: {}]  }
   0x1   :  { %v18_v2 = vld [vmem:[%s128_s1] sm:$0xf]  ;;  %v15_v9 = vld [vmem:[%s130_s0 + $0x8] sm:$0xff]  ;;  %v16_v14 = vld [vmem:[%s130_s0 + $0x10] sm:$0xff] }
   0x2   :  { %v21_v1 = vshrl.u32 %v20_v0, 7  ;;  %v44_v3 = vld [vmem:[%s129_s2] sm:$0xf]  ;;  %v17_v15 = vld [vmem:[%s130_s0 + $0x18] sm:$0xff] }
   0x3   :  { %v14_v8 = vld [vmem:[%s130_s0] sm:$0xff] }
   0x4   :  { %v22_v4 = vsub.s32 0, %v21_v1  ;;  %v26_v5 = vsub.s32 1, %v21_v1  ;;  %v30_v6 = vsub.s32 2, %v21_v1  ;;  %v34_v7 = vsub.s32 3, %v21_v1 }
   0x6   :  { %v23_v10 = vrot.slane %v18_v2, %v22_v4  ;;  %v49_v11 = vrot.slane %v44_v3, %v22_v4  ;;  %v27_v12 = vrot.slane %v18_v2, %v26_v5  ;;  %v53_v13 = vrot.slane %v44_v3, %v26_v5 }
   0x7   :  { %v31_v16 = vrot.slane %v18_v2, %v30_v6  ;;  %v57_v17 = vrot.slane %v44_v3, %v30_v6  ;;  %v35_v18 = vrot.slane %v18_v2, %v34_v7  ;;  %v61_v19 = vrot.slane %v44_v3, %v34_v7 }
   0x8   :  { %v40_v20 = vmul.f32 %v23_v10, %v14_v8  ;;  %v41_v21 = vmul.f32 %v27_v12, %v15_v9 }
   0x9   :  { %v42_v22 = vmul.f32 %v31_v16, %v16_v14  ;;  %v43_v23 = vmul.f32 %v35_v18, %v17_v15 }
   0xa   :  { %v66_v24 = vadd.f32 %v49_v11, %v40_v20  ;;  %v67_v25 = vadd.f32 %v53_v13, %v41_v21 }
   0xb   :  { %v68_v26 = vadd.f32 %v57_v17, %v42_v22  ;;  %v69_v27 = vadd.f32 %v61_v19, %v43_v23 }
   0xc   :  { %70 = vst [vmem:[%s131_s3] sm:$0xff] %v66_v24  ;;  %71 = vst [vmem:[%s131_s3 + $0x8] sm:$0xff] %v67_v25 }
   0xd   :  { %72 = vst [vmem:[%s131_s3 + $0x10] sm:$0xff] %v68_v26  ;;  %73 = vst [vmem:[%s131_s3 + $0x18] sm:$0xff] %v69_v27 }

// kernel: quantized_resnet18_forward.116
= control target key start
LH: loop header
LB: loop body
LE: loop exit
PB: predicated region body
PF: predicated region fallthrough
CT: control target
= control target key end

     0   :  { %v23_v0 = vlaneseq  ;;  %s160_s1 = inlined_call_operand.vmem [shape: f32[1,512], index: 1, kind: input, shape index: {}]   ;;  %s161_s2 = inlined_call_operand.vmem [shape: f32[1,512], index: 2, kind: input, shape index: {}]   ;;  %s162_s0 = inlined_call_operand.vmem [shape: f32[8,512], index: 0, kind: input, shape index: {}]   ;;  %s163_s3 = inlined_call_operand.vmem [shape: f32[8,512], index: 3, kind: input, shape index: {}]   ;;  %s164_s4 = inlined_call_operand.vmem [shape: f32[8,512], index: 4, kind: output, shape index: {}]  }
   0x1   :  { %v21_v2 = vld [vmem:[%s160_s1] sm:$0xf]  ;;  %v18_v9 = vld [vmem:[%s162_s0 + $0x8] sm:$0xff]  ;;  %v19_v14 = vld [vmem:[%s162_s0 + $0x10] sm:$0xff] }
   0x2   :  { %v24_v1 = vshrl.u32 %v23_v0, 7  ;;  %v47_v3 = vld [vmem:[%s161_s2] sm:$0xf]  ;;  %v20_v15 = vld [vmem:[%s162_s0 + $0x18] sm:$0xff]  ;;  %v74_v23 = vld [vmem:[%s163_s3 + $0x8] sm:$0xff] }
   0x3   :  { %v17_v8 = vld [vmem:[%s162_s0] sm:$0xff]  ;;  %v75_v28 = vld [vmem:[%s163_s3 + $0x10] sm:$0xff]  ;;  %v76_v29 = vld [vmem:[%s163_s3 + $0x18] sm:$0xff] }
   0x4   :  { %v25_v4 = vsub.s32 0, %v24_v1  ;;  %v29_v5 = vsub.s32 1, %v24_v1  ;;  %v33_v6 = vsub.s32 2, %v24_v1  ;;  %v37_v7 = vsub.s32 3, %v24_v1  ;;  %v73_v22 = vld [vmem:[%s163_s3] sm:$0xff] }
   0x6   :  { %v26_v10 = vrot.slane %v21_v2, %v25_v4  ;;  %v52_v11 = vrot.slane %v47_v3, %v25_v4  ;;  %v30_v12 = vrot.slane %v21_v2, %v29_v5  ;;  %v56_v13 = vrot.slane %v47_v3, %v29_v5 }
   0x7   :  { %v34_v16 = vrot.slane %v21_v2, %v33_v6  ;;  %v60_v17 = vrot.slane %v47_v3, %v33_v6  ;;  %v38_v18 = vrot.slane %v21_v2, %v37_v7  ;;  %v64_v19 = vrot.slane %v47_v3, %v37_v7 }
   0x8   :  { %v43_v20 = vmul.f32 %v26_v10, %v17_v8  ;;  %v44_v21 = vmul.f32 %v30_v12, %v18_v9 }
   0x9   :  { %v45_v24 = vmul.f32 %v34_v16, %v19_v14  ;;  %v46_v25 = vmul.f32 %v38_v18, %v20_v15 }
   0xa   :  { %v69_v26 = vadd.f32 %v52_v11, %v43_v20  ;;  %v70_v27 = vadd.f32 %v56_v13, %v44_v21 }
   0xb   :  { %v71_v30 = vadd.f32 %v60_v17, %v45_v24  ;;  %v72_v31 = vadd.f32 %v64_v19, %v46_v25 }
   0xc   :  { %v77_v32 = vadd.f32 %v73_v22, %v69_v26  ;;  %v78_v33 = vadd.f32 %v74_v23, %v70_v27 }
   0xd   :  { %v79_v34 = vadd.f32 %v75_v28, %v71_v30  ;;  %v80_v35 = vadd.f32 %v76_v29, %v72_v31 }
   0xe   :  { %v81_v36 = vmax.f32 %v77_v32, 0.0  ;;  %v82_v37 = vmax.f32 %v78_v33, 0.0 }
   0xf   :  { %v83_v38 = vmax.f32 %v79_v34, 0.0  ;;  %v84_v39 = vmax.f32 %v80_v35, 0.0 }
  0x10   :  { %85 = vst [vmem:[%s164_s4] sm:$0xff] %v81_v36  ;;  %86 = vst [vmem:[%s164_s4 + $0x8] sm:$0xff] %v82_v37 }
  0x11   :  { %87 = vst [vmem:[%s164_s4 + $0x10] sm:$0xff] %v83_v38  ;;  %88 = vst [vmem:[%s164_s4 + $0x18] sm:$0xff] %v84_v39 }

// kernel: quantized_resnet18_forward.114
= control target key start
LH: loop header
LB: loop body
LE: loop exit
PB: predicated region body
PF: predicated region fallthrough
CT: control target
= control target key end

     0   :  { %s1932_s0 = inlined_call_operand.vmem [shape: bf16[16,4608], index: 0, kind: input, shape index: {}]   ;;  %s1933_s1 = inlined_call_operand.vmem [shape: bf16[4608,512], index: 1, kind: input, shape index: {}]   ;;  %s1934_s2 = inlined_call_operand.vmem [shape: f32[16,512], index: 2, kind: output, shape index: {}]  }
   0x1   :  { %1935 = sst [smem:[#allocation6_spill]] %s1932_s0 }
   0x2   :  { %s1558_s9 = smov 0   ;;  %s1560_s10 = smov 0  }
   0x3   :  { %s1562_s11 = smov 0   ;;  %s1564_s12 = smov 0  }
   0x4   :  { %s1566_s13 = smov 0   ;;  %s1568_s14 = smov 0  }
   0x5   :  { %s1570_s15 = smov 0   ;;  %s1572_s16 = smov 0  }
   0x6   :  { %s1574_s17 = smov 0   ;;  %s1576_s18 = smov 0  }
   0x7   :  { %s1578_s19 = smov 0  }
   0x8 LB: > { %s1169_s20 = sadd.s32 4294967295, %s1540_s19   ;;  %s24_s21 = sadd.s32 1, %s1532_s17  ;;  %s1540_s19 = sphi %s1578_s19, %s12_s19   ;;  %s1536_s18 = sphi %s1576_s18, %s1949_s18   ;;  %s1532_s17 = sphi %s1574_s17, %s1948_s17   ;;  %s1528_s16 = sphi %s1572_s16, %s1947_s16   ;;  %s1524_s15 = sphi %s1570_s15, %s1946_s15   ;;  %s1520_s14 = sphi %s1568_s14, %s1945_s14   ;;  %s1516_s13 = sphi %s1566_s13, %s1944_s13   ;;  %s1512_s12 = sphi %s1564_s12, %s1943_s12   ;;  %s1508_s11 = sphi %s1562_s11, %s1942_s11   ;;  %s1504_s10 = sphi %s1560_s10, %s1941_s10   ;;  %s1500_s9 = sphi %s1558_s9, %s1940_s9  }
   0x9   : > { %p25_p0 = scmp.ge.s32.totalorder %s24_s21, 9  ;;  %s27_s22 = sadd.s32 1, %s1536_s18 }
   0xa   : > { %s40_s23 = sadd.s32 1, %s1520_s14  ;;  %p47_p1 = scmp.ne.s32.totalorder %s1520_s14, %s1516_s13 }
   0xb   : > { %s1951_s21 = smov (%p25_p0, %s24_s21), 0  ;;  %s1953_s22 = smov (!%p25_p0, %s27_s22), %s1536_s18 }
   0xc   : > { %s36_s24 = ssub.s32 %s1532_s17, %s1951_s21  ;;  %p48_p2 = scmp.eq.s32.totalorder %s1540_s19, 0 }
   0xd   : > { %p29_p3 = scmp.ge.s32.totalorder %s1953_s22, 2  ;;  %p38_p4 = scmp.eq.s32.totalorder %s36_s24, 0 }
   0xe   : > { %p1625_p5 = por %p48_p2, %p47_p1  ;;  %s68_s26 = sadd.s32 1, %s1512_s12 }
   0xf   : > { %s1955_s22 = smov (%p29_p3, %s1953_s22), 0  ;;  %p75_p6 = scmp.ne.s32.totalorder %s1512_s12, %s1508_s11 }
  0x10   : > { %s1633_s27 = scalar_select %p38_p4, %s1520_s14, %s40_s23  }
  0x11   : > { %s64_s28 = ssub.s32 %s1536_s18, %s1955_s22  ;;  %p1639_p9 = por %p75_p6, %p48_p2 }
  0x12   : > { %s65_s29 = sor.u32 %s64_s28, %s36_s24  ;;  %p94_p7 = scmp.eq.s32.totalorder %s64_s28, 0 }
  0x13   : > { %p66_p8 = scmp.eq.s32.totalorder %s65_s29, 0  ;;  %s96_s3 = sadd.s32 1, %s1504_s10 }
  0x14   : > { %p106_p10 = scmp.ne.s32.totalorder %s1504_s10, %s1500_s9  ;;  %p107_p11 = scmp.eq.s32.totalorder %s1169_s20, 17 }
  0x15   : > { %s1647_s4 = scalar_select %p66_p8, %s1512_s12, %s68_s26  }
  0x16   : > { %s1650_s5 = scalar_select %p94_p7, %s1504_s10, %s96_s3  }
  0x17   : > { %p1652_p12 = por %p107_p11, %p106_p10  ;;  %p1172_p13 = scmp.ge.s32.totalorder %s1540_s19, 18 }
  0x19   : > { %129 = sbr.rel (%p1172_p13) target bundleno = 81 (0x51), region = 16 }
  0x1e   : > { %132 = sbr.rel (!%p1625_p5) target bundleno = 42 (0x2a), region = 20  ;;  %s134_s7 = sand.u32 (%p1625_p5), 1, %s1520_s14  }
  0x1f   : > { %s1260_s8 = sshll.u32 (%p1625_p5), %s1532_s17, 4  ;;  %s1173_s23 = sshll.u32 (%p1625_p5), %s134_s7, 5 }
  0x20   : > { %s1939_s0 = sld [smem:[#allocation6_spill]] (%p1625_p5)  ;;  %s136_s20 = scalar_lea.vmem (%p1625_p5), [#allocation3], %s1173_s23 }
  0x26   : > { %s142_s28 = scalar_lea.vmem %s1939_s0, %s1260_s8 }
  0x27   : > { %v155_v0 = vld [vmem:[%s142_s28] sm:$0xff]  ;;  %v157_v1 = vld [vmem:[%s142_s28 + $0x8] sm:$0xff]  ;;  %v159_v2 = vld [vmem:[%s142_s28 + $0x90] sm:$0xff] }
  0x28   : > { %156 = vst [vmem:[%s136_s20] sm:$0xff] %v155_v0  ;;  %158 = vst [vmem:[%s136_s20 + $0x8] sm:$0xff] %v157_v1  ;;  %v161_v3 = vld [vmem:[%s142_s28 + $0x98] sm:$0xff] }
  0x29   : > { %160 = vst [vmem:[%s136_s20 + $0x10] sm:$0xff] %v159_v2  ;;  %162 = vst [vmem:[%s136_s20 + $0x18] sm:$0xff] %v161_v3 }
  0x2a PF: > { %168 = sbr.rel (!%p1639_p9) target bundleno = 81 (0x51), region = 43  ;;  %s170_s25 = sand.u32 (%p1639_p9), 1, %s1512_s12  }
  0x2b   : > { %s1178_s29 = sshll.u32 (%p1639_p9), %s1536_s18, 1  ;;  %s1176_s3 = sshll.u32 (%p1639_p9), %s170_s25, 9 }
  0x2c   : > { %s1261_s7 = sshll.u32 (%p1639_p9), %s1532_s17, 8  ;;  %s1677_s30 = scalar_lea.vmem (%p1639_p9), [#allocation4], %s1176_s3 }
  0x2d   : > { %s176_s8 = sadd.s32 (%p1639_p9), %s1261_s7, %s1178_s29 }
  0x2e   : > { %s1180_s24 = sshll.u32 (%p1639_p9), %s176_s8, 2 }
  0x2f   : > { %s1672_s0 = scalar_lea.vmem %s1933_s1, %s1180_s24 }
  0x30   : > { %v333_v4 = vld [vmem:[%s1672_s0] sm:$0xff]  ;;  %v335_v5 = vld [vmem:[%s1672_s0 + $0x10] sm:$0xff] }
  0x31   : > { %v337_v6 = vld [vmem:[%s1672_s0 + $0x20] sm:$0xff]  ;;  %334 = vst [vmem:[%s1677_s30] sm:$0xff] %v333_v4  ;;  %336 = vst [vmem:[%s1677_s30 + $0x8] sm:$0xff] %v335_v5  ;;  %v339_v7 = vld [vmem:[%s1672_s0 + $0x30] sm:$0xff] }
  0x32   : > { %338 = vst [vmem:[%s1677_s30 + $0x10] sm:$0xff] %v337_v6  ;;  %v341_v8 = vld [vmem:[%s1672_s0 + $0x40] sm:$0xff]  ;;  %v343_v9 = vld [vmem:[%s1672_s0 + $0x50] sm:$0xff]  ;;  %340 = vst [vmem:[%s1677_s30 + $0x18] sm:$0xff] %v339_v7 }
  0x33   : > { %342 = vst [vmem:[%s1677_s30 + $0x20] sm:$0xff] %v341_v8  ;;  %344 = vst [vmem:[%s1677_s30 + $0x28] sm:$0xff] %v343_v9  ;;  %v345_v10 = vld [vmem:[%s1672_s0 + $0x60] sm:$0xff]  ;;  %v347_v11 = vld [vmem:[%s1672_s0 + $0x70] sm:$0xff] }
  0x34   : > { %v349_v12 = vld [vmem:[%s1672_s0 + $0x80] sm:$0xff]  ;;  %346 = vst [vmem:[%s1677_s30 + $0x30] sm:$0xff] %v345_v10  ;;  %348 = vst [vmem:[%s1677_s30 + $0x38] sm:$0xff] %v347_v11  ;;  %v351_v13 = vld [vmem:[%s1672_s0 + $0x90] sm:$0xff] }
  0x35   : > { %350 = vst [vmem:[%s1677_s30 + $0x40] sm:$0xff] %v349_v12  ;;  %v353_v14 = vld [vmem:[%s1672_s0 + $0xa0] sm:$0xff]  ;;  %v355_v15 = vld [vmem:[%s1672_s0 + $0xb0] sm:$0xff]  ;;  %352 = vst [vmem:[%s1677_s30 + $0x48] sm:$0xff] %v351_v13 }
  0x36   : > { %354 = vst [vmem:[%s1677_s30 + $0x50] sm:$0xff] %v353_v14  ;;  %356 = vst [vmem:[%s1677_s30 + $0x58] sm:$0xff] %v355_v15  ;;  %v357_v16 = vld [vmem:[%s1672_s0 + $0xc0] sm:$0xff]  ;;  %v359_v17 = vld [vmem:[%s1672_s0 + $0xd0] sm:$0xff] }
  0x37   : > { %v361_v18 = vld [vmem:[%s1672_s0 + $0xe0] sm:$0xff]  ;;  %358 = vst [vmem:[%s1677_s30 + $0x60] sm:$0xff] %v357_v16  ;;  %360 = vst [vmem:[%s1677_s30 + $0x68] sm:$0xff] %v359_v17  ;;  %v363_v19 = vld [vmem:[%s1672_s0 + $0xf0] sm:$0xff] }
  0x38   : > { %362 = vst [vmem:[%s1677_s30 + $0x70] sm:$0xff] %v361_v18  ;;  %v365_v20 = vld [vmem:[%s1672_s0 + $0x100] sm:$0xff]  ;;  %v367_v21 = vld [vmem:[%s1672_s0 + $0x110] sm:$0xff]  ;;  %364 = vst [vmem:[%s1677_s30 + $0x78] sm:$0xff] %v363_v19 }
  0x39   : > { %366 = vst [vmem:[%s1677_s30 + $0x80] sm:$0xff] %v365_v20  ;;  %368 = vst [vmem:[%s1677_s30 + $0x88] sm:$0xff] %v367_v21  ;;  %v369_v22 = vld [vmem:[%s1672_s0 + $0x120] sm:$0xff]  ;;  %v371_v23 = vld [vmem:[%s1672_s0 + $0x130] sm:$0xff] }
  0x3a   : > { %v373_v24 = vld [vmem:[%s1672_s0 + $0x140] sm:$0xff]  ;;  %370 = vst [vmem:[%s1677_s30 + $0x90] sm:$0xff] %v369_v22  ;;  %372 = vst [vmem:[%s1677_s30 + $0x98] sm:$0xff] %v371_v23  ;;  %v375_v25 = vld [vmem:[%s1672_s0 + $0x150] sm:$0xff] }
  0x3b   : > { %374 = vst [vmem:[%s1677_s30 + $0xa0] sm:$0xff] %v373_v24  ;;  %v377_v26 = vld [vmem:[%s1672_s0 + $0x160] sm:$0xff]  ;;  %v379_v27 = vld [vmem:[%s1672_s0 + $0x170] sm:$0xff]  ;;  %376 = vst [vmem:[%s1677_s30 + $0xa8] sm:$0xff] %v375_v25 }
  0x3c   : > { %378 = vst [vmem:[%s1677_s30 + $0xb0] sm:$0xff] %v377_v26  ;;  %380 = vst [vmem:[%s1677_s30 + $0xb8] sm:$0xff] %v379_v27  ;;  %v381_v28 = vld [vmem:[%s1672_s0 + $0x180] sm:$0xff]  ;;  %v383_v29 = vld [vmem:[%s1672_s0 + $0x190] sm:$0xff] }
  0x3d   : > { %v385_v30 = vld [vmem:[%s1672_s0 + $0x1a0] sm:$0xff]  ;;  %382 = vst [vmem:[%s1677_s30 + $0xc0] sm:$0xff] %v381_v28  ;;  %384 = vst [vmem:[%s1677_s30 + $0xc8] sm:$0xff] %v383_v29  ;;  %v387_v31 = vld [vmem:[%s1672_s0 + $0x1b0] sm:$0xff] }
  0x3e   : > { %386 = vst [vmem:[%s1677_s30 + $0xd0] sm:$0xff] %v385_v30  ;;  %v389_v32 = vld [vmem:[%s1672_s0 + $0x1c0] sm:$0xff]  ;;  %v391_v33 = vld [vmem:[%s1672_s0 + $0x1d0] sm:$0xff]  ;;  %388 = vst [vmem:[%s1677_s30 + $0xd8] sm:$0xff] %v387_v31 }
  0x3f   : > { %390 = vst [vmem:[%s1677_s30 + $0xe0] sm:$0xff] %v389_v32  ;;  %392 = vst [vmem:[%s1677_s30 + $0xe8] sm:$0xff] %v391_v33  ;;  %v393_v34 = vld [vmem:[%s1672_s0 + $0x1e0] sm:$0xff]  ;;  %v395_v35 = vld [vmem:[%s1672_s0 + $0x1f0] sm:$0xff] }
  0x40   : > { %v397_v36 = vld [vmem:[%s1672_s0 + $0x200] sm:$0xff]  ;;  %394 = vst [vmem:[%s1677_s30 + $0xf0] sm:$0xff] %v393_v34  ;;  %396 = vst [vmem:[%s1677_s30 + $0xf8] sm:$0xff] %v395_v35  ;;  %v399_v37 = vld [vmem:[%s1672_s0 + $0x210] sm:$0xff] }
  0x41   : > { %398 = vst [vmem:[%s1677_s30 + $0x100] sm:$0xff] %v397_v36  ;;  %v401_v38 = vld [vmem:[%s1672_s0 + $0x220] sm:$0xff]  ;;  %v403_v39 = vld [vmem:[%s1672_s0 + $0x230] sm:$0xff]  ;;  %400 = vst [vmem:[%s1677_s30 + $0x108] sm:$0xff] %v399_v37 }
  0x42   : > { %402 = vst [vmem:[%s1677_s30 + $0x110] sm:$0xff] %v401_v38  ;;  %404 = vst [vmem:[%s1677_s30 + $0x118] sm:$0xff] %v403_v39  ;;  %v405_v40 = vld [vmem:[%s1672_s0 + $0x240] sm:$0xff]  ;;  %v407_v41 = vld [vmem:[%s1672_s0 + $0x250] sm:$0xff] }
  0x43   : > { %v409_v42 = vld [vmem:[%s1672_s0 + $0x260] sm:$0xff]  ;;  %406 = vst [vmem:[%s1677_s30 + $0x120] sm:$0xff] %v405_v40  ;;  %408 = vst [vmem:[%s1677_s30 + $0x128] sm:$0xff] %v407_v41  ;;  %v411_v43 = vld [vmem:[%s1672_s0 + $0x270] sm:$0xff] }
  0x44   : > { %410 = vst [vmem:[%s1677_s30 + $0x130] sm:$0xff] %v409_v42  ;;  %v413_v44 = vld [vmem:[%s1672_s0 + $0x280] sm:$0xff]  ;;  %v415_v45 = vld [vmem:[%s1672_s0 + $0x290] sm:$0xff]  ;;  %412 = vst [vmem:[%s1677_s30 + $0x138] sm:$0xff] %v411_v43 }
  0x45   : > { %414 = vst [vmem:[%s1677_s30 + $0x140] sm:$0xff] %v413_v44  ;;  %416 = vst [vmem:[%s1677_s30 + $0x148] sm:$0xff] %v415_v45  ;;  %v417_v46 = vld [vmem:[%s1672_s0 + $0x2a0] sm:$0xff]  ;;  %v419_v47 = vld [vmem:[%s1672_s0 + $0x2b0] sm:$0xff] }
  0x46   : > { %v421_v48 = vld [vmem:[%s1672_s0 + $0x2c0] sm:$0xff]  ;;  %418 = vst [vmem:[%s1677_s30 + $0x150] sm:$0xff] %v417_v46  ;;  %420 = vst [vmem:[%s1677_s30 + $0x158] sm:$0xff] %v419_v47  ;;  %v423_v49 = vld [vmem:[%s1672_s0 + $0x2d0] sm:$0xff] }
  0x47   : > { %422 = vst [vmem:[%s1677_s30 + $0x160] sm:$0xff] %v421_v48  ;;  %v425_v50 = vld [vmem:[%s1672_s0 + $0x2e0] sm:$0xff]  ;;  %v427_v51 = vld [vmem:[%s1672_s0 + $0x2f0] sm:$0xff]  ;;  %424 = vst [vmem:[%s1677_s30 + $0x168] sm:$0xff] %v423_v49 }
  0x48   : > { %426 = vst [vmem:[%s1677_s30 + $0x170] sm:$0xff] %v425_v50  ;;  %428 = vst [vmem:[%s1677_s30 + $0x178] sm:$0xff] %v427_v51  ;;  %v429_v52 = vld [vmem:[%s1672_s0 + $0x300] sm:$0xff]  ;;  %v431_v53 = vld [vmem:[%s1672_s0 + $0x310] sm:$0xff] }
  0x49   : > { %v433_v54 = vld [vmem:[%s1672_s0 + $0x320] sm:$0xff]  ;;  %430 = vst [vmem:[%s1677_s30 + $0x180] sm:$0xff] %v429_v52  ;;  %432 = vst [vmem:[%s1677_s30 + $0x188] sm:$0xff] %v431_v53  ;;  %v435_v55 = vld [vmem:[%s1672_s0 + $0x330] sm:$0xff] }
  0x4a   : > { %434 = vst [vmem:[%s1677_s30 + $0x190] sm:$0xff] %v433_v54  ;;  %v437_v56 = vld [vmem:[%s1672_s0 + $0x340] sm:$0xff]  ;;  %v439_v57 = vld [vmem:[%s1672_s0 + $0x350] sm:$0xff]  ;;  %436 = vst [vmem:[%s1677_s30 + $0x198] sm:$0xff] %v435_v55 }
  0x4b   : > { %438 = vst [vmem:[%s1677_s30 + $0x1a0] sm:$0xff] %v437_v56  ;;  %440 = vst [vmem:[%s1677_s30 + $0x1a8] sm:$0xff] %v439_v57  ;;  %v441_v58 = vld [vmem:[%s1672_s0 + $0x360] sm:$0xff]  ;;  %v443_v59 = vld [vmem:[%s1672_s0 + $0x370] sm:$0xff] }
  0x4c   : > { %v445_v60 = vld [vmem:[%s1672_s0 + $0x380] sm:$0xff]  ;;  %442 = vst [vmem:[%s1677_s30 + $0x1b0] sm:$0xff] %v441_v58  ;;  %444 = vst [vmem:[%s1677_s30 + $0x1b8] sm:$0xff] %v443_v59  ;;  %v447_v61 = vld [vmem:[%s1672_s0 + $0x390] sm:$0xff] }
  0x4d   : > { %446 = vst [vmem:[%s1677_s30 + $0x1c0] sm:$0xff] %v445_v60  ;;  %v449_v62 = vld [vmem:[%s1672_s0 + $0x3a0] sm:$0xff]  ;;  %v451_v63 = vld [vmem:[%s1672_s0 + $0x3b0] sm:$0xff]  ;;  %448 = vst [vmem:[%s1677_s30 + $0x1c8] sm:$0xff] %v447_v61 }
  0x4e   : > { %450 = vst [vmem:[%s1677_s30 + $0x1d0] sm:$0xff] %v449_v62  ;;  %452 = vst [vmem:[%s1677_s30 + $0x1d8] sm:$0xff] %v451_v63  ;;  %v453_v0 = vld [vmem:[%s1672_s0 + $0x3c0] sm:$0xff]  ;;  %v455_v1 = vld [vmem:[%s1672_s0 + $0x3d0] sm:$0xff] }
  0x4f   : > { %v457_v2 = vld [vmem:[%s1672_s0 + $0x3e0] sm:$0xff]  ;;  %454 = vst [vmem:[%s1677_s30 + $0x1e0] sm:$0xff] %v453_v0  ;;  %456 = vst [vmem:[%s1677_s30 + $0x1e8] sm:$0xff] %v455_v1  ;;  %v459_v3 = vld [vmem:[%s1672_s0 + $0x3f0] sm:$0xff] }
  0x50   : > { %458 = vst [vmem:[%s1677_s30 + $0x1f0] sm:$0xff] %v457_v2  ;;  %460 = vst [vmem:[%s1677_s30 + $0x1f8] sm:$0xff] %v459_v3 }
  0x51 PF: > { %p1181_p0 = scmp.ge.s32.totalorder %s1540_s19, 1  ;;  %p465_p1 = scmp.lt.s32.totalorder %s1540_s19, 19 }
  0x53   : > { %p466_p2 = pnand %p1181_p0, %p465_p1 }
  0x54   : > { %s472_s28 = sand.u32 (!%p466_p2), 1, %s1516_s13   ;;  %s479_s20 = sand.u32 (!%p466_p2), 1, %s1508_s11  }
  0x55   : > { %469 = sbr.rel (%p466_p2) target bundleno = 385 (0x181), region = 81  ;;  %s1182_s25 = sshll.u32 (!%p466_p2), %s472_s28, 5 }
  0x56   : > { %s1183_s29 = sshll.u32 (!%p466_p2), %s479_s20, 9  ;;  %s500_s3 = sand.u32 (!%p466_p2), 1, %s1500_s9  }
  0x57   : > { %s1184_s7 = sshll.u32 (!%p466_p2), %s500_s3, 5  ;;  %s1809_s8 = scalar_lea.vmem (!%p466_p2), [#allocation3], %s1182_s25 }
  0x58   : > { %s1811_s0 = scalar_lea.vmem (!%p466_p2), [#allocation4], %s1183_s29  ;;  %s1813_s24 = scalar_lea.vmem (!%p466_p2), [#allocation5], %s1184_s7 }
  0x59   : > { %p1185_p3 = scmp.ne.s32.totalorder (!%p466_p2), %s1524_s15, 0 }
  0x5b   : > { %512 = sbr.rel (%p1185_p3) target bundleno = 99 (0x63), region = 93 }
  0x60   : > { %v1542_v4 = vmov 0.0  }
  0x61   : > { %513 = vst [vmem:[#allocation2 + $0x10] sm:$0xff] %v1542_v4  ;;  %514 = vst [vmem:[#allocation2] sm:$0xff] %v1542_v4 }
  0x62   : > { %515 = vst [vmem:[#allocation2 + $0x18] sm:$0xff] %v1542_v4  ;;  %516 = vst [vmem:[#allocation2 + $0x8] sm:$0xff] %v1542_v4 }
  0x63 PF: > { %v1352_v5 = vld [vmem:[%s1811_s0 + $0x74] ss:$8 sps:$4 sm:$0xff]   ;;  %v1356_v7 = vld [vmem:[%s1811_s0 + $0x70] ss:$8 sps:$4 sm:$0xff]   ;;  %v1358_v9 = vld [vmem:[%s1811_s0 + $0x64] ss:$8 sps:$4 sm:$0xff]  }
  0x64   : > { %v1354_v6 = vld [vmem:[%s1811_s0 + $0x174] ss:$8 sps:$4 sm:$0xff]   ;;  %929 = vmatprep.subr.bf16.mxu0 %v1352_v5  ;;  %v1357_v8 = vld [vmem:[%s1811_s0 + $0x170] ss:$8 sps:$4 sm:$0xff]   ;;  %v1360_v10 = vld [vmem:[%s1811_s0 + $0x164] ss:$8 sps:$4 sm:$0xff]  }
  0x65   : > { %972 = vmatprep.subr.bf16.mxu1 %v1354_v6  ;;  %930 = vmatpush1.bf16.msra.mxu0 %v1356_v7  ;;  %v1362_v11 = vld [vmem:[%s1811_s0 + $0x60] ss:$8 sps:$4 sm:$0xff]   ;;  %v1364_v13 = vld [vmem:[%s1811_s0 + $0x54] ss:$8 sps:$4 sm:$0xff]   ;;  %v1368_v15 = vld [vmem:[%s1811_s0 + $0x50] ss:$8 sps:$4 sm:$0xff]  }
  0x66   : > { %973 = vmatpush1.bf16.msra.mxu1 %v1357_v8  ;;  %931 = vmatprep.subr.bf16.mxu0 %v1358_v9  ;;  %v1363_v12 = vld [vmem:[%s1811_s0 + $0x160] ss:$8 sps:$4 sm:$0xff]   ;;  %v1366_v14 = vld [vmem:[%s1811_s0 + $0x154] ss:$8 sps:$4 sm:$0xff]   ;;  %v1369_v16 = vld [vmem:[%s1811_s0 + $0x150] ss:$8 sps:$4 sm:$0xff]  }
  0x67   : > { %974 = vmatprep.subr.bf16.mxu1 %v1360_v10  ;;  %v1370_v17 = vld [vmem:[%s1811_s0 + $0x44] ss:$8 sps:$4 sm:$0xff]   ;;  %v1374_v19 = vld [vmem:[%s1811_s0 + $0x40] ss:$8 sps:$4 sm:$0xff]   ;;  %v1376_v21 = vld [vmem:[%s1811_s0 + $0x34] ss:$8 sps:$4 sm:$0xff]  }
  0x68   : > { %v1372_v18 = vld [vmem:[%s1811_s0 + $0x144] ss:$8 sps:$4 sm:$0xff]   ;;  %v1375_v20 = vld [vmem:[%s1811_s0 + $0x140] ss:$8 sps:$4 sm:$0xff]   ;;  %v1378_v22 = vld [vmem:[%s1811_s0 + $0x134] ss:$8 sps:$4 sm:$0xff]  }
  0x69   : > { %932 = vmatpush1.bf16.msra.mxu0 %v1362_v11  ;;  %v1380_v23 = vld [vmem:[%s1811_s0 + $0x30] ss:$8 sps:$4 sm:$0xff]   ;;  %v1382_v25 = vld [vmem:[%s1811_s0 + $0x24] ss:$8 sps:$4 sm:$0xff]   ;;  %v1386_v27 = vld [vmem:[%s1811_s0 + $0x20] ss:$8 sps:$4 sm:$0xff]  }
  0x6a   : > { %975 = vmatpush1.bf16.msra.mxu1 %v1363_v12  ;;  %933 = vmatprep.subr.bf16.mxu0 %v1364_v13  ;;  %v1381_v24 = vld [vmem:[%s1811_s0 + $0x130] ss:$8 sps:$4 sm:$0xff]   ;;  %v1384_v26 = vld [vmem:[%s1811_s0 + $0x124] ss:$8 sps:$4 sm:$0xff]   ;;  %v1387_v28 = vld [vmem:[%s1811_s0 + $0x120] ss:$8 sps:$4 sm:$0xff]  }
  0x6b   : > { %976 = vmatprep.subr.bf16.mxu1 %v1366_v14  ;;  %v1388_v29 = vld [vmem:[%s1811_s0 + $0x14] ss:$8 sps:$4 sm:$0xff]   ;;  %v1392_v31 = vld [vmem:[%s1811_s0 + $0x10] ss:$8 sps:$4 sm:$0xff]   ;;  %v1394_v33 = vld [vmem:[%s1811_s0 + $0x4] ss:$8 sps:$4 sm:$0xff]  }
  0x6c   : > { %v1390_v30 = vld [vmem:[%s1811_s0 + $0x114] ss:$8 sps:$4 sm:$0xff]   ;;  %v1393_v32 = vld [vmem:[%s1811_s0 + $0x110] ss:$8 sps:$4 sm:$0xff]   ;;  %v1396_v34 = vld [vmem:[%s1811_s0 + $0x104] ss:$8 sps:$4 sm:$0xff]  }
  0x6d   : > { %934 = vmatpush1.bf16.msra.mxu0 %v1368_v15  ;;  %v1398_v35 = vld [vmem:[%s1811_s0] ss:$8 sps:$4 sm:$0xff]   ;;  %v1400_v37 = vld [vmem:[%s1811_s0 + $0xf4] ss:$8 sps:$4 sm:$0xff]   ;;  %v1404_v39 = vld [vmem:[%s1811_s0 + $0xf0] ss:$8 sps:$4 sm:$0xff]  }
  0x6e   : > { %977 = vmatpush1.bf16.msra.mxu1 %v1369_v16  ;;  %935 = vmatprep.subr.bf16.mxu0 %v1370_v17  ;;  %v1399_v36 = vld [vmem:[%s1811_s0 + $0x100] ss:$8 sps:$4 sm:$0xff]   ;;  %v1402_v38 = vld [vmem:[%s1811_s0 + $0x1f4] ss:$8 sps:$4 sm:$0xff]   ;;  %v1405_v40 = vld [vmem:[%s1811_s0 + $0x1f0] ss:$8 sps:$4 sm:$0xff]  }
  0x6f   : > { %978 = vmatprep.subr.bf16.mxu1 %v1372_v18  ;;  %v1406_v41 = vld [vmem:[%s1811_s0 + $0xe4] ss:$8 sps:$4 sm:$0xff]   ;;  %v1410_v43 = vld [vmem:[%s1811_s0 + $0xe0] ss:$8 sps:$4 sm:$0xff]   ;;  %v1412_v45 = vld [vmem:[%s1811_s0 + $0xd4] ss:$8 sps:$4 sm:$0xff]  }
  0x70   : > { %v1408_v42 = vld [vmem:[%s1811_s0 + $0x1e4] ss:$8 sps:$4 sm:$0xff]   ;;  %v1411_v44 = vld [vmem:[%s1811_s0 + $0x1e0] ss:$8 sps:$4 sm:$0xff]   ;;  %v1414_v46 = vld [vmem:[%s1811_s0 + $0x1d4] ss:$8 sps:$4 sm:$0xff]  }
  0x71   : > { %936 = vmatpush1.bf16.msra.mxu0 %v1374_v19  ;;  %v1416_v47 = vld [vmem:[%s1811_s0 + $0xd0] ss:$8 sps:$4 sm:$0xff]   ;;  %v1418_v49 = vld [vmem:[%s1811_s0 + $0xc4] ss:$8 sps:$4 sm:$0xff]   ;;  %v1422_v51 = vld [vmem:[%s1811_s0 + $0xc0] ss:$8 sps:$4 sm:$0xff]  }
  0x72   : > { %979 = vmatpush1.bf16.msra.mxu1 %v1375_v20  ;;  %937 = vmatprep.subr.bf16.mxu0 %v1376_v21  ;;  %v1417_v48 = vld [vmem:[%s1811_s0 + $0x1d0] ss:$8 sps:$4 sm:$0xff]   ;;  %v1420_v50 = vld [vmem:[%s1811_s0 + $0x1c4] ss:$8 sps:$4 sm:$0xff]   ;;  %v1423_v53 = vld [vmem:[%s1811_s0 + $0x1c0] ss:$8 sps:$4 sm:$0xff]  }
  0x73   : > { %980 = vmatprep.subr.bf16.mxu1 %v1378_v22  ;;  %v1450_v52 = vld [vmem:[%s1809_s8 + $0x4] ss:$16 sps:$4 sm:$0xff]   ;;  %v1453_v56 = vld [vmem:[%s1809_s8 + $0xc] ss:$16 sps:$4 sm:$0xff]   ;;  %v1428_v57 = vld [vmem:[%s1811_s0 + $0xb0] ss:$8 sps:$4 sm:$0xff]  }
  0x74   : > { %v1424_v54 = vld [vmem:[%s1811_s0 + $0xb4] ss:$8 sps:$4 sm:$0xff]   ;;  %961 = vmatprep.mubr.bf16.mxu0 %v1450_v52  ;;  %1004 = vmatprep.mubr.bf16.mxu1 %v1453_v56  ;;  %v1429_v58 = vld [vmem:[%s1811_s0 + $0x1b0] ss:$8 sps:$4 sm:$0xff]   ;;  %v1430_v59 = vld [vmem:[%s1811_s0 + $0xa4] ss:$8 sps:$4 sm:$0xff]  }
  0x75   : > { %938 = vmatpush1.bf16.msra.mxu0 %v1380_v23  ;;  %v1426_v55 = vld [vmem:[%s1811_s0 + $0x1b4] ss:$8 sps:$4 sm:$0xff]   ;;  %v1432_v60 = vld [vmem:[%s1811_s0 + $0x1a4] ss:$8 sps:$4 sm:$0xff]   ;;  %v1434_v61 = vld [vmem:[%s1811_s0 + $0xa0] ss:$8 sps:$4 sm:$0xff]  }
  0x76   : > { %981 = vmatpush1.bf16.msra.mxu1 %v1381_v24  ;;  %939 = vmatprep.subr.bf16.mxu0 %v1382_v25  ;;  %v1435_v62 = vld [vmem:[%s1811_s0 + $0x1a0] ss:$8 sps:$4 sm:$0xff]   ;;  %v1436_v63 = vld [vmem:[%s1811_s0 + $0x94] ss:$8 sps:$4 sm:$0xff]   ;;  %v1440_v1 = vld [vmem:[%s1811_s0 + $0x90] ss:$8 sps:$4 sm:$0xff]  }
  0x77   : > { %982 = vmatprep.subr.bf16.mxu1 %v1384_v26  ;;  %v1438_v0 = vld [vmem:[%s1811_s0 + $0x194] ss:$8 sps:$4 sm:$0xff]   ;;  %v1441_v2 = vld [vmem:[%s1811_s0 + $0x190] ss:$8 sps:$4 sm:$0xff]   ;;  %v1442_v3 = vld [vmem:[%s1811_s0 + $0x84] ss:$8 sps:$4 sm:$0xff]  }
  0x78   : > { %v1444_v4 = vld [vmem:[%s1811_s0 + $0x184] ss:$8 sps:$4 sm:$0xff]   ;;  %v1446_v5 = vld [vmem:[%s1811_s0 + $0x80] ss:$8 sps:$4 sm:$0xff]   ;;  %v517_v10 = vld [vmem:[#allocation2 + $0x10] sm:$0xff]  ;;  %p1254_p4 = scmp.ne.s32.totalorder %s1524_s15, 8 }
  0x79   : > { %940 = vmatpush1.bf16.msra.mxu0 %v1386_v27  ;;  %v1447_v6 = vld [vmem:[%s1811_s0 + $0x180] ss:$8 sps:$4 sm:$0xff]   ;;  %v519_v19 = vld [vmem:[#allocation2 + $0x18] sm:$0xff] }
  0x7a   : > { %983 = vmatpush1.bf16.msra.mxu1 %v1387_v28  ;;  %941 = vmatprep.subr.bf16.mxu0 %v1388_v29  ;;  %v1448_v7 = vld [vmem:[%s1809_s8] ss:$16 sps:$4 sm:$0xff]   ;;  %v1451_v8 = vld [vmem:[%s1809_s8 + $0x8] ss:$16 sps:$4 sm:$0xff]  }
  0x7b   : > { %984 = vmatprep.subr.bf16.mxu1 %v1390_v30  ;;  %v518_v14 = vld [vmem:[#allocation2] sm:$0xff]  ;;  %v520_v24 = vld [vmem:[#allocation2 + $0x8] sm:$0xff] }
  0x7d   : > { %942 = vmatpush1.bf16.msra.mxu0 %v1392_v31 }
  0x7e   : > { %985 = vmatpush1.bf16.msra.mxu1 %v1393_v32  ;;  %943 = vmatprep.subr.bf16.mxu0 %v1394_v33 }
  0x7f   : > { %986 = vmatprep.subr.bf16.mxu1 %v1396_v34 }
  0x81   : > { %944 = vmatpush1.bf16.msra.mxu0 %v1398_v35 }
  0x82   : > { %987 = vmatpush1.bf16.msra.mxu1 %v1399_v36  ;;  %945 = vmatprep.subr.bf16.mxu0 %v1400_v37 }
  0x83   : > { %988 = vmatprep.subr.bf16.mxu1 %v1402_v38 }
  0x85   : > { %946 = vmatpush2.bf16.msra.mxu0 %v1404_v39 }
  0x86   : > { %989 = vmatpush2.bf16.msra.mxu1 %v1405_v40  ;;  %947 = vmatprep.subr.bf16.mxu0 %v1406_v41 }
  0x87   : > { %990 = vmatprep.subr.bf16.mxu1 %v1408_v42 }
  0x89   : > { %948 = vmatpush2.bf16.msra.mxu0 %v1410_v43 }
  0x8a   : > { %991 = vmatpush2.bf16.msra.mxu1 %v1411_v44  ;;  %949 = vmatprep.subr.bf16.mxu0 %v1412_v45 }
  0x8b   : > { %992 = vmatprep.subr.bf16.mxu1 %v1414_v46 }
  0x8d   : > { %950 = vmatpush2.bf16.msra.mxu0 %v1416_v47 }
  0x8e   : > { %993 = vmatpush2.bf16.msra.mxu1 %v1417_v48  ;;  %951 = vmatprep.subr.bf16.mxu0 %v1418_v49 }
  0x8f   : > { %994 = vmatprep.subr.bf16.mxu1 %v1420_v50 }
  0x91   : > { %952 = vmatpush2.bf16.msra.mxu0 %v1422_v51 }
  0x92   : > { %995 = vmatpush2.bf16.msra.mxu1 %v1423_v53  ;;  %953 = vmatprep.subr.bf16.mxu0 %v1424_v54 }
  0x93   : > { %996 = vmatprep.subr.bf16.mxu1 %v1426_v55 }
  0x95   : > { %954 = vmatpush2.bf16.msra.mxu0 %v1428_v57 }
  0x96   : > { %997 = vmatpush2.bf16.msra.mxu1 %v1429_v58  ;;  %955 = vmatprep.subr.bf16.mxu0 %v1430_v59 }
  0x97   : > { %998 = vmatprep.subr.bf16.mxu1 %v1432_v60 }
  0x99   : > { %956 = vmatpush2.bf16.msra.mxu0 %v1434_v61 }
  0x9a   : > { %999 = vmatpush2.bf16.msra.mxu1 %v1435_v62  ;;  %957 = vmatprep.subr.bf16.mxu0 %v1436_v63 }
  0x9b   : > { %1000 = vmatprep.subr.bf16.mxu1 %v1438_v0 }
  0x9d   : > { %958 = vmatpush2.bf16.msra.mxu0 %v1440_v1 }
  0x9e   : > { %1001 = vmatpush2.bf16.msra.mxu1 %v1441_v2  ;;  %959 = vmatprep.subr.bf16.mxu0 %v1442_v3 }
  0x9f   : > { %1002 = vmatprep.subr.bf16.mxu1 %v1444_v4 }
  0xa1   : > { %960 = vmatpush2.bf16.msra.mxu0 %v1446_v5 }
  0xa2   : > { %1003 = vmatpush2.bf16.msra.mxu1 %v1447_v6 }
  0xa4   : > { %962 = vmatmul.mubr.bf16.vlgmr.msra.gmra.mxu0 %v1448_v7 }
  0xa5   : > { %1005 = vmatmul.mubr.bf16.vlgmr.msra.gmra.mxu1 %v1451_v8 }
 0x164   : > { %v963_v9 = vpop.f32.mrf.mxu0 }
 0x165   : > { %v1006_v11 = vpop.f32.mrf.mxu1 }
 0x166   : > { %v1007_v12 = vadd.f32 %v1006_v11, %v963_v9  ;;  %v965_v13 = vpop.f32.mrf.mxu0 }
 0x167   : > { %v1008_v15 = vpop.f32.mrf.mxu1 }
 0x168   : > { %v1015_v16 = vadd.f32 %v1007_v12, %v517_v10  ;;  %v1009_v17 = vadd.f32 %v1008_v15, %v965_v13  ;;  %v967_v18 = vpop.f32.mrf.mxu0 }
 0x169   : > { %v1010_v20 = vpop.f32.mrf.mxu1 }
 0x16a   : > { %1019 = vst [vmem:[#allocation2 + $0x10] sm:$0xff] %v1015_v16  ;;  %v1016_v21 = vadd.f32 %v1009_v17, %v518_v14  ;;  %v1011_v22 = vadd.f32 %v1010_v20, %v967_v18  ;;  %v969_v23 = vpop.f32.mrf.mxu0 }
 0x16b   : > { %v1012_v25 = vpop.f32.mrf.mxu1 }
 0x16c   : > { %1020 = vst [vmem:[#allocation2] sm:$0xff] %v1016_v21  ;;  %v1017_v26 = vadd.f32 %v1011_v22, %v519_v19  ;;  %v1013_v27 = vadd.f32 %v1012_v25, %v969_v23  ;;  %1026 = sbr.rel (%p1254_p4) target bundleno = 377 (0x179), region = 97 }
 0x16e   : > { %1021 = vst [vmem:[#allocation2 + $0x18] sm:$0xff] %v1017_v26  ;;  %v1018_v28 = vadd.f32 %v1013_v27, %v520_v24 }
 0x170   : > { %1022 = vst [vmem:[#allocation2 + $0x8] sm:$0xff] %v1018_v28 }
 0x171   : > { %v1027_v29 = vld [vmem:[#allocation2 + $0x10] sm:$0xff] }
 0x172   : > { %1031 = vst [vmem:[%s1813_s24] sm:$0xff] %v1027_v29 }
 0x173   : > { %v1028_v30 = vld [vmem:[#allocation2] sm:$0xff] }
 0x174   : > { %1032 = vst [vmem:[%s1813_s24 + $0x8] sm:$0xff] %v1028_v30 }
 0x175   : > { %v1029_v31 = vld [vmem:[#allocation2 + $0x18] sm:$0xff] }
 0x176   : > { %1033 = vst [vmem:[%s1813_s24 + $0x10] sm:$0xff] %v1029_v31 }
 0x177   : > { %v1030_v32 = vld [vmem:[#allocation2 + $0x8] sm:$0xff] }
 0x178   : > { %1034 = vst [vmem:[%s1813_s24 + $0x18] sm:$0xff] %v1030_v32 }
 0x179 PF: > { %1041 = sbr.rel (!%p1652_p12) target bundleno = 385 (0x181), region = 101  ;;  %s1262_s9 = sshll.u32 (%p1652_p12), %s1528_s16, 4  ;;  %v1060_v33 = vld [vmem:[%s1813_s24] sm:$0xff] (%p1652_p12) }
 0x17a   : > { %s1047_s15 = scalar_lea.vmem (%p1652_p12), %s1934_s2, %s1262_s9 }
 0x17b   : > { %v1062_v34 = vld [vmem:[%s1813_s24 + $0x8] sm:$0xff] (%p1652_p12)  ;;  %1061 = vst [vmem:[%s1047_s15] sm:$0xff] (%p1652_p12), %v1060_v33 }
 0x17c   : > { %1063 = vst [vmem:[%s1047_s15 + $0x8] sm:$0xff] (%p1652_p12), %v1062_v34 }
 0x17d   : > { %v1064_v35 = vld [vmem:[%s1813_s24 + $0x10] sm:$0xff] (%p1652_p12) }
 0x17e   : > { %1065 = vst [vmem:[%s1047_s15 + $0x20] sm:$0xff] %v1064_v35 }
 0x17f   : > { %v1066_v36 = vld [vmem:[%s1813_s24 + $0x18] sm:$0xff] }
 0x180   : > { %1067 = vst [vmem:[%s1047_s15 + $0x28] sm:$0xff] %v1066_v36 }
 0x181 PF: > { %s12_s19 = sadd.s32 1, %s1540_s19   ;;  %s1940_s9 = smov %s1504_s10 }
 0x182   : > { %p9_p5 = scmp.ge.s32.totalorder %s12_s19, 20   ;;  %s1941_s10 = smov %s1650_s5 }
 0x183   : > { %s1942_s11 = smov %s1512_s12  ;;  %s1943_s12 = smov %s1647_s4 }
 0x184   : > { %s1944_s13 = smov %s1520_s14  ;;  %s1945_s14 = smov %s1633_s27 }
 0x185   : > { %s1946_s15 = smov %s1532_s17  ;;  %s1947_s16 = smov %s1536_s18 }
 0x186   : > { %s1948_s17 = smov %s1951_s21  ;;  %s1949_s18 = smov %s1955_s22 }
 0x187   :  { %11 = sbr.rel (!%p9_p5) target bundleno = 8 (0x8), region = 163 }

// kernel: quantized_resnet18_forward.123
= control target key start
LH: loop header
LB: loop body
LE: loop exit
PB: predicated region body
PF: predicated region fallthrough
CT: control target
= control target key end

     0   :  { %s2175_s12 = smov 0   ;;  %s2177_s13 = smov 0   ;;  %s2691_s0 = inlined_call_operand.vmem [shape: bf16[16,512], index: 0, kind: input, shape index: {}]   ;;  %s2692_s1 = inlined_call_operand.vmem [shape: bf16[512,1024], index: 1, kind: input, shape index: {}]   ;;  %s2693_s2 = inlined_call_operand.vmem [shape: f32[1,1024], index: 2, kind: input, shape index: {}]   ;;  %s2694_s3 = inlined_call_operand.vmem [shape: f32[16,1024], index: 3, kind: output, shape index: {}]  }
   0x1   :  { %s2179_s14 = smov 0   ;;  %s2181_s15 = smov 0  }
   0x2   :  { %s2183_s16 = smov 0  }
   0x3 LB: > { %s28_s17 = sadd.s32 1, %s2149_s15  ;;  %s1726_s18 = sadd.s32 4294967295, %s2153_s16   ;;  %s2153_s16 = sphi %s2183_s16, %s13_s16   ;;  %s2149_s15 = sphi %s2181_s15, %s2699_s15   ;;  %s2145_s14 = sphi %s2179_s14, %s2698_s14   ;;  %s2141_s13 = sphi %s2177_s13, %s2697_s13   ;;  %s2137_s12 = sphi %s2175_s12, %s2696_s12  }
   0x4   : > { %p30_p0 = scmp.ge.s32.totalorder %s28_s17, 2  ;;  %p76_p1 = scmp.ne.s32.totalorder %s2141_s13, %s2137_s12 }
   0x5   : > { %p77_p2 = scmp.eq.s32.totalorder %s2153_s16, 0  ;;  %p134_p4 = scmp.eq.s32.totalorder %s1726_s18, 1 }
   0x6   : > { %s2701_s17 = smov (%p30_p0, %s28_s17), 0  ;;  %s69_s20 = sadd.s32 1, %s2141_s13 }
   0x7   : > { %p78_p3 = por %p77_p2, %p76_p1  ;;  %s65_s19 = ssub.s32 %s2149_s15, %s2701_s17 }
   0x8   : > { %p67_p5 = scmp.eq.s32.totalorder %s65_s19, 0  ;;  %p2210_p6 = por %p134_p4, %p76_p1 }
   0x9   : > { %p1730_p7 = scmp.ge.s32.totalorder %s2153_s16, 2 }
   0xa   : > { %s2215_s22 = scalar_select %p67_p5, %s2141_s13, %s69_s20  }
   0xb   : > { %171 = sbr.rel (%p1730_p7) target bundleno = 84 (0x54), region = 20 }
  0x10   : > { %174 = sbr.rel (!%p78_p3) target bundleno = 84 (0x54), region = 24  ;;  %s176_s23 = sand.u32 (%p78_p3), 1, %s2141_s13  }
  0x11   : > { %s1875_s24 = sshll.u32 (%p78_p3), %s2149_s15, 4  ;;  %s1731_s25 = sshll.u32 (%p78_p3), %s176_s23, 10 }
  0x12   : > { %s2223_s28 = scalar_lea.vmem (%p78_p3), %s2692_s1, %s1875_s24  ;;  %s2228_s29 = scalar_lea.vmem (%p78_p3), [#allocation3], %s1731_s25 }
  0x13   : > { %v197_v0 = vld [vmem:[%s2223_s28] sm:$0xff] (%p78_p3)  ;;  %v199_v1 = vld [vmem:[%s2223_s28 + $0x8] sm:$0xff] (%p78_p3) }
  0x14   : > { %v201_v2 = vld [vmem:[%s2223_s28 + $0x20] sm:$0xff] (%p78_p3)  ;;  %198 = vst [vmem:[%s2228_s29] sm:$0xff] (%p78_p3), %v197_v0  ;;  %200 = vst [vmem:[%s2228_s29 + $0x8] sm:$0xff] (%p78_p3), %v199_v1  ;;  %v203_v3 = vld [vmem:[%s2223_s28 + $0x28] sm:$0xff] (%p78_p3) }
  0x15   : > { %202 = vst [vmem:[%s2228_s29 + $0x10] sm:$0xff] %v201_v2  ;;  %v205_v4 = vld [vmem:[%s2223_s28 + $0x40] sm:$0xff]  ;;  %v207_v5 = vld [vmem:[%s2223_s28 + $0x48] sm:$0xff]  ;;  %204 = vst [vmem:[%s2228_s29 + $0x18] sm:$0xff] %v203_v3 }
  0x16   : > { %206 = vst [vmem:[%s2228_s29 + $0x20] sm:$0xff] %v205_v4  ;;  %208 = vst [vmem:[%s2228_s29 + $0x28] sm:$0xff] %v207_v5  ;;  %v209_v6 = vld [vmem:[%s2223_s28 + $0x60] sm:$0xff]  ;;  %v211_v7 = vld [vmem:[%s2223_s28 + $0x68] sm:$0xff] }
  0x17   : > { %v213_v8 = vld [vmem:[%s2223_s28 + $0x80] sm:$0xff]  ;;  %210 = vst [vmem:[%s2228_s29 + $0x30] sm:$0xff] %v209_v6  ;;  %212 = vst [vmem:[%s2228_s29 + $0x38] sm:$0xff] %v211_v7  ;;  %v215_v9 = vld [vmem:[%s2223_s28 + $0x88] sm:$0xff] }
  0x18   : > { %214 = vst [vmem:[%s2228_s29 + $0x40] sm:$0xff] %v213_v8  ;;  %v217_v10 = vld [vmem:[%s2223_s28 + $0xa0] sm:$0xff]  ;;  %v219_v11 = vld [vmem:[%s2223_s28 + $0xa8] sm:$0xff]  ;;  %216 = vst [vmem:[%s2228_s29 + $0x48] sm:$0xff] %v215_v9 }
  0x19   : > { %218 = vst [vmem:[%s2228_s29 + $0x50] sm:$0xff] %v217_v10  ;;  %220 = vst [vmem:[%s2228_s29 + $0x58] sm:$0xff] %v219_v11  ;;  %v221_v12 = vld [vmem:[%s2223_s28 + $0xc0] sm:$0xff]  ;;  %v223_v13 = vld [vmem:[%s2223_s28 + $0xc8] sm:$0xff] }
  0x1a   : > { %v225_v14 = vld [vmem:[%s2223_s28 + $0xe0] sm:$0xff]  ;;  %222 = vst [vmem:[%s2228_s29 + $0x60] sm:$0xff] %v221_v12  ;;  %224 = vst [vmem:[%s2228_s29 + $0x68] sm:$0xff] %v223_v13  ;;  %v227_v15 = vld [vmem:[%s2223_s28 + $0xe8] sm:$0xff] }
  0x1b   : > { %226 = vst [vmem:[%s2228_s29 + $0x70] sm:$0xff] %v225_v14  ;;  %v229_v16 = vld [vmem:[%s2223_s28 + $0x100] sm:$0xff]  ;;  %v231_v17 = vld [vmem:[%s2223_s28 + $0x108] sm:$0xff]  ;;  %228 = vst [vmem:[%s2228_s29 + $0x78] sm:$0xff] %v227_v15 }
  0x1c   : > { %230 = vst [vmem:[%s2228_s29 + $0x80] sm:$0xff] %v229_v16  ;;  %232 = vst [vmem:[%s2228_s29 + $0x88] sm:$0xff] %v231_v17  ;;  %v233_v18 = vld [vmem:[%s2223_s28 + $0x120] sm:$0xff]  ;;  %v235_v19 = vld [vmem:[%s2223_s28 + $0x128] sm:$0xff] }
  0x1d   : > { %v237_v20 = vld [vmem:[%s2223_s28 + $0x140] sm:$0xff]  ;;  %234 = vst [vmem:[%s2228_s29 + $0x90] sm:$0xff] %v233_v18  ;;  %236 = vst [vmem:[%s2228_s29 + $0x98] sm:$0xff] %v235_v19  ;;  %v239_v21 = vld [vmem:[%s2223_s28 + $0x148] sm:$0xff] }
  0x1e   : > { %238 = vst [vmem:[%s2228_s29 + $0xa0] sm:$0xff] %v237_v20  ;;  %v241_v22 = vld [vmem:[%s2223_s28 + $0x160] sm:$0xff]  ;;  %v243_v23 = vld [vmem:[%s2223_s28 + $0x168] sm:$0xff]  ;;  %240 = vst [vmem:[%s2228_s29 + $0xa8] sm:$0xff] %v239_v21 }
  0x1f   : > { %242 = vst [vmem:[%s2228_s29 + $0xb0] sm:$0xff] %v241_v22  ;;  %244 = vst [vmem:[%s2228_s29 + $0xb8] sm:$0xff] %v243_v23  ;;  %v245_v24 = vld [vmem:[%s2223_s28 + $0x180] sm:$0xff]  ;;  %v247_v25 = vld [vmem:[%s2223_s28 + $0x188] sm:$0xff] }
  0x20   : > { %v249_v26 = vld [vmem:[%s2223_s28 + $0x1a0] sm:$0xff]  ;;  %246 = vst [vmem:[%s2228_s29 + $0xc0] sm:$0xff] %v245_v24  ;;  %248 = vst [vmem:[%s2228_s29 + $0xc8] sm:$0xff] %v247_v25  ;;  %v251_v27 = vld [vmem:[%s2223_s28 + $0x1a8] sm:$0xff] }
  0x21   : > { %250 = vst [vmem:[%s2228_s29 + $0xd0] sm:$0xff] %v249_v26  ;;  %v253_v28 = vld [vmem:[%s2223_s28 + $0x1c0] sm:$0xff]  ;;  %v255_v29 = vld [vmem:[%s2223_s28 + $0x1c8] sm:$0xff]  ;;  %252 = vst [vmem:[%s2228_s29 + $0xd8] sm:$0xff] %v251_v27 }
  0x22   : > { %254 = vst [vmem:[%s2228_s29 + $0xe0] sm:$0xff] %v253_v28  ;;  %256 = vst [vmem:[%s2228_s29 + $0xe8] sm:$0xff] %v255_v29  ;;  %v257_v30 = vld [vmem:[%s2223_s28 + $0x1e0] sm:$0xff]  ;;  %v259_v31 = vld [vmem:[%s2223_s28 + $0x1e8] sm:$0xff] }
  0x23   : > { %v261_v32 = vld [vmem:[%s2223_s28 + $0x200] sm:$0xff]  ;;  %258 = vst [vmem:[%s2228_s29 + $0xf0] sm:$0xff] %v257_v30  ;;  %260 = vst [vmem:[%s2228_s29 + $0xf8] sm:$0xff] %v259_v31  ;;  %v263_v33 = vld [vmem:[%s2223_s28 + $0x208] sm:$0xff] }
  0x24   : > { %262 = vst [vmem:[%s2228_s29 + $0x100] sm:$0xff] %v261_v32  ;;  %v265_v34 = vld [vmem:[%s2223_s28 + $0x220] sm:$0xff]  ;;  %v267_v35 = vld [vmem:[%s2223_s28 + $0x228] sm:$0xff]  ;;  %264 = vst [vmem:[%s2228_s29 + $0x108] sm:$0xff] %v263_v33 }
  0x25   : > { %266 = vst [vmem:[%s2228_s29 + $0x110] sm:$0xff] %v265_v34  ;;  %268 = vst [vmem:[%s2228_s29 + $0x118] sm:$0xff] %v267_v35  ;;  %v269_v36 = vld [vmem:[%s2223_s28 + $0x240] sm:$0xff]  ;;  %v271_v37 = vld [vmem:[%s2223_s28 + $0x248] sm:$0xff] }
  0x26   : > { %v273_v38 = vld [vmem:[%s2223_s28 + $0x260] sm:$0xff]  ;;  %270 = vst [vmem:[%s2228_s29 + $0x120] sm:$0xff] %v269_v36  ;;  %272 = vst [vmem:[%s2228_s29 + $0x128] sm:$0xff] %v271_v37  ;;  %v275_v39 = vld [vmem:[%s2223_s28 + $0x268] sm:$0xff] }
  0x27   : > { %274 = vst [vmem:[%s2228_s29 + $0x130] sm:$0xff] %v273_v38  ;;  %v277_v40 = vld [vmem:[%s2223_s28 + $0x280] sm:$0xff]  ;;  %v279_v41 = vld [vmem:[%s2223_s28 + $0x288] sm:$0xff]  ;;  %276 = vst [vmem:[%s2228_s29 + $0x138] sm:$0xff] %v275_v39 }
  0x28   : > { %278 = vst [vmem:[%s2228_s29 + $0x140] sm:$0xff] %v277_v40  ;;  %280 = vst [vmem:[%s2228_s29 + $0x148] sm:$0xff] %v279_v41  ;;  %v281_v42 = vld [vmem:[%s2223_s28 + $0x2a0] sm:$0xff]  ;;  %v283_v43 = vld [vmem:[%s2223_s28 + $0x2a8] sm:$0xff] }
  0x29   : > { %v285_v44 = vld [vmem:[%s2223_s28 + $0x2c0] sm:$0xff]  ;;  %282 = vst [vmem:[%s2228_s29 + $0x150] sm:$0xff] %v281_v42  ;;  %284 = vst [vmem:[%s2228_s29 + $0x158] sm:$0xff] %v283_v43  ;;  %v287_v45 = vld [vmem:[%s2223_s28 + $0x2c8] sm:$0xff] }
  0x2a   : > { %286 = vst [vmem:[%s2228_s29 + $0x160] sm:$0xff] %v285_v44  ;;  %v289_v46 = vld [vmem:[%s2223_s28 + $0x2e0] sm:$0xff]  ;;  %v291_v47 = vld [vmem:[%s2223_s28 + $0x2e8] sm:$0xff]  ;;  %288 = vst [vmem:[%s2228_s29 + $0x168] sm:$0xff] %v287_v45 }
  0x2b   : > { %290 = vst [vmem:[%s2228_s29 + $0x170] sm:$0xff] %v289_v46  ;;  %292 = vst [vmem:[%s2228_s29 + $0x178] sm:$0xff] %v291_v47  ;;  %v293_v48 = vld [vmem:[%s2223_s28 + $0x300] sm:$0xff]  ;;  %v295_v49 = vld [vmem:[%s2223_s28 + $0x308] sm:$0xff] }
  0x2c   : > { %v297_v50 = vld [vmem:[%s2223_s28 + $0x320] sm:$0xff]  ;;  %294 = vst [vmem:[%s2228_s29 + $0x180] sm:$0xff] %v293_v48  ;;  %296 = vst [vmem:[%s2228_s29 + $0x188] sm:$0xff] %v295_v49  ;;  %v299_v51 = vld [vmem:[%s2223_s28 + $0x328] sm:$0xff] }
  0x2d   : > { %298 = vst [vmem:[%s2228_s29 + $0x190] sm:$0xff] %v297_v50  ;;  %v301_v52 = vld [vmem:[%s2223_s28 + $0x340] sm:$0xff]  ;;  %v303_v53 = vld [vmem:[%s2223_s28 + $0x348] sm:$0xff]  ;;  %300 = vst [vmem:[%s2228_s29 + $0x198] sm:$0xff] %v299_v51 }
  0x2e   : > { %302 = vst [vmem:[%s2228_s29 + $0x1a0] sm:$0xff] %v301_v52  ;;  %304 = vst [vmem:[%s2228_s29 + $0x1a8] sm:$0xff] %v303_v53  ;;  %v305_v54 = vld [vmem:[%s2223_s28 + $0x360] sm:$0xff]  ;;  %v307_v55 = vld [vmem:[%s2223_s28 + $0x368] sm:$0xff] }
  0x2f   : > { %v309_v56 = vld [vmem:[%s2223_s28 + $0x380] sm:$0xff]  ;;  %306 = vst [vmem:[%s2228_s29 + $0x1b0] sm:$0xff] %v305_v54  ;;  %308 = vst [vmem:[%s2228_s29 + $0x1b8] sm:$0xff] %v307_v55  ;;  %v311_v57 = vld [vmem:[%s2223_s28 + $0x388] sm:$0xff] }
  0x30   : > { %310 = vst [vmem:[%s2228_s29 + $0x1c0] sm:$0xff] %v309_v56  ;;  %v313_v58 = vld [vmem:[%s2223_s28 + $0x3a0] sm:$0xff]  ;;  %v315_v59 = vld [vmem:[%s2223_s28 + $0x3a8] sm:$0xff]  ;;  %312 = vst [vmem:[%s2228_s29 + $0x1c8] sm:$0xff] %v311_v57 }
  0x31   : > { %314 = vst [vmem:[%s2228_s29 + $0x1d0] sm:$0xff] %v313_v58  ;;  %316 = vst [vmem:[%s2228_s29 + $0x1d8] sm:$0xff] %v315_v59  ;;  %v317_v60 = vld [vmem:[%s2223_s28 + $0x3c0] sm:$0xff]  ;;  %v319_v61 = vld [vmem:[%s2223_s28 + $0x3c8] sm:$0xff] }
  0x32   : > { %v321_v62 = vld [vmem:[%s2223_s28 + $0x3e0] sm:$0xff]  ;;  %318 = vst [vmem:[%s2228_s29 + $0x1e0] sm:$0xff] %v317_v60  ;;  %320 = vst [vmem:[%s2228_s29 + $0x1e8] sm:$0xff] %v319_v61  ;;  %v323_v63 = vld [vmem:[%s2223_s28 + $0x3e8] sm:$0xff] }
  0x33   : > { %322 = vst [vmem:[%s2228_s29 + $0x1f0] sm:$0xff] %v321_v62  ;;  %v325_v0 = vld [vmem:[%s2223_s28 + $0x400] sm:$0xff]  ;;  %v327_v1 = vld [vmem:[%s2223_s28 + $0x408] sm:$0xff]  ;;  %324 = vst [vmem:[%s2228_s29 + $0x1f8] sm:$0xff] %v323_v63 }
  0x34   : > { %326 = vst [vmem:[%s2228_s29 + $0x200] sm:$0xff] %v325_v0  ;;  %328 = vst [vmem:[%s2228_s29 + $0x208] sm:$0xff] %v327_v1  ;;  %v329_v2 = vld [vmem:[%s2223_s28 + $0x420] sm:$0xff]  ;;  %v331_v3 = vld [vmem:[%s2223_s28 + $0x428] sm:$0xff] }
  0x35   : > { %v333_v4 = vld [vmem:[%s2223_s28 + $0x440] sm:$0xff]  ;;  %330 = vst [vmem:[%s2228_s29 + $0x210] sm:$0xff] %v329_v2  ;;  %332 = vst [vmem:[%s2228_s29 + $0x218] sm:$0xff] %v331_v3  ;;  %v335_v5 = vld [vmem:[%s2223_s28 + $0x448] sm:$0xff] }
  0x36   : > { %334 = vst [vmem:[%s2228_s29 + $0x220] sm:$0xff] %v333_v4  ;;  %v337_v6 = vld [vmem:[%s2223_s28 + $0x460] sm:$0xff]  ;;  %v339_v7 = vld [vmem:[%s2223_s28 + $0x468] sm:$0xff]  ;;  %336 = vst [vmem:[%s2228_s29 + $0x228] sm:$0xff] %v335_v5 }
  0x37   : > { %338 = vst [vmem:[%s2228_s29 + $0x230] sm:$0xff] %v337_v6  ;;  %340 = vst [vmem:[%s2228_s29 + $0x238] sm:$0xff] %v339_v7  ;;  %v341_v8 = vld [vmem:[%s2223_s28 + $0x480] sm:$0xff]  ;;  %v343_v9 = vld [vmem:[%s2223_s28 + $0x488] sm:$0xff] }
  0x38   : > { %v345_v10 = vld [vmem:[%s2223_s28 + $0x4a0] sm:$0xff]  ;;  %342 = vst [vmem:[%s2228_s29 + $0x240] sm:$0xff] %v341_v8  ;;  %344 = vst [vmem:[%s2228_s29 + $0x248] sm:$0xff] %v343_v9  ;;  %v347_v11 = vld [vmem:[%s2223_s28 + $0x4a8] sm:$0xff] }
  0x39   : > { %346 = vst [vmem:[%s2228_s29 + $0x250] sm:$0xff] %v345_v10  ;;  %v349_v12 = vld [vmem:[%s2223_s28 + $0x4c0] sm:$0xff]  ;;  %v351_v13 = vld [vmem:[%s2223_s28 + $0x4c8] sm:$0xff]  ;;  %348 = vst [vmem:[%s2228_s29 + $0x258] sm:$0xff] %v347_v11 }
  0x3a   : > { %350 = vst [vmem:[%s2228_s29 + $0x260] sm:$0xff] %v349_v12  ;;  %352 = vst [vmem:[%s2228_s29 + $0x268] sm:$0xff] %v351_v13  ;;  %v353_v14 = vld [vmem:[%s2223_s28 + $0x4e0] sm:$0xff]  ;;  %v355_v15 = vld [vmem:[%s2223_s28 + $0x4e8] sm:$0xff] }
  0x3b   : > { %v357_v16 = vld [vmem:[%s2223_s28 + $0x500] sm:$0xff]  ;;  %354 = vst [vmem:[%s2228_s29 + $0x270] sm:$0xff] %v353_v14  ;;  %356 = vst [vmem:[%s2228_s29 + $0x278] sm:$0xff] %v355_v15  ;;  %v359_v17 = vld [vmem:[%s2223_s28 + $0x508] sm:$0xff] }
  0x3c   : > { %358 = vst [vmem:[%s2228_s29 + $0x280] sm:$0xff] %v357_v16  ;;  %v361_v18 = vld [vmem:[%s2223_s28 + $0x520] sm:$0xff]  ;;  %v363_v19 = vld [vmem:[%s2223_s28 + $0x528] sm:$0xff]  ;;  %360 = vst [vmem:[%s2228_s29 + $0x288] sm:$0xff] %v359_v17 }
  0x3d   : > { %362 = vst [vmem:[%s2228_s29 + $0x290] sm:$0xff] %v361_v18  ;;  %364 = vst [vmem:[%s2228_s29 + $0x298] sm:$0xff] %v363_v19  ;;  %v365_v20 = vld [vmem:[%s2223_s28 + $0x540] sm:$0xff]  ;;  %v367_v21 = vld [vmem:[%s2223_s28 + $0x548] sm:$0xff] }
  0x3e   : > { %v369_v22 = vld [vmem:[%s2223_s28 + $0x560] sm:$0xff]  ;;  %366 = vst [vmem:[%s2228_s29 + $0x2a0] sm:$0xff] %v365_v20  ;;  %368 = vst [vmem:[%s2228_s29 + $0x2a8] sm:$0xff] %v367_v21  ;;  %v371_v23 = vld [vmem:[%s2223_s28 + $0x568] sm:$0xff] }
  0x3f   : > { %370 = vst [vmem:[%s2228_s29 + $0x2b0] sm:$0xff] %v369_v22  ;;  %v373_v24 = vld [vmem:[%s2223_s28 + $0x580] sm:$0xff]  ;;  %v375_v25 = vld [vmem:[%s2223_s28 + $0x588] sm:$0xff]  ;;  %372 = vst [vmem:[%s2228_s29 + $0x2b8] sm:$0xff] %v371_v23 }
  0x40   : > { %374 = vst [vmem:[%s2228_s29 + $0x2c0] sm:$0xff] %v373_v24  ;;  %376 = vst [vmem:[%s2228_s29 + $0x2c8] sm:$0xff] %v375_v25  ;;  %v377_v26 = vld [vmem:[%s2223_s28 + $0x5a0] sm:$0xff]  ;;  %v379_v27 = vld [vmem:[%s2223_s28 + $0x5a8] sm:$0xff] }
  0x41   : > { %v381_v28 = vld [vmem:[%s2223_s28 + $0x5c0] sm:$0xff]  ;;  %378 = vst [vmem:[%s2228_s29 + $0x2d0] sm:$0xff] %v377_v26  ;;  %380 = vst [vmem:[%s2228_s29 + $0x2d8] sm:$0xff] %v379_v27  ;;  %v383_v29 = vld [vmem:[%s2223_s28 + $0x5c8] sm:$0xff] }
  0x42   : > { %382 = vst [vmem:[%s2228_s29 + $0x2e0] sm:$0xff] %v381_v28  ;;  %v385_v30 = vld [vmem:[%s2223_s28 + $0x5e0] sm:$0xff]  ;;  %v387_v31 = vld [vmem:[%s2223_s28 + $0x5e8] sm:$0xff]  ;;  %384 = vst [vmem:[%s2228_s29 + $0x2e8] sm:$0xff] %v383_v29 }
  0x43   : > { %386 = vst [vmem:[%s2228_s29 + $0x2f0] sm:$0xff] %v385_v30  ;;  %388 = vst [vmem:[%s2228_s29 + $0x2f8] sm:$0xff] %v387_v31  ;;  %v389_v32 = vld [vmem:[%s2223_s28 + $0x600] sm:$0xff]  ;;  %v391_v33 = vld [vmem:[%s2223_s28 + $0x608] sm:$0xff] }
  0x44   : > { %v393_v34 = vld [vmem:[%s2223_s28 + $0x620] sm:$0xff]  ;;  %390 = vst [vmem:[%s2228_s29 + $0x300] sm:$0xff] %v389_v32  ;;  %392 = vst [vmem:[%s2228_s29 + $0x308] sm:$0xff] %v391_v33  ;;  %v395_v35 = vld [vmem:[%s2223_s28 + $0x628] sm:$0xff] }
  0x45   : > { %394 = vst [vmem:[%s2228_s29 + $0x310] sm:$0xff] %v393_v34  ;;  %v397_v36 = vld [vmem:[%s2223_s28 + $0x640] sm:$0xff]  ;;  %v399_v37 = vld [vmem:[%s2223_s28 + $0x648] sm:$0xff]  ;;  %396 = vst [vmem:[%s2228_s29 + $0x318] sm:$0xff] %v395_v35 }
  0x46   : > { %398 = vst [vmem:[%s2228_s29 + $0x320] sm:$0xff] %v397_v36  ;;  %400 = vst [vmem:[%s2228_s29 + $0x328] sm:$0xff] %v399_v37  ;;  %v401_v38 = vld [vmem:[%s2223_s28 + $0x660] sm:$0xff]  ;;  %v403_v39 = vld [vmem:[%s2223_s28 + $0x668] sm:$0xff] }
  0x47   : > { %v405_v40 = vld [vmem:[%s2223_s28 + $0x680] sm:$0xff]  ;;  %402 = vst [vmem:[%s2228_s29 + $0x330] sm:$0xff] %v401_v38  ;;  %404 = vst [vmem:[%s2228_s29 + $0x338] sm:$0xff] %v403_v39  ;;  %v407_v41 = vld [vmem:[%s2223_s28 + $0x688] sm:$0xff] }
  0x48   : > { %406 = vst [vmem:[%s2228_s29 + $0x340] sm:$0xff] %v405_v40  ;;  %v409_v42 = vld [vmem:[%s2223_s28 + $0x6a0] sm:$0xff]  ;;  %v411_v43 = vld [vmem:[%s2223_s28 + $0x6a8] sm:$0xff]  ;;  %408 = vst [vmem:[%s2228_s29 + $0x348] sm:$0xff] %v407_v41 }
  0x49   : > { %410 = vst [vmem:[%s2228_s29 + $0x350] sm:$0xff] %v409_v42  ;;  %412 = vst [vmem:[%s2228_s29 + $0x358] sm:$0xff] %v411_v43  ;;  %v413_v44 = vld [vmem:[%s2223_s28 + $0x6c0] sm:$0xff]  ;;  %v415_v45 = vld [vmem:[%s2223_s28 + $0x6c8] sm:$0xff] }
  0x4a   : > { %v417_v46 = vld [vmem:[%s2223_s28 + $0x6e0] sm:$0xff]  ;;  %414 = vst [vmem:[%s2228_s29 + $0x360] sm:$0xff] %v413_v44  ;;  %416 = vst [vmem:[%s2228_s29 + $0x368] sm:$0xff] %v415_v45  ;;  %v419_v47 = vld [vmem:[%s2223_s28 + $0x6e8] sm:$0xff] }
  0x4b   : > { %418 = vst [vmem:[%s2228_s29 + $0x370] sm:$0xff] %v417_v46  ;;  %v421_v48 = vld [vmem:[%s2223_s28 + $0x700] sm:$0xff]  ;;  %v423_v49 = vld [vmem:[%s2223_s28 + $0x708] sm:$0xff]  ;;  %420 = vst [vmem:[%s2228_s29 + $0x378] sm:$0xff] %v419_v47 }
  0x4c   : > { %422 = vst [vmem:[%s2228_s29 + $0x380] sm:$0xff] %v421_v48  ;;  %424 = vst [vmem:[%s2228_s29 + $0x388] sm:$0xff] %v423_v49  ;;  %v425_v50 = vld [vmem:[%s2223_s28 + $0x720] sm:$0xff]  ;;  %v427_v51 = vld [vmem:[%s2223_s28 + $0x728] sm:$0xff] }
  0x4d   : > { %v429_v52 = vld [vmem:[%s2223_s28 + $0x740] sm:$0xff]  ;;  %426 = vst [vmem:[%s2228_s29 + $0x390] sm:$0xff] %v425_v50  ;;  %428 = vst [vmem:[%s2228_s29 + $0x398] sm:$0xff] %v427_v51  ;;  %v431_v53 = vld [vmem:[%s2223_s28 + $0x748] sm:$0xff] }
  0x4e   : > { %430 = vst [vmem:[%s2228_s29 + $0x3a0] sm:$0xff] %v429_v52  ;;  %v433_v54 = vld [vmem:[%s2223_s28 + $0x760] sm:$0xff]  ;;  %v435_v55 = vld [vmem:[%s2223_s28 + $0x768] sm:$0xff]  ;;  %432 = vst [vmem:[%s2228_s29 + $0x3a8] sm:$0xff] %v431_v53 }
  0x4f   : > { %434 = vst [vmem:[%s2228_s29 + $0x3b0] sm:$0xff] %v433_v54  ;;  %436 = vst [vmem:[%s2228_s29 + $0x3b8] sm:$0xff] %v435_v55  ;;  %v437_v56 = vld [vmem:[%s2223_s28 + $0x780] sm:$0xff]  ;;  %v439_v57 = vld [vmem:[%s2223_s28 + $0x788] sm:$0xff] }
  0x50   : > { %v441_v58 = vld [vmem:[%s2223_s28 + $0x7a0] sm:$0xff]  ;;  %438 = vst [vmem:[%s2228_s29 + $0x3c0] sm:$0xff] %v437_v56  ;;  %440 = vst [vmem:[%s2228_s29 + $0x3c8] sm:$0xff] %v439_v57  ;;  %v443_v59 = vld [vmem:[%s2223_s28 + $0x7a8] sm:$0xff] }
  0x51   : > { %442 = vst [vmem:[%s2228_s29 + $0x3d0] sm:$0xff] %v441_v58  ;;  %v445_v60 = vld [vmem:[%s2223_s28 + $0x7c0] sm:$0xff]  ;;  %v447_v61 = vld [vmem:[%s2223_s28 + $0x7c8] sm:$0xff]  ;;  %444 = vst [vmem:[%s2228_s29 + $0x3d8] sm:$0xff] %v443_v59 }
  0x52   : > { %446 = vst [vmem:[%s2228_s29 + $0x3e0] sm:$0xff] %v445_v60  ;;  %448 = vst [vmem:[%s2228_s29 + $0x3e8] sm:$0xff] %v447_v61  ;;  %v449_v62 = vld [vmem:[%s2223_s28 + $0x7e0] sm:$0xff]  ;;  %v451_v63 = vld [vmem:[%s2223_s28 + $0x7e8] sm:$0xff] }
  0x53   : > { %450 = vst [vmem:[%s2228_s29 + $0x3f0] sm:$0xff] %v449_v62  ;;  %452 = vst [vmem:[%s2228_s29 + $0x3f8] sm:$0xff] %v451_v63 }
  0x54 PF: > { %p1734_p8 = scmp.ge.s32.totalorder %s2153_s16, 1  ;;  %p465_p9 = scmp.lt.s32.totalorder %s2153_s16, 3 }
  0x56   : > { %p466_p10 = pnand %p1734_p8, %p465_p9 }
  0x57   : > { %s472_s30 = sand.u32 (!%p466_p10), 1, %s2137_s12   ;;  %s1737_s20 = sshll.u32 (!%p466_p10), %s2145_s14, 2 }
  0x58   : > { %469 = sbr.rel (%p466_p10) target bundleno = 436 (0x1b4), region = 51  ;;  %s1735_s4 = sshll.u32 (!%p466_p10), %s472_s30, 10 }
  0x59   : > { %s2498_s9 = scalar_lea.vmem (!%p466_p10), [#allocation3], %s1735_s4  ;;  %p523_p11 = scmp.lt.s32.totalorder (!%p466_p10), %s1737_s20, 7 }
  0x5a   : > { %s1736_s26 = sshll.u32 (!%p466_p10), %s472_s30, 6 }
  0x5b   : > { %s2652_s27 = scalar_lea.vmem (!%p466_p10), [#allocation4], %s1736_s26 }
  0x5d   : > { %v2491_v0 = vld [vmem:[%s2691_s0 + $0x4] ss:$16 sps:$4 sm:$0xff]   ;;  %v2496_v1 = vld [vmem:[%s2691_s0 + $0xc] ss:$16 sps:$4 sm:$0xff]   ;;  %v1921_v4 = vld [vmem:[%s2498_s9 + $0xe0] ss:$16 sps:$4 sm:$0xff]  }
  0x5e   : > { %v1917_v2 = vld [vmem:[%s2498_s9 + $0xe4] ss:$16 sps:$4 sm:$0xff]   ;;  %1373 = vmatprep.mubr.bf16.mxu0 %v2491_v0  ;;  %1416 = vmatprep.mubr.bf16.mxu1 %v2496_v1  ;;  %v1922_v5 = vld [vmem:[%s2498_s9 + $0x2e0] ss:$16 sps:$4 sm:$0xff]   ;;  %s2703_s20 = smov (!%p523_p11, %s1737_s20), 7  ;;  %s1876_s12 = sshll.u32 (%p2210_p6), %s2145_s14, 5 }
  0x5f   : > { %v1919_v3 = vld [vmem:[%s2498_s9 + $0x2e4] ss:$16 sps:$4 sm:$0xff]   ;;  %1341 = vmatprep.subr.bf16.mxu0 %v1917_v2  ;;  %v1927_v8 = vld [vmem:[%s2498_s9 + $0xc0] ss:$16 sps:$4 sm:$0xff]   ;;  %s525_s25 = scalar_lea.vmem %s2693_s2, %s2703_s20  ;;  %s1590_s30 = scalar_lea.vmem (%p2210_p6), %s2694_s3, %s1876_s12 }
  0x60   : > { %1384 = vmatprep.subr.bf16.mxu1 %v1919_v3  ;;  %v1923_v6 = vld [vmem:[%s2498_s9 + $0xc4] ss:$16 sps:$4 sm:$0xff]   ;;  %1342 = vmatpush1.bf16.msra.mxu0 %v1921_v4  ;;  %v1928_v9 = vld [vmem:[%s2498_s9 + $0x2c0] ss:$16 sps:$4 sm:$0xff]   ;;  %v2021_v4 = vld [vmem:[%s2498_s9 + $0xec] ss:$16 sps:$4 sm:$0xff]  }
  0x61   : > { %1385 = vmatpush1.bf16.msra.mxu1 %v1922_v5  ;;  %v1925_v7 = vld [vmem:[%s2498_s9 + $0x2c4] ss:$16 sps:$4 sm:$0xff]   ;;  %1343 = vmatprep.subr.bf16.mxu0 %v1923_v6  ;;  %v1933_v12 = vld [vmem:[%s2498_s9 + $0xa0] ss:$16 sps:$4 sm:$0xff]   ;;  %v2024_v5 = vld [vmem:[%s2498_s9 + $0x2ec] ss:$16 sps:$4 sm:$0xff]  }
  0x62   : > { %1386 = vmatprep.subr.bf16.mxu1 %v1925_v7  ;;  %v1929_v10 = vld [vmem:[%s2498_s9 + $0xa4] ss:$16 sps:$4 sm:$0xff]   ;;  %v1934_v13 = vld [vmem:[%s2498_s9 + $0x2a0] ss:$16 sps:$4 sm:$0xff]   ;;  %v2576_v7 = vld [vmem:[%s2691_s0 + $0x8] ss:$16 sps:$4 sm:$0xff]  }
  0x63   : > { %v1931_v11 = vld [vmem:[%s2498_s9 + $0x2a4] ss:$16 sps:$4 sm:$0xff]   ;;  %v1939_v16 = vld [vmem:[%s2498_s9 + $0x80] ss:$16 sps:$4 sm:$0xff]  }
  0x64   : > { %1344 = vmatpush1.bf16.msra.mxu0 %v1927_v8  ;;  %v1935_v14 = vld [vmem:[%s2498_s9 + $0x84] ss:$16 sps:$4 sm:$0xff]   ;;  %v1940_v17 = vld [vmem:[%s2498_s9 + $0x280] ss:$16 sps:$4 sm:$0xff]   ;;  %v2019_v8 = vld [vmem:[%s2498_s9 + $0xe8] ss:$16 sps:$4 sm:$0xff]  }
  0x65   : > { %1387 = vmatpush1.bf16.msra.mxu1 %v1928_v9  ;;  %1345 = vmatprep.subr.bf16.mxu0 %v1929_v10  ;;  %v1937_v15 = vld [vmem:[%s2498_s9 + $0x284] ss:$16 sps:$4 sm:$0xff]   ;;  %v1945_v20 = vld [vmem:[%s2498_s9 + $0x60] ss:$16 sps:$4 sm:$0xff]   ;;  %v2022_v9 = vld [vmem:[%s2498_s9 + $0x2e8] ss:$16 sps:$4 sm:$0xff]  }
  0x66   : > { %1388 = vmatprep.subr.bf16.mxu1 %v1931_v11  ;;  %v1941_v18 = vld [vmem:[%s2498_s9 + $0x64] ss:$16 sps:$4 sm:$0xff]   ;;  %v1946_v21 = vld [vmem:[%s2498_s9 + $0x260] ss:$16 sps:$4 sm:$0xff]   ;;  %v2027_v10 = vld [vmem:[%s2498_s9 + $0xcc] ss:$16 sps:$4 sm:$0xff]  }
  0x67   : > { %v1943_v19 = vld [vmem:[%s2498_s9 + $0x264] ss:$16 sps:$4 sm:$0xff]   ;;  %v1951_v24 = vld [vmem:[%s2498_s9 + $0x40] ss:$16 sps:$4 sm:$0xff]   ;;  %v2030_v11 = vld [vmem:[%s2498_s9 + $0x2cc] ss:$16 sps:$4 sm:$0xff]  }
  0x68   : > { %1346 = vmatpush1.bf16.msra.mxu0 %v1933_v12  ;;  %v1947_v22 = vld [vmem:[%s2498_s9 + $0x44] ss:$16 sps:$4 sm:$0xff]   ;;  %v1952_v25 = vld [vmem:[%s2498_s9 + $0x240] ss:$16 sps:$4 sm:$0xff]   ;;  %v2025_v12 = vld [vmem:[%s2498_s9 + $0xc8] ss:$16 sps:$4 sm:$0xff]  }
  0x69   : > { %1389 = vmatpush1.bf16.msra.mxu1 %v1934_v13  ;;  %1347 = vmatprep.subr.bf16.mxu0 %v1935_v14  ;;  %v1949_v23 = vld [vmem:[%s2498_s9 + $0x244] ss:$16 sps:$4 sm:$0xff]   ;;  %v1957_v28 = vld [vmem:[%s2498_s9 + $0x20] ss:$16 sps:$4 sm:$0xff]   ;;  %v2028_v13 = vld [vmem:[%s2498_s9 + $0x2c8] ss:$16 sps:$4 sm:$0xff]  }
  0x6a   : > { %1390 = vmatprep.subr.bf16.mxu1 %v1937_v15  ;;  %v1953_v26 = vld [vmem:[%s2498_s9 + $0x24] ss:$16 sps:$4 sm:$0xff]   ;;  %v1958_v29 = vld [vmem:[%s2498_s9 + $0x220] ss:$16 sps:$4 sm:$0xff]   ;;  %v2033_v14 = vld [vmem:[%s2498_s9 + $0xac] ss:$16 sps:$4 sm:$0xff]  }
  0x6b   : > { %v1955_v27 = vld [vmem:[%s2498_s9 + $0x224] ss:$16 sps:$4 sm:$0xff]   ;;  %v1963_v32 = vld [vmem:[%s2498_s9] ss:$16 sps:$4 sm:$0xff]   ;;  %v2036_v15 = vld [vmem:[%s2498_s9 + $0x2ac] ss:$16 sps:$4 sm:$0xff]  }
  0x6c   : > { %1348 = vmatpush1.bf16.msra.mxu0 %v1939_v16  ;;  %v1959_v30 = vld [vmem:[%s2498_s9 + $0x4] ss:$16 sps:$4 sm:$0xff]   ;;  %v1964_v33 = vld [vmem:[%s2498_s9 + $0x200] ss:$16 sps:$4 sm:$0xff]   ;;  %v2031_v16 = vld [vmem:[%s2498_s9 + $0xa8] ss:$16 sps:$4 sm:$0xff]  }
  0x6d   : > { %1391 = vmatpush1.bf16.msra.mxu1 %v1940_v17  ;;  %1349 = vmatprep.subr.bf16.mxu0 %v1941_v18  ;;  %v1961_v31 = vld [vmem:[%s2498_s9 + $0x204] ss:$16 sps:$4 sm:$0xff]   ;;  %v1969_v36 = vld [vmem:[%s2498_s9 + $0x1e0] ss:$16 sps:$4 sm:$0xff]   ;;  %v2034_v17 = vld [vmem:[%s2498_s9 + $0x2a8] ss:$16 sps:$4 sm:$0xff]  }
  0x6e   : > { %1392 = vmatprep.subr.bf16.mxu1 %v1943_v19  ;;  %v1965_v34 = vld [vmem:[%s2498_s9 + $0x1e4] ss:$16 sps:$4 sm:$0xff]   ;;  %v1970_v37 = vld [vmem:[%s2498_s9 + $0x3e0] ss:$16 sps:$4 sm:$0xff]   ;;  %v2039_v18 = vld [vmem:[%s2498_s9 + $0x8c] ss:$16 sps:$4 sm:$0xff]  }
  0x6f   : > { %v1967_v35 = vld [vmem:[%s2498_s9 + $0x3e4] ss:$16 sps:$4 sm:$0xff]   ;;  %v1975_v40 = vld [vmem:[%s2498_s9 + $0x1c0] ss:$16 sps:$4 sm:$0xff]   ;;  %v2042_v19 = vld [vmem:[%s2498_s9 + $0x28c] ss:$16 sps:$4 sm:$0xff]  }
  0x70   : > { %1350 = vmatpush1.bf16.msra.mxu0 %v1945_v20  ;;  %v1971_v38 = vld [vmem:[%s2498_s9 + $0x1c4] ss:$16 sps:$4 sm:$0xff]   ;;  %v1976_v41 = vld [vmem:[%s2498_s9 + $0x3c0] ss:$16 sps:$4 sm:$0xff]   ;;  %v2037_v20 = vld [vmem:[%s2498_s9 + $0x88] ss:$16 sps:$4 sm:$0xff]  }
  0x71   : > { %1393 = vmatpush1.bf16.msra.mxu1 %v1946_v21  ;;  %1351 = vmatprep.subr.bf16.mxu0 %v1947_v22  ;;  %v1973_v39 = vld [vmem:[%s2498_s9 + $0x3c4] ss:$16 sps:$4 sm:$0xff]   ;;  %v1981_v44 = vld [vmem:[%s2498_s9 + $0x1a0] ss:$16 sps:$4 sm:$0xff]   ;;  %v2040_v21 = vld [vmem:[%s2498_s9 + $0x288] ss:$16 sps:$4 sm:$0xff]  }
  0x72   : > { %1394 = vmatprep.subr.bf16.mxu1 %v1949_v23  ;;  %v1977_v42 = vld [vmem:[%s2498_s9 + $0x1a4] ss:$16 sps:$4 sm:$0xff]   ;;  %v1982_v45 = vld [vmem:[%s2498_s9 + $0x3a0] ss:$16 sps:$4 sm:$0xff]   ;;  %v2043_v22 = vld [vmem:[%s2498_s9 + $0x68] ss:$16 sps:$4 sm:$0xff]  }
  0x73   : > { %v1979_v43 = vld [vmem:[%s2498_s9 + $0x3a4] ss:$16 sps:$4 sm:$0xff]   ;;  %v1987_v48 = vld [vmem:[%s2498_s9 + $0x180] ss:$16 sps:$4 sm:$0xff]   ;;  %v2046_v23 = vld [vmem:[%s2498_s9 + $0x268] ss:$16 sps:$4 sm:$0xff]  }
  0x74   : > { %1352 = vmatpush1.bf16.msra.mxu0 %v1951_v24  ;;  %v1983_v46 = vld [vmem:[%s2498_s9 + $0x184] ss:$16 sps:$4 sm:$0xff]   ;;  %v1988_v49 = vld [vmem:[%s2498_s9 + $0x380] ss:$16 sps:$4 sm:$0xff]   ;;  %v2051_v24 = vld [vmem:[%s2498_s9 + $0x4c] ss:$16 sps:$4 sm:$0xff]  }
  0x75   : > { %1395 = vmatpush1.bf16.msra.mxu1 %v1952_v25  ;;  %1353 = vmatprep.subr.bf16.mxu0 %v1953_v26  ;;  %v1985_v47 = vld [vmem:[%s2498_s9 + $0x384] ss:$16 sps:$4 sm:$0xff]   ;;  %v1993_v52 = vld [vmem:[%s2498_s9 + $0x160] ss:$16 sps:$4 sm:$0xff]   ;;  %v2054_v25 = vld [vmem:[%s2498_s9 + $0x24c] ss:$16 sps:$4 sm:$0xff]  }
  0x76   : > { %1396 = vmatprep.subr.bf16.mxu1 %v1955_v27  ;;  %v1989_v50 = vld [vmem:[%s2498_s9 + $0x164] ss:$16 sps:$4 sm:$0xff]   ;;  %v1994_v53 = vld [vmem:[%s2498_s9 + $0x360] ss:$16 sps:$4 sm:$0xff]   ;;  %v2049_v26 = vld [vmem:[%s2498_s9 + $0x48] ss:$16 sps:$4 sm:$0xff]  }
  0x77   : > { %v1991_v51 = vld [vmem:[%s2498_s9 + $0x364] ss:$16 sps:$4 sm:$0xff]   ;;  %v1999_v56 = vld [vmem:[%s2498_s9 + $0x140] ss:$16 sps:$4 sm:$0xff]   ;;  %v2052_v27 = vld [vmem:[%s2498_s9 + $0x248] ss:$16 sps:$4 sm:$0xff]  }
  0x78   : > { %1354 = vmatpush1.bf16.msra.mxu0 %v1957_v28  ;;  %v1995_v54 = vld [vmem:[%s2498_s9 + $0x144] ss:$16 sps:$4 sm:$0xff]   ;;  %v2000_v57 = vld [vmem:[%s2498_s9 + $0x340] ss:$16 sps:$4 sm:$0xff]   ;;  %v2057_v28 = vld [vmem:[%s2498_s9 + $0x2c] ss:$16 sps:$4 sm:$0xff]  }
  0x79   : > { %1397 = vmatpush1.bf16.msra.mxu1 %v1958_v29  ;;  %1355 = vmatprep.subr.bf16.mxu0 %v1959_v30  ;;  %v1997_v55 = vld [vmem:[%s2498_s9 + $0x344] ss:$16 sps:$4 sm:$0xff]   ;;  %v2005_v60 = vld [vmem:[%s2498_s9 + $0x120] ss:$16 sps:$4 sm:$0xff]   ;;  %v2060_v29 = vld [vmem:[%s2498_s9 + $0x22c] ss:$16 sps:$4 sm:$0xff]  }
  0x7a   : > { %1398 = vmatprep.subr.bf16.mxu1 %v1961_v31  ;;  %v2001_v58 = vld [vmem:[%s2498_s9 + $0x124] ss:$16 sps:$4 sm:$0xff]   ;;  %v2006_v61 = vld [vmem:[%s2498_s9 + $0x320] ss:$16 sps:$4 sm:$0xff]   ;;  %v2055_v30 = vld [vmem:[%s2498_s9 + $0x28] ss:$16 sps:$4 sm:$0xff]  }
  0x7b   : > { %v2003_v59 = vld [vmem:[%s2498_s9 + $0x324] ss:$16 sps:$4 sm:$0xff]   ;;  %v2011_v2 = vld [vmem:[%s2498_s9 + $0x100] ss:$16 sps:$4 sm:$0xff]   ;;  %v2058_v31 = vld [vmem:[%s2498_s9 + $0x228] ss:$16 sps:$4 sm:$0xff]  }
  0x7c   : > { %1356 = vmatpush1.bf16.msra.mxu0 %v1963_v32  ;;  %v2007_v62 = vld [vmem:[%s2498_s9 + $0x104] ss:$16 sps:$4 sm:$0xff]   ;;  %v2012_v3 = vld [vmem:[%s2498_s9 + $0x300] ss:$16 sps:$4 sm:$0xff]   ;;  %v2063_v32 = vld [vmem:[%s2498_s9 + $0xc] ss:$16 sps:$4 sm:$0xff]  }
  0x7d   : > { %1399 = vmatpush1.bf16.msra.mxu1 %v1964_v33  ;;  %1357 = vmatprep.subr.bf16.mxu0 %v1965_v34  ;;  %v2009_v63 = vld [vmem:[%s2498_s9 + $0x304] ss:$16 sps:$4 sm:$0xff]   ;;  %v2571_v6 = vld [vmem:[%s2691_s0] ss:$16 sps:$4 sm:$0xff]   ;;  %v2066_v33 = vld [vmem:[%s2498_s9 + $0x20c] ss:$16 sps:$4 sm:$0xff]  }
  0x7e   : > { %1400 = vmatprep.subr.bf16.mxu1 %v1967_v35  ;;  %v2061_v34 = vld [vmem:[%s2498_s9 + $0x8] ss:$16 sps:$4 sm:$0xff]  }
  0x7f   : > { %v2064_v35 = vld [vmem:[%s2498_s9 + $0x208] ss:$16 sps:$4 sm:$0xff]  }
  0x80   : > { %1358 = vmatpush2.bf16.msra.mxu0 %v1969_v36  ;;  %v2069_v36 = vld [vmem:[%s2498_s9 + $0x1ec] ss:$16 sps:$4 sm:$0xff]  }
  0x81   : > { %1401 = vmatpush2.bf16.msra.mxu1 %v1970_v37  ;;  %1359 = vmatprep.subr.bf16.mxu0 %v1971_v38  ;;  %v2072_v37 = vld [vmem:[%s2498_s9 + $0x3ec] ss:$16 sps:$4 sm:$0xff]   ;;  %v2067_v38 = vld [vmem:[%s2498_s9 + $0x1e8] ss:$16 sps:$4 sm:$0xff]  }
  0x82   : > { %1402 = vmatprep.subr.bf16.mxu1 %v1973_v39  ;;  %v2070_v39 = vld [vmem:[%s2498_s9 + $0x3e8] ss:$16 sps:$4 sm:$0xff]  }
  0x84   : > { %1360 = vmatpush2.bf16.msra.mxu0 %v1975_v40  ;;  %v2075_v40 = vld [vmem:[%s2498_s9 + $0x1cc] ss:$16 sps:$4 sm:$0xff]  }
  0x85   : > { %1403 = vmatpush2.bf16.msra.mxu1 %v1976_v41  ;;  %1361 = vmatprep.subr.bf16.mxu0 %v1977_v42  ;;  %v2078_v41 = vld [vmem:[%s2498_s9 + $0x3cc] ss:$16 sps:$4 sm:$0xff]   ;;  %v2073_v42 = vld [vmem:[%s2498_s9 + $0x1c8] ss:$16 sps:$4 sm:$0xff]  }
  0x86   : > { %1404 = vmatprep.subr.bf16.mxu1 %v1979_v43  ;;  %v2076_v43 = vld [vmem:[%s2498_s9 + $0x3c8] ss:$16 sps:$4 sm:$0xff]  }
  0x88   : > { %1362 = vmatpush2.bf16.msra.mxu0 %v1981_v44  ;;  %v2081_v44 = vld [vmem:[%s2498_s9 + $0x1ac] ss:$16 sps:$4 sm:$0xff]  }
  0x89   : > { %1405 = vmatpush2.bf16.msra.mxu1 %v1982_v45  ;;  %1363 = vmatprep.subr.bf16.mxu0 %v1983_v46  ;;  %v2084_v45 = vld [vmem:[%s2498_s9 + $0x3ac] ss:$16 sps:$4 sm:$0xff]   ;;  %v2079_v46 = vld [vmem:[%s2498_s9 + $0x1a8] ss:$16 sps:$4 sm:$0xff]  }
  0x8a   : > { %1406 = vmatprep.subr.bf16.mxu1 %v1985_v47  ;;  %v2082_v47 = vld [vmem:[%s2498_s9 + $0x3a8] ss:$16 sps:$4 sm:$0xff]  }
  0x8c   : > { %1364 = vmatpush2.bf16.msra.mxu0 %v1987_v48  ;;  %v2087_v48 = vld [vmem:[%s2498_s9 + $0x18c] ss:$16 sps:$4 sm:$0xff]  }
  0x8d   : > { %1407 = vmatpush2.bf16.msra.mxu1 %v1988_v49  ;;  %1365 = vmatprep.subr.bf16.mxu0 %v1989_v50  ;;  %v2090_v49 = vld [vmem:[%s2498_s9 + $0x38c] ss:$16 sps:$4 sm:$0xff]   ;;  %v2085_v50 = vld [vmem:[%s2498_s9 + $0x188] ss:$16 sps:$4 sm:$0xff]  }
  0x8e   : > { %1408 = vmatprep.subr.bf16.mxu1 %v1991_v51  ;;  %v2088_v51 = vld [vmem:[%s2498_s9 + $0x388] ss:$16 sps:$4 sm:$0xff]  }
  0x90   : > { %1366 = vmatpush2.bf16.msra.mxu0 %v1993_v52  ;;  %v2093_v52 = vld [vmem:[%s2498_s9 + $0x16c] ss:$16 sps:$4 sm:$0xff]  }
  0x91   : > { %1409 = vmatpush2.bf16.msra.mxu1 %v1994_v53  ;;  %1367 = vmatprep.subr.bf16.mxu0 %v1995_v54  ;;  %v2096_v53 = vld [vmem:[%s2498_s9 + $0x36c] ss:$16 sps:$4 sm:$0xff]   ;;  %v2091_v54 = vld [vmem:[%s2498_s9 + $0x168] ss:$16 sps:$4 sm:$0xff]  }
  0x92   : > { %1410 = vmatprep.subr.bf16.mxu1 %v1997_v55  ;;  %v2094_v55 = vld [vmem:[%s2498_s9 + $0x368] ss:$16 sps:$4 sm:$0xff]  }
  0x94   : > { %1368 = vmatpush2.bf16.msra.mxu0 %v1999_v56  ;;  %v2099_v56 = vld [vmem:[%s2498_s9 + $0x14c] ss:$16 sps:$4 sm:$0xff]  }
  0x95   : > { %1411 = vmatpush2.bf16.msra.mxu1 %v2000_v57  ;;  %1369 = vmatprep.subr.bf16.mxu0 %v2001_v58  ;;  %v2102_v57 = vld [vmem:[%s2498_s9 + $0x34c] ss:$16 sps:$4 sm:$0xff]   ;;  %v2097_v58 = vld [vmem:[%s2498_s9 + $0x148] ss:$16 sps:$4 sm:$0xff]  }
  0x96   : > { %1412 = vmatprep.subr.bf16.mxu1 %v2003_v59  ;;  %v2100_v59 = vld [vmem:[%s2498_s9 + $0x348] ss:$16 sps:$4 sm:$0xff]  }
  0x98   : > { %1370 = vmatpush2.bf16.msra.mxu0 %v2005_v60  ;;  %v2105_v60 = vld [vmem:[%s2498_s9 + $0x12c] ss:$16 sps:$4 sm:$0xff]  }
  0x99   : > { %1413 = vmatpush2.bf16.msra.mxu1 %v2006_v61  ;;  %1371 = vmatprep.subr.bf16.mxu0 %v2007_v62  ;;  %v2108_v61 = vld [vmem:[%s2498_s9 + $0x32c] ss:$16 sps:$4 sm:$0xff]   ;;  %v2103_v62 = vld [vmem:[%s2498_s9 + $0x128] ss:$16 sps:$4 sm:$0xff]  }
  0x9a   : > { %1414 = vmatprep.subr.bf16.mxu1 %v2009_v63  ;;  %v2106_v63 = vld [vmem:[%s2498_s9 + $0x328] ss:$16 sps:$4 sm:$0xff]  }
  0x9c   : > { %1372 = vmatpush2.bf16.msra.mxu0 %v2011_v2  ;;  %v2111_v2 = vld [vmem:[%s2498_s9 + $0x10c] ss:$16 sps:$4 sm:$0xff]  }
  0x9d   : > { %1415 = vmatpush2.bf16.msra.mxu1 %v2012_v3  ;;  %1427 = vmatprep.subr.bf16.mxu0 %v2021_v4  ;;  %v2114_v3 = vld [vmem:[%s2498_s9 + $0x30c] ss:$16 sps:$4 sm:$0xff]   ;;  %v2109_v4 = vld [vmem:[%s2498_s9 + $0x108] ss:$16 sps:$4 sm:$0xff]  }
  0x9e   : > { %1470 = vmatprep.subr.bf16.mxu1 %v2024_v5  ;;  %v2112_v5 = vld [vmem:[%s2498_s9 + $0x308] ss:$16 sps:$4 sm:$0xff]  }
  0x9f   : > { %1374 = vmatmul.mubr.bf16.vlgmr.msra.gmra.mxu0 %v2571_v6 }
  0xa0   : > { %1417 = vmatmul.mubr.bf16.vlgmr.msra.gmra.mxu1 %v2576_v7  ;;  %1428 = vmatpush1.bf16.msra.mxu0 %v2019_v8  ;;  %v1542_v8 = vlaneseq }
  0xa1   : > { %1471 = vmatpush1.bf16.msra.mxu1 %v2022_v9  ;;  %1429 = vmatprep.subr.bf16.mxu0 %v2027_v10 }
  0xa2   : > { %1472 = vmatprep.subr.bf16.mxu1 %v2030_v11  ;;  %1459 = vmatprep.mubr.bf16.mxu0 %v2491_v0  ;;  %v2045_v0 = vld [vmem:[%s2498_s9 + $0x6c] ss:$16 sps:$4 sm:$0xff]   ;;  %v1543_v9 = vshrl.u32 %v1542_v8, 7  ;;  %v1540_v11 = vld [vmem:[%s525_s25] sm:$0xf] }
  0xa3   : > { %1502 = vmatprep.mubr.bf16.mxu1 %v2496_v1  ;;  %v2048_v1 = vld [vmem:[%s2498_s9 + $0x26c] ss:$16 sps:$4 sm:$0xff]  }
  0xa4   : > { %1430 = vmatpush1.bf16.msra.mxu0 %v2025_v12  ;;  %v1544_v10 = vsub.s32 0, %v1543_v9  ;;  %v1548_v12 = vsub.s32 1, %v1543_v9 }
  0xa5   : > { %1473 = vmatpush1.bf16.msra.mxu1 %v2028_v13  ;;  %1431 = vmatprep.subr.bf16.mxu0 %v2033_v14 }
  0xa6   : > { %1474 = vmatprep.subr.bf16.mxu1 %v2036_v15  ;;  %v1545_v13 = vrot.slane %v1540_v11, %v1544_v10 }
  0xa8   : > { %1432 = vmatpush1.bf16.msra.mxu0 %v2031_v16  ;;  %v1549_v16 = vrot.slane %v1540_v11, %v1548_v12 }
  0xa9   : > { %1475 = vmatpush1.bf16.msra.mxu1 %v2034_v17  ;;  %1433 = vmatprep.subr.bf16.mxu0 %v2039_v18 }
  0xaa   : > { %1476 = vmatprep.subr.bf16.mxu1 %v2042_v19 }
  0xac   : > { %1434 = vmatpush1.bf16.msra.mxu0 %v2037_v20 }
  0xad   : > { %1477 = vmatpush1.bf16.msra.mxu1 %v2040_v21  ;;  %1435 = vmatprep.subr.bf16.mxu0 %v2045_v0 }
  0xae   : > { %1478 = vmatprep.subr.bf16.mxu1 %v2048_v1 }
  0xb0   : > { %1436 = vmatpush1.bf16.msra.mxu0 %v2043_v22 }
  0xb1   : > { %1479 = vmatpush1.bf16.msra.mxu1 %v2046_v23  ;;  %1437 = vmatprep.subr.bf16.mxu0 %v2051_v24 }
  0xb2   : > { %1480 = vmatprep.subr.bf16.mxu1 %v2054_v25 }
  0xb4   : > { %1438 = vmatpush1.bf16.msra.mxu0 %v2049_v26 }
  0xb5   : > { %1481 = vmatpush1.bf16.msra.mxu1 %v2052_v27  ;;  %1439 = vmatprep.subr.bf16.mxu0 %v2057_v28  ;;  %v1552_v27 = vsub.s32 2, %v1543_v9  ;;  %v1556_v28 = vsub.s32 3, %v1543_v9 }
  0xb6   : > { %1482 = vmatprep.subr.bf16.mxu1 %v2060_v29 }
  0xb7   : > { %v1553_v29 = vrot.slane %v1540_v11, %v1552_v27 }
  0xb8   : > { %1440 = vmatpush1.bf16.msra.mxu0 %v2055_v30 }
  0xb9   : > { %1483 = vmatpush1.bf16.msra.mxu1 %v2058_v31  ;;  %1441 = vmatprep.subr.bf16.mxu0 %v2063_v32 }
  0xba   : > { %1484 = vmatprep.subr.bf16.mxu1 %v2066_v33  ;;  %v1557_v33 = vrot.slane %v1540_v11, %v1556_v28 }
  0xbc   : > { %1442 = vmatpush1.bf16.msra.mxu0 %v2061_v34 }
  0xbd   : > { %1485 = vmatpush1.bf16.msra.mxu1 %v2064_v35  ;;  %1443 = vmatprep.subr.bf16.mxu0 %v2069_v36 }
  0xbe   : > { %1486 = vmatprep.subr.bf16.mxu1 %v2072_v37 }
  0xc0   : > { %1444 = vmatpush2.bf16.msra.mxu0 %v2067_v38 }
  0xc1   : > { %1487 = vmatpush2.bf16.msra.mxu1 %v2070_v39  ;;  %1445 = vmatprep.subr.bf16.mxu0 %v2075_v40 }
  0xc2   : > { %1488 = vmatprep.subr.bf16.mxu1 %v2078_v41 }
  0xc4   : > { %1446 = vmatpush2.bf16.msra.mxu0 %v2073_v42 }
  0xc5   : > { %1489 = vmatpush2.bf16.msra.mxu1 %v2076_v43  ;;  %1447 = vmatprep.subr.bf16.mxu0 %v2081_v44 }
  0xc6   : > { %1490 = vmatprep.subr.bf16.mxu1 %v2084_v45 }
  0xc8   : > { %1448 = vmatpush2.bf16.msra.mxu0 %v2079_v46 }
  0xc9   : > { %1491 = vmatpush2.bf16.msra.mxu1 %v2082_v47  ;;  %1449 = vmatprep.subr.bf16.mxu0 %v2087_v48 }
  0xca   : > { %1492 = vmatprep.subr.bf16.mxu1 %v2090_v49 }
  0xcc   : > { %1450 = vmatpush2.bf16.msra.mxu0 %v2085_v50 }
  0xcd   : > { %1493 = vmatpush2.bf16.msra.mxu1 %v2088_v51  ;;  %1451 = vmatprep.subr.bf16.mxu0 %v2093_v52 }
  0xce   : > { %1494 = vmatprep.subr.bf16.mxu1 %v2096_v53 }
  0xd0   : > { %1452 = vmatpush2.bf16.msra.mxu0 %v2091_v54 }
  0xd1   : > { %1495 = vmatpush2.bf16.msra.mxu1 %v2094_v55  ;;  %1453 = vmatprep.subr.bf16.mxu0 %v2099_v56 }
  0xd2   : > { %1496 = vmatprep.subr.bf16.mxu1 %v2102_v57 }
  0xd4   : > { %1454 = vmatpush2.bf16.msra.mxu0 %v2097_v58 }
  0xd5   : > { %1497 = vmatpush2.bf16.msra.mxu1 %v2100_v59  ;;  %1455 = vmatprep.subr.bf16.mxu0 %v2105_v60 }
  0xd6   : > { %1498 = vmatprep.subr.bf16.mxu1 %v2108_v61 }
  0xd8   : > { %1456 = vmatpush2.bf16.msra.mxu0 %v2103_v62 }
  0xd9   : > { %1499 = vmatpush2.bf16.msra.mxu1 %v2106_v63  ;;  %1457 = vmatprep.subr.bf16.mxu0 %v2111_v2 }
  0xda   : > { %1500 = vmatprep.subr.bf16.mxu1 %v2114_v3 }
  0xdc   : > { %1458 = vmatpush2.bf16.msra.mxu0 %v2109_v4 }
  0xdd   : > { %1501 = vmatpush2.bf16.msra.mxu1 %v2112_v5 }
  0xdf   : > { %1460 = vmatmul.mubr.bf16.vlgmr.msra.gmra.mxu0 %v2571_v6 }
  0xe0   : > { %1503 = vmatmul.mubr.bf16.vlgmr.msra.gmra.mxu1 %v2576_v7 }
 0x15f   : > { %v1375_v14 = vpop.f32.mrf.mxu0 }
 0x160   : > { %v1418_v15 = vpop.f32.mrf.mxu1 }
 0x161   : > { %v1419_v6 = vadd.f32 %v1418_v15, %v1375_v14  ;;  %v1377_v7 = vpop.f32.mrf.mxu0 }
 0x162   : > { %v1420_v17 = vpop.f32.mrf.mxu1 }
 0x163   : > { %v1562_v18 = vadd.f32 %v1545_v13, %v1419_v6  ;;  %v1421_v19 = vadd.f32 %v1420_v17, %v1377_v7  ;;  %v1379_v20 = vpop.f32.mrf.mxu0 }
 0x164   : > { %v1422_v21 = vpop.f32.mrf.mxu1 }
 0x165   : > { %1570 = vst [vmem:[%s2652_s27] sm:$0xff] %v1562_v18  ;;  %v1563_v0 = vadd.f32 %v1549_v16, %v1421_v19  ;;  %v1423_v1 = vadd.f32 %v1422_v21, %v1379_v20  ;;  %v1381_v22 = vpop.f32.mrf.mxu0 }
 0x166   : > { %v1424_v23 = vpop.f32.mrf.mxu1 }
 0x167   : > { %1571 = vst [vmem:[%s2652_s27 + $0x8] sm:$0xff] %v1563_v0  ;;  %v1566_v24 = vadd.f32 %v1545_v13, %v1423_v1  ;;  %v1425_v25 = vadd.f32 %v1424_v23, %v1381_v22 }
 0x169   : > { %1574 = vst [vmem:[%s2652_s27 + $0x20] sm:$0xff] %v1566_v24  ;;  %v1567_v26 = vadd.f32 %v1549_v16, %v1425_v25 }
 0x16b   : > { %1575 = vst [vmem:[%s2652_s27 + $0x28] sm:$0xff] %v1567_v26 }
 0x16c   : > { %v1603_v47 = vld [vmem:[%s2652_s27] sm:$0xff] (%p2210_p6) }
 0x16d   : > { %1604 = vst [vmem:[%s1590_s30] sm:$0xff] (%p2210_p6), %v1603_v47 }
 0x16e   : > { %v1605_v48 = vld [vmem:[%s2652_s27 + $0x8] sm:$0xff] (%p2210_p6) }
 0x16f   : > { %1606 = vst [vmem:[%s1590_s30 + $0x8] sm:$0xff] (%p2210_p6), %v1605_v48 }
 0x170   : > { %v1611_v51 = vld [vmem:[%s2652_s27 + $0x20] sm:$0xff] (%p2210_p6) }
 0x171   : > { %1612 = vst [vmem:[%s1590_s30 + $0x40] sm:$0xff] (%p2210_p6), %v1611_v51 }
 0x172   : > { %v1613_v52 = vld [vmem:[%s2652_s27 + $0x28] sm:$0xff] (%p2210_p6) }
 0x173   : > { %1614 = vst [vmem:[%s1590_s30 + $0x48] sm:$0xff] (%p2210_p6), %v1613_v52 }
 0x19f   : > { %v1461_v30 = vpop.f32.mrf.mxu0 }
 0x1a0   : > { %v1504_v31 = vpop.f32.mrf.mxu1 }
 0x1a1   : > { %v1505_v32 = vadd.f32 %v1504_v31, %v1461_v30  ;;  %v1463_v34 = vpop.f32.mrf.mxu0 }
 0x1a2   : > { %v1506_v35 = vpop.f32.mrf.mxu1 }
 0x1a3   : > { %v1564_v36 = vadd.f32 %v1553_v29, %v1505_v32  ;;  %v1507_v37 = vadd.f32 %v1506_v35, %v1463_v34  ;;  %v1465_v38 = vpop.f32.mrf.mxu0 }
 0x1a4   : > { %v1508_v39 = vpop.f32.mrf.mxu1 }
 0x1a5   : > { %1572 = vst [vmem:[%s2652_s27 + $0x10] sm:$0xff] %v1564_v36  ;;  %v1565_v40 = vadd.f32 %v1557_v33, %v1507_v37  ;;  %v1509_v41 = vadd.f32 %v1508_v39, %v1465_v38  ;;  %v1467_v42 = vpop.f32.mrf.mxu0 }
 0x1a6   : > { %v1510_v43 = vpop.f32.mrf.mxu1 }
 0x1a7   : > { %1573 = vst [vmem:[%s2652_s27 + $0x18] sm:$0xff] %v1565_v40  ;;  %v1568_v44 = vadd.f32 %v1553_v29, %v1509_v41  ;;  %v1511_v45 = vadd.f32 %v1510_v43, %v1467_v42  ;;  %1584 = sbr.rel (!%p2210_p6) target bundleno = 436 (0x1b4), region = 67 }
 0x1a9   : > { %1576 = vst [vmem:[%s2652_s27 + $0x30] sm:$0xff] %v1568_v44  ;;  %v1569_v46 = vadd.f32 %v1557_v33, %v1511_v45 }
 0x1ab   : > { %1577 = vst [vmem:[%s2652_s27 + $0x38] sm:$0xff] %v1569_v46 }
 0x1ac   : > { %v1607_v49 = vld [vmem:[%s2652_s27 + $0x10] sm:$0xff] }
 0x1ad   : > { %1608 = vst [vmem:[%s1590_s30 + $0x10] sm:$0xff] %v1607_v49 }
 0x1ae   : > { %v1609_v50 = vld [vmem:[%s2652_s27 + $0x18] sm:$0xff] }
 0x1af   : > { %1610 = vst [vmem:[%s1590_s30 + $0x18] sm:$0xff] %v1609_v50 }
 0x1b0   : > { %v1615_v53 = vld [vmem:[%s2652_s27 + $0x30] sm:$0xff] }
 0x1b1   : > { %1616 = vst [vmem:[%s1590_s30 + $0x50] sm:$0xff] %v1615_v53 }
 0x1b2   : > { %v1617_v54 = vld [vmem:[%s2652_s27 + $0x38] sm:$0xff] }
 0x1b3   : > { %1618 = vst [vmem:[%s1590_s30 + $0x58] sm:$0xff] %v1617_v54 }
 0x1b4 PF: > { %s13_s16 = sadd.s32 1, %s2153_s16   ;;  %s2696_s12 = smov %s2141_s13 }
 0x1b5   : > { %p10_p12 = scmp.ge.s32.totalorder %s13_s16, 4   ;;  %s2697_s13 = smov %s2215_s22 }
 0x1b6   : > { %s2698_s14 = smov %s2149_s15  ;;  %s2699_s15 = smov %s2701_s17 }
 0x1b7   :  { %12 = sbr.rel (!%p10_p12) target bundleno = 3 (0x3), region = 127 }

</bundles_post_ra>
